<compile_context>
chip_gen: v7x
topology: tpu7x:2x2x1
jax: 0.10.0
libtpu: 0.0.40
codegen_flags: <defaults>
</compile_context>

<pallas_src>
import functools

import jax
import jax.numpy as jnp
from jax.experimental import pallas as pl
from jax.experimental.pallas import tpu as pltpu

_EPS = 1e-5


def _bn_scale_shift(s, q, g, b, count, eps):
    """Per-channel scale/shift from global sum / sum-of-squares (biased variance)."""
    mean = s / count
    var = q / count - mean * mean
    scale = g * jax.lax.rsqrt(var + eps)
    shift = b - mean * scale
    return scale, shift


# --------------------------------------------------------------------------------
# K1: fused conv1 || conv2 (1x1) matmul, tiled over M, + global BN sum/sumsq stats.
# --------------------------------------------------------------------------------

def _pw_conv_stats_kernel(x_ref, w_ref, y1_ref, y2_ref, sum_ref, ssq_ref, *, c_half):
    i = pl.program_id(0)
    y = jnp.dot(x_ref[...], w_ref[...], preferred_element_type=jnp.float32)
    y1_ref[...] = y[:, :c_half]
    y2_ref[...] = y[:, c_half:]

    @pl.when(i == 0)
    def _init():
        sum_ref[...] = jnp.zeros_like(sum_ref)
        ssq_ref[...] = jnp.zeros_like(ssq_ref)

    sum_ref[...] += jnp.sum(y, axis=0, keepdims=True)
    ssq_ref[...] += jnp.sum(y * y, axis=0, keepdims=True)


def pw_conv_stats(x2d, w12, *, tm):
    M, cin = x2d.shape
    cout2 = w12.shape[1]
    ch = cout2 // 2
    assert M % tm == 0
    kern = functools.partial(_pw_conv_stats_kernel, c_half=ch)
    return pl.pallas_call(
        kern,
        out_shape=(
            jax.ShapeDtypeStruct((M, ch), jnp.float32),      # raw conv1 output
            jax.ShapeDtypeStruct((M, ch), jnp.float32),      # raw conv2 output
            jax.ShapeDtypeStruct((1, cout2), jnp.float32),   # per-channel sum
            jax.ShapeDtypeStruct((1, cout2), jnp.float32),   # per-channel sum of squares
        ),
        grid=(M // tm,),
        in_specs=[
            pl.BlockSpec((tm, cin), lambda i: (i, 0)),
            pl.BlockSpec((cin, cout2), lambda i: (0, 0)),
        ],
        out_specs=(
            pl.BlockSpec((tm, ch), lambda i: (i, 0)),
            pl.BlockSpec((tm, ch), lambda i: (i, 0)),
            pl.BlockSpec((1, cout2), lambda i: (0, 0)),      # resident accumulator
            pl.BlockSpec((1, cout2), lambda i: (0, 0)),      # resident accumulator
        ),
        compiler_params=pltpu.CompilerParams(dimension_semantics=("arbitrary",)),
    )(x2d, w12)


# --------------------------------------------------------------------------------
# K2 / K3: fused BN-apply (+optional ReLU) of the producer output + 3x3 conv
# (9 shifted MXU dots from a padded VMEM tile) + global stats of the raw conv output.
# --------------------------------------------------------------------------------

def _conv3x3_kernel(xp_ref, s_ref, q_ref, g_ref, be_ref, w_ref,
                    z_ref, osum_ref, ossq_ref, xn_ref,
                    *, H, W, count, relu_in, eps):
    b = pl.program_id(0)
    cin = w_ref.shape[1]
    cout = w_ref.shape[2]
    Hp, Wp = H + 2, W + 2

    # Fused BatchNorm "apply" of the raw producer output, using global batch stats.
    scale, shift = _bn_scale_shift(s_ref[...], q_ref[...], g_ref[...], be_ref[...],
                                   count, eps)
    xn = xp_ref[0] * scale.reshape(1, 1, cin) + shift.reshape(1, 1, cin)
    if relu_in:
        xn = jnp.maximum(xn, 0.0)

    # Input was zero-padded *before* normalization; re-zero the 1-pixel halo so the
    # 3x3 taps see true zero padding in normalized space.
    hi = jax.lax.broadcasted_iota(jnp.int32, (Hp, Wp, cin), 0)
    wi = jax.lax.broadcasted_iota(jnp.int32, (Hp, Wp, cin), 1)
    interior = (hi >= 1) & (hi <= H) & (wi >= 1) & (wi <= W)
    xn_ref[...] = jnp.where(interior, xn, 0.0)

    # 3x3 conv = 9 shifted (H*W, Cin) @ (Cin, Cout) MXU dots accumulated in f32.
    acc = jnp.zeros((H * W, cout), jnp.float32)
    for t in range(9):
        kh, kw = divmod(t, 3)
        patch = xn_ref[kh:kh + H, kw:kw + W, :].reshape(H * W, cin)
        acc = acc + jnp.dot(patch, w_ref[t], preferred_element_type=jnp.float32)
    z_ref[0] = acc.reshape(H, W, cout)

    # Global per-channel sum / sumsq of the raw conv output, for the next BN stage.
    @pl.when(b == 0)
    def _init():
        osum_ref[...] = jnp.zeros_like(osum_ref)
        ossq_ref[...] = jnp.zeros_like(ossq_ref)

    osum_ref[...] += jnp.sum(acc, axis=0, keepdims=True)
    ossq_ref[...] += jnp.sum(acc * acc, axis=0, keepdims=True)


def conv3x3_bn_in(xpad, s_in, q_in, g_in, b_in, w9, *, relu_in, count, eps=_EPS):
    B, Hp, Wp, cin = xpad.shape
    H, W = Hp - 2, Wp - 2
    cout = w9.shape[-1]
    kern = functools.partial(_conv3x3_kernel, H=H, W=W, count=count,
                             relu_in=relu_in, eps=eps)
    vec = lambda: pl.BlockSpec((1, cin), lambda b: (0, 0))
    return pl.pallas_call(
        kern,
        out_shape=(
            jax.ShapeDtypeStruct((B, H, W, cout), jnp.float32),
            jax.ShapeDtypeStruct((1, cout), jnp.float32),
            jax.ShapeDtypeStruct((1, cout), jnp.float32),
        ),
        grid=(B,),
        in_specs=[
            pl.BlockSpec((1, Hp, Wp, cin), lambda b: (b, 0, 0, 0)),
            vec(), vec(), vec(), vec(),
            pl.BlockSpec((9, cin, cout), lambda b: (0, 0, 0)),
        ],
        out_specs=(
            pl.BlockSpec((1, H, W, cout), lambda b: (b, 0, 0, 0)),
            pl.BlockSpec((1, cout), lambda b: (0, 0)),
            pl.BlockSpec((1, cout), lambda b: (0, 0)),
        ),
        scratch_shapes=[pltpu.VMEM((Hp, Wp, cin), jnp.float32)],
        compiler_params=pltpu.CompilerParams(dimension_semantics=("arbitrary",)),
    )(xpad, s_in, q_in, g_in, b_in, w9)


# --------------------------------------------------------------------------------
# K4: fused BN-apply of both branches + ReLU + MCA gates (avg/std pool, 3-tap channel
# conv via XLU roll, sigmoid) + concat-free final 1x1 conv + global final-BN stats.
# --------------------------------------------------------------------------------

def _final_kernel(x1_ref, x2_ref,
                  s1_ref, q1_ref, g1_ref, b1_ref,
                  s2_ref, q2_ref, g2_ref, b2_ref,
                  wt_ref, wb_ref, k3_ref, cf_ref,
                  yf_ref, fs_ref, fq_ref,
                  *, HW, count, eps):
    b = pl.program_id(0)
    C = x1_ref.shape[-1]

    def bn(x_ref_, s_ref_, q_ref_, g_ref_, be_ref_):
        scale, shift = _bn_scale_shift(s_ref_[...], q_ref_[...], g_ref_[...],
                                       be_ref_[...], count, eps)
        return x_ref_[0] * scale + shift                     # (HW, C)

    # Branch 1: ReLU(BN(second bottleneck conv output)); Branch 2: BN2(conv2 output).
    x1 = jnp.maximum(bn(x1_ref, s1_ref, q1_ref, g1_ref, b1_ref), 0.0)
    x2 = bn(x2_ref, s2_ref, q2_ref, g2_ref, b2_ref)

    k0, k1, k2 = k3_ref[0:1, :], k3_ref[1:2, :], k3_ref[2:3, :]   # (1, 1) taps
    c0, c1 = cf_ref[0:1, :], cf_ref[1:2, :]                        # 0.5 + sigmoid(w)
    lane = jax.lax.broadcasted_iota(jnp.int32, (1, C), 1)

    def mca(x):
        # Shared MCAGate: avg-pool + unbiased std-pool over HW, weighted mix,
        # size-3 conv across channels (roll + VPU FMAs, zero-padded ends), sigmoid.
        m = jnp.mean(x, axis=0, keepdims=True)                     # (1, C)
        d = x - m
        std = jnp.sqrt(jnp.sum(d * d, axis=0, keepdims=True) / (HW - 1))
        comb = c0 * m + c1 * std
        left = jnp.where(lane == 0, 0.0, pltpu.roll(comb, 1, axis=1))       # in[c-1]
        right = jnp.where(lane == C - 1, 0.0, pltpu.roll(comb, C - 1, axis=1))  # in[c+1]
        gate = jax.nn.sigmoid(k0 * left + k1 * comb + k2 * right)
        return x * gate

    # Concat-free final 1x1 conv: [x1 | x2] @ wf == x1 @ wf_top + x2 @ wf_bot.
    yf = (jnp.dot(mca(x1), wt_ref[...], preferred_element_type=jnp.float32)
          + jnp.dot(mca(x2), wb_ref[...], preferred_element_type=jnp.float32))
    yf_ref[0] = yf

    @pl.when(b == 0)
    def _init():
        fs_ref[...] = jnp.zeros_like(fs_ref)
        fq_ref[...] = jnp.zeros_like(fq_ref)

    fs_ref[...] += jnp.sum(yf, axis=0, keepdims=True)
    fq_ref[...] += jnp.sum(yf * yf, axis=0, keepdims=True)


def final_fused(x1r, x2r, s1, q1, g1, b1, s2, q2, g2, b2, wt, wb, k3, coef,
                *, count, eps=_EPS):
    B, HW, c_ = x1r.shape
    c2 = wt.shape[1]
    kern = functools.partial(_final_kernel, HW=HW, count=count, eps=eps)
    vec = lambda: pl.BlockSpec((1, c_), lambda b: (0, 0))
    return pl.pallas_call(
        kern,
        out_shape=(
            jax.ShapeDtypeStruct((B, HW, c2), jnp.float32),
            jax.ShapeDtypeStruct((1, c2), jnp.float32),
            jax.ShapeDtypeStruct((1, c2), jnp.float32),
        ),
        grid=(B,),
        in_specs=[
            pl.BlockSpec((1, HW, c_), lambda b: (b, 0, 0)),
            pl.BlockSpec((1, HW, c_), lambda b: (b, 0, 0)),
            vec(), vec(), vec(), vec(),
            vec(), vec(), vec(), vec(),
            pl.BlockSpec((c_, c2), lambda b: (0, 0)),
            pl.BlockSpec((c_, c2), lambda b: (0, 0)),
            pl.BlockSpec((3, 1), lambda b: (0, 0)),
            pl.BlockSpec((2, 1), lambda b: (0, 0)),
        ],
        out_specs=(
            pl.BlockSpec((1, HW, c2), lambda b: (b, 0, 0)),
            pl.BlockSpec((1, c2), lambda b: (0, 0)),
            pl.BlockSpec((1, c2), lambda b: (0, 0)),
        ),
        compiler_params=pltpu.CompilerParams(dimension_semantics=("arbitrary",)),
    )(x1r, x2r, s1, q1, g1, b1, s2, q2, g2, b2, wt, wb, k3, coef)


# --------------------------------------------------------------------------------
# K5: final BN-apply + ReLU, tiled over M ("parallel").
# --------------------------------------------------------------------------------

def _bn_relu_kernel(y_ref, s_ref, q_ref, g_ref, be_ref, o_ref, *, count, eps):
    scale, shift = _bn_scale_shift(s_ref[...], q_ref[...], g_ref[...], be_ref[...],
                                   count, eps)
    o_ref[...] = jnp.maximum(y_ref[...] * scale + shift, 0.0)


def bn_relu(y2d, s, q, g, b, *, tm, count, eps=_EPS):
    M, C = y2d.shape
    assert M % tm == 0
    kern = functools.partial(_bn_relu_kernel, count=count, eps=eps)
    vec = lambda: pl.BlockSpec((1, C), lambda i: (0, 0))
    return pl.pallas_call(
        kern,
        out_shape=jax.ShapeDtypeStruct((M, C), jnp.float32),
        grid=(M // tm,),
        in_specs=[pl.BlockSpec((tm, C), lambda i: (i, 0)), vec(), vec(), vec(), vec()],
        out_specs=pl.BlockSpec((tm, C), lambda i: (i, 0)),
        compiler_params=pltpu.CompilerParams(dimension_semantics=("parallel",)),
    )(y2d, s, q, g, b)


# --------------------------------------------------------------------------------
# Parameters and forward pass.
# --------------------------------------------------------------------------------

def init_params(key, c1, c2):
    c_ = c2 // 2
    ks = jax.random.split(key, 18)

    def w(k, shape):
        return 0.1 * jax.random.normal(k, shape, jnp.float32)

    def bn(kg, kb, c):
        return (jax.random.uniform(kg, (1, c), jnp.float32, 0.5, 1.5),
                0.1 * jax.random.normal(kb, (1, c), jnp.float32))

    p = {}
    p["w12"] = w(ks[0], (c1, 2 * c_))          # conv1 || conv2 pointwise weights
    p["g1"], p["b1"] = bn(ks[1], ks[2], c_)    # bn1
    p["g2"], p["b2"] = bn(ks[3], ks[4], c_)    # bn2
    p["bw1"] = w(ks[5], (9, c_, c_))           # bottleneck 3x3 conv #1 (tap, cin, cout)
    p["bg1"], p["bb1"] = bn(ks[6], ks[7], c_)
    p["bw2"] = w(ks[8], (9, c_, c_))           # bottleneck 3x3 conv #2
    p["bg2"], p["bb2"] = bn(ks[9], ks[10], c_)
    p["wf_top"] = w(ks[11], (c_, c2))          # final conv rows for x1 channels
    p["wf_bot"] = w(ks[12], (c_, c2))          # final conv rows for x2 channels
    p["gf"], p["bf"] = bn(ks[13], ks[14], c2)  # final_bn
    # Shared MCA gate: Conv2d(1,1,(1,3)) taps and the two mixing weights.
    p["k3"] = jax.random.uniform(ks[15], (3, 1), jnp.float32)
    p["coef"] = (0.5 + jax.nn.sigmoid(
        jax.random.uniform(ks[16], (2,), jnp.float32))).reshape(2, 1)
    return p


def csp_bottleneck_mca(x_nchw, p):
    B, C1, H, W = x_nchw.shape
    c_ = p["g1"].shape[1]
    c2 = p["gf"].shape[1]
    M, HW = B * H * W, H * W
    # TODO(synk): MCA std-pool divides by (HW - 1); requires H*W > 1.

    # M-tile: big enough to amortize per-step overhead, >= 2 steps when possible.
    tm = M
    for cand in (512, 256, 128, 64, 32, 16, 8):
        if M % cand == 0 and M // cand >= 2:
            tm = cand
            break

    x2d = jnp.transpose(x_nchw, (0, 2, 3, 1)).reshape(M, C1)

    # K1: fused conv1 || conv2 + global BN stats (two-pass BN, pass 1).
    y1, y2, s12, q12 = pw_conv_stats(x2d, p["w12"], tm=tm)
    s1, q1 = s12[:, :c_], q12[:, :c_]
    s2, q2 = s12[:, c_:], q12[:, c_:]

    # K2: bn1-apply (fused) + 3x3 conv #1 + stats of its raw output.
    y1p = jnp.pad(y1.reshape(B, H, W, c_), ((0, 0), (1, 1), (1, 1), (0, 0)))
    z1, sz1, qz1 = conv3x3_bn_in(y1p, s1, q1, p["g1"], p["b1"], p["bw1"],
                                 relu_in=False, count=M)

    # K3: bn+ReLU-apply (fused) + 3x3 conv #2 + stats.
    z1p = jnp.pad(z1, ((0, 0), (1, 1), (1, 1), (0, 0)))
    z2, sz2, qz2 = conv3x3_bn_in(z1p, sz1, qz1, p["bg1"], p["bb1"], p["bw2"],
                                 relu_in=True, count=M)

    # K4: BN-apply both branches + ReLU + shared MCA gates + concat-free final conv
    #     + global final-BN stats.
    yf, sf, qf = final_fused(z2.reshape(B, HW, c_), y2.reshape(B, HW, c_),
                             sz2, qz2, p["bg2"], p["bb2"],
                             s2, q2, p["g2"], p["b2"],
                             p["wf_top"], p["wf_bot"], p["k3"], p["coef"],
                             count=M)

    # K5: final BN + ReLU (two-pass BN, pass 2), lane-dense (c2 multiple of 128) stores.
    out = bn_relu(yf.reshape(M, c2), sf, qf, p["gf"], p["bf"], tm=tm, count=M)
    return jnp.transpose(out.reshape(B, H, W, c2), (0, 3, 1, 2))


if __name__ == "__main__":
    key = jax.random.PRNGKey(0)
    kx, kp = jax.random.split(key)
    # Small but lane-friendly shapes (channel counts multiples of 128, consistent with
    # the module's typical 512-channel usage but reduced for a quick test).
    B, c1, c2, H, W = 2, 256, 256, 16, 16
    x = jax.random.uniform(kx, (B, c1, H, W), jnp.float32)
    params = init_params(kp, c1, c2)

    fwd = jax.jit(csp_bottleneck_mca)
    out = jax.block_until_ready(fwd(x, params))
    assert out.shape == (B, c2, H, W)
    assert bool(jnp.all(jnp.isfinite(out)))
    print("KERNEL_OK")
</pallas_src>

<mosaic_0001>
module attributes {stable_mosaic.version = 11 : i64} {
  func.func @_pw_conv_stats_kernel(%arg0: i32, %arg1: memref<256x256xf32, #tpu.memory_space<vmem>>, %arg2: memref<256x256xf32, #tpu.memory_space<vmem>>, %arg3: memref<256x128xf32, #tpu.memory_space<vmem>>, %arg4: memref<256x128xf32, #tpu.memory_space<vmem>>, %arg5: memref<1x256xf32, #tpu.memory_space<vmem>>, %arg6: memref<1x256xf32, #tpu.memory_space<vmem>>) attributes {dimension_semantics = [#tpu.dimension_semantics<arbitrary>], iteration_bounds = array<i64: 2>, scalar_prefetch = 0 : i64, scratch_operands = 0 : i64, tpu.core_type = #tpu.core_type<tc>, window_params = [{transform_indices = @transform_0, window_bounds = array<i64: 256, 256>}, {pipeline_mode = #tpu.pipeline_mode<synchronous>, transform_indices = @transform_1, window_bounds = array<i64: 256, 256>}, {transform_indices = @transform_2, window_bounds = array<i64: 256, 128>}, {transform_indices = @transform_3, window_bounds = array<i64: 256, 128>}, {pipeline_mode = #tpu.pipeline_mode<synchronous>, transform_indices = @transform_4, window_bounds = array<i64: 1, 256>}, {pipeline_mode = #tpu.pipeline_mode<synchronous>, transform_indices = @transform_5, window_bounds = array<i64: 1, 256>}]} {
    %c0 = arith.constant 0 : index
    %c0_0 = arith.constant 0 : index
    %0 = vector.load %arg1[%c0, %c0_0] : memref<256x256xf32, #tpu.memory_space<vmem>>, vector<256x256xf32>
    %c0_1 = arith.constant 0 : index
    %c0_2 = arith.constant 0 : index
    %1 = vector.load %arg2[%c0_1, %c0_2] : memref<256x256xf32, #tpu.memory_space<vmem>>, vector<256x256xf32>
    %cst = arith.constant dense<0.000000e+00> : vector<256x256xf32>
    %2 = tpu.matmul %0, %1, %cst {dimension_numbers = #tpu.dot_dimension_numbers<[1], [0], [0], [1], [0, 0, 1, 1], [], []>} : vector<256x256xf32>, vector<256x256xf32>, vector<256x256xf32> -> vector<256x256xf32>
    %3 = vector.extract_strided_slice %2 {offsets = [0, 0], sizes = [256, 128], strides = [1, 1]} : vector<256x256xf32> to vector<256x128xf32>
    %c0_3 = arith.constant 0 : index
    %c0_4 = arith.constant 0 : index
    %4 = vector.load %arg3[%c0_3, %c0_4] : memref<256x128xf32, #tpu.memory_space<vmem>>, vector<256x128xf32>
    tpu.vector_store %arg3[%c0_3, %c0_4], %3 {strides = array<i32>} : memref<256x128xf32, #tpu.memory_space<vmem>>, vector<256x128xf32>,
    %5 = vector.extract_strided_slice %2 {offsets = [0, 128], sizes = [256, 128], strides = [1, 1]} : vector<256x256xf32> to vector<256x128xf32>
    %c0_5 = arith.constant 0 : index
    %c0_6 = arith.constant 0 : index
    %6 = vector.load %arg4[%c0_5, %c0_6] : memref<256x128xf32, #tpu.memory_space<vmem>>, vector<256x128xf32>
    tpu.vector_store %arg4[%c0_5, %c0_6], %5 {strides = array<i32>} : memref<256x128xf32, #tpu.memory_space<vmem>>, vector<256x128xf32>,
    %c0_i32 = arith.constant 0 : i32
    %7 = arith.cmpi eq, %arg0, %c0_i32 : i32
    %8 = arith.extui %7 : i1 to i32
    %c0_i32_7 = arith.constant 0 : i32
    %9 = arith.cmpi ne, %8, %c0_i32_7 : i32
    scf.if %9 {
      %cst_18 = arith.constant 0.000000e+00 : f32
      %21 = vector.broadcast %cst_18 : f32 to vector<1x256xf32>
      %c0_19 = arith.constant 0 : index
      %c0_20 = arith.constant 0 : index
      %22 = vector.load %arg5[%c0_19, %c0_20] : memref<1x256xf32, #tpu.memory_space<vmem>>, vector<1x256xf32>
      tpu.vector_store %arg5[%c0_19, %c0_20], %21 {strides = array<i32>} : memref<1x256xf32, #tpu.memory_space<vmem>>, vector<1x256xf32>,
      %cst_21 = arith.constant 0.000000e+00 : f32
      %23 = vector.broadcast %cst_21 : f32 to vector<1x256xf32>
      %c0_22 = arith.constant 0 : index
      %c0_23 = arith.constant 0 : index
      %24 = vector.load %arg6[%c0_22, %c0_23] : memref<1x256xf32, #tpu.memory_space<vmem>>, vector<1x256xf32>
      tpu.vector_store %arg6[%c0_22, %c0_23], %23 {strides = array<i32>} : memref<1x256xf32, #tpu.memory_space<vmem>>, vector<1x256xf32>,
    } else {
    }
    %c0_8 = arith.constant 0 : index
    %c0_9 = arith.constant 0 : index
    %10 = vector.load %arg5[%c0_8, %c0_9] : memref<1x256xf32, #tpu.memory_space<vmem>>, vector<1x256xf32>
    %cst_10 = arith.constant dense<0.000000e+00> : vector<256xf32>
    %11 = vector.multi_reduction <add>, %2, %cst_10 [0] : vector<256x256xf32> to vector<256xf32>
    %12 = vector.shape_cast %11 : vector<256xf32> to vector<1x256xf32>
    %13 = arith.addf %10, %12 : vector<1x256xf32>
    %c0_11 = arith.constant 0 : index
    %c0_12 = arith.constant 0 : index
    %14 = vector.load %arg5[%c0_11, %c0_12] : memref<1x256xf32, #tpu.memory_space<vmem>>, vector<1x256xf32>
    tpu.vector_store %arg5[%c0_11, %c0_12], %13 {strides = array<i32>} : memref<1x256xf32, #tpu.memory_space<vmem>>, vector<1x256xf32>,
    %c0_13 = arith.constant 0 : index
    %c0_14 = arith.constant 0 : index
    %15 = vector.load %arg6[%c0_13, %c0_14] : memref<1x256xf32, #tpu.memory_space<vmem>>, vector<1x256xf32>
    %16 = arith.mulf %2, %2 : vector<256x256xf32>
    %cst_15 = arith.constant dense<0.000000e+00> : vector<256xf32>
    %17 = vector.multi_reduction <add>, %16, %cst_15 [0] : vector<256x256xf32> to vector<256xf32>
    %18 = vector.shape_cast %17 : vector<256xf32> to vector<1x256xf32>
    %19 = arith.addf %15, %18 : vector<1x256xf32>
    %c0_16 = arith.constant 0 : index
    %c0_17 = arith.constant 0 : index
    %20 = vector.load %arg6[%c0_16, %c0_17] : memref<1x256xf32, #tpu.memory_space<vmem>>, vector<1x256xf32>
    tpu.vector_store %arg6[%c0_16, %c0_17], %19 {strides = array<i32>} : memref<1x256xf32, #tpu.memory_space<vmem>>, vector<1x256xf32>,
    return
  }
  func.func @transform_0(%arg0: i32) -> (i32, i32) {
    %c0_i32 = arith.constant 0 : i32
    %c0_i32_0 = arith.constant 0 : i32
    return %arg0, %c0_i32 : i32, i32
  }
  func.func @transform_1(%arg0: i32) -> (i32, i32) {
    %c0_i32 = arith.constant 0 : i32
    %c0_i32_0 = arith.constant 0 : i32
    %c0_i32_1 = arith.constant 0 : i32
    return %c0_i32, %c0_i32_0 : i32, i32
  }
  func.func @transform_2(%arg0: i32) -> (i32, i32) {
    %c0_i32 = arith.constant 0 : i32
    %c0_i32_0 = arith.constant 0 : i32
    return %arg0, %c0_i32 : i32, i32
  }
  func.func @transform_3(%arg0: i32) -> (i32, i32) {
    %c0_i32 = arith.constant 0 : i32
    %c0_i32_0 = arith.constant 0 : i32
    return %arg0, %c0_i32 : i32, i32
  }
  func.func @transform_4(%arg0: i32) -> (i32, i32) {
    %c0_i32 = arith.constant 0 : i32
    %c0_i32_0 = arith.constant 0 : i32
    %c0_i32_1 = arith.constant 0 : i32
    return %c0_i32, %c0_i32_0 : i32, i32
  }
  func.func @transform_5(%arg0: i32) -> (i32, i32) {
    %c0_i32 = arith.constant 0 : i32
    %c0_i32_0 = arith.constant 0 : i32
    %c0_i32_1 = arith.constant 0 : i32
    return %c0_i32, %c0_i32_0 : i32, i32
  }
}

module attributes {stable_mosaic.version = 11 : i64} {
  func.func @_final_kernel(%arg0: i32, %arg1: memref<1x256x128xf32, #tpu.memory_space<vmem>>, %arg2: memref<1x256x128xf32, #tpu.memory_space<vmem>>, %arg3: memref<1x128xf32, #tpu.memory_space<vmem>>, %arg4: memref<1x128xf32, #tpu.memory_space<vmem>>, %arg5: memref<1x128xf32, #tpu.memory_space<vmem>>, %arg6: memref<1x128xf32, #tpu.memory_space<vmem>>, %arg7: memref<1x128xf32, #tpu.memory_space<vmem>>, %arg8: memref<1x128xf32, #tpu.memory_space<vmem>>, %arg9: memref<1x128xf32, #tpu.memory_space<vmem>>, %arg10: memref<1x128xf32, #tpu.memory_space<vmem>>, %arg11: memref<128x256xf32, #tpu.memory_space<vmem>>, %arg12: memref<128x256xf32, #tpu.memory_space<vmem>>, %arg13: memref<3x1xf32, #tpu.memory_space<vmem>>, %arg14: memref<2x1xf32, #tpu.memory_space<vmem>>, %arg15: memref<1x256x256xf32, #tpu.memory_space<vmem>>, %arg16: memref<1x256xf32, #tpu.memory_space<vmem>>, %arg17: memref<1x256xf32, #tpu.memory_space<vmem>>) attributes {dimension_semantics = [#tpu.dimension_semantics<arbitrary>], iteration_bounds = array<i64: 2>, scalar_prefetch = 0 : i64, scratch_operands = 0 : i64, tpu.core_type = #tpu.core_type<tc>, window_params = [{transform_indices = @transform_0, window_bounds = array<i64: 1, 256, 128>}, {transform_indices = @transform_1, window_bounds = array<i64: 1, 256, 128>}, {pipeline_mode = #tpu.pipeline_mode<synchronous>, transform_indices = @transform_2, window_bounds = array<i64: 1, 128>}, {pipeline_mode = #tpu.pipeline_mode<synchronous>, transform_indices = @transform_3, window_bounds = array<i64: 1, 128>}, {pipeline_mode = #tpu.pipeline_mode<synchronous>, transform_indices = @transform_4, window_bounds = array<i64: 1, 128>}, {pipeline_mode = #tpu.pipeline_mode<synchronous>, transform_indices = @transform_5, window_bounds = array<i64: 1, 128>}, {pipeline_mode = #tpu.pipeline_mode<synchronous>, transform_indices = @transform_6, window_bounds = array<i64: 1, 128>}, {pipeline_mode = #tpu.pipeline_mode<synchronous>, transform_indices = @transform_7, window_bounds = array<i64: 1, 128>}, {pipeline_mode = #tpu.pipeline_mode<synchronous>, transform_indices = @transform_8, window_bounds = array<i64: 1, 128>}, {pipeline_mode = #tpu.pipeline_mode<synchronous>, transform_indices = @transform_9, window_bounds = array<i64: 1, 128>}, {pipeline_mode = #tpu.pipeline_mode<synchronous>, transform_indices = @transform_10, window_bounds = array<i64: 128, 256>}, {pipeline_mode = #tpu.pipeline_mode<synchronous>, transform_indices = @transform_11, window_bounds = array<i64: 128, 256>}, {pipeline_mode = #tpu.pipeline_mode<synchronous>, transform_indices = @transform_12, window_bounds = array<i64: 3, 1>}, {pipeline_mode = #tpu.pipeline_mode<synchronous>, transform_indices = @transform_13, window_bounds = array<i64: 2, 1>}, {transform_indices = @transform_14, window_bounds = array<i64: 1, 256, 256>}, {pipeline_mode = #tpu.pipeline_mode<synchronous>, transform_indices = @transform_15, window_bounds = array<i64: 1, 256>}, {pipeline_mode = #tpu.pipeline_mode<synchronous>, transform_indices = @transform_16, window_bounds = array<i64: 1, 256>}]} {
    %c0 = arith.constant 0 : index
    %c0_0 = arith.constant 0 : index
    %0 = vector.load %arg3[%c0, %c0_0] : memref<1x128xf32, #tpu.memory_space<vmem>>, vector<1x128xf32>
    %c0_1 = arith.constant 0 : index
    %c0_2 = arith.constant 0 : index
    %1 = vector.load %arg4[%c0_1, %c0_2] : memref<1x128xf32, #tpu.memory_space<vmem>>, vector<1x128xf32>
    %c0_3 = arith.constant 0 : index
    %c0_4 = arith.constant 0 : index
    %2 = vector.load %arg5[%c0_3, %c0_4] : memref<1x128xf32, #tpu.memory_space<vmem>>, vector<1x128xf32>
    %c0_5 = arith.constant 0 : index
    %c0_6 = arith.constant 0 : index
    %3 = vector.load %arg6[%c0_5, %c0_6] : memref<1x128xf32, #tpu.memory_space<vmem>>, vector<1x128xf32>
    %cst = arith.constant 5.120000e+02 : f32
    %4 = vector.broadcast %cst : f32 to vector<1x128xf32>
    %5 = arith.divf %0, %4 : vector<1x128xf32>
    %cst_7 = arith.constant 5.120000e+02 : f32
    %6 = vector.broadcast %cst_7 : f32 to vector<1x128xf32>
    %7 = arith.divf %1, %6 : vector<1x128xf32>
    %8 = arith.mulf %5, %5 : vector<1x128xf32>
    %9 = arith.subf %7, %8 : vector<1x128xf32>
    %cst_8 = arith.constant 9.99999974E-6 : f32
    %10 = vector.broadcast %cst_8 : f32 to vector<1x128xf32>
    %11 = arith.addf %9, %10 : vector<1x128xf32>
    %12 = math.rsqrt %11 : vector<1x128xf32>
    %13 = arith.mulf %2, %12 : vector<1x128xf32>
    %14 = arith.mulf %5, %13 : vector<1x128xf32>
    %15 = arith.subf %3, %14 : vector<1x128xf32>
    %c0_9 = arith.constant 0 : index
    %c0_10 = arith.constant 0 : index
    %c0_11 = arith.constant 0 : index
    %16 = vector.load %arg1[%c0_9, %c0_10, %c0_11] : memref<1x256x128xf32, #tpu.memory_space<vmem>>, vector<1x256x128xf32>
    %17 = vector.shape_cast %16 : vector<1x256x128xf32> to vector<256x128xf32>
    %18 = vector.broadcast %13 : vector<1x128xf32> to vector<256x128xf32>
    %19 = arith.mulf %17, %18 : vector<256x128xf32>
    %20 = vector.broadcast %15 : vector<1x128xf32> to vector<256x128xf32>
    %21 = arith.addf %19, %20 : vector<256x128xf32>
    %cst_12 = arith.constant 0.000000e+00 : f32
    %22 = vector.broadcast %cst_12 : f32 to vector<256x128xf32>
    %23 = arith.maximumf %21, %22 : vector<256x128xf32>
    %c0_13 = arith.constant 0 : index
    %c0_14 = arith.constant 0 : index
    %24 = vector.load %arg7[%c0_13, %c0_14] : memref<1x128xf32, #tpu.memory_space<vmem>>, vector<1x128xf32>
    %c0_15 = arith.constant 0 : index
    %c0_16 = arith.constant 0 : index
    %25 = vector.load %arg8[%c0_15, %c0_16] : memref<1x128xf32, #tpu.memory_space<vmem>>, vector<1x128xf32>
    %c0_17 = arith.constant 0 : index
    %c0_18 = arith.constant 0 : index
    %26 = vector.load %arg9[%c0_17, %c0_18] : memref<1x128xf32, #tpu.memory_space<vmem>>, vector<1x128xf32>
    %c0_19 = arith.constant 0 : index
    %c0_20 = arith.constant 0 : index
    %27 = vector.load %arg10[%c0_19, %c0_20] : memref<1x128xf32, #tpu.memory_space<vmem>>, vector<1x128xf32>
    %cst_21 = arith.constant 5.120000e+02 : f32
    %28 = vector.broadcast %cst_21 : f32 to vector<1x128xf32>
    %29 = arith.divf %24, %28 : vector<1x128xf32>
    %cst_22 = arith.constant 5.120000e+02 : f32
    %30 = vector.broadcast %cst_22 : f32 to vector<1x128xf32>
    %31 = arith.divf %25, %30 : vector<1x128xf32>
    %32 = arith.mulf %29, %29 : vector<1x128xf32>
    %33 = arith.subf %31, %32 : vector<1x128xf32>
    %cst_23 = arith.constant 9.99999974E-6 : f32
    %34 = vector.broadcast %cst_23 : f32 to vector<1x128xf32>
    %35 = arith.addf %33, %34 : vector<1x128xf32>
    %36 = math.rsqrt %35 : vector<1x128xf32>
    %37 = arith.mulf %26, %36 : vector<1x128xf32>
    %38 = arith.mulf %29, %37 : vector<1x128xf32>
    %39 = arith.subf %27, %38 : vector<1x128xf32>
    %c0_24 = arith.constant 0 : index
    %c0_25 = arith.constant 0 : index
    %c0_26 = arith.constant 0 : index
    %40 = vector.load %arg2[%c0_24, %c0_25, %c0_26] : memref<1x256x128xf32, #tpu.memory_space<vmem>>, vector<1x256x128xf32>
    %41 = vector.shape_cast %40 : vector<1x256x128xf32> to vector<256x128xf32>
    %42 = vector.broadcast %37 : vector<1x128xf32> to vector<256x128xf32>
    %43 = arith.mulf %41, %42 : vector<256x128xf32>
    %44 = vector.broadcast %39 : vector<1x128xf32> to vector<256x128xf32>
    %45 = arith.addf %43, %44 : vector<256x128xf32>
    %c0_27 = arith.constant 0 : index
    %c0_28 = arith.constant 0 : index
    %46 = vector.load %arg13[%c0_27, %c0_28] : memref<3x1xf32, #tpu.memory_space<vmem>>, vector<1x1xf32>
    %c1 = arith.constant 1 : index
    %c0_29 = arith.constant 0 : index
    %47 = vector.load %arg13[%c1, %c0_29] : memref<3x1xf32, #tpu.memory_space<vmem>>, vector<1x1xf32>
    %c2 = arith.constant 2 : index
    %c0_30 = arith.constant 0 : index
    %48 = vector.load %arg13[%c2, %c0_30] : memref<3x1xf32, #tpu.memory_space<vmem>>, vector<1x1xf32>
    %c0_31 = arith.constant 0 : index
    %c0_32 = arith.constant 0 : index
    %49 = vector.load %arg14[%c0_31, %c0_32] : memref<2x1xf32, #tpu.memory_space<vmem>>, vector<1x1xf32>
    %c1_33 = arith.constant 1 : index
    %c0_34 = arith.constant 0 : index
    %50 = vector.load %arg14[%c1_33, %c0_34] : memref<2x1xf32, #tpu.memory_space<vmem>>, vector<1x1xf32>
    %51 = tpu.iota {dimensions = array<i32: 1>} : vector<1x128xi32>
    %cst_35 = arith.constant dense<0.000000e+00> : vector<128xf32>
    %52 = vector.multi_reduction <add>, %23, %cst_35 [0] : vector<256x128xf32> to vector<128xf32>
    %53 = vector.shape_cast %52 : vector<128xf32> to vector<1x128xf32>
    %cst_36 = arith.constant 2.560000e+02 : f32
    %54 = vector.broadcast %cst_36 : f32 to vector<1x128xf32>
    %55 = arith.divf %53, %54 : vector<1x128xf32>
    %56 = vector.broadcast %55 : vector<1x128xf32> to vector<256x128xf32>
    %57 = arith.subf %23, %56 : vector<256x128xf32>
    %58 = arith.mulf %57, %57 : vector<256x128xf32>
    %cst_37 = arith.constant dense<0.000000e+00> : vector<128xf32>
    %59 = vector.multi_reduction <add>, %58, %cst_37 [0] : vector<256x128xf32> to vector<128xf32>
    %60 = vector.shape_cast %59 : vector<128xf32> to vector<1x128xf32>
    %cst_38 = arith.constant 2.550000e+02 : f32
    %61 = vector.broadcast %cst_38 : f32 to vector<1x128xf32>
    %62 = arith.divf %60, %61 : vector<1x128xf32>
    %63 = math.sqrt %62 : vector<1x128xf32>
    %64 = vector.broadcast %49 : vector<1x1xf32> to vector<1x128xf32>
    %65 = arith.mulf %64, %55 : vector<1x128xf32>
    %66 = vector.broadcast %50 : vector<1x1xf32> to vector<1x128xf32>
    %67 = arith.mulf %66, %63 : vector<1x128xf32>
    %68 = arith.addf %65, %67 : vector<1x128xf32>
    %c0_i32 = arith.constant 0 : i32
    %69 = vector.broadcast %c0_i32 : i32 to vector<1x128xi32>
    %70 = arith.cmpi eq, %51, %69 : vector<1x128xi32>
    %c1_i32 = arith.constant 1 : i32
    %71 = tpu.dynamic_rotate %68 by %c1_i32 dim 1 : vector<1x128xf32>, i32 -> vector<1x128xf32>
    %cst_39 = arith.constant 0.000000e+00 : f32
    %72 = vector.broadcast %cst_39 : f32 to vector<1x128xf32>
    %73 = arith.select %70, %72, %71 : vector<1x128xi1>, vector<1x128xf32>
    %c127_i32 = arith.constant 127 : i32
    %74 = vector.broadcast %c127_i32 : i32 to vector<1x128xi32>
    %75 = arith.cmpi eq, %51, %74 : vector<1x128xi32>
    %c127_i32_40 = arith.constant 127 : i32
    %76 = tpu.dynamic_rotate %68 by %c127_i32_40 dim 1 : vector<1x128xf32>, i32 -> vector<1x128xf32>
    %cst_41 = arith.constant 0.000000e+00 : f32
    %77 = vector.broadcast %cst_41 : f32 to vector<1x128xf32>
    %78 = arith.select %75, %77, %76 : vector<1x128xi1>, vector<1x128xf32>
    %79 = vector.broadcast %46 : vector<1x1xf32> to vector<1x128xf32>
    %80 = arith.mulf %79, %73 : vector<1x128xf32>
    %81 = vector.broadcast %47 : vector<1x1xf32> to vector<1x128xf32>
    %82 = arith.mulf %81, %68 : vector<1x128xf32>
    %83 = arith.addf %80, %82 : vector<1x128xf32>
    %84 = vector.broadcast %48 : vector<1x1xf32> to vector<1x128xf32>
    %85 = arith.mulf %84, %78 : vector<1x128xf32>
    %86 = arith.addf %83, %85 : vector<1x128xf32>
    %87 = arith.negf %86 : vector<1x128xf32>
    %88 = math.exp %87 : vector<1x128xf32>
    %cst_42 = arith.constant 1.000000e+00 : f32
    %89 = vector.broadcast %cst_42 : f32 to vector<1x128xf32>
    %90 = arith.addf %89, %88 : vector<1x128xf32>
    %91 = arith.divf %89, %90 : vector<1x128xf32>
    %92 = vector.broadcast %91 : vector<1x128xf32> to vector<256x128xf32>
    %93 = arith.mulf %23, %92 : vector<256x128xf32>
    %c0_43 = arith.constant 0 : index
    %c0_44 = arith.constant 0 : index
    %94 = vector.load %arg11[%c0_43, %c0_44] : memref<128x256xf32, #tpu.memory_space<vmem>>, vector<128x256xf32>
    %cst_45 = arith.constant dense<0.000000e+00> : vector<256x256xf32>
    %95 = tpu.matmul %93, %94, %cst_45 {dimension_numbers = #tpu.dot_dimension_numbers<[1], [0], [0], [1], [0, 0, 1, 1], [], []>} : vector<256x128xf32>, vector<128x256xf32>, vector<256x256xf32> -> vector<256x256xf32>
    %cst_46 = arith.constant dense<0.000000e+00> : vector<128xf32>
    %96 = vector.multi_reduction <add>, %45, %cst_46 [0] : vector<256x128xf32> to vector<128xf32>
    %97 = vector.shape_cast %96 : vector<128xf32> to vector<1x128xf32>
    %cst_47 = arith.constant 2.560000e+02 : f32
    %98 = vector.broadcast %cst_47 : f32 to vector<1x128xf32>
    %99 = arith.divf %97, %98 : vector<1x128xf32>
    %100 = vector.broadcast %99 : vector<1x128xf32> to vector<256x128xf32>
    %101 = arith.subf %45, %100 : vector<256x128xf32>
    %102 = arith.mulf %101, %101 : vector<256x128xf32>
    %cst_48 = arith.constant dense<0.000000e+00> : vector<128xf32>
    %103 = vector.multi_reduction <add>, %102, %cst_48 [0] : vector<256x128xf32> to vector<128xf32>
    %104 = vector.shape_cast %103 : vector<128xf32> to vector<1x128xf32>
    %cst_49 = arith.constant 2.550000e+02 : f32
    %105 = vector.broadcast %cst_49 : f32 to vector<1x128xf32>
    %106 = arith.divf %104, %105 : vector<1x128xf32>
    %107 = math.sqrt %106 : vector<1x128xf32>
    %108 = vector.broadcast %49 : vector<1x1xf32> to vector<1x128xf32>
    %109 = arith.mulf %108, %99 : vector<1x128xf32>
    %110 = vector.broadcast %50 : vector<1x1xf32> to vector<1x128xf32>
    %111 = arith.mulf %110, %107 : vector<1x128xf32>
    %112 = arith.addf %109, %111 : vector<1x128xf32>
    %c0_i32_50 = arith.constant 0 : i32
    %113 = vector.broadcast %c0_i32_50 : i32 to vector<1x128xi32>
    %114 = arith.cmpi eq, %51, %113 : vector<1x128xi32>
    %c1_i32_51 = arith.constant 1 : i32
    %115 = tpu.dynamic_rotate %112 by %c1_i32_51 dim 1 : vector<1x128xf32>, i32 -> vector<1x128xf32>
    %cst_52 = arith.constant 0.000000e+00 : f32
    %116 = vector.broadcast %cst_52 : f32 to vector<1x128xf32>
    %117 = arith.select %114, %116, %115 : vector<1x128xi1>, vector<1x128xf32>
    %c127_i32_53 = arith.constant 127 : i32
    %118 = vector.broadcast %c127_i32_53 : i32 to vector<1x128xi32>
    %119 = arith.cmpi eq, %51, %118 : vector<1x128xi32>
    %c127_i32_54 = arith.constant 127 : i32
    %120 = tpu.dynamic_rotate %112 by %c127_i32_54 dim 1 : vector<1x128xf32>, i32 -> vector<1x128xf32>
    %cst_55 = arith.constant 0.000000e+00 : f32
    %121 = vector.broadcast %cst_55 : f32 to vector<1x128xf32>
    %122 = arith.select %119, %121, %120 : vector<1x128xi1>, vector<1x128xf32>
    %123 = vector.broadcast %46 : vector<1x1xf32> to vector<1x128xf32>
    %124 = arith.mulf %123, %117 : vector<1x128xf32>
    %125 = vector.broadcast %47 : vector<1x1xf32> to vector<1x128xf32>
    %126 = arith.mulf %125, %112 : vector<1x128xf32>
    %127 = arith.addf %124, %126 : vector<1x128xf32>
    %128 = vector.broadcast %48 : vector<1x1xf32> to vector<1x128xf32>
    %129 = arith.mulf %128, %122 : vector<1x128xf32>
    %130 = arith.addf %127, %129 : vector<1x128xf32>
    %131 = arith.negf %130 : vector<1x128xf32>
    %132 = math.exp %131 : vector<1x128xf32>
    %cst_56 = arith.constant 1.000000e+00 : f32
    %133 = vector.broadcast %cst_56 : f32 to vector<1x128xf32>
    %134 = arith.addf %133, %132 : vector<1x128xf32>
    %135 = arith.divf %133, %134 : vector<1x128xf32>
    %136 = vector.broadcast %135 : vector<1x128xf32> to vector<256x128xf32>
    %137 = arith.mulf %45, %136 : vector<256x128xf32>
    %c0_57 = arith.constant 0 : index
    %c0_58 = arith.constant 0 : index
    %138 = vector.load %arg12[%c0_57, %c0_58] : memref<128x256xf32, #tpu.memory_space<vmem>>, vector<128x256xf32>
    %cst_59 = arith.constant dense<0.000000e+00> : vector<256x256xf32>
    %139 = tpu.matmul %137, %138, %cst_59 {dimension_numbers = #tpu.dot_dimension_numbers<[1], [0], [0], [1], [0, 0, 1, 1], [], []>} : vector<256x128xf32>, vector<128x256xf32>, vector<256x256xf32> -> vector<256x256xf32>
    %140 = arith.addf %95, %139 : vector<256x256xf32>
    %c0_60 = arith.constant 0 : index
    %c0_61 = arith.constant 0 : index
    %c0_62 = arith.constant 0 : index
    %141 = vector.load %arg15[%c0_60, %c0_61, %c0_62] : memref<1x256x256xf32, #tpu.memory_space<vmem>>, vector<1x256x256xf32>
    %142 = vector.shape_cast %141 : vector<1x256x256xf32> to vector<256x256xf32>
    %143 = vector.shape_cast %140 : vector<256x256xf32> to vector<1x256x256xf32>
    tpu.vector_store %arg15[%c0_60, %c0_61, %c0_62], %143 {strides = array<i32>} : memref<1x256x256xf32, #tpu.memory_space<vmem>>, vector<1x256x256xf32>,
    %c0_i32_63 = arith.constant 0 : i32
    %144 = arith.cmpi eq, %arg0, %c0_i32_63 : i32
    %145 = arith.extui %144 : i1 to i32
    %c0_i32_64 = arith.constant 0 : i32
    %146 = arith.cmpi ne, %145, %c0_i32_64 : i32
    scf.if %146 {
      %cst_75 = arith.constant 0.000000e+00 : f32
      %158 = vector.broadcast %cst_75 : f32 to vector<1x256xf32>
      %c0_76 = arith.constant 0 : index
      %c0_77 = arith.constant 0 : index
      %159 = vector.load %arg16[%c0_76, %c0_77] : memref<1x256xf32, #tpu.memory_space<vmem>>, vector<1x256xf32>
      tpu.vector_store %arg16[%c0_76, %c0_77], %158 {strides = array<i32>} : memref<1x256xf32, #tpu.memory_space<vmem>>, vector<1x256xf32>,
      %cst_78 = arith.constant 0.000000e+00 : f32
      %160 = vector.broadcast %cst_78 : f32 to vector<1x256xf32>
      %c0_79 = arith.constant 0 : index
      %c0_80 = arith.constant 0 : index
      %161 = vector.load %arg17[%c0_79, %c0_80] : memref<1x256xf32, #tpu.memory_space<vmem>>, vector<1x256xf32>
      tpu.vector_store %arg17[%c0_79, %c0_80], %160 {strides = array<i32>} : memref<1x256xf32, #tpu.memory_space<vmem>>, vector<1x256xf32>,
    } else {
    }
    %c0_65 = arith.constant 0 : index
    %c0_66 = arith.constant 0 : index
    %147 = vector.load %arg16[%c0_65, %c0_66] : memref<1x256xf32, #tpu.memory_space<vmem>>, vector<1x256xf32>
    %cst_67 = arith.constant dense<0.000000e+00> : vector<256xf32>
    %148 = vector.multi_reduction <add>, %140, %cst_67 [0] : vector<256x256xf32> to vector<256xf32>
    %149 = vector.shape_cast %148 : vector<256xf32> to vector<1x256xf32>
    %150 = arith.addf %147, %149 : vector<1x256xf32>
    %c0_68 = arith.constant 0 : index
    %c0_69 = arith.constant 0 : index
    %151 = vector.load %arg16[%c0_68, %c0_69] : memref<1x256xf32, #tpu.memory_space<vmem>>, vector<1x256xf32>
    tpu.vector_store %arg16[%c0_68, %c0_69], %150 {strides = array<i32>} : memref<1x256xf32, #tpu.memory_space<vmem>>, vector<1x256xf32>,
    %c0_70 = arith.constant 0 : index
    %c0_71 = arith.constant 0 : index
    %152 = vector.load %arg17[%c0_70, %c0_71] : memref<1x256xf32, #tpu.memory_space<vmem>>, vector<1x256xf32>
    %153 = arith.mulf %140, %140 : vector<256x256xf32>
    %cst_72 = arith.constant dense<0.000000e+00> : vector<256xf32>
    %154 = vector.multi_reduction <add>, %153, %cst_72 [0] : vector<256x256xf32> to vector<256xf32>
    %155 = vector.shape_cast %154 : vector<256xf32> to vector<1x256xf32>
    %156 = arith.addf %152, %155 : vector<1x256xf32>
    %c0_73 = arith.constant 0 : index
    %c0_74 = arith.constant 0 : index
    %157 = vector.load %arg17[%c0_73, %c0_74] : memref<1x256xf32, #tpu.memory_space<vmem>>, vector<1x256xf32>
    tpu.vector_store %arg17[%c0_73, %c0_74], %156 {strides = array<i32>} : memref<1x256xf32, #tpu.memory_space<vmem>>, vector<1x256xf32>,
    return
  }
  func.func @transform_0(%arg0: i32) -> (i32, i32, i32) {
    %c0_i32 = arith.constant 0 : i32
    %c0_i32_0 = arith.constant 0 : i32
    %c0_i32_1 = arith.constant 0 : i32
    return %arg0, %c0_i32, %c0_i32_0 : i32, i32, i32
  }
  func.func @transform_1(%arg0: i32) -> (i32, i32, i32) {
    %c0_i32 = arith.constant 0 : i32
    %c0_i32_0 = arith.constant 0 : i32
    %c0_i32_1 = arith.constant 0 : i32
    return %arg0, %c0_i32, %c0_i32_0 : i32, i32, i32
  }
  func.func @transform_2(%arg0: i32) -> (i32, i32) {
    %c0_i32 = arith.constant 0 : i32
    %c0_i32_0 = arith.constant 0 : i32
    %c0_i32_1 = arith.constant 0 : i32
    return %c0_i32, %c0_i32_0 : i32, i32
  }
  func.func @transform_3(%arg0: i32) -> (i32, i32) {
    %c0_i32 = arith.constant 0 : i32
    %c0_i32_0 = arith.constant 0 : i32
    %c0_i32_1 = arith.constant 0 : i32
    return %c0_i32, %c0_i32_0 : i32, i32
  }
  func.func @transform_4(%arg0: i32) -> (i32, i32) {
    %c0_i32 = arith.constant 0 : i32
    %c0_i32_0 = arith.constant 0 : i32
    %c0_i32_1 = arith.constant 0 : i32
    return %c0_i32, %c0_i32_0 : i32, i32
  }
  func.func @transform_5(%arg0: i32) -> (i32, i32) {
    %c0_i32 = arith.constant 0 : i32
    %c0_i32_0 = arith.constant 0 : i32
    %c0_i32_1 = arith.constant 0 : i32
    return %c0_i32, %c0_i32_0 : i32, i32
  }
  func.func @transform_6(%arg0: i32) -> (i32, i32) {
    %c0_i32 = arith.constant 0 : i32
    %c0_i32_0 = arith.constant 0 : i32
    %c0_i32_1 = arith.constant 0 : i32
    return %c0_i32, %c0_i32_0 : i32, i32
  }
  func.func @transform_7(%arg0: i32) -> (i32, i32) {
    %c0_i32 = arith.constant 0 : i32
    %c0_i32_0 = arith.constant 0 : i32
    %c0_i32_1 = arith.constant 0 : i32
    return %c0_i32, %c0_i32_0 : i32, i32
  }
  func.func @transform_8(%arg0: i32) -> (i32, i32) {
    %c0_i32 = arith.constant 0 : i32
    %c0_i32_0 = arith.constant 0 : i32
    %c0_i32_1 = arith.constant 0 : i32
    return %c0_i32, %c0_i32_0 : i32, i32
  }
  func.func @transform_9(%arg0: i32) -> (i32, i32) {
    %c0_i32 = arith.constant 0 : i32
    %c0_i32_0 = arith.constant 0 : i32
    %c0_i32_1 = arith.constant 0 : i32
    return %c0_i32, %c0_i32_0 : i32, i32
  }
  func.func @transform_10(%arg0: i32) -> (i32, i32) {
    %c0_i32 = arith.constant 0 : i32
    %c0_i32_0 = arith.constant 0 : i32
    %c0_i32_1 = arith.constant 0 : i32
    return %c0_i32, %c0_i32_0 : i32, i32
  }
  func.func @transform_11(%arg0: i32) -> (i32, i32) {
    %c0_i32 = arith.constant 0 : i32
    %c0_i32_0 = arith.constant 0 : i32
    %c0_i32_1 = arith.constant 0 : i32
    return %c0_i32, %c0_i32_0 : i32, i32
  }
  func.func @transform_12(%arg0: i32) -> (i32, i32) {
    %c0_i32 = arith.constant 0 : i32
    %c0_i32_0 = arith.constant 0 : i32
    %c0_i32_1 = arith.constant 0 : i32
    return %c0_i32, %c0_i32_0 : i32, i32
  }
  func.func @transform_13(%arg0: i32) -> (i32, i32) {
    %c0_i32 = arith.constant 0 : i32
    %c0_i32_0 = arith.constant 0 : i32
    %c0_i32_1 = arith.constant 0 : i32
    return %c0_i32, %c0_i32_0 : i32, i32
  }
  func.func @transform_14(%arg0: i32) -> (i32, i32, i32) {
    %c0_i32 = arith.constant 0 : i32
    %c0_i32_0 = arith.constant 0 : i32
    %c0_i32_1 = arith.constant 0 : i32
    return %arg0, %c0_i32, %c0_i32_0 : i32, i32, i32
  }
  func.func @transform_15(%arg0: i32) -> (i32, i32) {
    %c0_i32 = arith.constant 0 : i32
    %c0_i32_0 = arith.constant 0 : i32
    %c0_i32_1 = arith.constant 0 : i32
    return %c0_i32, %c0_i32_0 : i32, i32
  }
  func.func @transform_16(%arg0: i32) -> (i32, i32) {
    %c0_i32 = arith.constant 0 : i32
    %c0_i32_0 = arith.constant 0 : i32
    %c0_i32_1 = arith.constant 0 : i32
    return %c0_i32, %c0_i32_0 : i32, i32
  }
}

module attributes {stable_mosaic.version = 11 : i64} {
  func.func @_conv3x3_kernel(%arg0: i32, %arg1: memref<1x18x18x128xf32, #tpu.memory_space<vmem>>, %arg2: memref<1x128xf32, #tpu.memory_space<vmem>>, %arg3: memref<1x128xf32, #tpu.memory_space<vmem>>, %arg4: memref<1x128xf32, #tpu.memory_space<vmem>>, %arg5: memref<1x128xf32, #tpu.memory_space<vmem>>, %arg6: memref<9x128x128xf32, #tpu.memory_space<vmem>>, %arg7: memref<1x16x16x128xf32, #tpu.memory_space<vmem>>, %arg8: memref<1x128xf32, #tpu.memory_space<vmem>>, %arg9: memref<1x128xf32, #tpu.memory_space<vmem>>, %arg10: memref<18x18x128xf32, #tpu.memory_space<vmem>>) attributes {dimension_semantics = [#tpu.dimension_semantics<arbitrary>], iteration_bounds = array<i64: 2>, scalar_prefetch = 0 : i64, scratch_operands = 1 : i64, tpu.core_type = #tpu.core_type<tc>, window_params = [{transform_indices = @transform_0, window_bounds = array<i64: 1, 18, 18, 128>}, {pipeline_mode = #tpu.pipeline_mode<synchronous>, transform_indices = @transform_1, window_bounds = array<i64: 1, 128>}, {pipeline_mode = #tpu.pipeline_mode<synchronous>, transform_indices = @transform_2, window_bounds = array<i64: 1, 128>}, {pipeline_mode = #tpu.pipeline_mode<synchronous>, transform_indices = @transform_3, window_bounds = array<i64: 1, 128>}, {pipeline_mode = #tpu.pipeline_mode<synchronous>, transform_indices = @transform_4, window_bounds = array<i64: 1, 128>}, {pipeline_mode = #tpu.pipeline_mode<synchronous>, transform_indices = @transform_5, window_bounds = array<i64: 9, 128, 128>}, {transform_indices = @transform_6, window_bounds = array<i64: 1, 16, 16, 128>}, {pipeline_mode = #tpu.pipeline_mode<synchronous>, transform_indices = @transform_7, window_bounds = array<i64: 1, 128>}, {pipeline_mode = #tpu.pipeline_mode<synchronous>, transform_indices = @transform_8, window_bounds = array<i64: 1, 128>}]} {
    %c0 = arith.constant 0 : index
    %c0_0 = arith.constant 0 : index
    %0 = vector.load %arg2[%c0, %c0_0] : memref<1x128xf32, #tpu.memory_space<vmem>>, vector<1x128xf32>
    %c0_1 = arith.constant 0 : index
    %c0_2 = arith.constant 0 : index
    %1 = vector.load %arg3[%c0_1, %c0_2] : memref<1x128xf32, #tpu.memory_space<vmem>>, vector<1x128xf32>
    %c0_3 = arith.constant 0 : index
    %c0_4 = arith.constant 0 : index
    %2 = vector.load %arg4[%c0_3, %c0_4] : memref<1x128xf32, #tpu.memory_space<vmem>>, vector<1x128xf32>
    %c0_5 = arith.constant 0 : index
    %c0_6 = arith.constant 0 : index
    %3 = vector.load %arg5[%c0_5, %c0_6] : memref<1x128xf32, #tpu.memory_space<vmem>>, vector<1x128xf32>
    %cst = arith.constant 5.120000e+02 : f32
    %4 = vector.broadcast %cst : f32 to vector<1x128xf32>
    %5 = arith.divf %0, %4 : vector<1x128xf32>
    %cst_7 = arith.constant 5.120000e+02 : f32
    %6 = vector.broadcast %cst_7 : f32 to vector<1x128xf32>
    %7 = arith.divf %1, %6 : vector<1x128xf32>
    %8 = arith.mulf %5, %5 : vector<1x128xf32>
    %9 = arith.subf %7, %8 : vector<1x128xf32>
    %cst_8 = arith.constant 9.99999974E-6 : f32
    %10 = vector.broadcast %cst_8 : f32 to vector<1x128xf32>
    %11 = arith.addf %9, %10 : vector<1x128xf32>
    %12 = math.rsqrt %11 : vector<1x128xf32>
    %13 = arith.mulf %2, %12 : vector<1x128xf32>
    %14 = arith.mulf %5, %13 : vector<1x128xf32>
    %15 = arith.subf %3, %14 : vector<1x128xf32>
    %c0_9 = arith.constant 0 : index
    %c0_10 = arith.constant 0 : index
    %c0_11 = arith.constant 0 : index
    %c0_12 = arith.constant 0 : index
    %16 = vector.load %arg1[%c0_9, %c0_10, %c0_11, %c0_12] : memref<1x18x18x128xf32, #tpu.memory_space<vmem>>, vector<1x18x18x128xf32>
    %17 = vector.shape_cast %16 : vector<1x18x18x128xf32> to vector<18x18x128xf32>
    %18 = vector.shape_cast %13 : vector<1x128xf32> to vector<1x1x128xf32>
    %19 = vector.broadcast %18 : vector<1x1x128xf32> to vector<18x18x128xf32>
    %20 = arith.mulf %17, %19 : vector<18x18x128xf32>
    %21 = vector.shape_cast %15 : vector<1x128xf32> to vector<1x1x128xf32>
    %22 = vector.broadcast %21 : vector<1x1x128xf32> to vector<18x18x128xf32>
    %23 = arith.addf %20, %22 : vector<18x18x128xf32>
    %cst_13 = arith.constant 0.000000e+00 : f32
    %24 = vector.broadcast %cst_13 : f32 to vector<18x18x128xf32>
    %25 = arith.maximumf %23, %24 : vector<18x18x128xf32>
    %26 = tpu.iota {dimensions = array<i32: 0>} : vector<18x18x128xi32>
    %27 = tpu.iota {dimensions = array<i32: 1>} : vector<18x18x128xi32>
    %c1_i32 = arith.constant 1 : i32
    %28 = vector.broadcast %c1_i32 : i32 to vector<18x18x128xi32>
    %29 = arith.cmpi sge, %26, %28 : vector<18x18x128xi32>
    %c16_i32 = arith.constant 16 : i32
    %30 = vector.broadcast %c16_i32 : i32 to vector<18x18x128xi32>
    %31 = arith.cmpi sle, %26, %30 : vector<18x18x128xi32>
    %32 = arith.andi %29, %31 : vector<18x18x128xi1>
    %c1_i32_14 = arith.constant 1 : i32
    %33 = vector.broadcast %c1_i32_14 : i32 to vector<18x18x128xi32>
    %34 = arith.cmpi sge, %27, %33 : vector<18x18x128xi32>
    %35 = arith.andi %32, %34 : vector<18x18x128xi1>
    %c16_i32_15 = arith.constant 16 : i32
    %36 = vector.broadcast %c16_i32_15 : i32 to vector<18x18x128xi32>
    %37 = arith.cmpi sle, %27, %36 : vector<18x18x128xi32>
    %38 = arith.andi %35, %37 : vector<18x18x128xi1>
    %cst_16 = arith.constant 0.000000e+00 : f32
    %39 = vector.broadcast %cst_16 : f32 to vector<18x18x128xf32>
    %40 = arith.select %38, %25, %39 : vector<18x18x128xi1>, vector<18x18x128xf32>
    %c0_17 = arith.constant 0 : index
    %c0_18 = arith.constant 0 : index
    %c0_19 = arith.constant 0 : index
    %41 = vector.load %arg10[%c0_17, %c0_18, %c0_19] : memref<18x18x128xf32, #tpu.memory_space<vmem>>, vector<18x18x128xf32>
    tpu.vector_store %arg10[%c0_17, %c0_18, %c0_19], %40 {strides = array<i32>} : memref<18x18x128xf32, #tpu.memory_space<vmem>>, vector<18x18x128xf32>,
    %cst_20 = arith.constant 0.000000e+00 : f32
    %42 = vector.broadcast %cst_20 : f32 to vector<256x128xf32>
    %c0_21 = arith.constant 0 : index
    %c0_22 = arith.constant 0 : index
    %c0_23 = arith.constant 0 : index
    %43 = vector.load %arg10[%c0_21, %c0_22, %c0_23] : memref<18x18x128xf32, #tpu.memory_space<vmem>>, vector<16x16x128xf32>
    %44 = vector.shape_cast %43 : vector<16x16x128xf32> to vector<256x128xf32>
    %c0_24 = arith.constant 0 : index
    %c0_25 = arith.constant 0 : index
    %c0_26 = arith.constant 0 : index
    %45 = vector.load %arg6[%c0_24, %c0_25, %c0_26] : memref<9x128x128xf32, #tpu.memory_space<vmem>>, vector<1x128x128xf32>
    %46 = vector.shape_cast %45 : vector<1x128x128xf32> to vector<128x128xf32>
    %cst_27 = arith.constant dense<0.000000e+00> : vector<256x128xf32>
    %47 = tpu.matmul %44, %46, %cst_27 {dimension_numbers = #tpu.dot_dimension_numbers<[1], [0], [0], [1], [0, 0, 1, 1], [], []>} : vector<256x128xf32>, vector<128x128xf32>, vector<256x128xf32> -> vector<256x128xf32>
    %48 = arith.addf %42, %47 : vector<256x128xf32>
    %c0_28 = arith.constant 0 : index
    %c1 = arith.constant 1 : index
    %c0_29 = arith.constant 0 : index
    %49 = vector.load %arg10[%c0_28, %c1, %c0_29] : memref<18x18x128xf32, #tpu.memory_space<vmem>>, vector<16x16x128xf32>
    %50 = vector.shape_cast %49 : vector<16x16x128xf32> to vector<256x128xf32>
    %c1_30 = arith.constant 1 : index
    %c0_31 = arith.constant 0 : index
    %c0_32 = arith.constant 0 : index
    %51 = vector.load %arg6[%c1_30, %c0_31, %c0_32] : memref<9x128x128xf32, #tpu.memory_space<vmem>>, vector<1x128x128xf32>
    %52 = vector.shape_cast %51 : vector<1x128x128xf32> to vector<128x128xf32>
    %cst_33 = arith.constant dense<0.000000e+00> : vector<256x128xf32>
    %53 = tpu.matmul %50, %52, %cst_33 {dimension_numbers = #tpu.dot_dimension_numbers<[1], [0], [0], [1], [0, 0, 1, 1], [], []>} : vector<256x128xf32>, vector<128x128xf32>, vector<256x128xf32> -> vector<256x128xf32>
    %54 = arith.addf %48, %53 : vector<256x128xf32>
    %c0_34 = arith.constant 0 : index
    %c2 = arith.constant 2 : index
    %c0_35 = arith.constant 0 : index
    %55 = vector.load %arg10[%c0_34, %c2, %c0_35] : memref<18x18x128xf32, #tpu.memory_space<vmem>>, vector<16x16x128xf32>
    %56 = vector.shape_cast %55 : vector<16x16x128xf32> to vector<256x128xf32>
    %c2_36 = arith.constant 2 : index
    %c0_37 = arith.constant 0 : index
    %c0_38 = arith.constant 0 : index
    %57 = vector.load %arg6[%c2_36, %c0_37, %c0_38] : memref<9x128x128xf32, #tpu.memory_space<vmem>>, vector<1x128x128xf32>
    %58 = vector.shape_cast %57 : vector<1x128x128xf32> to vector<128x128xf32>
    %cst_39 = arith.constant dense<0.000000e+00> : vector<256x128xf32>
    %59 = tpu.matmul %56, %58, %cst_39 {dimension_numbers = #tpu.dot_dimension_numbers<[1], [0], [0], [1], [0, 0, 1, 1], [], []>} : vector<256x128xf32>, vector<128x128xf32>, vector<256x128xf32> -> vector<256x128xf32>
    %60 = arith.addf %54, %59 : vector<256x128xf32>
    %c1_40 = arith.constant 1 : index
    %c0_41 = arith.constant 0 : index
    %c0_42 = arith.constant 0 : index
    %61 = vector.load %arg10[%c1_40, %c0_41, %c0_42] : memref<18x18x128xf32, #tpu.memory_space<vmem>>, vector<16x16x128xf32>
    %62 = vector.shape_cast %61 : vector<16x16x128xf32> to vector<256x128xf32>
    %c3 = arith.constant 3 : index
    %c0_43 = arith.constant 0 : index
    %c0_44 = arith.constant 0 : index
    %63 = vector.load %arg6[%c3, %c0_43, %c0_44] : memref<9x128x128xf32, #tpu.memory_space<vmem>>, vector<1x128x128xf32>
    %64 = vector.shape_cast %63 : vector<1x128x128xf32> to vector<128x128xf32>
    %cst_45 = arith.constant dense<0.000000e+00> : vector<256x128xf32>
    %65 = tpu.matmul %62, %64, %cst_45 {dimension_numbers = #tpu.dot_dimension_numbers<[1], [0], [0], [1], [0, 0, 1, 1], [], []>} : vector<256x128xf32>, vector<128x128xf32>, vector<256x128xf32> -> vector<256x128xf32>
    %66 = arith.addf %60, %65 : vector<256x128xf32>
    %c1_46 = arith.constant 1 : index
    %c1_47 = arith.constant 1 : index
    %c0_48 = arith.constant 0 : index
    %67 = vector.load %arg10[%c1_46, %c1_47, %c0_48] : memref<18x18x128xf32, #tpu.memory_space<vmem>>, vector<16x16x128xf32>
    %68 = vector.shape_cast %67 : vector<16x16x128xf32> to vector<256x128xf32>
    %c4 = arith.constant 4 : index
    %c0_49 = arith.constant 0 : index
    %c0_50 = arith.constant 0 : index
    %69 = vector.load %arg6[%c4, %c0_49, %c0_50] : memref<9x128x128xf32, #tpu.memory_space<vmem>>, vector<1x128x128xf32>
    %70 = vector.shape_cast %69 : vector<1x128x128xf32> to vector<128x128xf32>
    %cst_51 = arith.constant dense<0.000000e+00> : vector<256x128xf32>
    %71 = tpu.matmul %68, %70, %cst_51 {dimension_numbers = #tpu.dot_dimension_numbers<[1], [0], [0], [1], [0, 0, 1, 1], [], []>} : vector<256x128xf32>, vector<128x128xf32>, vector<256x128xf32> -> vector<256x128xf32>
    %72 = arith.addf %66, %71 : vector<256x128xf32>
    %c1_52 = arith.constant 1 : index
    %c2_53 = arith.constant 2 : index
    %c0_54 = arith.constant 0 : index
    %73 = vector.load %arg10[%c1_52, %c2_53, %c0_54] : memref<18x18x128xf32, #tpu.memory_space<vmem>>, vector<16x16x128xf32>
    %74 = vector.shape_cast %73 : vector<16x16x128xf32> to vector<256x128xf32>
    %c5 = arith.constant 5 : index
    %c0_55 = arith.constant 0 : index
    %c0_56 = arith.constant 0 : index
    %75 = vector.load %arg6[%c5, %c0_55, %c0_56] : memref<9x128x128xf32, #tpu.memory_space<vmem>>, vector<1x128x128xf32>
    %76 = vector.shape_cast %75 : vector<1x128x128xf32> to vector<128x128xf32>
    %cst_57 = arith.constant dense<0.000000e+00> : vector<256x128xf32>
    %77 = tpu.matmul %74, %76, %cst_57 {dimension_numbers = #tpu.dot_dimension_numbers<[1], [0], [0], [1], [0, 0, 1, 1], [], []>} : vector<256x128xf32>, vector<128x128xf32>, vector<256x128xf32> -> vector<256x128xf32>
    %78 = arith.addf %72, %77 : vector<256x128xf32>
    %c2_58 = arith.constant 2 : index
    %c0_59 = arith.constant 0 : index
    %c0_60 = arith.constant 0 : index
    %79 = vector.load %arg10[%c2_58, %c0_59, %c0_60] : memref<18x18x128xf32, #tpu.memory_space<vmem>>, vector<16x16x128xf32>
    %80 = vector.shape_cast %79 : vector<16x16x128xf32> to vector<256x128xf32>
    %c6 = arith.constant 6 : index
    %c0_61 = arith.constant 0 : index
    %c0_62 = arith.constant 0 : index
    %81 = vector.load %arg6[%c6, %c0_61, %c0_62] : memref<9x128x128xf32, #tpu.memory_space<vmem>>, vector<1x128x128xf32>
    %82 = vector.shape_cast %81 : vector<1x128x128xf32> to vector<128x128xf32>
    %cst_63 = arith.constant dense<0.000000e+00> : vector<256x128xf32>
    %83 = tpu.matmul %80, %82, %cst_63 {dimension_numbers = #tpu.dot_dimension_numbers<[1], [0], [0], [1], [0, 0, 1, 1], [], []>} : vector<256x128xf32>, vector<128x128xf32>, vector<256x128xf32> -> vector<256x128xf32>
    %84 = arith.addf %78, %83 : vector<256x128xf32>
    %c2_64 = arith.constant 2 : index
    %c1_65 = arith.constant 1 : index
    %c0_66 = arith.constant 0 : index
    %85 = vector.load %arg10[%c2_64, %c1_65, %c0_66] : memref<18x18x128xf32, #tpu.memory_space<vmem>>, vector<16x16x128xf32>
    %86 = vector.shape_cast %85 : vector<16x16x128xf32> to vector<256x128xf32>
    %c7 = arith.constant 7 : index
    %c0_67 = arith.constant 0 : index
    %c0_68 = arith.constant 0 : index
    %87 = vector.load %arg6[%c7, %c0_67, %c0_68] : memref<9x128x128xf32, #tpu.memory_space<vmem>>, vector<1x128x128xf32>
    %88 = vector.shape_cast %87 : vector<1x128x128xf32> to vector<128x128xf32>
    %cst_69 = arith.constant dense<0.000000e+00> : vector<256x128xf32>
    %89 = tpu.matmul %86, %88, %cst_69 {dimension_numbers = #tpu.dot_dimension_numbers<[1], [0], [0], [1], [0, 0, 1, 1], [], []>} : vector<256x128xf32>, vector<128x128xf32>, vector<256x128xf32> -> vector<256x128xf32>
    %90 = arith.addf %84, %89 : vector<256x128xf32>
    %c2_70 = arith.constant 2 : index
    %c2_71 = arith.constant 2 : index
    %c0_72 = arith.constant 0 : index
    %91 = vector.load %arg10[%c2_70, %c2_71, %c0_72] : memref<18x18x128xf32, #tpu.memory_space<vmem>>, vector<16x16x128xf32>
    %92 = vector.shape_cast %91 : vector<16x16x128xf32> to vector<256x128xf32>
    %c8 = arith.constant 8 : index
    %c0_73 = arith.constant 0 : index
    %c0_74 = arith.constant 0 : index
    %93 = vector.load %arg6[%c8, %c0_73, %c0_74] : memref<9x128x128xf32, #tpu.memory_space<vmem>>, vector<1x128x128xf32>
    %94 = vector.shape_cast %93 : vector<1x128x128xf32> to vector<128x128xf32>
    %cst_75 = arith.constant dense<0.000000e+00> : vector<256x128xf32>
    %95 = tpu.matmul %92, %94, %cst_75 {dimension_numbers = #tpu.dot_dimension_numbers<[1], [0], [0], [1], [0, 0, 1, 1], [], []>} : vector<256x128xf32>, vector<128x128xf32>, vector<256x128xf32> -> vector<256x128xf32>
    %96 = arith.addf %90, %95 : vector<256x128xf32>
    %97 = vector.shape_cast %96 : vector<256x128xf32> to vector<16x16x128xf32>
    %c0_76 = arith.constant 0 : index
    %c0_77 = arith.constant 0 : index
    %c0_78 = arith.constant 0 : index
    %c0_79 = arith.constant 0 : index
    %98 = vector.load %arg7[%c0_76, %c0_77, %c0_78, %c0_79] : memref<1x16x16x128xf32, #tpu.memory_space<vmem>>, vector<1x16x16x128xf32>
    %99 = vector.shape_cast %98 : vector<1x16x16x128xf32> to vector<16x16x128xf32>
    %100 = vector.shape_cast %97 : vector<16x16x128xf32> to vector<1x16x16x128xf32>
    tpu.vector_store %arg7[%c0_76, %c0_77, %c0_78, %c0_79], %100 {strides = array<i32>} : memref<1x16x16x128xf32, #tpu.memory_space<vmem>>, vector<1x16x16x128xf32>,
    %c0_i32 = arith.constant 0 : i32
    %101 = arith.cmpi eq, %arg0, %c0_i32 : i32
    %102 = arith.extui %101 : i1 to i32
    %c0_i32_80 = arith.constant 0 : i32
    %103 = arith.cmpi ne, %102, %c0_i32_80 : i32
    scf.if %103 {
      %cst_91 = arith.constant 0.000000e+00 : f32
      %115 = vector.broadcast %cst_91 : f32 to vector<1x128xf32>
      %c0_92 = arith.constant 0 : index
      %c0_93 = arith.constant 0 : index
      %116 = vector.load %arg8[%c0_92, %c0_93] : memref<1x128xf32, #tpu.memory_space<vmem>>, vector<1x128xf32>
      tpu.vector_store %arg8[%c0_92, %c0_93], %115 {strides = array<i32>} : memref<1x128xf32, #tpu.memory_space<vmem>>, vector<1x128xf32>,
      %cst_94 = arith.constant 0.000000e+00 : f32
      %117 = vector.broadcast %cst_94 : f32 to vector<1x128xf32>
      %c0_95 = arith.constant 0 : index
      %c0_96 = arith.constant 0 : index
      %118 = vector.load %arg9[%c0_95, %c0_96] : memref<1x128xf32, #tpu.memory_space<vmem>>, vector<1x128xf32>
      tpu.vector_store %arg9[%c0_95, %c0_96], %117 {strides = array<i32>} : memref<1x128xf32, #tpu.memory_space<vmem>>, vector<1x128xf32>,
    } else {
    }
    %c0_81 = arith.constant 0 : index
    %c0_82 = arith.constant 0 : index
    %104 = vector.load %arg8[%c0_81, %c0_82] : memref<1x128xf32, #tpu.memory_space<vmem>>, vector<1x128xf32>
    %cst_83 = arith.constant dense<0.000000e+00> : vector<128xf32>
    %105 = vector.multi_reduction <add>, %96, %cst_83 [0] : vector<256x128xf32> to vector<128xf32>
    %106 = vector.shape_cast %105 : vector<128xf32> to vector<1x128xf32>
    %107 = arith.addf %104, %106 : vector<1x128xf32>
    %c0_84 = arith.constant 0 : index
    %c0_85 = arith.constant 0 : index
    %108 = vector.load %arg8[%c0_84, %c0_85] : memref<1x128xf32, #tpu.memory_space<vmem>>, vector<1x128xf32>
    tpu.vector_store %arg8[%c0_84, %c0_85], %107 {strides = array<i32>} : memref<1x128xf32, #tpu.memory_space<vmem>>, vector<1x128xf32>,
    %c0_86 = arith.constant 0 : index
    %c0_87 = arith.constant 0 : index
    %109 = vector.load %arg9[%c0_86, %c0_87] : memref<1x128xf32, #tpu.memory_space<vmem>>, vector<1x128xf32>
    %110 = arith.mulf %96, %96 : vector<256x128xf32>
    %cst_88 = arith.constant dense<0.000000e+00> : vector<128xf32>
    %111 = vector.multi_reduction <add>, %110, %cst_88 [0] : vector<256x128xf32> to vector<128xf32>
    %112 = vector.shape_cast %111 : vector<128xf32> to vector<1x128xf32>
    %113 = arith.addf %109, %112 : vector<1x128xf32>
    %c0_89 = arith.constant 0 : index
    %c0_90 = arith.constant 0 : index
    %114 = vector.load %arg9[%c0_89, %c0_90] : memref<1x128xf32, #tpu.memory_space<vmem>>, vector<1x128xf32>
    tpu.vector_store %arg9[%c0_89, %c0_90], %113 {strides = array<i32>} : memref<1x128xf32, #tpu.memory_space<vmem>>, vector<1x128xf32>,
    return
  }
  func.func @transform_0(%arg0: i32) -> (i32, i32, i32, i32) {
    %c0_i32 = arith.constant 0 : i32
    %c0_i32_0 = arith.constant 0 : i32
    %c0_i32_1 = arith.constant 0 : i32
    %c0_i32_2 = arith.constant 0 : i32
    return %arg0, %c0_i32, %c0_i32_0, %c0_i32_1 : i32, i32, i32, i32
  }
  func.func @transform_1(%arg0: i32) -> (i32, i32) {
    %c0_i32 = arith.constant 0 : i32
    %c0_i32_0 = arith.constant 0 : i32
    %c0_i32_1 = arith.constant 0 : i32
    return %c0_i32, %c0_i32_0 : i32, i32
  }
  func.func @transform_2(%arg0: i32) -> (i32, i32) {
    %c0_i32 = arith.constant 0 : i32
    %c0_i32_0 = arith.constant 0 : i32
    %c0_i32_1 = arith.constant 0 : i32
    return %c0_i32, %c0_i32_0 : i32, i32
  }
  func.func @transform_3(%arg0: i32) -> (i32, i32) {
    %c0_i32 = arith.constant 0 : i32
    %c0_i32_0 = arith.constant 0 : i32
    %c0_i32_1 = arith.constant 0 : i32
    return %c0_i32, %c0_i32_0 : i32, i32
  }
  func.func @transform_4(%arg0: i32) -> (i32, i32) {
    %c0_i32 = arith.constant 0 : i32
    %c0_i32_0 = arith.constant 0 : i32
    %c0_i32_1 = arith.constant 0 : i32
    return %c0_i32, %c0_i32_0 : i32, i32
  }
  func.func @transform_5(%arg0: i32) -> (i32, i32, i32) {
    %c0_i32 = arith.constant 0 : i32
    %c0_i32_0 = arith.constant 0 : i32
    %c0_i32_1 = arith.constant 0 : i32
    %c0_i32_2 = arith.constant 0 : i32
    return %c0_i32, %c0_i32_0, %c0_i32_1 : i32, i32, i32
  }
  func.func @transform_6(%arg0: i32) -> (i32, i32, i32, i32) {
    %c0_i32 = arith.constant 0 : i32
    %c0_i32_0 = arith.constant 0 : i32
    %c0_i32_1 = arith.constant 0 : i32
    %c0_i32_2 = arith.constant 0 : i32
    return %arg0, %c0_i32, %c0_i32_0, %c0_i32_1 : i32, i32, i32, i32
  }
  func.func @transform_7(%arg0: i32) -> (i32, i32) {
    %c0_i32 = arith.constant 0 : i32
    %c0_i32_0 = arith.constant 0 : i32
    %c0_i32_1 = arith.constant 0 : i32
    return %c0_i32, %c0_i32_0 : i32, i32
  }
  func.func @transform_8(%arg0: i32) -> (i32, i32) {
    %c0_i32 = arith.constant 0 : i32
    %c0_i32_0 = arith.constant 0 : i32
    %c0_i32_1 = arith.constant 0 : i32
    return %c0_i32, %c0_i32_0 : i32, i32
  }
}

module attributes {stable_mosaic.version = 11 : i64} {
  func.func @_conv3x3_kernel(%arg0: i32, %arg1: memref<1x18x18x128xf32, #tpu.memory_space<vmem>>, %arg2: memref<1x128xf32, #tpu.memory_space<vmem>>, %arg3: memref<1x128xf32, #tpu.memory_space<vmem>>, %arg4: memref<1x128xf32, #tpu.memory_space<vmem>>, %arg5: memref<1x128xf32, #tpu.memory_space<vmem>>, %arg6: memref<9x128x128xf32, #tpu.memory_space<vmem>>, %arg7: memref<1x16x16x128xf32, #tpu.memory_space<vmem>>, %arg8: memref<1x128xf32, #tpu.memory_space<vmem>>, %arg9: memref<1x128xf32, #tpu.memory_space<vmem>>, %arg10: memref<18x18x128xf32, #tpu.memory_space<vmem>>) attributes {dimension_semantics = [#tpu.dimension_semantics<arbitrary>], iteration_bounds = array<i64: 2>, scalar_prefetch = 0 : i64, scratch_operands = 1 : i64, tpu.core_type = #tpu.core_type<tc>, window_params = [{transform_indices = @transform_0, window_bounds = array<i64: 1, 18, 18, 128>}, {pipeline_mode = #tpu.pipeline_mode<synchronous>, transform_indices = @transform_1, window_bounds = array<i64: 1, 128>}, {pipeline_mode = #tpu.pipeline_mode<synchronous>, transform_indices = @transform_2, window_bounds = array<i64: 1, 128>}, {pipeline_mode = #tpu.pipeline_mode<synchronous>, transform_indices = @transform_3, window_bounds = array<i64: 1, 128>}, {pipeline_mode = #tpu.pipeline_mode<synchronous>, transform_indices = @transform_4, window_bounds = array<i64: 1, 128>}, {pipeline_mode = #tpu.pipeline_mode<synchronous>, transform_indices = @transform_5, window_bounds = array<i64: 9, 128, 128>}, {transform_indices = @transform_6, window_bounds = array<i64: 1, 16, 16, 128>}, {pipeline_mode = #tpu.pipeline_mode<synchronous>, transform_indices = @transform_7, window_bounds = array<i64: 1, 128>}, {pipeline_mode = #tpu.pipeline_mode<synchronous>, transform_indices = @transform_8, window_bounds = array<i64: 1, 128>}]} {
    %c0 = arith.constant 0 : index
    %c0_0 = arith.constant 0 : index
    %0 = vector.load %arg2[%c0, %c0_0] : memref<1x128xf32, #tpu.memory_space<vmem>>, vector<1x128xf32>
    %c0_1 = arith.constant 0 : index
    %c0_2 = arith.constant 0 : index
    %1 = vector.load %arg3[%c0_1, %c0_2] : memref<1x128xf32, #tpu.memory_space<vmem>>, vector<1x128xf32>
    %c0_3 = arith.constant 0 : index
    %c0_4 = arith.constant 0 : index
    %2 = vector.load %arg4[%c0_3, %c0_4] : memref<1x128xf32, #tpu.memory_space<vmem>>, vector<1x128xf32>
    %c0_5 = arith.constant 0 : index
    %c0_6 = arith.constant 0 : index
    %3 = vector.load %arg5[%c0_5, %c0_6] : memref<1x128xf32, #tpu.memory_space<vmem>>, vector<1x128xf32>
    %cst = arith.constant 5.120000e+02 : f32
    %4 = vector.broadcast %cst : f32 to vector<1x128xf32>
    %5 = arith.divf %0, %4 : vector<1x128xf32>
    %cst_7 = arith.constant 5.120000e+02 : f32
    %6 = vector.broadcast %cst_7 : f32 to vector<1x128xf32>
    %7 = arith.divf %1, %6 : vector<1x128xf32>
    %8 = arith.mulf %5, %5 : vector<1x128xf32>
    %9 = arith.subf %7, %8 : vector<1x128xf32>
    %cst_8 = arith.constant 9.99999974E-6 : f32
    %10 = vector.broadcast %cst_8 : f32 to vector<1x128xf32>
    %11 = arith.addf %9, %10 : vector<1x128xf32>
    %12 = math.rsqrt %11 : vector<1x128xf32>
    %13 = arith.mulf %2, %12 : vector<1x128xf32>
    %14 = arith.mulf %5, %13 : vector<1x128xf32>
    %15 = arith.subf %3, %14 : vector<1x128xf32>
    %c0_9 = arith.constant 0 : index
    %c0_10 = arith.constant 0 : index
    %c0_11 = arith.constant 0 : index
    %c0_12 = arith.constant 0 : index
    %16 = vector.load %arg1[%c0_9, %c0_10, %c0_11, %c0_12] : memref<1x18x18x128xf32, #tpu.memory_space<vmem>>, vector<1x18x18x128xf32>
    %17 = vector.shape_cast %16 : vector<1x18x18x128xf32> to vector<18x18x128xf32>
    %18 = vector.shape_cast %13 : vector<1x128xf32> to vector<1x1x128xf32>
    %19 = vector.broadcast %18 : vector<1x1x128xf32> to vector<18x18x128xf32>
    %20 = arith.mulf %17, %19 : vector<18x18x128xf32>
    %21 = vector.shape_cast %15 : vector<1x128xf32> to vector<1x1x128xf32>
    %22 = vector.broadcast %21 : vector<1x1x128xf32> to vector<18x18x128xf32>
    %23 = arith.addf %20, %22 : vector<18x18x128xf32>
    %24 = tpu.iota {dimensions = array<i32: 0>} : vector<18x18x128xi32>
    %25 = tpu.iota {dimensions = array<i32: 1>} : vector<18x18x128xi32>
    %c1_i32 = arith.constant 1 : i32
    %26 = vector.broadcast %c1_i32 : i32 to vector<18x18x128xi32>
    %27 = arith.cmpi sge, %24, %26 : vector<18x18x128xi32>
    %c16_i32 = arith.constant 16 : i32
    %28 = vector.broadcast %c16_i32 : i32 to vector<18x18x128xi32>
    %29 = arith.cmpi sle, %24, %28 : vector<18x18x128xi32>
    %30 = arith.andi %27, %29 : vector<18x18x128xi1>
    %c1_i32_13 = arith.constant 1 : i32
    %31 = vector.broadcast %c1_i32_13 : i32 to vector<18x18x128xi32>
    %32 = arith.cmpi sge, %25, %31 : vector<18x18x128xi32>
    %33 = arith.andi %30, %32 : vector<18x18x128xi1>
    %c16_i32_14 = arith.constant 16 : i32
    %34 = vector.broadcast %c16_i32_14 : i32 to vector<18x18x128xi32>
    %35 = arith.cmpi sle, %25, %34 : vector<18x18x128xi32>
    %36 = arith.andi %33, %35 : vector<18x18x128xi1>
    %cst_15 = arith.constant 0.000000e+00 : f32
    %37 = vector.broadcast %cst_15 : f32 to vector<18x18x128xf32>
    %38 = arith.select %36, %23, %37 : vector<18x18x128xi1>, vector<18x18x128xf32>
    %c0_16 = arith.constant 0 : index
    %c0_17 = arith.constant 0 : index
    %c0_18 = arith.constant 0 : index
    %39 = vector.load %arg10[%c0_16, %c0_17, %c0_18] : memref<18x18x128xf32, #tpu.memory_space<vmem>>, vector<18x18x128xf32>
    tpu.vector_store %arg10[%c0_16, %c0_17, %c0_18], %38 {strides = array<i32>} : memref<18x18x128xf32, #tpu.memory_space<vmem>>, vector<18x18x128xf32>,
    %cst_19 = arith.constant 0.000000e+00 : f32
    %40 = vector.broadcast %cst_19 : f32 to vector<256x128xf32>
    %c0_20 = arith.constant 0 : index
    %c0_21 = arith.constant 0 : index
    %c0_22 = arith.constant 0 : index
    %41 = vector.load %arg10[%c0_20, %c0_21, %c0_22] : memref<18x18x128xf32, #tpu.memory_space<vmem>>, vector<16x16x128xf32>
    %42 = vector.shape_cast %41 : vector<16x16x128xf32> to vector<256x128xf32>
    %c0_23 = arith.constant 0 : index
    %c0_24 = arith.constant 0 : index
    %c0_25 = arith.constant 0 : index
    %43 = vector.load %arg6[%c0_23, %c0_24, %c0_25] : memref<9x128x128xf32, #tpu.memory_space<vmem>>, vector<1x128x128xf32>
    %44 = vector.shape_cast %43 : vector<1x128x128xf32> to vector<128x128xf32>
    %cst_26 = arith.constant dense<0.000000e+00> : vector<256x128xf32>
    %45 = tpu.matmul %42, %44, %cst_26 {dimension_numbers = #tpu.dot_dimension_numbers<[1], [0], [0], [1], [0, 0, 1, 1], [], []>} : vector<256x128xf32>, vector<128x128xf32>, vector<256x128xf32> -> vector<256x128xf32>
    %46 = arith.addf %40, %45 : vector<256x128xf32>
    %c0_27 = arith.constant 0 : index
    %c1 = arith.constant 1 : index
    %c0_28 = arith.constant 0 : index
    %47 = vector.load %arg10[%c0_27, %c1, %c0_28] : memref<18x18x128xf32, #tpu.memory_space<vmem>>, vector<16x16x128xf32>
    %48 = vector.shape_cast %47 : vector<16x16x128xf32> to vector<256x128xf32>
    %c1_29 = arith.constant 1 : index
    %c0_30 = arith.constant 0 : index
    %c0_31 = arith.constant 0 : index
    %49 = vector.load %arg6[%c1_29, %c0_30, %c0_31] : memref<9x128x128xf32, #tpu.memory_space<vmem>>, vector<1x128x128xf32>
    %50 = vector.shape_cast %49 : vector<1x128x128xf32> to vector<128x128xf32>
    %cst_32 = arith.constant dense<0.000000e+00> : vector<256x128xf32>
    %51 = tpu.matmul %48, %50, %cst_32 {dimension_numbers = #tpu.dot_dimension_numbers<[1], [0], [0], [1], [0, 0, 1, 1], [], []>} : vector<256x128xf32>, vector<128x128xf32>, vector<256x128xf32> -> vector<256x128xf32>
    %52 = arith.addf %46, %51 : vector<256x128xf32>
    %c0_33 = arith.constant 0 : index
    %c2 = arith.constant 2 : index
    %c0_34 = arith.constant 0 : index
    %53 = vector.load %arg10[%c0_33, %c2, %c0_34] : memref<18x18x128xf32, #tpu.memory_space<vmem>>, vector<16x16x128xf32>
    %54 = vector.shape_cast %53 : vector<16x16x128xf32> to vector<256x128xf32>
    %c2_35 = arith.constant 2 : index
    %c0_36 = arith.constant 0 : index
    %c0_37 = arith.constant 0 : index
    %55 = vector.load %arg6[%c2_35, %c0_36, %c0_37] : memref<9x128x128xf32, #tpu.memory_space<vmem>>, vector<1x128x128xf32>
    %56 = vector.shape_cast %55 : vector<1x128x128xf32> to vector<128x128xf32>
    %cst_38 = arith.constant dense<0.000000e+00> : vector<256x128xf32>
    %57 = tpu.matmul %54, %56, %cst_38 {dimension_numbers = #tpu.dot_dimension_numbers<[1], [0], [0], [1], [0, 0, 1, 1], [], []>} : vector<256x128xf32>, vector<128x128xf32>, vector<256x128xf32> -> vector<256x128xf32>
    %58 = arith.addf %52, %57 : vector<256x128xf32>
    %c1_39 = arith.constant 1 : index
    %c0_40 = arith.constant 0 : index
    %c0_41 = arith.constant 0 : index
    %59 = vector.load %arg10[%c1_39, %c0_40, %c0_41] : memref<18x18x128xf32, #tpu.memory_space<vmem>>, vector<16x16x128xf32>
    %60 = vector.shape_cast %59 : vector<16x16x128xf32> to vector<256x128xf32>
    %c3 = arith.constant 3 : index
    %c0_42 = arith.constant 0 : index
    %c0_43 = arith.constant 0 : index
    %61 = vector.load %arg6[%c3, %c0_42, %c0_43] : memref<9x128x128xf32, #tpu.memory_space<vmem>>, vector<1x128x128xf32>
    %62 = vector.shape_cast %61 : vector<1x128x128xf32> to vector<128x128xf32>
    %cst_44 = arith.constant dense<0.000000e+00> : vector<256x128xf32>
    %63 = tpu.matmul %60, %62, %cst_44 {dimension_numbers = #tpu.dot_dimension_numbers<[1], [0], [0], [1], [0, 0, 1, 1], [], []>} : vector<256x128xf32>, vector<128x128xf32>, vector<256x128xf32> -> vector<256x128xf32>
    %64 = arith.addf %58, %63 : vector<256x128xf32>
    %c1_45 = arith.constant 1 : index
    %c1_46 = arith.constant 1 : index
    %c0_47 = arith.constant 0 : index
    %65 = vector.load %arg10[%c1_45, %c1_46, %c0_47] : memref<18x18x128xf32, #tpu.memory_space<vmem>>, vector<16x16x128xf32>
    %66 = vector.shape_cast %65 : vector<16x16x128xf32> to vector<256x128xf32>
    %c4 = arith.constant 4 : index
    %c0_48 = arith.constant 0 : index
    %c0_49 = arith.constant 0 : index
    %67 = vector.load %arg6[%c4, %c0_48, %c0_49] : memref<9x128x128xf32, #tpu.memory_space<vmem>>, vector<1x128x128xf32>
    %68 = vector.shape_cast %67 : vector<1x128x128xf32> to vector<128x128xf32>
    %cst_50 = arith.constant dense<0.000000e+00> : vector<256x128xf32>
    %69 = tpu.matmul %66, %68, %cst_50 {dimension_numbers = #tpu.dot_dimension_numbers<[1], [0], [0], [1], [0, 0, 1, 1], [], []>} : vector<256x128xf32>, vector<128x128xf32>, vector<256x128xf32> -> vector<256x128xf32>
    %70 = arith.addf %64, %69 : vector<256x128xf32>
    %c1_51 = arith.constant 1 : index
    %c2_52 = arith.constant 2 : index
    %c0_53 = arith.constant 0 : index
    %71 = vector.load %arg10[%c1_51, %c2_52, %c0_53] : memref<18x18x128xf32, #tpu.memory_space<vmem>>, vector<16x16x128xf32>
    %72 = vector.shape_cast %71 : vector<16x16x128xf32> to vector<256x128xf32>
    %c5 = arith.constant 5 : index
    %c0_54 = arith.constant 0 : index
    %c0_55 = arith.constant 0 : index
    %73 = vector.load %arg6[%c5, %c0_54, %c0_55] : memref<9x128x128xf32, #tpu.memory_space<vmem>>, vector<1x128x128xf32>
    %74 = vector.shape_cast %73 : vector<1x128x128xf32> to vector<128x128xf32>
    %cst_56 = arith.constant dense<0.000000e+00> : vector<256x128xf32>
    %75 = tpu.matmul %72, %74, %cst_56 {dimension_numbers = #tpu.dot_dimension_numbers<[1], [0], [0], [1], [0, 0, 1, 1], [], []>} : vector<256x128xf32>, vector<128x128xf32>, vector<256x128xf32> -> vector<256x128xf32>
    %76 = arith.addf %70, %75 : vector<256x128xf32>
    %c2_57 = arith.constant 2 : index
    %c0_58 = arith.constant 0 : index
    %c0_59 = arith.constant 0 : index
    %77 = vector.load %arg10[%c2_57, %c0_58, %c0_59] : memref<18x18x128xf32, #tpu.memory_space<vmem>>, vector<16x16x128xf32>
    %78 = vector.shape_cast %77 : vector<16x16x128xf32> to vector<256x128xf32>
    %c6 = arith.constant 6 : index
    %c0_60 = arith.constant 0 : index
    %c0_61 = arith.constant 0 : index
    %79 = vector.load %arg6[%c6, %c0_60, %c0_61] : memref<9x128x128xf32, #tpu.memory_space<vmem>>, vector<1x128x128xf32>
    %80 = vector.shape_cast %79 : vector<1x128x128xf32> to vector<128x128xf32>
    %cst_62 = arith.constant dense<0.000000e+00> : vector<256x128xf32>
    %81 = tpu.matmul %78, %80, %cst_62 {dimension_numbers = #tpu.dot_dimension_numbers<[1], [0], [0], [1], [0, 0, 1, 1], [], []>} : vector<256x128xf32>, vector<128x128xf32>, vector<256x128xf32> -> vector<256x128xf32>
    %82 = arith.addf %76, %81 : vector<256x128xf32>
    %c2_63 = arith.constant 2 : index
    %c1_64 = arith.constant 1 : index
    %c0_65 = arith.constant 0 : index
    %83 = vector.load %arg10[%c2_63, %c1_64, %c0_65] : memref<18x18x128xf32, #tpu.memory_space<vmem>>, vector<16x16x128xf32>
    %84 = vector.shape_cast %83 : vector<16x16x128xf32> to vector<256x128xf32>
    %c7 = arith.constant 7 : index
    %c0_66 = arith.constant 0 : index
    %c0_67 = arith.constant 0 : index
    %85 = vector.load %arg6[%c7, %c0_66, %c0_67] : memref<9x128x128xf32, #tpu.memory_space<vmem>>, vector<1x128x128xf32>
    %86 = vector.shape_cast %85 : vector<1x128x128xf32> to vector<128x128xf32>
    %cst_68 = arith.constant dense<0.000000e+00> : vector<256x128xf32>
    %87 = tpu.matmul %84, %86, %cst_68 {dimension_numbers = #tpu.dot_dimension_numbers<[1], [0], [0], [1], [0, 0, 1, 1], [], []>} : vector<256x128xf32>, vector<128x128xf32>, vector<256x128xf32> -> vector<256x128xf32>
    %88 = arith.addf %82, %87 : vector<256x128xf32>
    %c2_69 = arith.constant 2 : index
    %c2_70 = arith.constant 2 : index
    %c0_71 = arith.constant 0 : index
    %89 = vector.load %arg10[%c2_69, %c2_70, %c0_71] : memref<18x18x128xf32, #tpu.memory_space<vmem>>, vector<16x16x128xf32>
    %90 = vector.shape_cast %89 : vector<16x16x128xf32> to vector<256x128xf32>
    %c8 = arith.constant 8 : index
    %c0_72 = arith.constant 0 : index
    %c0_73 = arith.constant 0 : index
    %91 = vector.load %arg6[%c8, %c0_72, %c0_73] : memref<9x128x128xf32, #tpu.memory_space<vmem>>, vector<1x128x128xf32>
    %92 = vector.shape_cast %91 : vector<1x128x128xf32> to vector<128x128xf32>
    %cst_74 = arith.constant dense<0.000000e+00> : vector<256x128xf32>
    %93 = tpu.matmul %90, %92, %cst_74 {dimension_numbers = #tpu.dot_dimension_numbers<[1], [0], [0], [1], [0, 0, 1, 1], [], []>} : vector<256x128xf32>, vector<128x128xf32>, vector<256x128xf32> -> vector<256x128xf32>
    %94 = arith.addf %88, %93 : vector<256x128xf32>
    %95 = vector.shape_cast %94 : vector<256x128xf32> to vector<16x16x128xf32>
    %c0_75 = arith.constant 0 : index
    %c0_76 = arith.constant 0 : index
    %c0_77 = arith.constant 0 : index
    %c0_78 = arith.constant 0 : index
    %96 = vector.load %arg7[%c0_75, %c0_76, %c0_77, %c0_78] : memref<1x16x16x128xf32, #tpu.memory_space<vmem>>, vector<1x16x16x128xf32>
    %97 = vector.shape_cast %96 : vector<1x16x16x128xf32> to vector<16x16x128xf32>
    %98 = vector.shape_cast %95 : vector<16x16x128xf32> to vector<1x16x16x128xf32>
    tpu.vector_store %arg7[%c0_75, %c0_76, %c0_77, %c0_78], %98 {strides = array<i32>} : memref<1x16x16x128xf32, #tpu.memory_space<vmem>>, vector<1x16x16x128xf32>,
    %c0_i32 = arith.constant 0 : i32
    %99 = arith.cmpi eq, %arg0, %c0_i32 : i32
    %100 = arith.extui %99 : i1 to i32
    %c0_i32_79 = arith.constant 0 : i32
    %101 = arith.cmpi ne, %100, %c0_i32_79 : i32
    scf.if %101 {
      %cst_90 = arith.constant 0.000000e+00 : f32
      %113 = vector.broadcast %cst_90 : f32 to vector<1x128xf32>
      %c0_91 = arith.constant 0 : index
      %c0_92 = arith.constant 0 : index
      %114 = vector.load %arg8[%c0_91, %c0_92] : memref<1x128xf32, #tpu.memory_space<vmem>>, vector<1x128xf32>
      tpu.vector_store %arg8[%c0_91, %c0_92], %113 {strides = array<i32>} : memref<1x128xf32, #tpu.memory_space<vmem>>, vector<1x128xf32>,
      %cst_93 = arith.constant 0.000000e+00 : f32
      %115 = vector.broadcast %cst_93 : f32 to vector<1x128xf32>
      %c0_94 = arith.constant 0 : index
      %c0_95 = arith.constant 0 : index
      %116 = vector.load %arg9[%c0_94, %c0_95] : memref<1x128xf32, #tpu.memory_space<vmem>>, vector<1x128xf32>
      tpu.vector_store %arg9[%c0_94, %c0_95], %115 {strides = array<i32>} : memref<1x128xf32, #tpu.memory_space<vmem>>, vector<1x128xf32>,
    } else {
    }
    %c0_80 = arith.constant 0 : index
    %c0_81 = arith.constant 0 : index
    %102 = vector.load %arg8[%c0_80, %c0_81] : memref<1x128xf32, #tpu.memory_space<vmem>>, vector<1x128xf32>
    %cst_82 = arith.constant dense<0.000000e+00> : vector<128xf32>
    %103 = vector.multi_reduction <add>, %94, %cst_82 [0] : vector<256x128xf32> to vector<128xf32>
    %104 = vector.shape_cast %103 : vector<128xf32> to vector<1x128xf32>
    %105 = arith.addf %102, %104 : vector<1x128xf32>
    %c0_83 = arith.constant 0 : index
    %c0_84 = arith.constant 0 : index
    %106 = vector.load %arg8[%c0_83, %c0_84] : memref<1x128xf32, #tpu.memory_space<vmem>>, vector<1x128xf32>
    tpu.vector_store %arg8[%c0_83, %c0_84], %105 {strides = array<i32>} : memref<1x128xf32, #tpu.memory_space<vmem>>, vector<1x128xf32>,
    %c0_85 = arith.constant 0 : index
    %c0_86 = arith.constant 0 : index
    %107 = vector.load %arg9[%c0_85, %c0_86] : memref<1x128xf32, #tpu.memory_space<vmem>>, vector<1x128xf32>
    %108 = arith.mulf %94, %94 : vector<256x128xf32>
    %cst_87 = arith.constant dense<0.000000e+00> : vector<128xf32>
    %109 = vector.multi_reduction <add>, %108, %cst_87 [0] : vector<256x128xf32> to vector<128xf32>
    %110 = vector.shape_cast %109 : vector<128xf32> to vector<1x128xf32>
    %111 = arith.addf %107, %110 : vector<1x128xf32>
    %c0_88 = arith.constant 0 : index
    %c0_89 = arith.constant 0 : index
    %112 = vector.load %arg9[%c0_88, %c0_89] : memref<1x128xf32, #tpu.memory_space<vmem>>, vector<1x128xf32>
    tpu.vector_store %arg9[%c0_88, %c0_89], %111 {strides = array<i32>} : memref<1x128xf32, #tpu.memory_space<vmem>>, vector<1x128xf32>,
    return
  }
  func.func @transform_0(%arg0: i32) -> (i32, i32, i32, i32) {
    %c0_i32 = arith.constant 0 : i32
    %c0_i32_0 = arith.constant 0 : i32
    %c0_i32_1 = arith.constant 0 : i32
    %c0_i32_2 = arith.constant 0 : i32
    return %arg0, %c0_i32, %c0_i32_0, %c0_i32_1 : i32, i32, i32, i32
  }
  func.func @transform_1(%arg0: i32) -> (i32, i32) {
    %c0_i32 = arith.constant 0 : i32
    %c0_i32_0 = arith.constant 0 : i32
    %c0_i32_1 = arith.constant 0 : i32
    return %c0_i32, %c0_i32_0 : i32, i32
  }
  func.func @transform_2(%arg0: i32) -> (i32, i32) {
    %c0_i32 = arith.constant 0 : i32
    %c0_i32_0 = arith.constant 0 : i32
    %c0_i32_1 = arith.constant 0 : i32
    return %c0_i32, %c0_i32_0 : i32, i32
  }
  func.func @transform_3(%arg0: i32) -> (i32, i32) {
    %c0_i32 = arith.constant 0 : i32
    %c0_i32_0 = arith.constant 0 : i32
    %c0_i32_1 = arith.constant 0 : i32
    return %c0_i32, %c0_i32_0 : i32, i32
  }
  func.func @transform_4(%arg0: i32) -> (i32, i32) {
    %c0_i32 = arith.constant 0 : i32
    %c0_i32_0 = arith.constant 0 : i32
    %c0_i32_1 = arith.constant 0 : i32
    return %c0_i32, %c0_i32_0 : i32, i32
  }
  func.func @transform_5(%arg0: i32) -> (i32, i32, i32) {
    %c0_i32 = arith.constant 0 : i32
    %c0_i32_0 = arith.constant 0 : i32
    %c0_i32_1 = arith.constant 0 : i32
    %c0_i32_2 = arith.constant 0 : i32
    return %c0_i32, %c0_i32_0, %c0_i32_1 : i32, i32, i32
  }
  func.func @transform_6(%arg0: i32) -> (i32, i32, i32, i32) {
    %c0_i32 = arith.constant 0 : i32
    %c0_i32_0 = arith.constant 0 : i32
    %c0_i32_1 = arith.constant 0 : i32
    %c0_i32_2 = arith.constant 0 : i32
    return %arg0, %c0_i32, %c0_i32_0, %c0_i32_1 : i32, i32, i32, i32
  }
  func.func @transform_7(%arg0: i32) -> (i32, i32) {
    %c0_i32 = arith.constant 0 : i32
    %c0_i32_0 = arith.constant 0 : i32
    %c0_i32_1 = arith.constant 0 : i32
    return %c0_i32, %c0_i32_0 : i32, i32
  }
  func.func @transform_8(%arg0: i32) -> (i32, i32) {
    %c0_i32 = arith.constant 0 : i32
    %c0_i32_0 = arith.constant 0 : i32
    %c0_i32_1 = arith.constant 0 : i32
    return %c0_i32, %c0_i32_0 : i32, i32
  }
}

module attributes {stable_mosaic.version = 11 : i64} {
  func.func @_bn_relu_kernel(%arg0: i32, %arg1: memref<256x256xf32, #tpu.memory_space<vmem>>, %arg2: memref<1x256xf32, #tpu.memory_space<vmem>>, %arg3: memref<1x256xf32, #tpu.memory_space<vmem>>, %arg4: memref<1x256xf32, #tpu.memory_space<vmem>>, %arg5: memref<1x256xf32, #tpu.memory_space<vmem>>, %arg6: memref<256x256xf32, #tpu.memory_space<vmem>>) attributes {dimension_semantics = [#tpu.dimension_semantics<parallel>], iteration_bounds = array<i64: 2>, scalar_prefetch = 0 : i64, scratch_operands = 0 : i64, tpu.core_type = #tpu.core_type<tc>, window_params = [{transform_indices = @transform_0, window_bounds = array<i64: 256, 256>}, {pipeline_mode = #tpu.pipeline_mode<synchronous>, transform_indices = @transform_1, window_bounds = array<i64: 1, 256>}, {pipeline_mode = #tpu.pipeline_mode<synchronous>, transform_indices = @transform_2, window_bounds = array<i64: 1, 256>}, {pipeline_mode = #tpu.pipeline_mode<synchronous>, transform_indices = @transform_3, window_bounds = array<i64: 1, 256>}, {pipeline_mode = #tpu.pipeline_mode<synchronous>, transform_indices = @transform_4, window_bounds = array<i64: 1, 256>}, {transform_indices = @transform_5, window_bounds = array<i64: 256, 256>}]} {
    %c0 = arith.constant 0 : index
    %c0_0 = arith.constant 0 : index
    %0 = vector.load %arg2[%c0, %c0_0] : memref<1x256xf32, #tpu.memory_space<vmem>>, vector<1x256xf32>
    %c0_1 = arith.constant 0 : index
    %c0_2 = arith.constant 0 : index
    %1 = vector.load %arg3[%c0_1, %c0_2] : memref<1x256xf32, #tpu.memory_space<vmem>>, vector<1x256xf32>
    %c0_3 = arith.constant 0 : index
    %c0_4 = arith.constant 0 : index
    %2 = vector.load %arg4[%c0_3, %c0_4] : memref<1x256xf32, #tpu.memory_space<vmem>>, vector<1x256xf32>
    %c0_5 = arith.constant 0 : index
    %c0_6 = arith.constant 0 : index
    %3 = vector.load %arg5[%c0_5, %c0_6] : memref<1x256xf32, #tpu.memory_space<vmem>>, vector<1x256xf32>
    %cst = arith.constant 5.120000e+02 : f32
    %4 = vector.broadcast %cst : f32 to vector<1x256xf32>
    %5 = arith.divf %0, %4 : vector<1x256xf32>
    %cst_7 = arith.constant 5.120000e+02 : f32
    %6 = vector.broadcast %cst_7 : f32 to vector<1x256xf32>
    %7 = arith.divf %1, %6 : vector<1x256xf32>
    %8 = arith.mulf %5, %5 : vector<1x256xf32>
    %9 = arith.subf %7, %8 : vector<1x256xf32>
    %cst_8 = arith.constant 9.99999974E-6 : f32
    %10 = vector.broadcast %cst_8 : f32 to vector<1x256xf32>
    %11 = arith.addf %9, %10 : vector<1x256xf32>
    %12 = math.rsqrt %11 : vector<1x256xf32>
    %13 = arith.mulf %2, %12 : vector<1x256xf32>
    %14 = arith.mulf %5, %13 : vector<1x256xf32>
    %15 = arith.subf %3, %14 : vector<1x256xf32>
    %c0_9 = arith.constant 0 : index
    %c0_10 = arith.constant 0 : index
    %16 = vector.load %arg1[%c0_9, %c0_10] : memref<256x256xf32, #tpu.memory_space<vmem>>, vector<256x256xf32>
    %17 = vector.broadcast %13 : vector<1x256xf32> to vector<256x256xf32>
    %18 = arith.mulf %16, %17 : vector<256x256xf32>
    %19 = vector.broadcast %15 : vector<1x256xf32> to vector<256x256xf32>
    %20 = arith.addf %18, %19 : vector<256x256xf32>
    %cst_11 = arith.constant 0.000000e+00 : f32
    %21 = vector.broadcast %cst_11 : f32 to vector<256x256xf32>
    %22 = arith.maximumf %20, %21 : vector<256x256xf32>
    %c0_12 = arith.constant 0 : index
    %c0_13 = arith.constant 0 : index
    %23 = vector.load %arg6[%c0_12, %c0_13] : memref<256x256xf32, #tpu.memory_space<vmem>>, vector<256x256xf32>
    tpu.vector_store %arg6[%c0_12, %c0_13], %22 {strides = array<i32>} : memref<256x256xf32, #tpu.memory_space<vmem>>, vector<256x256xf32>,
    return
  }
  func.func @transform_0(%arg0: i32) -> (i32, i32) {
    %c0_i32 = arith.constant 0 : i32
    %c0_i32_0 = arith.constant 0 : i32
    return %arg0, %c0_i32 : i32, i32
  }
  func.func @transform_1(%arg0: i32) -> (i32, i32) {
    %c0_i32 = arith.constant 0 : i32
    %c0_i32_0 = arith.constant 0 : i32
    %c0_i32_1 = arith.constant 0 : i32
    return %c0_i32, %c0_i32_0 : i32, i32
  }
  func.func @transform_2(%arg0: i32) -> (i32, i32) {
    %c0_i32 = arith.constant 0 : i32
    %c0_i32_0 = arith.constant 0 : i32
    %c0_i32_1 = arith.constant 0 : i32
    return %c0_i32, %c0_i32_0 : i32, i32
  }
  func.func @transform_3(%arg0: i32) -> (i32, i32) {
    %c0_i32 = arith.constant 0 : i32
    %c0_i32_0 = arith.constant 0 : i32
    %c0_i32_1 = arith.constant 0 : i32
    return %c0_i32, %c0_i32_0 : i32, i32
  }
  func.func @transform_4(%arg0: i32) -> (i32, i32) {
    %c0_i32 = arith.constant 0 : i32
    %c0_i32_0 = arith.constant 0 : i32
    %c0_i32_1 = arith.constant 0 : i32
    return %c0_i32, %c0_i32_0 : i32, i32
  }
  func.func @transform_5(%arg0: i32) -> (i32, i32) {
    %c0_i32 = arith.constant 0 : i32
    %c0_i32_0 = arith.constant 0 : i32
    return %arg0, %c0_i32 : i32, i32
  }
}

</mosaic_0001>

<bundles_post_ra>
// kernel: csp_bottleneck_mca.5
= control target key start
LH: loop header
LB: loop body
LE: loop exit
PB: predicated region body
PF: predicated region fallthrough
CT: control target
= control target key end

     0   :  { %11 = vsyncpa [#allocation3], 0  ;;  %s2113_s0 = inlined_call_operand.hbm [shape: f32[512,256], index: 0, kind: input, shape index: {}]   ;;  %s2114_s1 = inlined_call_operand.hbm [shape: f32[256,256], index: 1, kind: input, shape index: {}]   ;;  %s2115_s2 = inlined_call_operand.vmem [shape: f32[512,128], index: 2, kind: output, shape index: {0}]   ;;  %s2116_s3 = inlined_call_operand.vmem [shape: f32[512,128], index: 3, kind: output, shape index: {1}]   ;;  %s2117_s4 = inlined_call_operand.vmem [shape: f32[1,256], index: 4, kind: output, shape index: {2}]   ;;  %s2118_s5 = inlined_call_operand.vmem [shape: f32[1,256], index: 5, kind: output, shape index: {3}]  }
   0x1   :  { %13 = vsyncpa [#allocation3 + $0x1], 0 }
   0x2   :  { %14 = vsyncpa [#allocation5], 0  ;;  %s1416_s18 = smov 0   ;;  %s1418_s19 = smov 0  }
   0x3   :  { %s1420_s20 = smov 0   ;;  %s1422_s21 = smov 0  }
   0x4 LB: > { %s1435_s22 = sadd.s32 4294967295, %s1378_s21   ;;  %p40_p0 = scmp.ne.s32.totalorder %s1370_s19, %s1366_s18  ;;  %s1378_s21 = sphi %s1422_s21, %s2185_s21   ;;  %s1374_s20 = sphi %s1420_s20, %s2184_s20   ;;  %s1370_s19 = sphi %s1418_s19, %s2183_s19   ;;  %s1366_s18 = sphi %s1416_s18, %s2182_s18  }
   0x5   : > { %p2119_p1 = scmp.eq.s32.totalorder %s1435_s22, 0  ;;  %p1113_p2 = scmp.ge.s32.totalorder %s1378_s21, 1 }
   0x6   : > { %p166_p3 = scmp.lt.s32.totalorder %s1378_s21, 3  ;;  %s1380_s25 = smov [#allocation4]  }
   0x7   : > { %p1444_p5 = por %p2119_p1, %p40_p0  ;;  %s178_s26 = sshll.u32 %s1380_s25, 4  ;;  %s179_s26 = int_to_ptr.vmem [resolvable:$true] %s178_s26 }
   0x8   : > { %p1448_p6 = pnand %p1113_p2, %p166_p3  ;;  %s1461_s28 = sadd.s32 1, %s1378_s21  }
   0x9   : > { %s2146_s23 = scalar_select %p1444_p5, 1, 0 }
   0xa   : > { %s2147_s24 = scalar_select %p1448_p6, 1, 0 }
   0xb   : > { %p1234_p7 = pneg %p1448_p6  ;;  %s27_s29 = sadd.s32 1, %s1374_s20 }
   0xc   : > { %s24_s30 = ssub.s32 %s1378_s21, %s1461_s28  ;;  %s1282_s8 = scalar_lea.hbm %s2114_s1, 8192 }
   0xd   : > { %p1456_p8 = pnand %p1234_p7, %p2119_p1  ;;  %p1283_p9 = scmp.ne.s32.totalorder %s2114_s1, %s1282_s8 }
   0xe   : > { %p1289_p13 = scmp.lt.u32.totalorder %s1282_s8, %s2114_s1 }
   0xf   : > { %p1284_p10 = pneg %p1456_p8 }
  0x11   : > { %p1285_p11 = pnand %p1284_p10, %p1283_p9 }
  0x13   : > { %p1286_p12 = pneg %p1285_p11 }
  0x15   : > { %p1291_p0 = pnand %p1289_p13, %p1286_p12 }
  0x17   : > { %1294 = shalt.err (!%p1291_p0)
}
  0x18   : > { %s1295_s13 = scalar_lea.vmem %s179_s26, 8192  ;;  %p1303_p4 = scmp.lt.s32.totalorder %s179_s26, %s179_s26 }
  0x19   : > { %p1296_p2 = scmp.ne.s32.totalorder %s179_s26, %s1295_s13  ;;  %p1304_p1 = scmp.lt.s32.totalorder %s1295_s13, %s1295_s13 }
  0x1b   : > { %p1298_p3 = pnand %p1296_p2, %p1284_p10  ;;  %p1305_p5 = por %p1304_p1, %p1303_p4 }
  0x1d   : > { %p1299_p7 = pneg %p1298_p3 }
  0x1f   : > { %p1306_p6 = pnand %p1305_p5, %p1299_p7 }
  0x21   : > { %1309 = shalt.err (!%p1306_p6)
}
  0x22   : > { %s1381_s14 = smov 256   ;;  %s1382_s15 = smov 16  }
  0x23   : > { %1237 = dma.hbm_to_vmem [thread:$0]  (!%p1456_p8), %s2114_s1, 8192, %s179_s26, [#allocation5], %s1381_s14, %s1381_s14, %s1382_s15  }
  0x24   : > { %p25_p1 = scmp.eq.s32.totalorder %s24_s30, 0  ;;  %p34_p4 = scmp.ne.s32.totalorder %s1374_s20, %s1370_s19 }
  0x25   : > { %p35_p5 = scmp.eq.s32.totalorder %s1378_s21, 0  ;;  %p1243_p6 = scmp.lt.s32.totalorder %s1378_s21, 2 }
  0x26   : > { %s1490_s18 = scalar_select %p25_p1, %s1374_s20, %s27_s29  }
  0x27   : > { %p36_p9 = por %p35_p5, %p34_p4  ;;  %s192_s25 = sand.u32 1, %s1374_s20  }
  0x28   : > { %s1116_s6 = sshll.u32 %s192_s25, 9  ;;  %s1131_s7 = sshll.u32 %s1378_s21, 13 }
  0x29   : > { %s1497_s27 = scalar_lea.hbm %s2113_s0, %s1131_s7  ;;  %s196_s26 = scalar_lea.vmem [#allocation2], %s1116_s6 }
  0x2a   : > { %s204_s30 = sshll.u32 %s196_s26, 4  ;;  %p1501_p8 = pnand %p1243_p6, %p36_p9  ;;  %s1499_s30 = int_to_ptr.vmem [resolvable:$true] %s204_s30 }
  0x2b   : > { %s1505_s21 = scalar_lea.sflag [#allocation3], %s192_s25  ;;  %s1310_s10 = scalar_lea.hbm %s1497_s27, 8192 }
  0x2c   : > { %p1311_p10 = scmp.ne.s32.totalorder %s1497_s27, %s1310_s10  ;;  %p1312_p11 = pneg %p1501_p8 }
  0x2d   : > { %s1315_s13 = scalar_lea.hbm %s2113_s0, 16384  ;;  %p1316_p0 = scmp.lt.u32.totalorder %s1497_s27, %s2113_s0 }
  0x2e   : > { %p1313_p12 = pnand %p1312_p11, %p1311_p10  ;;  %p1317_p2 = scmp.lt.u32.totalorder %s1315_s13, %s1310_s10 }
  0x2f   : > { %p1319_p7 = scmp.lt.u32.totalorder %s1310_s10, %s1497_s27 }
  0x30   : > { %p1314_p13 = pneg %p1313_p12  ;;  %p1318_p3 = por %p1317_p2, %p1316_p0 }
  0x32   : > { %p1320_p1 = por %p1319_p7, %p1318_p3 }
  0x34   : > { %p1321_p4 = pnand %p1320_p1, %p1314_p13 }
  0x36   : > { %1324 = shalt.err (!%p1321_p4)
}
  0x37   : > { %s1325_s25 = scalar_lea.vmem %s1499_s30, 8192  ;;  %s1383_s6 = smov [#allocation2]  }
  0x38   : > { %p1326_p5 = scmp.ne.s32.totalorder %s1499_s30, %s1325_s25  ;;  %s1330_s7 = sshll.u32 %s1383_s6, 4  ;;  %s1331_s7 = int_to_ptr.vmem [resolvable:$false] %s1330_s7 }
  0x39   : > { %s1332_s8 = scalar_lea.vmem %s1331_s7, 16384  ;;  %p1333_p10 = scmp.lt.s32.totalorder %s1499_s30, %s1331_s7 }
  0x3a   : > { %p1328_p6 = pnand %p1326_p5, %p1312_p11  ;;  %p1334_p12 = scmp.lt.s32.totalorder %s1332_s8, %s1325_s25 }
  0x3c   : > { %p1329_p9 = pneg %p1328_p6  ;;  %p1335_p0 = por %p1334_p12, %p1333_p10 }
  0x3e   : > { %p1336_p2 = pnand %p1335_p0, %p1329_p9 }
  0x40   : > { %1339 = shalt.err (!%p1336_p2)
}
  0x41   : > { %1241 = dma.hbm_to_vmem [thread:$0]  (!%p1501_p8), %s1497_s27, 8192, %s1499_s30, %s1505_s21, %s1381_s14, %s1381_s14, %s1382_s15  }
  0x42   : > { %p2150_p11 = scmp.ne.s32.totalorder %s2147_s24, 0 }
  0x44   : > { %216 = sbr.rel (%p2150_p11) target bundleno = 528 (0x210), region = 28 }
  0x4b   : > { %s218_s9 = sand.u32 1, %s1370_s19   ;;  %p2151_p13 = scmp.ne.s32.totalorder %s2146_s23, 0 }
  0x4c   : > { %s1121_s26 = sshll.u32 %s218_s9, 9  ;;  %s219_s10 = scalar_lea.sflag [#allocation3], %s218_s9 }
  0x4d   : > { %s1539_s11 = scalar_lea.vmem [#allocation2], %s1121_s26 }
  0x4e   : > { %1357 = dma.done.wait (%p2151_p13), %s219_s10, 8192  }
  0x4f   : > { %1359 = vsyncadd (%p2151_p13), %s219_s10, 4294959104  ;;  %p2152_p3 = scmp.eq.s32.totalorder %s1435_s22, 0 }
  0x51   : > { %1361 = dma.done.wait (%p2152_p3), [#allocation5], 8192   ;;  %p2153_p8 = pmov %p2152_p3 }
  0x52   : > { %v336_v0 = vld [vmem:[#allocation4 + $0x8] sm:$0xff]  ;;  %v338_v1 = vld [vmem:[#allocation4 + $0x18] sm:$0xff]  ;;  %v335_v2 = vld [vmem:[#allocation4] sm:$0xff]  ;;  %s1123_s23 = sshll.u32 %s1435_s22, 5  ;;  %p2166_p1 = scmp.ne.s32.totalorder %s1435_s22, 0 }
  0x53   : > { %1363 = vsyncadd (%p2153_p8), [#allocation5], 4294959104  ;;  %v1132_v3 = vpack.c.bf16 %v338_v1, %v336_v0  ;;  %v337_v4 = vld [vmem:[#allocation4 + $0x10] sm:$0xff]  ;;  %v340_v5 = vld [vmem:[#allocation4 + $0x28] sm:$0xff]  ;;  %p260_p7 = scmp.lt.s32.totalorder %s1123_s23, 63 }
  0x54   : > { %v342_v6 = vld [vmem:[#allocation4 + $0x38] sm:$0xff]  ;;  %v1134_v7 = vpack.c.bf16 %v337_v4, %v335_v2  ;;  %v339_v9 = vld [vmem:[#allocation4 + $0x20] sm:$0xff]  ;;  %v341_v10 = vld [vmem:[#allocation4 + $0x30] sm:$0xff] }
  0x55   : > { %v1136_v8 = vpack.c.bf16 %v342_v6, %v340_v5  ;;  %v344_v11 = vld [vmem:[#allocation4 + $0x48] sm:$0xff]  ;;  %1133 = vmatprep.subr.bf16.mxu0 %v1132_v3  ;;  %1196 = vmatprep.subr.bf16.mxu1 %v1132_v3  ;;  %v346_v12 = vld [vmem:[#allocation4 + $0x58] sm:$0xff]  ;;  %v1138_v13 = vpack.c.bf16 %v341_v10, %v339_v9  ;;  %v343_v15 = vld [vmem:[#allocation4 + $0x40] sm:$0xff]  ;;  %s2187_s23 = smov (!%p260_p7, %s1123_s23), 63 }
  0x56   : > { %1135 = vmatpush1.bf16.msra.mxu0 %v1134_v7  ;;  %1212 = vmatpush1.bf16.msra.mxu1 %v1134_v7  ;;  %v1140_v14 = vpack.c.bf16 %v346_v12, %v344_v11  ;;  %v345_v16 = vld [vmem:[#allocation4 + $0x50] sm:$0xff]  ;;  %v348_v17 = vld [vmem:[#allocation4 + $0x68] sm:$0xff]  ;;  %v350_v18 = vld [vmem:[#allocation4 + $0x78] sm:$0xff]  ;;  %s1124_s24 = sshll.u32 %s2187_s23, 3 }
  0x57   : > { %1137 = vmatprep.subr.bf16.mxu0 %v1136_v8  ;;  %1197 = vmatprep.subr.bf16.mxu1 %v1136_v8  ;;  %v1142_v19 = vpack.c.bf16 %v345_v16, %v343_v15  ;;  %v1144_v20 = vpack.c.bf16 %v350_v18, %v348_v17  ;;  %v347_v21 = vld [vmem:[#allocation4 + $0x60] sm:$0xff]  ;;  %v349_v22 = vld [vmem:[#allocation4 + $0x70] sm:$0xff]  ;;  %v352_v23 = vld [vmem:[#allocation4 + $0x88] sm:$0xff]  ;;  %s1617_s27 = scalar_lea.vmem %s2115_s2, %s1124_s24  ;;  %s1622_s21 = scalar_lea.vmem %s2116_s3, %s1124_s24 }
  0x58   : > { %v354_v24 = vld [vmem:[#allocation4 + $0x98] sm:$0xff]  ;;  %v1146_v25 = vpack.c.bf16 %v349_v22, %v347_v21  ;;  %v351_v27 = vld [vmem:[#allocation4 + $0x80] sm:$0xff]  ;;  %v353_v28 = vld [vmem:[#allocation4 + $0x90] sm:$0xff] }
  0x59   : > { %v1148_v26 = vpack.c.bf16 %v354_v24, %v352_v23  ;;  %v356_v29 = vld [vmem:[#allocation4 + $0xa8] sm:$0xff]  ;;  %v358_v30 = vld [vmem:[#allocation4 + $0xb8] sm:$0xff]  ;;  %v1150_v31 = vpack.c.bf16 %v353_v28, %v351_v27  ;;  %v355_v33 = vld [vmem:[#allocation4 + $0xa0] sm:$0xff] }
  0x5a   : > { %1139 = vmatpush1.bf16.msra.mxu0 %v1138_v13  ;;  %1213 = vmatpush1.bf16.msra.mxu1 %v1138_v13  ;;  %v1152_v32 = vpack.c.bf16 %v358_v30, %v356_v29  ;;  %v357_v34 = vld [vmem:[#allocation4 + $0xb0] sm:$0xff]  ;;  %v360_v35 = vld [vmem:[#allocation4 + $0xc8] sm:$0xff]  ;;  %v362_v36 = vld [vmem:[#allocation4 + $0xd8] sm:$0xff] }
  0x5b   : > { %1141 = vmatprep.subr.bf16.mxu0 %v1140_v14  ;;  %1198 = vmatprep.subr.bf16.mxu1 %v1140_v14  ;;  %v1154_v37 = vpack.c.bf16 %v357_v34, %v355_v33  ;;  %v359_v38 = vld [vmem:[#allocation4 + $0xc0] sm:$0xff]  ;;  %v1156_v39 = vpack.c.bf16 %v362_v36, %v360_v35  ;;  %v361_v40 = vld [vmem:[#allocation4 + $0xd0] sm:$0xff]  ;;  %v272_v41 = vld [vmem:[%s1539_s11 + $0x8] sm:$0xff] }
  0x5c   : > { %v304_v42 = vld [vmem:[%s1539_s11 + $0x108] sm:$0xff]  ;;  %v366_v44 = vld [vmem:[#allocation4 + $0xf8] sm:$0xff]  ;;  %463 = vmatprep.mubr.f32.mxu0 %v272_v41  ;;  %v1158_v45 = vpack.c.bf16 %v361_v40, %v359_v38  ;;  %v363_v47 = vld [vmem:[#allocation4 + $0xe0] sm:$0xff] }
  0x5d   : > { %v364_v43 = vld [vmem:[#allocation4 + $0xe8] sm:$0xff]  ;;  %559 = vmatprep.mubr.f32.mxu1 %v304_v42  ;;  %v365_v48 = vld [vmem:[#allocation4 + $0xf0] sm:$0xff]  ;;  %v370_v50 = vld [vmem:[#allocation4 + $0x118] sm:$0xff] }
  0x5e   : > { %1143 = vmatpush1.bf16.msra.mxu0 %v1142_v19  ;;  %1214 = vmatpush1.bf16.msra.mxu1 %v1142_v19  ;;  %v1160_v46 = vpack.c.bf16 %v366_v44, %v364_v43  ;;  %v368_v49 = vld [vmem:[#allocation4 + $0x108] sm:$0xff]  ;;  %v1162_v51 = vpack.c.bf16 %v365_v48, %v363_v47  ;;  %v367_v53 = vld [vmem:[#allocation4 + $0x100] sm:$0xff]  ;;  %v369_v54 = vld [vmem:[#allocation4 + $0x110] sm:$0xff] }
  0x5f   : > { %1145 = vmatprep.subr.bf16.mxu0 %v1144_v20  ;;  %1199 = vmatprep.subr.bf16.mxu1 %v1144_v20  ;;  %v1164_v52 = vpack.c.bf16 %v370_v50, %v368_v49  ;;  %v372_v55 = vld [vmem:[#allocation4 + $0x128] sm:$0xff]  ;;  %v374_v56 = vld [vmem:[#allocation4 + $0x138] sm:$0xff]  ;;  %v1166_v57 = vpack.c.bf16 %v369_v54, %v367_v53  ;;  %v371_v59 = vld [vmem:[#allocation4 + $0x120] sm:$0xff] }
  0x60   : > { %v1168_v58 = vpack.c.bf16 %v374_v56, %v372_v55  ;;  %v373_v60 = vld [vmem:[#allocation4 + $0x130] sm:$0xff]  ;;  %v376_v61 = vld [vmem:[#allocation4 + $0x148] sm:$0xff]  ;;  %v378_v62 = vld [vmem:[#allocation4 + $0x158] sm:$0xff] }
  0x61   : > { %v1170_v63 = vpack.c.bf16 %v373_v60, %v371_v59  ;;  %v1172_v0 = vpack.c.bf16 %v378_v62, %v376_v61  ;;  %v375_v1 = vld [vmem:[#allocation4 + $0x140] sm:$0xff]  ;;  %v377_v2 = vld [vmem:[#allocation4 + $0x150] sm:$0xff]  ;;  %v380_v3 = vld [vmem:[#allocation4 + $0x168] sm:$0xff] }
  0x62   : > { %1147 = vmatpush1.bf16.msra.mxu0 %v1146_v25  ;;  %1215 = vmatpush1.bf16.msra.mxu1 %v1146_v25  ;;  %v382_v4 = vld [vmem:[#allocation4 + $0x178] sm:$0xff]  ;;  %v1174_v5 = vpack.c.bf16 %v377_v2, %v375_v1  ;;  %v379_v7 = vld [vmem:[#allocation4 + $0x160] sm:$0xff]  ;;  %v381_v8 = vld [vmem:[#allocation4 + $0x170] sm:$0xff] }
  0x63   : > { %1149 = vmatprep.subr.bf16.mxu0 %v1148_v26  ;;  %1200 = vmatprep.subr.bf16.mxu1 %v1148_v26  ;;  %v1176_v6 = vpack.c.bf16 %v382_v4, %v380_v3  ;;  %v384_v9 = vld [vmem:[#allocation4 + $0x188] sm:$0xff]  ;;  %v386_v10 = vld [vmem:[#allocation4 + $0x198] sm:$0xff]  ;;  %v1178_v11 = vpack.c.bf16 %v381_v8, %v379_v7  ;;  %v383_v13 = vld [vmem:[#allocation4 + $0x180] sm:$0xff] }
  0x64   : > { %v1180_v12 = vpack.c.bf16 %v386_v10, %v384_v9  ;;  %v385_v14 = vld [vmem:[#allocation4 + $0x190] sm:$0xff]  ;;  %v388_v15 = vld [vmem:[#allocation4 + $0x1a8] sm:$0xff]  ;;  %v390_v16 = vld [vmem:[#allocation4 + $0x1b8] sm:$0xff] }
  0x65   : > { %v1182_v17 = vpack.c.bf16 %v385_v14, %v383_v13  ;;  %v1184_v18 = vpack.c.bf16 %v390_v16, %v388_v15  ;;  %v387_v19 = vld [vmem:[#allocation4 + $0x1a0] sm:$0xff]  ;;  %v389_v20 = vld [vmem:[#allocation4 + $0x1b0] sm:$0xff]  ;;  %v392_v21 = vld [vmem:[#allocation4 + $0x1c8] sm:$0xff] }
  0x66   : > { %1151 = vmatpush1.bf16.msra.mxu0 %v1150_v31  ;;  %1216 = vmatpush1.bf16.msra.mxu1 %v1150_v31  ;;  %v394_v22 = vld [vmem:[#allocation4 + $0x1d8] sm:$0xff]  ;;  %v1186_v23 = vpack.c.bf16 %v389_v20, %v387_v19  ;;  %v391_v25 = vld [vmem:[#allocation4 + $0x1c0] sm:$0xff]  ;;  %v393_v26 = vld [vmem:[#allocation4 + $0x1d0] sm:$0xff] }
  0x67   : > { %1153 = vmatprep.subr.bf16.mxu0 %v1152_v32  ;;  %1201 = vmatprep.subr.bf16.mxu1 %v1152_v32  ;;  %v1188_v24 = vpack.c.bf16 %v394_v22, %v392_v21  ;;  %v396_v27 = vld [vmem:[#allocation4 + $0x1e8] sm:$0xff]  ;;  %v398_v28 = vld [vmem:[#allocation4 + $0x1f8] sm:$0xff]  ;;  %v1190_v29 = vpack.c.bf16 %v393_v26, %v391_v25  ;;  %v395_v31 = vld [vmem:[#allocation4 + $0x1e0] sm:$0xff] }
  0x68   : > { %v1192_v30 = vpack.c.bf16 %v398_v28, %v396_v27  ;;  %v397_v32 = vld [vmem:[#allocation4 + $0x1f0] sm:$0xff]  ;;  %v271_v34 = vld [vmem:[%s1539_s11] sm:$0xff]  ;;  %v274_v36 = vld [vmem:[%s1539_s11 + $0x18] sm:$0xff] }
  0x69   : > { %v1194_v33 = vpack.c.bf16 %v397_v32, %v395_v31  ;;  %v303_v35 = vld [vmem:[%s1539_s11 + $0x100] sm:$0xff]  ;;  %v273_v38 = vld [vmem:[%s1539_s11 + $0x10] sm:$0xff]  ;;  %v276_v40 = vld [vmem:[%s1539_s11 + $0x28] sm:$0xff] }
  0x6a   : > { %1155 = vmatpush1.bf16.msra.mxu0 %v1154_v37  ;;  %1217 = vmatpush1.bf16.msra.mxu1 %v1154_v37  ;;  %v306_v37 = vld [vmem:[%s1539_s11 + $0x118] sm:$0xff]  ;;  %v308_v41 = vld [vmem:[%s1539_s11 + $0x128] sm:$0xff]  ;;  %v275_v42 = vld [vmem:[%s1539_s11 + $0x20] sm:$0xff] }
  0x6b   : > { %1157 = vmatprep.subr.bf16.mxu0 %v1156_v39  ;;  %1202 = vmatprep.subr.bf16.mxu1 %v1156_v39  ;;  %v305_v39 = vld [vmem:[%s1539_s11 + $0x110] sm:$0xff]  ;;  %v307_v43 = vld [vmem:[%s1539_s11 + $0x120] sm:$0xff]  ;;  %v278_v44 = vld [vmem:[%s1539_s11 + $0x38] sm:$0xff] }
  0x6c   : > { %v309_v47 = vld [vmem:[%s1539_s11 + $0x130] sm:$0xff]  ;;  %v280_v48 = vld [vmem:[%s1539_s11 + $0x48] sm:$0xff]  ;;  %v279_v50 = vld [vmem:[%s1539_s11 + $0x40] sm:$0xff] }
  0x6d   : > { %v312_v49 = vld [vmem:[%s1539_s11 + $0x148] sm:$0xff]  ;;  %v314_v53 = vld [vmem:[%s1539_s11 + $0x158] sm:$0xff]  ;;  %v281_v54 = vld [vmem:[%s1539_s11 + $0x50] sm:$0xff] }
  0x6e   : > { %1159 = vmatpush1.bf16.msra.mxu0 %v1158_v45  ;;  %1218 = vmatpush1.bf16.msra.mxu1 %v1158_v45  ;;  %v310_v45 = vld [vmem:[%s1539_s11 + $0x138] sm:$0xff]  ;;  %v313_v55 = vld [vmem:[%s1539_s11 + $0x150] sm:$0xff]  ;;  %v284_v56 = vld [vmem:[%s1539_s11 + $0x68] sm:$0xff] }
  0x6f   : > { %1161 = vmatprep.subr.bf16.mxu0 %v1160_v46  ;;  %1203 = vmatprep.subr.bf16.mxu1 %v1160_v46  ;;  %v277_v46 = vld [vmem:[%s1539_s11 + $0x30] sm:$0xff]  ;;  %v315_v59 = vld [vmem:[%s1539_s11 + $0x160] sm:$0xff]  ;;  %v286_v60 = vld [vmem:[%s1539_s11 + $0x78] sm:$0xff] }
  0x70   : > { %v318_v61 = vld [vmem:[%s1539_s11 + $0x178] sm:$0xff]  ;;  %v285_v62 = vld [vmem:[%s1539_s11 + $0x70] sm:$0xff]  ;;  %v320_v1 = vld [vmem:[%s1539_s11 + $0x188] sm:$0xff] }
  0x71   : > { %v287_v2 = vld [vmem:[%s1539_s11 + $0x80] sm:$0xff]  ;;  %v290_v4 = vld [vmem:[%s1539_s11 + $0x98] sm:$0xff]  ;;  %v321_v7 = vld [vmem:[%s1539_s11 + $0x190] sm:$0xff] }
  0x72   : > { %1163 = vmatpush1.bf16.msra.mxu0 %v1162_v51  ;;  %1219 = vmatpush1.bf16.msra.mxu1 %v1162_v51  ;;  %v311_v51 = vld [vmem:[%s1539_s11 + $0x140] sm:$0xff]  ;;  %v292_v8 = vld [vmem:[%s1539_s11 + $0xa8] sm:$0xff]  ;;  %v326_v13 = vld [vmem:[%s1539_s11 + $0x1b8] sm:$0xff] }
  0x73   : > { %1165 = vmatprep.subr.bf16.mxu0 %v1164_v52  ;;  %1204 = vmatprep.subr.bf16.mxu1 %v1164_v52  ;;  %v282_v52 = vld [vmem:[%s1539_s11 + $0x58] sm:$0xff]  ;;  %v319_v3 = vld [vmem:[%s1539_s11 + $0x180] sm:$0xff]  ;;  %v324_v9 = vld [vmem:[%s1539_s11 + $0x1a8] sm:$0xff] }
  0x74   : > { %v291_v10 = vld [vmem:[%s1539_s11 + $0xa0] sm:$0xff]  ;;  %v293_v14 = vld [vmem:[%s1539_s11 + $0xb0] sm:$0xff]  ;;  %v296_v16 = vld [vmem:[%s1539_s11 + $0xc8] sm:$0xff] }
  0x75   : > { %v325_v15 = vld [vmem:[%s1539_s11 + $0x1b0] sm:$0xff]  ;;  %v327_v19 = vld [vmem:[%s1539_s11 + $0x1c0] sm:$0xff]  ;;  %v298_v20 = vld [vmem:[%s1539_s11 + $0xd8] sm:$0xff] }
  0x76   : > { %1167 = vmatpush1.bf16.msra.mxu0 %v1166_v57  ;;  %1220 = vmatpush1.bf16.msra.mxu1 %v1166_v57  ;;  %v316_v57 = vld [vmem:[%s1539_s11 + $0x168] sm:$0xff]  ;;  %v330_v21 = vld [vmem:[%s1539_s11 + $0x1d8] sm:$0xff]  ;;  %v297_v22 = vld [vmem:[%s1539_s11 + $0xd0] sm:$0xff] }
  0x77   : > { %1169 = vmatprep.subr.bf16.mxu0 %v1168_v58  ;;  %1205 = vmatprep.subr.bf16.mxu1 %v1168_v58  ;;  %v283_v58 = vld [vmem:[%s1539_s11 + $0x60] sm:$0xff]  ;;  %v332_v25 = vld [vmem:[%s1539_s11 + $0x1e8] sm:$0xff]  ;;  %v302_v28 = vld [vmem:[%s1539_s11 + $0xf8] sm:$0xff] }
  0x78   : > { %v299_v26 = vld [vmem:[%s1539_s11 + $0xe0] sm:$0xff]  ;;  %v333_v31 = vld [vmem:[%s1539_s11 + $0x1f0] sm:$0xff] }
  0x79   : > { %v331_v27 = vld [vmem:[%s1539_s11 + $0x1e0] sm:$0xff] }
  0x7a   : > { %1171 = vmatpush1.bf16.msra.mxu0 %v1170_v63  ;;  %1221 = vmatpush1.bf16.msra.mxu1 %v1170_v63  ;;  %v317_v63 = vld [vmem:[%s1539_s11 + $0x170] sm:$0xff] }
  0x7b   : > { %1173 = vmatprep.subr.bf16.mxu0 %v1172_v0  ;;  %1206 = vmatprep.subr.bf16.mxu1 %v1172_v0  ;;  %v288_v0 = vld [vmem:[%s1539_s11 + $0x88] sm:$0xff] }
  0x7e   : > { %1175 = vmatpush1.bf16.msra.mxu0 %v1174_v5  ;;  %1222 = vmatpush1.bf16.msra.mxu1 %v1174_v5  ;;  %v322_v5 = vld [vmem:[%s1539_s11 + $0x198] sm:$0xff] }
  0x7f   : > { %1177 = vmatprep.subr.bf16.mxu0 %v1176_v6  ;;  %1207 = vmatprep.subr.bf16.mxu1 %v1176_v6  ;;  %v289_v6 = vld [vmem:[%s1539_s11 + $0x90] sm:$0xff] }
  0x82   : > { %1179 = vmatpush1.bf16.msra.mxu0 %v1178_v11  ;;  %1223 = vmatpush1.bf16.msra.mxu1 %v1178_v11  ;;  %v323_v11 = vld [vmem:[%s1539_s11 + $0x1a0] sm:$0xff] }
  0x83   : > { %1181 = vmatprep.subr.bf16.mxu0 %v1180_v12  ;;  %1208 = vmatprep.subr.bf16.mxu1 %v1180_v12  ;;  %v294_v12 = vld [vmem:[%s1539_s11 + $0xb8] sm:$0xff] }
  0x86   : > { %1183 = vmatpush1.bf16.msra.mxu0 %v1182_v17  ;;  %1224 = vmatpush1.bf16.msra.mxu1 %v1182_v17  ;;  %v328_v17 = vld [vmem:[%s1539_s11 + $0x1c8] sm:$0xff] }
  0x87   : > { %1185 = vmatprep.subr.bf16.mxu0 %v1184_v18  ;;  %1209 = vmatprep.subr.bf16.mxu1 %v1184_v18  ;;  %v295_v18 = vld [vmem:[%s1539_s11 + $0xc0] sm:$0xff] }
  0x8a   : > { %1187 = vmatpush1.bf16.msra.mxu0 %v1186_v23  ;;  %1225 = vmatpush1.bf16.msra.mxu1 %v1186_v23  ;;  %v329_v23 = vld [vmem:[%s1539_s11 + $0x1d0] sm:$0xff] }
  0x8b   : > { %1189 = vmatprep.subr.bf16.mxu0 %v1188_v24  ;;  %1210 = vmatprep.subr.bf16.mxu1 %v1188_v24  ;;  %v300_v24 = vld [vmem:[%s1539_s11 + $0xe8] sm:$0xff] }
  0x8e   : > { %1191 = vmatpush1.bf16.msra.mxu0 %v1190_v29  ;;  %1226 = vmatpush1.bf16.msra.mxu1 %v1190_v29  ;;  %v334_v29 = vld [vmem:[%s1539_s11 + $0x1f8] sm:$0xff] }
  0x8f   : > { %1193 = vmatprep.subr.bf16.mxu0 %v1192_v30  ;;  %1211 = vmatprep.subr.bf16.mxu1 %v1192_v30  ;;  %v301_v30 = vld [vmem:[%s1539_s11 + $0xf0] sm:$0xff] }
  0x92   : > { %1195 = vmatpush1.bf16.msra.mxu0 %v1194_v33  ;;  %1227 = vmatpush1.bf16.msra.mxu1 %v1194_v33 }
  0x95   : > { %464 = vmatmul.mubr.f32.vlgmr.msra.gmra.mrb[0].mxu0 %v271_v34  ;;  %560 = vmatmul.mubr.f32.vlgmr.msra.gmra.mrb[0].mxu1 %v303_v35 }
  0x96   : > { %469 = vmatprep.mubr.f32.mxu0 %v274_v36  ;;  %565 = vmatprep.mubr.f32.mxu1 %v306_v37 }
  0x99   : > { %470 = vmatmul.mubr.f32.gmra.mrb[2].mxu0 %v273_v38  ;;  %566 = vmatmul.mubr.f32.gmra.mrb[2].mxu1 %v305_v39 }
  0x9a   : > { %475 = vmatprep.mubr.f32.mxu0 %v276_v40  ;;  %571 = vmatprep.mubr.f32.mxu1 %v308_v41 }
  0x9d   : > { %476 = vmatmul.mubr.f32.gmra.mrb[4].mxu0 %v275_v42  ;;  %572 = vmatmul.mubr.f32.gmra.mrb[4].mxu1 %v307_v43 }
  0x9e   : > { %481 = vmatprep.mubr.f32.mxu0 %v278_v44  ;;  %577 = vmatprep.mubr.f32.mxu1 %v310_v45 }
  0xa1   : > { %482 = vmatmul.mubr.f32.gmra.mrb[6].mxu0 %v277_v46  ;;  %578 = vmatmul.mubr.f32.gmra.mrb[6].mxu1 %v309_v47 }
  0xa2   : > { %487 = vmatprep.mubr.f32.mxu0 %v280_v48  ;;  %583 = vmatprep.mubr.f32.mxu1 %v312_v49 }
  0xa5   : > { %488 = vmatmul.mubr.f32.gmra.mrb[8].mxu0 %v279_v50  ;;  %584 = vmatmul.mubr.f32.gmra.mrb[8].mxu1 %v311_v51 }
  0xa6   : > { %493 = vmatprep.mubr.f32.mxu0 %v282_v52  ;;  %589 = vmatprep.mubr.f32.mxu1 %v314_v53 }
  0xa9   : > { %494 = vmatmul.mubr.f32.gmra.mrb[10].mxu0 %v281_v54  ;;  %590 = vmatmul.mubr.f32.gmra.mrb[10].mxu1 %v313_v55 }
  0xaa   : > { %499 = vmatprep.mubr.f32.mxu0 %v284_v56  ;;  %595 = vmatprep.mubr.f32.mxu1 %v316_v57 }
  0xad   : > { %500 = vmatmul.mubr.f32.gmra.mrb[12].mxu0 %v283_v58  ;;  %596 = vmatmul.mubr.f32.gmra.mrb[12].mxu1 %v315_v59 }
  0xae   : > { %505 = vmatprep.mubr.f32.mxu0 %v286_v60  ;;  %601 = vmatprep.mubr.f32.mxu1 %v318_v61 }
  0xb1   : > { %506 = vmatmul.mubr.f32.gmra.mrb[14].mxu0 %v285_v62  ;;  %602 = vmatmul.mubr.f32.gmra.mrb[14].mxu1 %v317_v63 }
  0xb2   : > { %511 = vmatprep.mubr.f32.mxu0 %v288_v0  ;;  %607 = vmatprep.mubr.f32.mxu1 %v320_v1 }
  0xb5   : > { %512 = vmatmul.mubr.f32.gmra.mrb[16].mxu0 %v287_v2  ;;  %608 = vmatmul.mubr.f32.gmra.mrb[16].mxu1 %v319_v3 }
  0xb6   : > { %517 = vmatprep.mubr.f32.mxu0 %v290_v4  ;;  %613 = vmatprep.mubr.f32.mxu1 %v322_v5 }
  0xb9   : > { %518 = vmatmul.mubr.f32.gmra.mrb[18].mxu0 %v289_v6  ;;  %614 = vmatmul.mubr.f32.gmra.mrb[18].mxu1 %v321_v7 }
  0xba   : > { %523 = vmatprep.mubr.f32.mxu0 %v292_v8  ;;  %619 = vmatprep.mubr.f32.mxu1 %v324_v9 }
  0xbd   : > { %524 = vmatmul.mubr.f32.gmra.mrb[20].mxu0 %v291_v10  ;;  %620 = vmatmul.mubr.f32.gmra.mrb[20].mxu1 %v323_v11 }
  0xbe   : > { %529 = vmatprep.mubr.f32.mxu0 %v294_v12  ;;  %625 = vmatprep.mubr.f32.mxu1 %v326_v13 }
  0xc1   : > { %530 = vmatmul.mubr.f32.gmra.mrb[22].mxu0 %v293_v14  ;;  %626 = vmatmul.mubr.f32.gmra.mrb[22].mxu1 %v325_v15 }
  0xc2   : > { %535 = vmatprep.mubr.f32.mxu0 %v296_v16  ;;  %631 = vmatprep.mubr.f32.mxu1 %v328_v17 }
  0xc5   : > { %536 = vmatmul.mubr.f32.gmra.mrb[24].mxu0 %v295_v18  ;;  %632 = vmatmul.mubr.f32.gmra.mrb[24].mxu1 %v327_v19 }
  0xc6   : > { %541 = vmatprep.mubr.f32.mxu0 %v298_v20  ;;  %637 = vmatprep.mubr.f32.mxu1 %v330_v21 }
  0xc9   : > { %542 = vmatmul.mubr.f32.gmra.mrb[26].mxu0 %v297_v22  ;;  %638 = vmatmul.mubr.f32.gmra.mrb[26].mxu1 %v329_v23 }
  0xca   : > { %547 = vmatprep.mubr.f32.mxu0 %v300_v24  ;;  %643 = vmatprep.mubr.f32.mxu1 %v332_v25 }
  0xcd   : > { %548 = vmatmul.mubr.f32.gmra.mrb[28].mxu0 %v299_v26  ;;  %644 = vmatmul.mubr.f32.gmra.mrb[28].mxu1 %v331_v27 }
  0xce   : > { %553 = vmatprep.mubr.f32.mxu0 %v302_v28  ;;  %649 = vmatprep.mubr.f32.mxu1 %v334_v29 }
  0xd1   : > { %554 = vmatmul.mubr.f32.gmra.mrb[30].mxu0 %v301_v30  ;;  %650 = vmatmul.mubr.f32.gmra.mrb[30].mxu1 %v333_v31 }
 0x168   : > { %v1624_v32 = vpop.f32.mrb[0].mxu0  ;;  %v1626_v33 = vpop.f32.mrb[0].mxu1 }
 0x169   : > { %656 = vst [vmem:[%s1617_s27] sm:$0xff] %v1624_v32  ;;  %672 = vst [vmem:[%s1617_s27 + $0x80] sm:$0xff] %v1626_v33  ;;  %v1632_v34 = vpop.f32.mrb[1].mxu0  ;;  %v1634_v35 = vpop.f32.mrb[1].mxu1 }
 0x16a   : > { %688 = vst [vmem:[%s1622_s21] sm:$0xff] %v1632_v34  ;;  %704 = vst [vmem:[%s1622_s21 + $0x80] sm:$0xff] %v1634_v35 }
 0x16c   : > { %v1640_v36 = vpop.f32.mrb[2].mxu0  ;;  %v1642_v37 = vpop.f32.mrb[2].mxu1 }
 0x16d   : > { %657 = vst [vmem:[%s1617_s27 + $0x8] sm:$0xff] %v1640_v36  ;;  %673 = vst [vmem:[%s1617_s27 + $0x88] sm:$0xff] %v1642_v37  ;;  %v1648_v38 = vpop.f32.mrb[3].mxu0  ;;  %v1650_v39 = vpop.f32.mrb[3].mxu1 }
 0x16e   : > { %689 = vst [vmem:[%s1622_s21 + $0x8] sm:$0xff] %v1648_v38  ;;  %705 = vst [vmem:[%s1622_s21 + $0x88] sm:$0xff] %v1650_v39 }
 0x170   : > { %v1656_v40 = vpop.f32.mrb[4].mxu0  ;;  %v1658_v41 = vpop.f32.mrb[4].mxu1 }
 0x171   : > { %658 = vst [vmem:[%s1617_s27 + $0x10] sm:$0xff] %v1656_v40  ;;  %674 = vst [vmem:[%s1617_s27 + $0x90] sm:$0xff] %v1658_v41  ;;  %v1664_v42 = vpop.f32.mrb[5].mxu0  ;;  %v1666_v43 = vpop.f32.mrb[5].mxu1 }
 0x172   : > { %690 = vst [vmem:[%s1622_s21 + $0x10] sm:$0xff] %v1664_v42  ;;  %706 = vst [vmem:[%s1622_s21 + $0x90] sm:$0xff] %v1666_v43 }
 0x174   : > { %v1672_v44 = vpop.f32.mrb[6].mxu0  ;;  %v1674_v45 = vpop.f32.mrb[6].mxu1 }
 0x175   : > { %659 = vst [vmem:[%s1617_s27 + $0x18] sm:$0xff] %v1672_v44  ;;  %675 = vst [vmem:[%s1617_s27 + $0x98] sm:$0xff] %v1674_v45  ;;  %v1680_v46 = vpop.f32.mrb[7].mxu0  ;;  %v1682_v47 = vpop.f32.mrb[7].mxu1 }
 0x176   : > { %691 = vst [vmem:[%s1622_s21 + $0x18] sm:$0xff] %v1680_v46  ;;  %707 = vst [vmem:[%s1622_s21 + $0x98] sm:$0xff] %v1682_v47 }
 0x178   : > { %v1688_v48 = vpop.f32.mrb[8].mxu0  ;;  %v1690_v49 = vpop.f32.mrb[8].mxu1 }
 0x179   : > { %660 = vst [vmem:[%s1617_s27 + $0x20] sm:$0xff] %v1688_v48  ;;  %676 = vst [vmem:[%s1617_s27 + $0xa0] sm:$0xff] %v1690_v49  ;;  %v1696_v50 = vpop.f32.mrb[9].mxu0  ;;  %v1698_v51 = vpop.f32.mrb[9].mxu1 }
 0x17a   : > { %692 = vst [vmem:[%s1622_s21 + $0x20] sm:$0xff] %v1696_v50  ;;  %708 = vst [vmem:[%s1622_s21 + $0xa0] sm:$0xff] %v1698_v51 }
 0x17c   : > { %v1704_v52 = vpop.f32.mrb[10].mxu0  ;;  %v1706_v53 = vpop.f32.mrb[10].mxu1 }
 0x17d   : > { %661 = vst [vmem:[%s1617_s27 + $0x28] sm:$0xff] %v1704_v52  ;;  %677 = vst [vmem:[%s1617_s27 + $0xa8] sm:$0xff] %v1706_v53  ;;  %v1712_v54 = vpop.f32.mrb[11].mxu0  ;;  %v1714_v55 = vpop.f32.mrb[11].mxu1 }
 0x17e   : > { %693 = vst [vmem:[%s1622_s21 + $0x28] sm:$0xff] %v1712_v54  ;;  %709 = vst [vmem:[%s1622_s21 + $0xa8] sm:$0xff] %v1714_v55 }
 0x180   : > { %v1720_v56 = vpop.f32.mrb[12].mxu0  ;;  %v1722_v57 = vpop.f32.mrb[12].mxu1 }
 0x181   : > { %662 = vst [vmem:[%s1617_s27 + $0x30] sm:$0xff] %v1720_v56  ;;  %678 = vst [vmem:[%s1617_s27 + $0xb0] sm:$0xff] %v1722_v57  ;;  %v1728_v58 = vpop.f32.mrb[13].mxu0  ;;  %v1730_v59 = vpop.f32.mrb[13].mxu1 }
 0x182   : > { %694 = vst [vmem:[%s1622_s21 + $0x30] sm:$0xff] %v1728_v58  ;;  %710 = vst [vmem:[%s1622_s21 + $0xb0] sm:$0xff] %v1730_v59 }
 0x184   : > { %v1736_v60 = vpop.f32.mrb[14].mxu0  ;;  %v1738_v61 = vpop.f32.mrb[14].mxu1 }
 0x185   : > { %663 = vst [vmem:[%s1617_s27 + $0x38] sm:$0xff] %v1736_v60  ;;  %679 = vst [vmem:[%s1617_s27 + $0xb8] sm:$0xff] %v1738_v61  ;;  %v1744_v62 = vpop.f32.mrb[15].mxu0  ;;  %v1746_v63 = vpop.f32.mrb[15].mxu1 }
 0x186   : > { %695 = vst [vmem:[%s1622_s21 + $0x38] sm:$0xff] %v1744_v62  ;;  %711 = vst [vmem:[%s1622_s21 + $0xb8] sm:$0xff] %v1746_v63 }
 0x188   : > { %v1752_v0 = vpop.f32.mrb[16].mxu0  ;;  %v1754_v1 = vpop.f32.mrb[16].mxu1 }
 0x189   : > { %664 = vst [vmem:[%s1617_s27 + $0x40] sm:$0xff] %v1752_v0  ;;  %680 = vst [vmem:[%s1617_s27 + $0xc0] sm:$0xff] %v1754_v1  ;;  %v1760_v2 = vpop.f32.mrb[17].mxu0  ;;  %v1762_v3 = vpop.f32.mrb[17].mxu1 }
 0x18a   : > { %696 = vst [vmem:[%s1622_s21 + $0x40] sm:$0xff] %v1760_v2  ;;  %712 = vst [vmem:[%s1622_s21 + $0xc0] sm:$0xff] %v1762_v3 }
 0x18c   : > { %v1768_v4 = vpop.f32.mrb[18].mxu0  ;;  %v1770_v5 = vpop.f32.mrb[18].mxu1 }
 0x18d   : > { %665 = vst [vmem:[%s1617_s27 + $0x48] sm:$0xff] %v1768_v4  ;;  %681 = vst [vmem:[%s1617_s27 + $0xc8] sm:$0xff] %v1770_v5  ;;  %v1776_v6 = vpop.f32.mrb[19].mxu0  ;;  %v1778_v7 = vpop.f32.mrb[19].mxu1 }
 0x18e   : > { %697 = vst [vmem:[%s1622_s21 + $0x48] sm:$0xff] %v1776_v6  ;;  %713 = vst [vmem:[%s1622_s21 + $0xc8] sm:$0xff] %v1778_v7 }
 0x190   : > { %v1784_v8 = vpop.f32.mrb[20].mxu0  ;;  %v1786_v9 = vpop.f32.mrb[20].mxu1 }
 0x191   : > { %2154 = vst [vmem:[#allocation8_spill] sm:$0xff] %v1786_v9  ;;  %666 = vst [vmem:[%s1617_s27 + $0x50] sm:$0xff] %v1784_v8  ;;  %v1792_v10 = vpop.f32.mrb[21].mxu0  ;;  %v1794_v11 = vpop.f32.mrb[21].mxu1 }
 0x192   : > { %682 = vst [vmem:[%s1617_s27 + $0xd0] sm:$0xff] %v1786_v9  ;;  %2155 = vst [vmem:[#allocation9_spill] sm:$0xff] %v1794_v11 }
 0x193   : > { %698 = vst [vmem:[%s1622_s21 + $0x50] sm:$0xff] %v1792_v10  ;;  %714 = vst [vmem:[%s1622_s21 + $0xd0] sm:$0xff] %v1794_v11 }
 0x194   : > { %v1800_v12 = vpop.f32.mrb[22].mxu0  ;;  %v1802_v13 = vpop.f32.mrb[22].mxu1 }
 0x195   : > { %2156 = vst [vmem:[#allocation10_spill] sm:$0xff] %v1802_v13  ;;  %667 = vst [vmem:[%s1617_s27 + $0x58] sm:$0xff] %v1800_v12  ;;  %v1808_v14 = vpop.f32.mrb[23].mxu0  ;;  %v1810_v15 = vpop.f32.mrb[23].mxu1 }
 0x196   : > { %683 = vst [vmem:[%s1617_s27 + $0xd8] sm:$0xff] %v1802_v13  ;;  %2157 = vst [vmem:[#allocation11_spill] sm:$0xff] %v1810_v15 }
 0x197   : > { %699 = vst [vmem:[%s1622_s21 + $0x58] sm:$0xff] %v1808_v14  ;;  %715 = vst [vmem:[%s1622_s21 + $0xd8] sm:$0xff] %v1810_v15 }
 0x198   : > { %v1816_v16 = vpop.f32.mrb[24].mxu0  ;;  %v1818_v17 = vpop.f32.mrb[24].mxu1 }
 0x199   : > { %2158 = vst [vmem:[#allocation12_spill] sm:$0xff] %v1818_v17  ;;  %668 = vst [vmem:[%s1617_s27 + $0x60] sm:$0xff] %v1816_v16  ;;  %v1824_v18 = vpop.f32.mrb[25].mxu0  ;;  %v1826_v19 = vpop.f32.mrb[25].mxu1 }
 0x19a   : > { %684 = vst [vmem:[%s1617_s27 + $0xe0] sm:$0xff] %v1818_v17  ;;  %2159 = vst [vmem:[#allocation13_spill] sm:$0xff] %v1826_v19 }
 0x19b   : > { %700 = vst [vmem:[%s1622_s21 + $0x60] sm:$0xff] %v1824_v18  ;;  %716 = vst [vmem:[%s1622_s21 + $0xe0] sm:$0xff] %v1826_v19 }
 0x19c   : > { %v1832_v20 = vpop.f32.mrb[26].mxu0  ;;  %v1834_v21 = vpop.f32.mrb[26].mxu1 }
 0x19d   : > { %2160 = vst [vmem:[#allocation14_spill] sm:$0xff] %v1834_v21  ;;  %669 = vst [vmem:[%s1617_s27 + $0x68] sm:$0xff] %v1832_v20  ;;  %v1840_v22 = vpop.f32.mrb[27].mxu0  ;;  %v1842_v23 = vpop.f32.mrb[27].mxu1 }
 0x19e   : > { %685 = vst [vmem:[%s1617_s27 + $0xe8] sm:$0xff] %v1834_v21  ;;  %2161 = vst [vmem:[#allocation15_spill] sm:$0xff] %v1842_v23 }
 0x19f   : > { %701 = vst [vmem:[%s1622_s21 + $0x68] sm:$0xff] %v1840_v22  ;;  %717 = vst [vmem:[%s1622_s21 + $0xe8] sm:$0xff] %v1842_v23 }
 0x1a0   : > { %v1848_v24 = vpop.f32.mrb[28].mxu0  ;;  %v1850_v25 = vpop.f32.mrb[28].mxu1 }
 0x1a1   : > { %2162 = vst [vmem:[#allocation16_spill] sm:$0xff] %v1850_v25  ;;  %670 = vst [vmem:[%s1617_s27 + $0x70] sm:$0xff] %v1848_v24  ;;  %v1856_v26 = vpop.f32.mrb[29].mxu0  ;;  %v1858_v27 = vpop.f32.mrb[29].mxu1  ;;  %723 = sbr.rel (%p2166_p1) target bundleno = 425 (0x1a9), region = 40 }
 0x1a2   : > { %686 = vst [vmem:[%s1617_s27 + $0xf0] sm:$0xff] %v1850_v25  ;;  %2163 = vst [vmem:[#allocation17_spill] sm:$0xff] %v1858_v27  ;;  %v1384_v25 = vmov (!%p2166_p1), 0.0  }
 0x1a3   : > { %702 = vst [vmem:[%s1622_s21 + $0x70] sm:$0xff] %v1856_v26  ;;  %718 = vst [vmem:[%s1622_s21 + $0xf0] sm:$0xff] %v1858_v27  ;;  %v724_v27 = vlaneseq (!%p2166_p1) }
 0x1a4   : > { %v1864_v28 = vpop.f32.mrb[30].mxu0  ;;  %v1866_v29 = vpop.f32.mrb[30].mxu1 }
 0x1a5   : > { %2164 = vst [vmem:[#allocation18_spill] sm:$0xff] %v1866_v29  ;;  %671 = vst [vmem:[%s1617_s27 + $0x78] sm:$0xff] %v1864_v28  ;;  %v1872_v30 = vpop.f32.mrb[31].mxu0  ;;  %v1874_v31 = vpop.f32.mrb[31].mxu1  ;;  %vm726_vm0 = vcmp.lt.s32.totalorder (!%p2166_p1), %v724_v27, 256 }
 0x1a6   : > { %687 = vst [vmem:[%s1617_s27 + $0xf8] sm:$0xff] %v1866_v29  ;;  %2165 = vst [vmem:[#allocation19_spill] sm:$0xff] %v1874_v31 }
 0x1a7   : > { %703 = vst [vmem:[%s1622_s21 + $0x78] sm:$0xff] %v1872_v30  ;;  %719 = vst [vmem:[%s1622_s21 + $0xf8] sm:$0xff] %v1874_v31 }
 0x1a8   : > { %728 = vst.msk [vmem:[%s2117_s4] sm:$0x3] %vm726_vm0, %v1384_v25  ;;  %729 = vst.msk [vmem:[%s2118_s5] sm:$0x3] %vm726_vm0, %v1384_v25 }
 0x1a9 PF: > { %v731_v29 = vadd.f32 %v1640_v36, %v1624_v32  ;;  %v768_v31 = vadd.f32 %v1648_v38, %v1632_v34 }
 0x1ab   : > { %v732_v23 = vadd.f32 %v731_v29, %v1656_v40  ;;  %v769_v27 = vadd.f32 %v768_v31, %v1664_v42 }
 0x1ad   : > { %v733_v21 = vadd.f32 %v732_v23, %v1672_v44  ;;  %v770_v19 = vadd.f32 %v769_v27, %v1680_v46 }
 0x1af   : > { %v734_v17 = vadd.f32 %v733_v21, %v1688_v48  ;;  %v771_v15 = vadd.f32 %v770_v19, %v1696_v50 }
 0x1b1   : > { %v735_v25 = vadd.f32 %v734_v17, %v1704_v52  ;;  %v772_v13 = vadd.f32 %v771_v15, %v1712_v54 }
 0x1b3   : > { %v736_v11 = vadd.f32 %v735_v25, %v1720_v56  ;;  %v773_v9 = vadd.f32 %v772_v13, %v1728_v58  ;;  %v830_v25 = vmul.f32 %v1624_v32, %v1624_v32 }
 0x1b5   : > { %v737_v29 = vadd.f32 %v736_v11, %v1736_v60  ;;  %v774_v31 = vadd.f32 %v773_v9, %v1744_v62  ;;  %v832_v11 = vmul.f32 %v1640_v36, %v1640_v36  ;;  %v835_v36 = vmul.f32 %v1664_v42, %v1664_v42 }
 0x1b7   : > { %v738_v23 = vadd.f32 %v737_v29, %v1752_v0  ;;  %v775_v27 = vadd.f32 %v774_v31, %v1760_v2  ;;  %v831_v29 = vmul.f32 %v1632_v34, %v1632_v34  ;;  %v833_v31 = vmul.f32 %v1648_v38, %v1648_v38 }
 0x1b8   : > { %v837_v38 = vmul.f32 %v1680_v46, %v1680_v46 }
 0x1b9   : > { %v739_v21 = vadd.f32 %v738_v23, %v1768_v4  ;;  %v776_v19 = vadd.f32 %v775_v27, %v1776_v6  ;;  %v834_v23 = vmul.f32 %v1656_v40, %v1656_v40  ;;  %v838_v40 = vmul.f32 %v1688_v48, %v1688_v48 }
 0x1ba   : > { %v841_v48 = vmul.f32 %v1712_v54, %v1712_v54 }
 0x1bb   : > { %v740_v17 = vadd.f32 %v739_v21, %v1784_v8  ;;  %v777_v15 = vadd.f32 %v776_v19, %v1792_v10  ;;  %v836_v21 = vmul.f32 %v1672_v44, %v1672_v44  ;;  %v894_v19 = vadd.f32 %v832_v11, %v830_v25 }
 0x1bc   : > { %v839_v44 = vmul.f32 %v1696_v50, %v1696_v50  ;;  %v840_v11 = vmul.f32 %v1704_v52, %v1704_v52  ;;  %v843_v52 = vmul.f32 %v1728_v58, %v1728_v58 }
 0x1bd   : > { %v741_v9 = vadd.f32 %v740_v17, %v1800_v12  ;;  %v778_v13 = vadd.f32 %v777_v15, %v1808_v14  ;;  %v931_v15 = vadd.f32 %v833_v31, %v831_v29  ;;  %v842_v31 = vmul.f32 %v1720_v56, %v1720_v56 }
 0x1be   : > { %v845_v56 = vmul.f32 %v1744_v62, %v1744_v62 }
 0x1bf   : > { %v742_v27 = vadd.f32 %v741_v9, %v1816_v16  ;;  %v779_v32 = vadd.f32 %v778_v13, %v1824_v18  ;;  %v895_v9 = vadd.f32 %v894_v19, %v834_v23  ;;  %v932_v25 = vadd.f32 %v931_v15, %v835_v36 }
 0x1c0   : > { %v846_v15 = vmul.f32 %v1752_v0, %v1752_v0  ;;  %v849_v0 = vmul.f32 %v1776_v6, %v1776_v6 }
 0x1c1   : > { %v743_v17 = vadd.f32 %v742_v27, %v1832_v20  ;;  %v780_v34 = vadd.f32 %v779_v32, %v1840_v22  ;;  %v896_v27 = vadd.f32 %v895_v9, %v836_v21  ;;  %v933_v29 = vadd.f32 %v932_v25, %v837_v38 }
 0x1c2   : > { %v844_v21 = vmul.f32 %v1736_v60, %v1736_v60  ;;  %v847_v60 = vmul.f32 %v1760_v2, %v1760_v2 }
 0x1c3   : > { %v744_v13 = vadd.f32 %v743_v17, %v1848_v24  ;;  %v781_v42 = vadd.f32 %v780_v34, %v1856_v26  ;;  %v897_v23 = vadd.f32 %v896_v27, %v838_v40  ;;  %v934_v36 = vadd.f32 %v933_v29, %v839_v44 }
 0x1c4   : > { %v850_v27 = vmul.f32 %v1784_v8, %v1784_v8  ;;  %v852_v29 = vmul.f32 %v1800_v12, %v1800_v12  ;;  %v853_v8 = vmul.f32 %v1808_v14, %v1808_v14  ;;  %v855_v12 = vmul.f32 %v1824_v18, %v1824_v18 }
 0x1c5   : > { %v745_v32 = vadd.f32 %v744_v13, %v1864_v28  ;;  %v782_v46 = vadd.f32 %v781_v42, %v1872_v30  ;;  %v898_v17 = vadd.f32 %v897_v23, %v840_v11  ;;  %v935_v38 = vadd.f32 %v934_v36, %v841_v48 }
 0x1c6   : > { %v848_v42 = vmul.f32 %v1768_v4, %v1768_v4  ;;  %v851_v4 = vmul.f32 %v1792_v10, %v1792_v10 }
 0x1c7   : > { %v746_v19 = vadd.f32 %v745_v32, %v1626_v33  ;;  %v783_v50 = vadd.f32 %v782_v46, %v1634_v35  ;;  %v899_v40 = vadd.f32 %v898_v17, %v842_v31  ;;  %v936_v13 = vadd.f32 %v935_v38, %v843_v52 }
 0x1c8   : > { %v856_v17 = vmul.f32 %v1832_v20, %v1832_v20  ;;  %v858_v38 = vmul.f32 %v1848_v24, %v1848_v24  ;;  %v859_v20 = vmul.f32 %v1856_v26, %v1856_v26  ;;  %v861_v24 = vmul.f32 %v1872_v30, %v1872_v30  ;;  %v2168_v26 = vld [vmem:[#allocation9_spill] sm:$0xff]  ;;  %v2170_v30 = vld [vmem:[#allocation11_spill] sm:$0xff] }
 0x1c9   : > { %v747_v34 = vadd.f32 %v746_v19, %v1642_v37  ;;  %v784_v54 = vadd.f32 %v783_v50, %v1650_v39  ;;  %v900_v44 = vadd.f32 %v899_v40, %v844_v21  ;;  %v937_v11 = vadd.f32 %v936_v13, %v845_v56 }
 0x1ca   : > { %v854_v50 = vmul.f32 %v1816_v16, %v1816_v16  ;;  %v857_v16 = vmul.f32 %v1840_v22, %v1840_v22 }
 0x1cb   : > { %v748_v9 = vadd.f32 %v747_v34, %v1658_v41  ;;  %v785_v58 = vadd.f32 %v784_v54, %v1666_v43  ;;  %v901_v32 = vadd.f32 %v900_v44, %v846_v15  ;;  %v938_v48 = vadd.f32 %v937_v11, %v847_v60 }
 0x1cc   : > { %v862_v44 = vmul.f32 %v1626_v33, %v1626_v33  ;;  %v865_v33 = vmul.f32 %v1650_v39, %v1650_v39  ;;  %v2174_v39 = vld [vmem:[#allocation15_spill] sm:$0xff] }
 0x1cd   : > { %v749_v25 = vadd.f32 %v748_v9, %v1674_v45  ;;  %v786_v62 = vadd.f32 %v785_v58, %v1682_v47  ;;  %v902_v31 = vadd.f32 %v901_v32, %v848_v42  ;;  %v939_v19 = vadd.f32 %v938_v48, %v849_v0 }
 0x1ce   : > { %v860_v58 = vmul.f32 %v1864_v28, %v1864_v28  ;;  %v863_v28 = vmul.f32 %v1634_v35, %v1634_v35  ;;  %v864_v32 = vmul.f32 %v1642_v37, %v1642_v37  ;;  %v2172_v35 = vld [vmem:[#allocation13_spill] sm:$0xff]  ;;  %v867_v37 = vmul.f32 %v1666_v43, %v1666_v43 }
 0x1cf   : > { %v750_v46 = vadd.f32 %v749_v25, %v1690_v49  ;;  %v787_v2 = vadd.f32 %v786_v62, %v1698_v51  ;;  %v903_v52 = vadd.f32 %v902_v31, %v850_v27  ;;  %v940_v21 = vadd.f32 %v939_v19, %v851_v4  ;;  %v2167_v62 = vld [vmem:[#allocation8_spill] sm:$0xff]  ;;  %v2176_v43 = vld [vmem:[#allocation17_spill] sm:$0xff] }
 0x1d0   : > { %v866_v31 = vmul.f32 %v1658_v41, %v1658_v41  ;;  %v869_v41 = vmul.f32 %v1682_v47, %v1682_v47  ;;  %v2178_v47 = vld [vmem:[#allocation19_spill] sm:$0xff] }
 0x1d1   : > { %v751_v23 = vadd.f32 %v750_v46, %v1706_v53  ;;  %v788_v6 = vadd.f32 %v787_v2, %v1714_v55  ;;  %v904_v34 = vadd.f32 %v903_v52, %v852_v29  ;;  %v941_v56 = vadd.f32 %v940_v21, %v853_v8  ;;  %v2169_v2 = vld [vmem:[#allocation10_spill] sm:$0xff] }
 0x1d2   : > { %v868_v52 = vmul.f32 %v1674_v45, %v1674_v45  ;;  %v871_v45 = vmul.f32 %v1698_v51, %v1698_v51  ;;  %v875_v51 = vmul.f32 %v1730_v59, %v1730_v59 }
 0x1d3   : > { %v752_v36 = vadd.f32 %v751_v23, %v1722_v57  ;;  %v789_v10 = vadd.f32 %v788_v6, %v1730_v59  ;;  %v905_v15 = vadd.f32 %v904_v34, %v854_v50  ;;  %v942_v9 = vadd.f32 %v941_v56, %v855_v12  ;;  %v2171_v6 = vld [vmem:[#allocation12_spill] sm:$0xff] }
 0x1d4   : > { %v870_v34 = vmul.f32 %v1690_v49, %v1690_v49  ;;  %v873_v49 = vmul.f32 %v1714_v55, %v1714_v55 }
 0x1d5   : > { %v753_v54 = vadd.f32 %v752_v36, %v1738_v61  ;;  %v790_v14 = vadd.f32 %v789_v10, %v1746_v63  ;;  %v906_v60 = vadd.f32 %v905_v15, %v856_v17  ;;  %v943_v42 = vadd.f32 %v942_v9, %v857_v16  ;;  %v2173_v10 = vld [vmem:[#allocation14_spill] sm:$0xff] }
 0x1d6   : > { %v872_v15 = vmul.f32 %v1706_v53, %v1706_v53  ;;  %v1385_v53 = vmov 1966171168  }
 0x1d7   : > { %v754_v40 = vadd.f32 %v753_v54, %v1754_v1  ;;  %v791_v18 = vadd.f32 %v790_v14, %v1762_v3  ;;  %v907_v25 = vadd.f32 %v906_v60, %v858_v38  ;;  %v944_v27 = vadd.f32 %v943_v42, %v859_v20  ;;  %v2175_v14 = vld [vmem:[#allocation16_spill] sm:$0xff] }
 0x1d8   : > { %v874_v60 = vmul.f32 %v1722_v57, %v1722_v57 }
 0x1d9   : > { %v755_v13 = vadd.f32 %v754_v40, %v1770_v5  ;;  %v792_v22 = vadd.f32 %v791_v18, %v1778_v7  ;;  %v908_v46 = vadd.f32 %v907_v25, %v860_v58  ;;  %v945_v29 = vadd.f32 %v944_v27, %v861_v24  ;;  %v2177_v18 = vld [vmem:[#allocation18_spill] sm:$0xff] }
 0x1da   : > { %v811_v25 = vlaneseq  ;;  %v877_v27 = vmul.f32 %v1746_v63, %v1746_v63  ;;  %v881_v63 = vmul.f32 %v1778_v7, %v1778_v7  ;;  %v885_v7 = vmul.f32 %v2170_v30, %v2170_v30 }
 0x1db   : > { %v756_v0 = vadd.f32 %v755_v13, %v2167_v62  ;;  %v793_v11 = vadd.f32 %v792_v22, %v2168_v26  ;;  %v909_v23 = vadd.f32 %v908_v46, %v862_v44  ;;  %v946_v50 = vadd.f32 %v945_v29, %v863_v28 }
 0x1dc   : > { %v809_v44 = vunpack.c.l.s4 %v1385_v53  ;;  %vm2079_vm1 = vcmp.lt.s32.totalorder %v811_v25, 256 }
 0x1dd   : > { %v757_v4 = vadd.f32 %v756_v0, %v2169_v2  ;;  %v794_v48 = vadd.f32 %v793_v11, %v2170_v30  ;;  %v910_v36 = vadd.f32 %v909_v23, %v864_v32  ;;  %v947_v17 = vadd.f32 %v946_v50, %v865_v33  ;;  %v730_v30 = vld [vmem:[%s2117_s4] sm:$0x3] }
 0x1de   : > { %v876_v0 = vmul.f32 %v1738_v61, %v1738_v61  ;;  %v878_v32 = vmul.f32 %v1754_v1, %v1754_v1  ;;  %v810_v29 = vunpack.c.0.s8 %v809_v44  ;;  %v880_v61 = vmul.f32 %v1770_v5, %v1770_v5 }
 0x1df   : > { %v758_v8 = vadd.f32 %v757_v4, %v2171_v6  ;;  %v795_v19 = vadd.f32 %v794_v48, %v2172_v35  ;;  %v911_v54 = vadd.f32 %v910_v36, %v866_v31  ;;  %v948_v38 = vadd.f32 %v947_v17, %v867_v37 }
 0x1e0   : > { %v879_v48 = vmul.f32 %v1762_v3, %v1762_v3  ;;  %v812_v31 = vshrl.u32 %v811_v25, 7  ;;  %v882_v1 = vmul.f32 %v2167_v62, %v2167_v62  ;;  %v883_v3 = vmul.f32 %v2168_v26, %v2168_v26 }
 0x1e1   : > { %v759_v12 = vadd.f32 %v758_v8, %v2173_v10  ;;  %v796_v21 = vadd.f32 %v795_v19, %v2174_v39  ;;  %v912_v40 = vadd.f32 %v911_v54, %v868_v52  ;;  %v949_v58 = vadd.f32 %v948_v38, %v869_v41 }
 0x1e2   : > { %v884_v5 = vmul.f32 %v2169_v2, %v2169_v2  ;;  %v886_v62 = vmul.f32 %v2171_v6, %v2171_v6  ;;  %v887_v26 = vmul.f32 %v2172_v35, %v2172_v35  ;;  %v888_v38 = vmul.f32 %v2173_v10, %v2173_v10 }
 0x1e3   : > { %v760_v16 = vadd.f32 %v759_v12, %v2175_v14  ;;  %v797_v56 = vadd.f32 %v796_v21, %v2176_v43  ;;  %v913_v13 = vadd.f32 %v912_v40, %v870_v34  ;;  %v950_v42 = vadd.f32 %v949_v58, %v871_v45 }
 0x1e4   : > { %v813_v21 = vsub.s32 %v810_v29, %v812_v31  ;;  %v889_v40 = vmul.f32 %v2174_v39, %v2174_v39  ;;  %v890_v6 = vmul.f32 %v2175_v14, %v2175_v14  ;;  %v891_v35 = vmul.f32 %v2176_v43, %v2176_v43 }
 0x1e5   : > { %v761_v20 = vadd.f32 %v760_v16, %v2177_v18  ;;  %v798_v9 = vadd.f32 %v797_v56, %v2178_v47  ;;  %v914_v11 = vadd.f32 %v913_v13, %v872_v15  ;;  %v951_v57 = vadd.f32 %v950_v42, %v873_v49 }
 0x1e6   : > { %v892_v39 = vmul.f32 %v2177_v18, %v2177_v18 }
 0x1e7   : > { %v762_v22 = vrot.slane %v761_v20, 4  ;;  %v799_v24 = vrot.slane %v798_v9, 4  ;;  %v915_v46 = vadd.f32 %v914_v11, %v874_v60  ;;  %v952_v33 = vadd.f32 %v951_v57, %v875_v51 }
 0x1e9   : > { %v763_v28 = vadd.f32 %v762_v22, %v761_v20  ;;  %v800_v55 = vadd.f32 %v799_v24, %v798_v9  ;;  %v916_v23 = vadd.f32 %v915_v46, %v876_v0  ;;  %v953_v37 = vadd.f32 %v952_v33, %v877_v27 }
 0x1ea   : > { %v893_v22 = vmul.f32 %v2178_v47, %v2178_v47 }
 0x1eb   : > { %v764_v4 = vrot.slane %v763_v28, 2  ;;  %v801_v59 = vrot.slane %v800_v55, 2  ;;  %v917_v50 = vadd.f32 %v916_v23, %v878_v32  ;;  %v954_v12 = vadd.f32 %v953_v37, %v879_v48 }
 0x1ed   : > { %v765_v8 = vadd.f32 %v764_v4, %v763_v28  ;;  %v802_v19 = vadd.f32 %v801_v59, %v800_v55  ;;  %v918_v41 = vadd.f32 %v917_v50, %v880_v61  ;;  %v955_v54 = vadd.f32 %v954_v12, %v881_v63  ;;  %v829_v59 = vld [vmem:[%s2118_s5] sm:$0x3] }
 0x1ef   : > { %v766_v52 = vrot.slane %v765_v8, 1  ;;  %v803_v36 = vrot.slane %v802_v19, 1  ;;  %v919_v16 = vadd.f32 %v918_v41, %v882_v1  ;;  %v956_v45 = vadd.f32 %v955_v54, %v883_v3 }
 0x1f1   : > { %v767_v17 = vadd.f32 %v766_v52, %v765_v8  ;;  %v804_v34 = vadd.f32 %v803_v36, %v802_v19  ;;  %v920_v2 = vadd.f32 %v919_v16, %v884_v5  ;;  %v957_v20 = vadd.f32 %v956_v45, %v885_v7 }
 0x1f3   : > { %v807_v56 = vcombine.low %v767_v17, %v804_v34  ;;  %v921_v9 = vadd.f32 %v920_v2, %v886_v62  ;;  %v958_v58 = vadd.f32 %v957_v20, %v887_v26 }
 0x1f5   : > { %v814_v15 = vrot.slane %v807_v56, %v813_v21  ;;  %v922_v60 = vadd.f32 %v921_v9, %v888_v38  ;;  %v959_v24 = vadd.f32 %v958_v58, %v889_v40 }
 0x1f7   : > { %v821_v49 = vrot.slane %v814_v15, %v813_v21  ;;  %v923_v14 = vadd.f32 %v922_v60, %v890_v6  ;;  %v960_v43 = vadd.f32 %v959_v24, %v891_v35 }
 0x1f9   : > { %v823_v13 = vadd.f32 %v821_v49, %v730_v30  ;;  %v924_v51 = vadd.f32 %v923_v14, %v892_v39  ;;  %v961_v42 = vadd.f32 %v960_v43, %v893_v22 }
 0x1fb   : > { %828 = vst.msk [vmem:[%s2117_s4] sm:$0x3] %vm2079_vm1, %v823_v13  ;;  %v925_v53 = vrot.slane %v924_v51, 4  ;;  %v962_v44 = vrot.slane %v961_v42, 4 }
 0x1fd   : > { %v926_v25 = vadd.f32 %v925_v53, %v924_v51  ;;  %v963_v18 = vadd.f32 %v962_v44, %v961_v42 }
 0x1ff   : > { %v927_v0 = vrot.slane %v926_v25, 2  ;;  %v964_v11 = vrot.slane %v963_v18, 2 }
 0x201   : > { %v928_v28 = vadd.f32 %v927_v0, %v926_v25  ;;  %v965_v55 = vadd.f32 %v964_v11, %v963_v18 }
 0x203   : > { %v929_v47 = vrot.slane %v928_v28, 1  ;;  %v966_v27 = vrot.slane %v965_v55, 1 }
 0x205   : > { %v930_v57 = vadd.f32 %v929_v47, %v928_v28  ;;  %v967_v32 = vadd.f32 %v966_v27, %v965_v55 }
 0x207   : > { %v970_v46 = vcombine.low %v930_v57, %v967_v32 }
 0x209   : > { %v977_v4 = vrot.slane %v970_v46, %v813_v21 }
 0x20b   : > { %v984_v48 = vrot.slane %v977_v4, %v813_v21 }
 0x20d   : > { %v986_v33 = vadd.f32 %v984_v48, %v829_v59 }
 0x20f   : > { %987 = vst.msk [vmem:[%s2118_s5] sm:$0x3] %vm2079_vm1, %v986_v33 }
 0x210 PF: > { %s2181_s11 = smov %s1490_s18  ;;  %p17_p4 = scmp.ge.s32.totalorder %s1461_s28, 4  }
 0x211   : > { %s2182_s18 = smov %s1370_s19  ;;  %s2183_s19 = smov %s1374_s20 }
 0x212   : > { %s2184_s20 = smov %s2181_s11  ;;  %s2185_s21 = smov %s1461_s28 }
 0x213   :  { %19 = sbr.rel (!%p17_p4) target bundleno = 4 (0x4), region = 104 }
 0x21a   :  { %1039 = vsyncpa [#allocation3], 1 }
 0x21b   :  { %1041 = vsyncpa [#allocation3 + $0x1], 1 }
 0x21c   :  { %1042 = vsyncpa [#allocation5], 1 }

// kernel: csp_bottleneck_mca.8
= control target key start
LH: loop header
LB: loop body
LE: loop exit
PB: predicated region body
PF: predicated region fallthrough
CT: control target
= control target key end

     0   :  { %s2521_s21 = smov 0   ;;  %s4015_s0 = inlined_call_operand.vmem [shape: f32[2,256,128], index: 0, kind: input, shape index: {}]   ;;  %s4016_s1 = inlined_call_operand.vmem [shape: f32[2,256,128], index: 1, kind: input, shape index: {}]   ;;  %s4017_s2 = inlined_call_operand.vmem [shape: f32[1,128], index: 2, kind: input, shape index: {}]   ;;  %s4018_s3 = inlined_call_operand.vmem [shape: f32[1,128], index: 3, kind: input, shape index: {}]   ;;  %s4019_s4 = inlined_call_operand.vmem [shape: f32[1,128], index: 4, kind: input, shape index: {}]   ;;  %s4020_s5 = inlined_call_operand.vmem [shape: f32[1,128], index: 5, kind: input, shape index: {}]   ;;  %s4021_s6 = inlined_call_operand.vmem [shape: f32[1,128], index: 6, kind: input, shape index: {}]   ;;  %s4022_s7 = inlined_call_operand.vmem [shape: f32[1,128], index: 7, kind: input, shape index: {}]   ;;  %s4023_s8 = inlined_call_operand.vmem [shape: f32[1,128], index: 8, kind: input, shape index: {}]   ;;  %s4024_s9 = inlined_call_operand.vmem [shape: f32[1,128], index: 9, kind: input, shape index: {}]   ;;  %s4025_s10 = inlined_call_operand.vmem [shape: f32[128,256], index: 10, kind: input, shape index: {}]   ;;  %s4026_s11 = inlined_call_operand.vmem [shape: f32[128,256], index: 11, kind: input, shape index: {}]   ;;  %s4027_s12 = inlined_call_operand.vmem [shape: f32[3,1], index: 12, kind: input, shape index: {}]   ;;  %s4028_s13 = inlined_call_operand.vmem [shape: f32[2,1], index: 13, kind: input, shape index: {}]   ;;  %s4029_s14 = inlined_call_operand.vmem [shape: f32[2,256,256], index: 14, kind: output, shape index: {0}]   ;;  %s4030_s15 = inlined_call_operand.vmem [shape: f32[1,256], index: 15, kind: output, shape index: {1}]   ;;  %s4031_s16 = inlined_call_operand.vmem [shape: f32[1,256], index: 16, kind: output, shape index: {2}]  }
   0x1   :  { %4121 = sst [smem:[#allocation45_spill]] %s4015_s0 }
   0x2 LB: > { %s2527_s22 = sadd.s32 4294967295, %s2428_s21   ;;  %p2247_p0 = scmp.ge.s32.totalorder %s2428_s21, 1  ;;  %s2428_s21 = sphi %s2521_s21, %s27_s21  }
   0x3   : > { %p467_p1 = scmp.lt.s32.totalorder %s2428_s21, 3 }
   0x5   : > { %p468_p2 = pnand %p2247_p0, %p467_p1 }
   0x7   : > { %471 = sbr.rel (%p468_p2) target bundleno = 835 (0x343), region = 76 }
   0xe   : > { %v815_v0 = vld [vmem:[%s4028_s13] sm:$0x1]  ;;  %v2430_v1 = vmov 0   ;;  %v816_v3 = vld [vmem:[%s4028_s13 + $0x1] sm:$0x1]  ;;  %p522_p3 = scmp.lt.s32.totalorder %s2527_s22, 1  ;;  %v4032_v20 = vlaneseq }
   0xf   : > { %2404 = vset.pattern.permute.xlu0 %v2430_v1  ;;  %2405 = vset.pattern.permute.xlu1 %v2430_v1  ;;  %v812_v2 = vld [vmem:[%s4027_s12] sm:$0x1]  ;;  %v813_v4 = vld [vmem:[%s4027_s12 + $0x1] sm:$0x1]  ;;  %v814_v5 = vld [vmem:[%s4027_s12 + $0x2] sm:$0x1] }
  0x10   : > { %970 = vperm.xlu0 %2404, %v815_v0   ;;  %991 = vperm.xlu1 %2405, %v812_v2   ;;  %v537_v6 = vld [vmem:[%s4017_s2] sm:$0x1]  ;;  %s2563_s30 = scalar_select %p522_p3, %s2527_s22, 1  ;;  %v2566_v24 = vshrl.u32 %v4032_v20, 7 }
  0x11   : > { %v542_v7 = vmul.f32 0.001953125, %v537_v6  ;;  %v538_v8 = vld [vmem:[%s4018_s3] sm:$0x1]  ;;  %s4124_s23 = sld [smem:[#allocation45_spill]]  ;;  %s2432_s19 = smov 127  }
  0x12   : > { %v543_v9 = vmul.f32 0.001953125, %v538_v8  ;;  %v691_v11 = vld [vmem:[%s4021_s6] sm:$0x1]  ;;  %4122 = vst [vmem:[#allocation2_spill] sm:$0xff] %v2566_v24  ;;  %s2259_s0 = sshll.u32 %s2563_s30, 8  ;;  %v2570_v26 = vsub.s32 0, %v2566_v24 }
  0x13   : > { %v544_v10 = vmul.f32 %v542_v7, %v542_v7  ;;  %v695_v13 = vmul.f32 0.001953125, %v691_v11  ;;  %v692_v14 = vld [vmem:[%s4022_s7] sm:$0x1]  ;;  %s2600_s18 = scalar_lea.vmem %s4016_s1, %s2259_s0  ;;  %s2261_s26 = sshll.u32 %s2563_s30, 9 }
  0x14   : > { %976 = vperm.xlu0 %2404, %v816_v3   ;;  %997 = vperm.xlu1 %2405, %v813_v4   ;;  %v696_v16 = vmul.f32 0.001953125, %v692_v14  ;;  %v539_v22 = vld [vmem:[%s4019_s4] sm:$0x1]  ;;  %4123 = vst [vmem:[#allocation3_spill] sm:$0xff] %v2570_v26  ;;  %v705_v49 = vld [vmem:[%s2600_s18 + $0x8] sm:$0xff]  ;;  %v706_v55 = vld [vmem:[%s2600_s18 + $0x10] sm:$0xff]  ;;  %s3532_s29 = scalar_lea.vmem %s4029_s14, %s2261_s26 }
  0x15   : > { %v545_v12 = vsub.f32 %v543_v9, %v544_v10  ;;  %v697_v17 = vmul.f32 %v695_v13, %v695_v13  ;;  %v540_v27 = vld [vmem:[%s4020_s5] sm:$0x1]  ;;  %v707_v62 = vld [vmem:[%s2600_s18 + $0x18] sm:$0xff]  ;;  %p2256_p4 = scmp.ne.s32.totalorder %s2527_s22, 0 }
  0x16   : > { %v693_v29 = vld [vmem:[%s4023_s8] sm:$0x1] }
  0x17   : > { %v546_v15 = vadd.f32 1e-05, %v545_v12  ;;  %v698_v18 = vsub.f32 %v696_v16, %v697_v17  ;;  %s2578_s24 = scalar_lea.vmem %s4124_s23, %s2259_s0  ;;  %v694_v40 = vld [vmem:[%s4024_s9] sm:$0x1]  ;;  %s2431_s0 = smov 1  }
  0x18   : > { %1004 = vperm.xlu0 %2404, %v814_v5   ;;  %v551_v32 = vld [vmem:[%s2578_s24] sm:$0xff]  ;;  %v552_v34 = vld [vmem:[%s2578_s24 + $0x8] sm:$0xff]  ;;  %v553_v37 = vld [vmem:[%s2578_s24 + $0x10] sm:$0xff] }
  0x19   : > { %2406 = vrsqrt.f32 %v546_v15  ;;  %v699_v19 = vadd.f32 1e-05, %v698_v18  ;;  %v554_v41 = vld [vmem:[%s2578_s24 + $0x18] sm:$0xff]  ;;  %v555_v44 = vld [vmem:[%s2578_s24 + $0x20] sm:$0xff]  ;;  %v556_v50 = vld [vmem:[%s2578_s24 + $0x28] sm:$0xff] }
  0x1a   : > { %v704_v48 = vld [vmem:[%s2600_s18] sm:$0xff]  ;;  %v557_v56 = vld [vmem:[%s2578_s24 + $0x30] sm:$0xff]  ;;  %v558_v63 = vld [vmem:[%s2578_s24 + $0x38] sm:$0xff] }
  0x1b   : > { %2408 = vrsqrt.f32 %v699_v19  ;;  %v708_v5 = vld [vmem:[%s2600_s18 + $0x20] sm:$0xff]  ;;  %v560_v14 = vld [vmem:[%s2578_s24 + $0x48] sm:$0xff]  ;;  %v577_v24 = vld [vmem:[%s2578_s24 + $0xd0] sm:$0xff] }
  0x1c   : > { %v559_v6 = vld [vmem:[%s2578_s24 + $0x40] sm:$0xff] }
  0x23   : > { %v2407_v21 = vpop.eup %2406 }
  0x24   : > { %v548_v23 = vmul.f32 %v2407_v21, %v539_v22  ;;  %v710_v22 = vld [vmem:[%s2600_s18 + $0x30] sm:$0xff] }
  0x25   : > { %v2409_v28 = vpop.eup %2408 }
  0x26   : > { %v549_v25 = vmul.f32 %v548_v23, %v542_v7  ;;  %v2584_v31 = vrot.slane %v548_v23, %v2570_v26  ;;  %v701_v33 = vmul.f32 %v2409_v28, %v693_v29  ;;  %v561_v23 = vld [vmem:[%s2578_s24 + $0x50] sm:$0xff] }
  0x28   : > { %v550_v30 = vsub.f32 %v540_v27, %v549_v25  ;;  %v589_v35 = vmul.f32 %v2584_v31, %v551_v32  ;;  %v590_v38 = vmul.f32 %v2584_v31, %v552_v34  ;;  %v702_v39 = vmul.f32 %v701_v33, %v695_v13  ;;  %v709_v13 = vld [vmem:[%s2600_s18 + $0x28] sm:$0xff]  ;;  %v711_v34 = vld [vmem:[%s2600_s18 + $0x38] sm:$0xff] }
  0x29   : > { %v591_v42 = vmul.f32 %v2584_v31, %v553_v37  ;;  %v2608_v47 = vrot.slane %v701_v33, %v2570_v26  ;;  %v592_v51 = vmul.f32 %v2584_v31, %v554_v41  ;;  %v593_v52 = vmul.f32 %v2584_v31, %v555_v44  ;;  %v712_v44 = vld [vmem:[%s2600_s18 + $0x40] sm:$0xff] }
  0x2a   : > { %v2590_v36 = vrot.slane %v550_v30, %v2570_v26  ;;  %v703_v46 = vsub.f32 %v694_v40, %v702_v39  ;;  %v594_v61 = vmul.f32 %v2584_v31, %v556_v50  ;;  %v595_v2 = vmul.f32 %v2584_v31, %v557_v56  ;;  %v564_v56 = vld [vmem:[%s2578_s24 + $0x68] sm:$0xff] }
  0x2b   : > { %v742_v58 = vmul.f32 %v2608_v47, %v704_v48  ;;  %v743_v59 = vmul.f32 %v2608_v47, %v705_v49  ;;  %v744_v1 = vmul.f32 %v2608_v47, %v706_v55  ;;  %v745_v7 = vmul.f32 %v2608_v47, %v707_v62  ;;  %v713_v55 = vld [vmem:[%s2600_s18 + $0x48] sm:$0xff] }
  0x2c   : > { %v627_v43 = vadd.f32 %v2590_v36, %v589_v35  ;;  %v628_v45 = vadd.f32 %v2590_v36, %v590_v38  ;;  %v629_v53 = vadd.f32 %v2590_v36, %v591_v42  ;;  %v2625_v60 = vrot.slane %v703_v46, %v2570_v26  ;;  %v562_v35 = vld [vmem:[%s2578_s24 + $0x58] sm:$0xff] }
  0x2d   : > { %v630_v0 = vadd.f32 %v2590_v36, %v592_v51  ;;  %v631_v3 = vadd.f32 %v2590_v36, %v593_v52  ;;  %v596_v11 = vmul.f32 %v2584_v31, %v558_v63  ;;  %v632_v12 = vadd.f32 %v2590_v36, %v594_v61 }
  0x2e   : > { %v2616_v54 = vmax.f32 %v627_v43, 0.0  ;;  %v2620_v57 = vmax.f32 %v628_v45, 0.0  ;;  %v2634_v4 = vmax.f32 %v629_v53, 0.0  ;;  %v2640_v8 = vadd.f32 %v2625_v60, %v742_v58  ;;  %v563_v45 = vld [vmem:[%s2578_s24 + $0x60] sm:$0xff] }
  0x2f   : > { %v2643_v9 = vadd.f32 %v2625_v60, %v743_v59  ;;  %v2651_v15 = vmax.f32 %v630_v0, 0.0  ;;  %v746_v16 = vmul.f32 %v2608_v47, %v708_v5  ;;  %v2655_v17 = vadd.f32 %v2625_v60, %v744_v1 }
  0x30   : > { %4125 = vst [vmem:[#allocation4_spill] sm:$0xff] %v2620_v57  ;;  %4126 = vst [vmem:[#allocation5_spill] sm:$0xff] %v2634_v4  ;;  %v819_v10 = vadd.f32 %v2620_v57, %v2616_v54  ;;  %v597_v18 = vmul.f32 %v2584_v31, %v559_v6  ;;  %v633_v19 = vadd.f32 %v2590_v36, %v595_v2  ;;  %v2659_v21 = vmax.f32 %v631_v3, 0.0  ;;  %v714_v2 = vld [vmem:[%s2600_s18 + $0x50] sm:$0xff] }
  0x31   : > { %4127 = vst [vmem:[#allocation6_spill] sm:$0xff] %v2651_v15  ;;  %v747_v25 = vmul.f32 %v2608_v47, %v709_v13  ;;  %v2665_v27 = vadd.f32 %v2625_v60, %v745_v7  ;;  %v1083_v29 = vadd.f32 %v2643_v9, %v2640_v8  ;;  %v598_v30 = vmul.f32 %v2584_v31, %v560_v14  ;;  %v565_v3 = vld [vmem:[%s2578_s24 + $0x70] sm:$0xff]  ;;  %v715_v14 = vld [vmem:[%s2600_s18 + $0x58] sm:$0xff] }
  0x32   : > { %4128 = vst [vmem:[#allocation7_spill] sm:$0xff] %v2659_v21  ;;  %v820_v28 = vadd.f32 %v819_v10, %v2634_v4  ;;  %v634_v32 = vadd.f32 %v2590_v36, %v596_v11  ;;  %v2672_v33 = vmax.f32 %v632_v12, 0.0  ;;  %v748_v37 = vmul.f32 %v2608_v47, %v710_v22 }
  0x33   : > { %v2678_v38 = vadd.f32 %v2625_v60, %v746_v16  ;;  %v1084_v40 = vadd.f32 %v1083_v29, %v2655_v17  ;;  %v599_v41 = vmul.f32 %v2584_v31, %v561_v23  ;;  %v635_v42 = vadd.f32 %v2590_v36, %v597_v18  ;;  %v566_v16 = vld [vmem:[%s2578_s24 + $0x78] sm:$0xff] }
  0x34   : > { %v821_v39 = vadd.f32 %v820_v28, %v2651_v15  ;;  %v2684_v43 = vmax.f32 %v633_v19, 0.0  ;;  %v749_v46 = vmul.f32 %v2608_v47, %v711_v34  ;;  %v2690_v48 = vadd.f32 %v2625_v60, %v747_v25 }
  0x35   : > { %v1085_v50 = vadd.f32 %v1084_v40, %v2665_v27  ;;  %v600_v51 = vmul.f32 %v2584_v31, %v562_v35  ;;  %v636_v52 = vadd.f32 %v2590_v36, %v598_v30  ;;  %v2696_v53 = vmax.f32 %v634_v32, 0.0  ;;  %v716_v30 = vld [vmem:[%s2600_s18 + $0x60] sm:$0xff] }
  0x36   : > { %v822_v49 = vadd.f32 %v821_v39, %v2659_v21  ;;  %v750_v58 = vmul.f32 %v2608_v47, %v712_v44  ;;  %v2702_v59 = vadd.f32 %v2625_v60, %v748_v37  ;;  %v601_v63 = vmul.f32 %v2584_v31, %v563_v45  ;;  %v567_v32 = vld [vmem:[%s2578_s24 + $0x80] sm:$0xff]  ;;  %v717_v44 = vld [vmem:[%s2600_s18 + $0x68] sm:$0xff] }
  0x37   : > { %v1086_v62 = vadd.f32 %v1085_v50, %v2678_v38  ;;  %v637_v0 = vadd.f32 %v2590_v36, %v599_v41  ;;  %v2708_v1 = vmax.f32 %v635_v42, 0.0  ;;  %v751_v5 = vmul.f32 %v2608_v47, %v713_v55  ;;  %v568_v45 = vld [vmem:[%s2578_s24 + $0x88] sm:$0xff] }
  0x38   : > { %v823_v61 = vadd.f32 %v822_v49, %v2672_v33  ;;  %v2714_v6 = vadd.f32 %v2625_v60, %v749_v46  ;;  %v602_v11 = vmul.f32 %v2584_v31, %v564_v56  ;;  %v638_v12 = vadd.f32 %v2590_v36, %v600_v51 }
  0x39   : > { %v1087_v10 = vadd.f32 %v1086_v62, %v2690_v48  ;;  %v2720_v13 = vmax.f32 %v636_v52, 0.0  ;;  %v752_v18 = vmul.f32 %v2608_v47, %v714_v2  ;;  %v2726_v19 = vadd.f32 %v2625_v60, %v750_v58  ;;  %v718_v58 = vld [vmem:[%s2600_s18 + $0x70] sm:$0xff] }
  0x3a   : > { %v824_v7 = vadd.f32 %v823_v61, %v2684_v43  ;;  %v603_v25 = vmul.f32 %v2584_v31, %v565_v3  ;;  %v639_v28 = vadd.f32 %v2590_v36, %v601_v63  ;;  %v2732_v29 = vmax.f32 %v637_v0, 0.0  ;;  %v569_v61 = vld [vmem:[%s2578_s24 + $0x90] sm:$0xff] }
  0x3b   : > { %v1088_v23 = vadd.f32 %v1087_v10, %v2702_v59  ;;  %v753_v34 = vmul.f32 %v2608_v47, %v715_v14  ;;  %v2738_v35 = vadd.f32 %v2625_v60, %v751_v5  ;;  %v604_v40 = vmul.f32 %v2584_v31, %v566_v16  ;;  %v719_v10 = vld [vmem:[%s2600_s18 + $0x78] sm:$0xff] }
  0x3c   : > { %v825_v22 = vadd.f32 %v824_v7, %v2696_v53  ;;  %v640_v41 = vadd.f32 %v2590_v36, %v602_v11  ;;  %v2744_v42 = vmax.f32 %v638_v12, 0.0  ;;  %v754_v46 = vmul.f32 %v2608_v47, %v716_v30  ;;  %v570_v11 = vld [vmem:[%s2578_s24 + $0x98] sm:$0xff]  ;;  %v571_v30 = vld [vmem:[%s2578_s24 + $0xa0] sm:$0xff] }
  0x3d   : > { %v1089_v39 = vadd.f32 %v1088_v23, %v2714_v6  ;;  %v2750_v49 = vadd.f32 %v2625_v60, %v752_v18  ;;  %v605_v52 = vmul.f32 %v2584_v31, %v567_v32  ;;  %v641_v55 = vadd.f32 %v2590_v36, %v603_v25 }
  0x3e   : > { %v826_v37 = vadd.f32 %v825_v22, %v2708_v1  ;;  %v2756_v56 = vmax.f32 %v639_v28, 0.0  ;;  %v755_v62 = vmul.f32 %v2608_v47, %v717_v44  ;;  %v2762_v63 = vadd.f32 %v2625_v60, %v753_v34  ;;  %v720_v28 = vld [vmem:[%s2600_s18 + $0x80] sm:$0xff] }
  0x3f   : > { %v1090_v51 = vadd.f32 %v1089_v39, %v2726_v19  ;;  %v606_v3 = vmul.f32 %v2584_v31, %v568_v45  ;;  %v642_v5 = vadd.f32 %v2590_v36, %v604_v40  ;;  %v2768_v7 = vmax.f32 %v640_v41, 0.0  ;;  %v721_v45 = vld [vmem:[%s2600_s18 + $0x88] sm:$0xff] }
  0x40   : > { %v827_v50 = vadd.f32 %v826_v37, %v2720_v13  ;;  %4129 = vst [vmem:[#allocation8_spill] sm:$0xff] %v2756_v56  ;;  %4130 = vst [vmem:[#allocation9_spill] sm:$0xff] %v2762_v63  ;;  %v756_v12 = vmul.f32 %v2608_v47, %v718_v58  ;;  %v2774_v14 = vadd.f32 %v2625_v60, %v754_v46  ;;  %v2780_v25 = vmax.f32 %v641_v55, 0.0  ;;  %v572_v46 = vld [vmem:[%s2578_s24 + $0xa8] sm:$0xff] }
  0x41   : > { %v1091_v2 = vadd.f32 %v1090_v51, %v2738_v35  ;;  %4131 = vst [vmem:[#allocation10_spill] sm:$0xff] %v2768_v7  ;;  %v607_v22 = vmul.f32 %v2584_v31, %v569_v61  ;;  %v643_v23 = vadd.f32 %v2590_v36, %v605_v52  ;;  %v757_v32 = vmul.f32 %v2608_v47, %v719_v10 }
  0x42   : > { %v828_v0 = vadd.f32 %v827_v50, %v2732_v29  ;;  %4132 = vst [vmem:[#allocation11_spill] sm:$0xff] %v2774_v14  ;;  %4133 = vst [vmem:[#allocation12_spill] sm:$0xff] %v2780_v25  ;;  %v2786_v34 = vadd.f32 %v2625_v60, %v755_v62  ;;  %v608_v40 = vmul.f32 %v2584_v31, %v570_v11  ;;  %v2792_v44 = vmax.f32 %v642_v5, 0.0 }
  0x43   : > { %v1092_v18 = vadd.f32 %v1091_v2, %v2750_v49  ;;  %v644_v41 = vadd.f32 %v2590_v36, %v606_v3  ;;  %v758_v50 = vmul.f32 %v2608_v47, %v720_v28  ;;  %v2798_v51 = vadd.f32 %v2625_v60, %v756_v12  ;;  %v573_v2 = vld [vmem:[%s2578_s24 + $0xb0] sm:$0xff] }
  0x44   : > { %v829_v16 = vadd.f32 %v828_v0, %v2744_v42  ;;  %4134 = vst [vmem:[#allocation13_spill] sm:$0xff] %v2786_v34  ;;  %v609_v58 = vmul.f32 %v2584_v31, %v571_v30  ;;  %v645_v61 = vadd.f32 %v2590_v36, %v607_v22  ;;  %v2804_v62 = vmax.f32 %v643_v23, 0.0  ;;  %v722_v0 = vld [vmem:[%s2600_s18 + $0x90] sm:$0xff]  ;;  %v723_v22 = vld [vmem:[%s2600_s18 + $0x98] sm:$0xff] }
  0x45   : > { %v1093_v39 = vadd.f32 %v1092_v18, %v2762_v63  ;;  %4135 = vst [vmem:[#allocation14_spill] sm:$0xff] %v2798_v51  ;;  %v759_v3 = vmul.f32 %v2608_v47, %v721_v45  ;;  %v2810_v5 = vadd.f32 %v2625_v60, %v757_v32  ;;  %v610_v12 = vmul.f32 %v2584_v31, %v572_v46  ;;  %v574_v23 = vld [vmem:[%s2578_s24 + $0xb8] sm:$0xff]  ;;  %v575_v46 = vld [vmem:[%s2578_s24 + $0xc0] sm:$0xff] }
  0x46   : > { %v830_v37 = vadd.f32 %v829_v16, %v2756_v56  ;;  %v646_v16 = vadd.f32 %v2590_v36, %v608_v40  ;;  %v2816_v18 = vmax.f32 %v644_v41, 0.0  ;;  %v760_v28 = vmul.f32 %v2608_v47, %v722_v0  ;;  %v724_v41 = vld [vmem:[%s2600_s18 + $0xa0] sm:$0xff] }
  0x47   : > { %v1094_v55 = vadd.f32 %v1093_v39, %v2774_v14  ;;  %4136 = vst [vmem:[#allocation15_spill] sm:$0xff] %v2810_v5  ;;  %v2822_v30 = vadd.f32 %v2625_v60, %v758_v50  ;;  %v611_v39 = vmul.f32 %v2584_v31, %v573_v2  ;;  %v647_v45 = vadd.f32 %v2590_v36, %v609_v58 }
  0x48   : > { %v831_v52 = vadd.f32 %v830_v37, %v2768_v7  ;;  %v2828_v40 = vmax.f32 %v645_v61, 0.0  ;;  %v648_v2 = vadd.f32 %v2590_v36, %v610_v12  ;;  %v2840_v58 = vmax.f32 %v646_v16, 0.0  ;;  %v725_v61 = vld [vmem:[%s2600_s18 + $0xa8] sm:$0xff]  ;;  %v726_v16 = vld [vmem:[%s2600_s18 + $0xb0] sm:$0xff] }
  0x49   : > { %v1095_v11 = vadd.f32 %v1094_v55, %v2786_v34  ;;  %4137 = vst [vmem:[#allocation16_spill] sm:$0xff] %v2822_v30  ;;  %v2834_v55 = vadd.f32 %v2625_v60, %v759_v3  ;;  %v762_v20 = vmul.f32 %v2608_v47, %v724_v41  ;;  %v2852_v12 = vmax.f32 %v647_v45, 0.0  ;;  %v727_v45 = vld [vmem:[%s2600_s18 + $0xb8] sm:$0xff] }
  0x4a   : > { %v832_v10 = vadd.f32 %v831_v52, %v2780_v25  ;;  %4138 = vst [vmem:[#allocation17_spill] sm:$0xff] %v2828_v40  ;;  %v761_v52 = vmul.f32 %v2608_v47, %v723_v22  ;;  %4140 = vst [vmem:[#allocation19_spill] sm:$0xff] %v2840_v58  ;;  %v2846_v22 = vadd.f32 %v2625_v60, %v760_v28 }
  0x4b   : > { %v1096_v37 = vadd.f32 %v1095_v11, %v2798_v51  ;;  %4139 = vst [vmem:[#allocation18_spill] sm:$0xff] %v2834_v55  ;;  %v576_v11 = vld [vmem:[%s2578_s24 + $0xc8] sm:$0xff]  ;;  %4142 = vst [vmem:[#allocation21_spill] sm:$0xff] %v2852_v12  ;;  %v763_v26 = vmul.f32 %v2608_v47, %v725_v61  ;;  %v2870_v61 = vadd.f32 %v2625_v60, %v762_v20 }
  0x4c   : > { %v833_v32 = vadd.f32 %v832_v10, %v2792_v44  ;;  %v612_v10 = vmul.f32 %v2584_v31, %v574_v23  ;;  %4141 = vst [vmem:[#allocation20_spill] sm:$0xff] %v2846_v22  ;;  %v649_v23 = vadd.f32 %v2590_v36, %v611_v39  ;;  %v2858_v41 = vadd.f32 %v2625_v60, %v761_v52 }
  0x4d   : > { %v1097_v0 = vadd.f32 %v1096_v37, %v2810_v5  ;;  %v613_v37 = vmul.f32 %v2584_v31, %v575_v46  ;;  %v2864_v39 = vmax.f32 %v648_v2, 0.0  ;;  %v764_v5 = vmul.f32 %v2608_v47, %v726_v16  ;;  %4145 = vst [vmem:[#allocation24_spill] sm:$0xff] %v2870_v61  ;;  %v728_v2 = vld [vmem:[%s2600_s18 + $0xc0] sm:$0xff] }
  0x4e   : > { %v834_v50 = vadd.f32 %v833_v32, %v2804_v62  ;;  %4143 = vst [vmem:[#allocation22_spill] sm:$0xff] %v2858_v41  ;;  %v650_v46 = vadd.f32 %v2590_v36, %v612_v10  ;;  %v2876_v10 = vmax.f32 %v649_v23, 0.0  ;;  %v765_v51 = vmul.f32 %v2608_v47, %v727_v45  ;;  %v729_v23 = vld [vmem:[%s2600_s18 + $0xc8] sm:$0xff] }
  0x4f   : > { %v1098_v32 = vadd.f32 %v1097_v0, %v2822_v30  ;;  %v614_v0 = vmul.f32 %v2584_v31, %v576_v11  ;;  %4144 = vst [vmem:[#allocation23_spill] sm:$0xff] %v2864_v39  ;;  %v578_v30 = vld [vmem:[%s2578_s24 + $0xd8] sm:$0xff]  ;;  %v651_v11 = vadd.f32 %v2590_v36, %v613_v37  ;;  %v2882_v16 = vadd.f32 %v2625_v60, %v763_v26 }
  0x50   : > { %v835_v3 = vadd.f32 %v834_v50, %v2816_v18  ;;  %4146 = vst [vmem:[#allocation25_spill] sm:$0xff] %v2876_v10  ;;  %v2888_v37 = vmax.f32 %v650_v46, 0.0  ;;  %v766_v34 = vmul.f32 %v2608_v47, %v728_v2  ;;  %v2894_v45 = vadd.f32 %v2625_v60, %v764_v5  ;;  %v730_v46 = vld [vmem:[%s2600_s18 + $0xd0] sm:$0xff] }
  0x51   : > { %v1099_v50 = vadd.f32 %v1098_v32, %v2834_v55  ;;  %v615_v32 = vmul.f32 %v2584_v31, %v577_v24  ;;  %v579_v55 = vld [vmem:[%s2578_s24 + $0xe0] sm:$0xff]  ;;  %4147 = vst [vmem:[#allocation26_spill] sm:$0xff] %v2882_v16  ;;  %v652_v24 = vadd.f32 %v2590_v36, %v614_v0  ;;  %v2900_v0 = vmax.f32 %v651_v11, 0.0  ;;  %v731_v11 = vld [vmem:[%s2600_s18 + $0xd8] sm:$0xff] }
  0x52   : > { %v836_v28 = vadd.f32 %v835_v3, %v2828_v40  ;;  %4148 = vst [vmem:[#allocation27_spill] sm:$0xff] %v2888_v37  ;;  %4149 = vst [vmem:[#allocation28_spill] sm:$0xff] %v2894_v45  ;;  %v767_v14 = vmul.f32 %v2608_v47, %v729_v23  ;;  %v2906_v2 = vadd.f32 %v2625_v60, %v765_v51 }
  0x53   : > { %v1100_v3 = vadd.f32 %v1099_v50, %v2846_v22  ;;  %v616_v50 = vmul.f32 %v2584_v31, %v578_v30  ;;  %v580_v22 = vld [vmem:[%s2578_s24 + $0xe8] sm:$0xff]  ;;  %v653_v30 = vadd.f32 %v2590_v36, %v615_v32  ;;  %4150 = vst [vmem:[#allocation29_spill] sm:$0xff] %v2900_v0  ;;  %v582_v32 = vld [vmem:[%s2578_s24 + $0xf8] sm:$0xff]  ;;  %v2918_v23 = vadd.f32 %v2625_v60, %v766_v34 }
  0x54   : > { %v837_v52 = vadd.f32 %v836_v28, %v2840_v58  ;;  %4151 = vst [vmem:[#allocation30_spill] sm:$0xff] %v2906_v2  ;;  %v620_v34 = vmul.f32 %v2584_v31, %v582_v32 }
  0x55   : > { %v1101_v28 = vadd.f32 %v1100_v3, %v2858_v41  ;;  %v617_v3 = vmul.f32 %v2584_v31, %v579_v55  ;;  %v581_v41 = vld [vmem:[%s2578_s24 + $0xf0] sm:$0xff]  ;;  %v2912_v55 = vmax.f32 %v652_v24, 0.0  ;;  %4153 = vst [vmem:[#allocation32_spill] sm:$0xff] %v2918_v23 }
  0x56   : > { %v838_v20 = vadd.f32 %v837_v52, %v2852_v12 }
  0x57   : > { %v1102_v52 = vadd.f32 %v1101_v28, %v2870_v61  ;;  %v654_v28 = vadd.f32 %v2590_v36, %v616_v50  ;;  %4152 = vst [vmem:[#allocation31_spill] sm:$0xff] %v2912_v55  ;;  %v768_v61 = vmul.f32 %v2608_v47, %v730_v46  ;;  %v2927_v50 = vadd.f32 %v2625_v60, %v767_v14 }
  0x58   : > { %v839_v26 = vadd.f32 %v838_v20, %v2864_v39  ;;  %v618_v20 = vmul.f32 %v2584_v31, %v580_v22  ;;  %v655_v22 = vadd.f32 %v2590_v36, %v617_v3 }
  0x59   : > { %v1103_v63 = vadd.f32 %v1102_v52, %v2882_v16  ;;  %v619_v52 = vmul.f32 %v2584_v31, %v581_v41  ;;  %v2924_v16 = vmax.f32 %v653_v30, 0.0  ;;  %4155 = vst [vmem:[#allocation34_spill] sm:$0xff] %v2927_v50  ;;  %v732_v41 = vld [vmem:[%s2600_s18 + $0xe0] sm:$0xff]  ;;  %v2938_v3 = vadd.f32 %v2625_v60, %v768_v61 }
  0x5a   : > { %v840_v5 = vadd.f32 %v839_v26, %v2876_v10  ;;  %v658_v61 = vadd.f32 %v2590_v36, %v620_v34  ;;  %v734_v34 = vld [vmem:[%s2600_s18 + $0xf0] sm:$0xff] }
  0x5b   : > { %v1104_v26 = vadd.f32 %v1103_v63, %v2894_v45  ;;  %4154 = vst [vmem:[#allocation33_spill] sm:$0xff] %v2924_v16  ;;  %v769_v63 = vmul.f32 %v2608_v47, %v731_v11  ;;  %v2934_v45 = vmax.f32 %v654_v28, 0.0  ;;  %4157 = vst [vmem:[#allocation36_spill] sm:$0xff] %v2938_v3  ;;  %v770_v28 = vmul.f32 %v2608_v47, %v732_v41 }
  0x5c   : > { %v841_v51 = vadd.f32 %v840_v5, %v2888_v37  ;;  %v656_v5 = vadd.f32 %v2590_v36, %v618_v20 }
  0x5d   : > { %v1105_v46 = vadd.f32 %v1104_v26, %v2906_v2  ;;  %4156 = vst [vmem:[#allocation35_spill] sm:$0xff] %v2934_v45  ;;  %v2943_v26 = vmax.f32 %v655_v22, 0.0  ;;  %v2949_v32 = vadd.f32 %v2625_v60, %v769_v63  ;;  %v2962_v41 = vadd.f32 %v2625_v60, %v770_v28 }
  0x5e   : > { %v842_v24 = vadd.f32 %v841_v51, %v2900_v0  ;;  %v657_v51 = vadd.f32 %v2590_v36, %v619_v52  ;;  %v2952_v11 = vmax.f32 %v656_v5, 0.0  ;;  %v2965_v36 = vmax.f32 %v658_v61, 0.0 }
  0x5f   : > { %v1106_v30 = vadd.f32 %v1105_v46, %v2918_v23  ;;  %4158 = vst [vmem:[#allocation37_spill] sm:$0xff] %v2943_v26  ;;  %4159 = vst [vmem:[#allocation38_spill] sm:$0xff] %v2949_v32 }
  0x60   : > { %v843_v14 = vadd.f32 %v842_v24, %v2912_v55  ;;  %4160 = vst [vmem:[#allocation39_spill] sm:$0xff] %v2952_v11  ;;  %v733_v24 = vld [vmem:[%s2600_s18 + $0xe8] sm:$0xff]  ;;  %v2957_v46 = vmax.f32 %v657_v51, 0.0  ;;  %4162 = vst [vmem:[#allocation41_spill] sm:$0xff] %v2962_v41 }
  0x61   : > { %v1107_v20 = vadd.f32 %v1106_v30, %v2927_v50  ;;  %v771_v30 = vmul.f32 %v2608_v47, %v733_v24  ;;  %4163 = vst [vmem:[#allocation42_spill] sm:$0xff] %v2965_v36  ;;  %v735_v24 = vld [vmem:[%s2600_s18 + $0xf8] sm:$0xff] }
  0x62   : > { %v844_v31 = vadd.f32 %v843_v14, %v2924_v16  ;;  %4161 = vst [vmem:[#allocation40_spill] sm:$0xff] %v2957_v46 }
  0x63   : > { %v1108_v22 = vadd.f32 %v1107_v20, %v2938_v3  ;;  %v772_v20 = vmul.f32 %v2608_v47, %v734_v34  ;;  %v2972_v51 = vadd.f32 %v2625_v60, %v771_v30 }
  0x64   : > { %v845_v52 = vadd.f32 %v844_v31, %v2934_v45 }
  0x65   : > { %v1109_v63 = vadd.f32 %v1108_v22, %v2949_v32  ;;  %4164 = vst [vmem:[#allocation43_spill] sm:$0xff] %v2972_v51  ;;  %v773_v22 = vmul.f32 %v2608_v47, %v735_v24  ;;  %v2979_v61 = vadd.f32 %v2625_v60, %v772_v20 }
  0x66   : > { %v846_v14 = vadd.f32 %v845_v52, %v2943_v26 }
  0x67   : > { %v1110_v52 = vadd.f32 %v1109_v63, %v2962_v41  ;;  %4165 = vst [vmem:[#allocation44_spill] sm:$0xff] %v2979_v61  ;;  %v2983_v34 = vadd.f32 %v2625_v60, %v773_v22 }
  0x68   : > { %v847_v5 = vadd.f32 %v846_v14, %v2952_v11 }
  0x69   : > { %v1111_v14 = vadd.f32 %v1110_v52, %v2972_v51 }
  0x6a   : > { %v848_v31 = vadd.f32 %v847_v5, %v2957_v46 }
  0x6b   : > { %v1112_v30 = vadd.f32 %v1111_v14, %v2979_v61 }
  0x6c   : > { %v849_v28 = vadd.f32 %v848_v31, %v2965_v36 }
  0x6d   : > { %v1113_v63 = vadd.f32 %v1112_v30, %v2983_v34 }
  0x6e   : > { %v850_v3 = vrot.slane %v849_v28, 4 }
  0x6f   : > { %v1114_v31 = vrot.slane %v1113_v63, 4 }
  0x70   : > { %v851_v32 = vadd.f32 %v850_v3, %v849_v28 }
  0x71   : > { %v1115_v2 = vadd.f32 %v1114_v31, %v1113_v63 }
  0x72   : > { %v852_v5 = vrot.slane %v851_v32, 2 }
  0x73   : > { %v1116_v20 = vrot.slane %v1115_v2, 2 }
  0x74   : > { %v853_v50 = vadd.f32 %v852_v5, %v851_v32 }
  0x75   : > { %v1117_v24 = vadd.f32 %v1116_v20, %v1115_v2 }
  0x76   : > { %v854_v41 = vrot.slane %v853_v50, 1 }
  0x78   : > { %v855_v23 = vadd.f32 %v854_v41, %v853_v50  ;;  %v1118_v41 = vrot.slane %v1117_v24, 1 }
  0x7a   : > { %v2987_v47 = vmul.f32 0.00390625, %v855_v23  ;;  %v1119_v20 = vadd.f32 %v1118_v41, %v1117_v24 }
  0x7c   : > { %v858_v52 = vsub.f32 %v2616_v54, %v2987_v47  ;;  %v859_v3 = vsub.f32 %v2620_v57, %v2987_v47  ;;  %v860_v60 = vsub.f32 %v2634_v4, %v2987_v47  ;;  %v861_v32 = vsub.f32 %v2651_v15, %v2987_v47 }
  0x7d   : > { %v862_v23 = vsub.f32 %v2659_v21, %v2987_v47  ;;  %v863_v14 = vsub.f32 %v2672_v33, %v2987_v47  ;;  %v864_v63 = vsub.f32 %v2684_v43, %v2987_v47  ;;  %v3007_v57 = vmul.f32 0.00390625, %v1119_v20 }
  0x7e   : > { %v890_v28 = vmul.f32 %v858_v52, %v858_v52  ;;  %v891_v22 = vmul.f32 %v859_v3, %v859_v3  ;;  %v892_v50 = vmul.f32 %v860_v60, %v860_v60  ;;  %v893_v5 = vmul.f32 %v861_v32, %v861_v32 }
  0x7f   : > { %v894_v31 = vmul.f32 %v862_v23, %v862_v23  ;;  %v865_v52 = vsub.f32 %v2696_v53, %v2987_v47  ;;  %v895_v3 = vmul.f32 %v863_v14, %v863_v14  ;;  %v866_v60 = vsub.f32 %v2708_v1, %v2987_v47 }
  0x80   : > { %v922_v30 = vadd.f32 %v891_v22, %v890_v28  ;;  %v896_v21 = vmul.f32 %v864_v63, %v864_v63  ;;  %v867_v32 = vsub.f32 %v2720_v13, %v2987_v47  ;;  %v868_v24 = vsub.f32 %v2732_v29, %v2987_v47 }
  0x81   : > { %v897_v28 = vmul.f32 %v865_v52, %v865_v52  ;;  %v898_v23 = vmul.f32 %v866_v60, %v866_v60  ;;  %v1121_v41 = vsub.f32 %v2640_v8, %v3007_v57  ;;  %v1122_v14 = vsub.f32 %v2643_v9, %v3007_v57 }
  0x82   : > { %v923_v2 = vadd.f32 %v922_v30, %v892_v50  ;;  %v1123_v63 = vsub.f32 %v2655_v17, %v3007_v57 }
  0x83   : > { %v1153_v20 = vmul.f32 %v1121_v41, %v1121_v41  ;;  %v1154_v52 = vmul.f32 %v1122_v14, %v1122_v14  ;;  %v873_v14 = vsub.f32 %v2792_v44, %v2987_v47 }
  0x84   : > { %v924_v15 = vadd.f32 %v923_v2, %v893_v5  ;;  %v899_v5 = vmul.f32 %v867_v32, %v867_v32  ;;  %v1125_v32 = vsub.f32 %v2678_v38, %v3007_v57 }
  0x85   : > { %v1185_v41 = vadd.f32 %v1154_v52, %v1153_v20  ;;  %v875_v52 = vsub.f32 %v2816_v18, %v2987_v47 }
  0x86   : > { %v925_v4 = vadd.f32 %v924_v15, %v894_v31  ;;  %v869_v15 = vsub.f32 %v2744_v42, %v2987_v47  ;;  %v900_v31 = vmul.f32 %v868_v24, %v868_v24 }
  0x88   : > { %v926_v22 = vadd.f32 %v925_v4, %v895_v3  ;;  %v870_v4 = vsub.f32 %v2756_v56, %v2987_v47  ;;  %v871_v3 = vsub.f32 %v2768_v7, %v2987_v47  ;;  %v901_v60 = vmul.f32 %v869_v15, %v869_v15 }
  0x8a   : > { %v927_v50 = vadd.f32 %v926_v22, %v896_v21  ;;  %v1124_v21 = vsub.f32 %v2665_v27, %v3007_v57  ;;  %v902_v56 = vmul.f32 %v870_v4, %v870_v4  ;;  %v903_v7 = vmul.f32 %v871_v3, %v871_v3 }
  0x8b   : > { %v905_v3 = vmul.f32 %v873_v14, %v873_v14  ;;  %v907_v14 = vmul.f32 %v875_v52, %v875_v52 }
  0x8c   : > { %v928_v30 = vadd.f32 %v927_v50, %v897_v28  ;;  %v1155_v28 = vmul.f32 %v1123_v63, %v1123_v63  ;;  %v872_v50 = vsub.f32 %v2780_v25, %v2987_v47  ;;  %v874_v25 = vsub.f32 %v2804_v62, %v2987_v47 }
  0x8e   : > { %v929_v2 = vadd.f32 %v928_v30, %v898_v23  ;;  %v1126_v23 = vsub.f32 %v2690_v48, %v3007_v57  ;;  %v1156_v30 = vmul.f32 %v1124_v21, %v1124_v21  ;;  %v1186_v63 = vadd.f32 %v1185_v41, %v1155_v28 }
  0x8f   : > { %v904_v4 = vmul.f32 %v872_v50, %v872_v50  ;;  %v876_v41 = vsub.f32 %v2828_v40, %v2987_v47  ;;  %v906_v50 = vmul.f32 %v874_v25, %v874_v25 }
  0x90   : > { %v930_v22 = vadd.f32 %v929_v2, %v899_v5  ;;  %v1127_v5 = vsub.f32 %v2702_v59, %v3007_v57  ;;  %v1157_v2 = vmul.f32 %v1125_v32, %v1125_v32  ;;  %v1158_v21 = vmul.f32 %v1126_v23, %v1126_v23 }
  0x91   : > { %v1187_v20 = vadd.f32 %v1186_v63, %v1156_v30  ;;  %v877_v63 = vsub.f32 %v2840_v58, %v2987_v47  ;;  %v908_v25 = vmul.f32 %v876_v41, %v876_v41 }
  0x92   : > { %v931_v24 = vadd.f32 %v930_v22, %v900_v31  ;;  %v1128_v22 = vsub.f32 %v2714_v6, %v3007_v57  ;;  %v1159_v32 = vmul.f32 %v1127_v5, %v1127_v5 }
  0x93   : > { %v1188_v28 = vadd.f32 %v1187_v20, %v1157_v2  ;;  %v878_v20 = vsub.f32 %v2852_v12, %v2987_v47  ;;  %v909_v52 = vmul.f32 %v877_v63, %v877_v63 }
  0x94   : > { %v932_v15 = vadd.f32 %v931_v24, %v901_v60  ;;  %v1129_v24 = vsub.f32 %v2726_v19, %v3007_v57  ;;  %v1160_v23 = vmul.f32 %v1128_v22, %v1128_v22 }
  0x95   : > { %v1189_v30 = vadd.f32 %v1188_v28, %v1158_v21  ;;  %v879_v28 = vsub.f32 %v2864_v39, %v2987_v47  ;;  %v910_v41 = vmul.f32 %v878_v20, %v878_v20 }
  0x96   : > { %v933_v31 = vadd.f32 %v932_v15, %v902_v56  ;;  %v1130_v15 = vsub.f32 %v2738_v35, %v3007_v57  ;;  %v1161_v5 = vmul.f32 %v1129_v24, %v1129_v24 }
  0x97   : > { %v1190_v2 = vadd.f32 %v1189_v30, %v1159_v32  ;;  %v880_v30 = vsub.f32 %v2876_v10, %v2987_v47  ;;  %v911_v63 = vmul.f32 %v879_v28, %v879_v28 }
  0x98   : > { %v934_v60 = vadd.f32 %v933_v31, %v903_v7  ;;  %v1131_v31 = vsub.f32 %v2750_v49, %v3007_v57  ;;  %v1162_v22 = vmul.f32 %v1130_v15, %v1130_v15 }
  0x99   : > { %v1191_v21 = vadd.f32 %v1190_v2, %v1160_v23  ;;  %v881_v2 = vsub.f32 %v2888_v37, %v2987_v47  ;;  %v912_v20 = vmul.f32 %v880_v30, %v880_v30 }
  0x9a   : > { %v935_v56 = vadd.f32 %v934_v60, %v904_v4  ;;  %v4166_v60 = vld [vmem:[#allocation9_spill] sm:$0xff]  ;;  %v1163_v24 = vmul.f32 %v1131_v31, %v1131_v31 }
  0x9b   : > { %v1132_v40 = vsub.f32 %v4166_v60, %v3007_v57  ;;  %v1192_v32 = vadd.f32 %v1191_v21, %v1161_v5  ;;  %v882_v21 = vsub.f32 %v2900_v0, %v2987_v47  ;;  %v913_v28 = vmul.f32 %v881_v2, %v881_v2 }
  0x9c   : > { %v936_v7 = vadd.f32 %v935_v56, %v905_v3  ;;  %v4167_v56 = vld [vmem:[#allocation11_spill] sm:$0xff] }
  0x9d   : > { %v1133_v58 = vsub.f32 %v4167_v56, %v3007_v57  ;;  %v1164_v15 = vmul.f32 %v1132_v40, %v1132_v40  ;;  %v1193_v23 = vadd.f32 %v1192_v32, %v1162_v22  ;;  %v883_v32 = vsub.f32 %v2912_v55, %v2987_v47 }
  0x9e   : > { %v937_v4 = vadd.f32 %v936_v7, %v906_v50  ;;  %v4168_v7 = vld [vmem:[#allocation13_spill] sm:$0xff]  ;;  %v914_v30 = vmul.f32 %v882_v21, %v882_v21 }
  0x9f   : > { %v1134_v12 = vsub.f32 %v4168_v7, %v3007_v57  ;;  %v1165_v31 = vmul.f32 %v1133_v58, %v1133_v58  ;;  %v1194_v5 = vadd.f32 %v1193_v23, %v1163_v24  ;;  %v884_v23 = vsub.f32 %v2924_v16, %v2987_v47 }
  0xa0   : > { %v938_v3 = vadd.f32 %v937_v4, %v907_v14  ;;  %v4169_v4 = vld [vmem:[#allocation14_spill] sm:$0xff]  ;;  %v915_v2 = vmul.f32 %v883_v32, %v883_v32 }
  0xa1   : > { %v1135_v39 = vsub.f32 %v4169_v4, %v3007_v57  ;;  %v1166_v40 = vmul.f32 %v1134_v12, %v1134_v12  ;;  %v1195_v22 = vadd.f32 %v1194_v5, %v1164_v15  ;;  %v885_v5 = vsub.f32 %v2934_v45, %v2987_v47 }
  0xa2   : > { %v939_v50 = vadd.f32 %v938_v3, %v908_v25  ;;  %v4170_v3 = vld [vmem:[#allocation15_spill] sm:$0xff]  ;;  %v916_v21 = vmul.f32 %v884_v23, %v884_v23 }
  0xa3   : > { %v1136_v10 = vsub.f32 %v4170_v3, %v3007_v57  ;;  %v1167_v58 = vmul.f32 %v1135_v39, %v1135_v39  ;;  %v1196_v24 = vadd.f32 %v1195_v22, %v1165_v31  ;;  %v886_v22 = vsub.f32 %v2943_v26, %v2987_v47 }
  0xa4   : > { %v940_v14 = vadd.f32 %v939_v50, %v909_v52  ;;  %v4171_v50 = vld [vmem:[#allocation16_spill] sm:$0xff]  ;;  %v917_v32 = vmul.f32 %v885_v5, %v885_v5 }
  0xa5   : > { %v1137_v37 = vsub.f32 %v4171_v50, %v3007_v57  ;;  %v1168_v12 = vmul.f32 %v1136_v10, %v1136_v10  ;;  %v1197_v15 = vadd.f32 %v1196_v24, %v1166_v40  ;;  %v887_v24 = vsub.f32 %v2952_v11, %v2987_v47 }
  0xa6   : > { %v941_v25 = vadd.f32 %v940_v14, %v910_v41  ;;  %v4172_v14 = vld [vmem:[#allocation18_spill] sm:$0xff]  ;;  %v918_v23 = vmul.f32 %v886_v22, %v886_v22 }
  0xa7   : > { %v1138_v0 = vsub.f32 %v4172_v14, %v3007_v57  ;;  %v1169_v39 = vmul.f32 %v1137_v37, %v1137_v37  ;;  %v1198_v31 = vadd.f32 %v1197_v15, %v1167_v58  ;;  %v888_v15 = vsub.f32 %v2957_v46, %v2987_v47  ;;  %v4178_v22 = vld [vmem:[#allocation30_spill] sm:$0xff] }
  0xa8   : > { %v942_v52 = vadd.f32 %v941_v25, %v911_v63  ;;  %v4173_v25 = vld [vmem:[#allocation20_spill] sm:$0xff]  ;;  %v919_v5 = vmul.f32 %v887_v24, %v887_v24 }
  0xa9   : > { %v1139_v55 = vsub.f32 %v4173_v25, %v3007_v57  ;;  %v1170_v10 = vmul.f32 %v1138_v0, %v1138_v0  ;;  %v1199_v40 = vadd.f32 %v1198_v31, %v1168_v12  ;;  %v889_v31 = vsub.f32 %v2965_v36, %v2987_v47 }
  0xaa   : > { %v943_v41 = vadd.f32 %v942_v52, %v912_v20  ;;  %v4174_v52 = vld [vmem:[#allocation22_spill] sm:$0xff] }
  0xab   : > { %v1140_v16 = vsub.f32 %v4174_v52, %v3007_v57  ;;  %v1171_v37 = vmul.f32 %v1139_v55, %v1139_v55  ;;  %v1200_v58 = vadd.f32 %v1199_v40, %v1169_v39  ;;  %v920_v40 = vmul.f32 %v888_v15, %v888_v15 }
  0xac   : > { %v944_v63 = vadd.f32 %v943_v41, %v913_v28  ;;  %v4175_v41 = vld [vmem:[#allocation24_spill] sm:$0xff] }
  0xad   : > { %v1141_v45 = vsub.f32 %v4175_v41, %v3007_v57  ;;  %v1172_v0 = vmul.f32 %v1140_v16, %v1140_v16  ;;  %v1201_v12 = vadd.f32 %v1200_v58, %v1170_v10  ;;  %v4179_v10 = vld [vmem:[#allocation32_spill] sm:$0xff] }
  0xae   : > { %v945_v20 = vadd.f32 %v944_v63, %v914_v30  ;;  %v4176_v63 = vld [vmem:[#allocation26_spill] sm:$0xff]  ;;  %v1145_v58 = vsub.f32 %v4179_v10, %v3007_v57 }
  0xaf   : > { %v1142_v26 = vsub.f32 %v4176_v63, %v3007_v57  ;;  %v1173_v55 = vmul.f32 %v1141_v45, %v1141_v45  ;;  %v1202_v39 = vadd.f32 %v1201_v12, %v1171_v37  ;;  %v921_v63 = vmul.f32 %v889_v31, %v889_v31 }
  0xb0   : > { %v946_v28 = vadd.f32 %v945_v20, %v915_v2  ;;  %v4177_v20 = vld [vmem:[#allocation28_spill] sm:$0xff] }
  0xb1   : > { %v1143_v11 = vsub.f32 %v4177_v20, %v3007_v57  ;;  %v1203_v46 = vadd.f32 %v1202_v39, %v1172_v0 }
  0xb2   : > { %v947_v30 = vadd.f32 %v946_v28, %v916_v21  ;;  %v1144_v21 = vsub.f32 %v4178_v22, %v3007_v57  ;;  %v1174_v28 = vmul.f32 %v1142_v26, %v1142_v26 }
  0xb3   : > { %v1175_v36 = vmul.f32 %v1143_v11, %v1143_v11  ;;  %v1204_v24 = vadd.f32 %v1203_v46, %v1173_v55  ;;  %v4183_v46 = vld [vmem:[#allocation41_spill] sm:$0xff] }
  0xb4   : > { %v948_v2 = vadd.f32 %v947_v30, %v917_v32  ;;  %v4180_v30 = vld [vmem:[#allocation34_spill] sm:$0xff]  ;;  %v1176_v45 = vmul.f32 %v1144_v21, %v1144_v21  ;;  %v1149_v55 = vsub.f32 %v4183_v46, %v3007_v57 }
  0xb5   : > { %v1146_v20 = vsub.f32 %v4180_v30, %v3007_v57  ;;  %v1205_v37 = vadd.f32 %v1204_v24, %v1174_v28 }
  0xb6   : > { %v949_v41 = vadd.f32 %v948_v2, %v918_v23  ;;  %v4181_v23 = vld [vmem:[#allocation36_spill] sm:$0xff]  ;;  %v1177_v2 = vmul.f32 %v1145_v58, %v1145_v58 }
  0xb7   : > { %v1147_v12 = vsub.f32 %v4181_v23, %v3007_v57  ;;  %v1206_v26 = vadd.f32 %v1205_v37, %v1175_v36  ;;  %v1151_v36 = vsub.f32 %v2979_v61, %v3007_v57 }
  0xb8   : > { %v950_v16 = vadd.f32 %v949_v41, %v919_v5  ;;  %v4182_v41 = vld [vmem:[#allocation38_spill] sm:$0xff]  ;;  %v1178_v5 = vmul.f32 %v1146_v20, %v1146_v20 }
  0xb9   : > { %v1148_v31 = vsub.f32 %v4182_v41, %v3007_v57  ;;  %v1207_v39 = vadd.f32 %v1206_v26, %v1176_v45  ;;  %v1152_v45 = vsub.f32 %v2983_v34, %v3007_v57 }
  0xba   : > { %v951_v32 = vadd.f32 %v950_v16, %v920_v40  ;;  %v1179_v40 = vmul.f32 %v1147_v12, %v1147_v12 }
  0xbb   : > { %v1208_v16 = vadd.f32 %v1207_v39, %v1177_v2  ;;  %v1180_v28 = vmul.f32 %v1148_v31, %v1148_v31  ;;  %v1183_v2 = vmul.f32 %v1151_v36, %v1151_v36  ;;  %v1184_v46 = vmul.f32 %v1152_v45, %v1152_v45 }
  0xbc   : > { %v952_v15 = vadd.f32 %v951_v32, %v921_v63  ;;  %v1150_v63 = vsub.f32 %v2972_v51, %v3007_v57  ;;  %v1181_v32 = vmul.f32 %v1149_v55, %v1149_v55 }
  0xbd   : > { %v1209_v24 = vadd.f32 %v1208_v16, %v1178_v5 }
  0xbe   : > { %v953_v0 = vrot.slane %v952_v15, 4 }
  0xbf   : > { %v1210_v37 = vadd.f32 %v1209_v24, %v1179_v40 }
  0xc0   : > { %v954_v11 = vadd.f32 %v953_v0, %v952_v15  ;;  %v1182_v15 = vmul.f32 %v1150_v63, %v1150_v63 }
  0xc1   : > { %v1211_v26 = vadd.f32 %v1210_v37, %v1180_v28 }
  0xc2   : > { %v955_v21 = vrot.slane %v954_v11, 2 }
  0xc3   : > { %v1212_v0 = vadd.f32 %v1211_v26, %v1181_v32  ;;  %v1289_v26 = vld [vmem:[%s4026_s11 + $0x18] sm:$0xff] }
  0xc4   : > { %v956_v58 = vadd.f32 %v955_v21, %v954_v11  ;;  %v971_v21 = vpop.permute.xlu0 %970 }
  0xc5   : > { %v1213_v51 = vadd.f32 %v1212_v0, %v1182_v15  ;;  %v973_v37 = vmul.f32 %v971_v21, %v2987_v47  ;;  %v1287_v47 = vld [vmem:[%s4026_s11 + $0x8] sm:$0xff]  ;;  %v1286_v0 = vld [vmem:[%s4026_s11] sm:$0xff] }
  0xc6   : > { %v957_v20 = vrot.slane %v956_v58, 1 }
  0xc7   : > { %v1214_v31 = vadd.f32 %v1213_v51, %v1183_v2  ;;  %v2262_v2 = vpack.c.bf16 %v1289_v26, %v1287_v47  ;;  %v1056_v47 = vld [vmem:[%s4025_s10 + $0x28] sm:$0xff]  ;;  %v1055_v26 = vld [vmem:[%s4025_s10 + $0x20] sm:$0xff] }
  0xc8   : > { %v958_v12 = vadd.f32 %v957_v20, %v956_v58  ;;  %v977_v36 = vpop.permute.xlu0 %976 }
  0xc9   : > { %v1215_v5 = vadd.f32 %v1214_v31, %v1184_v46  ;;  %2263 = vmatprep.subr.bf16.mxu1 %v2262_v2 }
  0xca   : > { %v960_v39 = vmul.f32 0.003921569, %v958_v12 }
  0xcb   : > { %v1216_v11 = vrot.slane %v1215_v5, 4 }
  0xcc   : > { %2410 = vrsqrt.f32 %v960_v39  ;;  %vm963_vm0 = vcmp.eq.f32.partialorder %v960_v39, inf  ;;  %v966_v24 = vand.u32 2147483648, %v960_v39  ;;  %vm965_vm1 = vcmp.eq.f32.partialorder %v960_v39, 0.0 }
  0xcd   : > { %v1217_v16 = vadd.f32 %v1216_v11, %v1215_v5  ;;  %v1052_v5 = vld [vmem:[%s4025_s10 + $0x8] sm:$0xff]  ;;  %v1054_v11 = vld [vmem:[%s4025_s10 + $0x18] sm:$0xff] }
  0xcf   : > { %v1218_v55 = vrot.slane %v1217_v16, 2 }
  0xd1   : > { %v1219_v63 = vadd.f32 %v1218_v55, %v1217_v16  ;;  %v2294_v55 = vpack.c.bf16 %v1054_v11, %v1052_v5  ;;  %v1294_v5 = vld [vmem:[%s4026_s11 + $0x40] sm:$0xff]  ;;  %v1296_v11 = vld [vmem:[%s4026_s11 + $0x50] sm:$0xff] }
  0xd3   : > { %v1220_v58 = vrot.slane %v1219_v63, 1  ;;  %2295 = vmatprep.subr.bf16.mxu0 %v2294_v55  ;;  %v1060_v55 = vld [vmem:[%s4025_s10 + $0x48] sm:$0xff] }
  0xd5   : > { %v1221_v45 = vadd.f32 %v1220_v58, %v1219_v63  ;;  %v1291_v58 = vld [vmem:[%s4026_s11 + $0x28] sm:$0xff] }
  0xd6   : > { %v2411_v40 = vpop.eup %2410 }
  0xd7   : > { %v962_v61 = vmul.f32 %v2411_v40, %v960_v39  ;;  %v1222_v46 = vmul.f32 0.003921569, %v1221_v45  ;;  %v1051_v40 = vld [vmem:[%s4025_s10] sm:$0xff] }
  0xd9   : > { %v964_v28 = vsel %vm963_vm0, %v960_v39, %v962_v61  ;;  %2412 = vrsqrt.f32 %v1222_v46  ;;  %vm1225_vm2 = vcmp.eq.f32.partialorder %v1222_v46, inf  ;;  %v1228_v15 = vand.u32 2147483648, %v1222_v46  ;;  %v1288_v39 = vld [vmem:[%s4026_s11 + $0x10] sm:$0xff] }
  0xda   : > { %v967_v32 = vsel %vm965_vm1, %v966_v24, %v964_v28  ;;  %vm1227_vm3 = vcmp.eq.f32.partialorder %v1222_v46, 0.0  ;;  %v2264_v31 = vpack.c.bf16 %v1288_v39, %v1286_v0  ;;  %v1053_v24 = vld [vmem:[%s4025_s10 + $0x10] sm:$0xff]  ;;  %v1295_v0 = vld [vmem:[%s4026_s11 + $0x48] sm:$0xff]  ;;  %v1297_v39 = vld [vmem:[%s4026_s11 + $0x58] sm:$0xff] }
  0xdb   : > { %v979_v20 = vmul.f32 %v977_v36, %v967_v32  ;;  %v2296_v28 = vpack.c.bf16 %v1053_v24, %v1051_v40  ;;  %v1293_v32 = vld [vmem:[%s4026_s11 + $0x38] sm:$0xff] }
  0xdc   : > { %2265 = vmatpush1.bf16.msra.mxu1 %v2264_v31  ;;  %v2266_v45 = vpack.c.bf16 %v1293_v32, %v1291_v58  ;;  %v2270_v31 = vpack.c.bf16 %v1297_v39, %v1295_v0  ;;  %v1062_v40 = vld [vmem:[%s4025_s10 + $0x58] sm:$0xff]  ;;  %v1299_v32 = vld [vmem:[%s4026_s11 + $0x68] sm:$0xff] }
  0xdd   : > { %v3120_v51 = vadd.f32 %v979_v20, %v973_v37  ;;  %v1230_v37 = vmul.f32 %v3007_v57, %v971_v21  ;;  %2297 = vmatpush1.bf16.msra.mxu0 %v2296_v28  ;;  %v1058_v57 = vld [vmem:[%s4025_s10 + $0x38] sm:$0xff]  ;;  %v2302_v24 = vpack.c.bf16 %v1062_v40, %v1060_v55  ;;  %v1061_v28 = vld [vmem:[%s4025_s10 + $0x50] sm:$0xff] }
  0xde   : > { %2267 = vmatprep.subr.bf16.mxu1 %v2266_v45  ;;  %v1298_v45 = vld [vmem:[%s4026_s11 + $0x60] sm:$0xff]  ;;  %v1305_v0 = vld [vmem:[%s4026_s11 + $0x98] sm:$0xff] }
  0xdf   : > { %982 = vrot.lane.b32.xlu1 %v3120_v51, %s2431_s0  ;;  %v1070_v55 = vld [vmem:[%s4025_s10 + $0x98] sm:$0xff] }
  0xe3   : > { %986 = vrot.lane.b32.xlu1 %v3120_v51, %s2432_s19  ;;  %v2413_v61 = vpop.eup %2412 }
  0xe4   : > { %v1224_v12 = vmul.f32 %v2413_v61, %v1222_v46  ;;  %v1292_v61 = vld [vmem:[%s4026_s11 + $0x30] sm:$0xff] }
  0xe6   : > { %v1226_v16 = vsel %vm1225_vm2, %v1222_v46, %v1224_v12  ;;  %v1290_v46 = vld [vmem:[%s4026_s11 + $0x20] sm:$0xff]  ;;  %v1057_v12 = vld [vmem:[%s4025_s10 + $0x30] sm:$0xff] }
  0xe7   : > { %v1229_v63 = vsel %vm1227_vm3, %v1228_v15, %v1226_v16  ;;  %v2268_v15 = vpack.c.bf16 %v1292_v61, %v1290_v46  ;;  %v2300_v2 = vpack.c.bf16 %v1057_v12, %v1055_v26  ;;  %v2272_v16 = vpack.c.bf16 %v1296_v11, %v1294_v5  ;;  %v1300_v46 = vld [vmem:[%s4026_s11 + $0x70] sm:$0xff] }
  0xe8   : > { %v1231_v20 = vmul.f32 %v1229_v63, %v977_v36  ;;  %v2298_v36 = vpack.c.bf16 %v1058_v57, %v1056_v47  ;;  %v1059_v63 = vld [vmem:[%s4025_s10 + $0x40] sm:$0xff]  ;;  %v2276_v61 = vpack.c.bf16 %v1300_v46, %v1298_v45  ;;  %v1066_v47 = vld [vmem:[%s4025_s10 + $0x78] sm:$0xff]  ;;  %v1065_v26 = vld [vmem:[%s4025_s10 + $0x70] sm:$0xff] }
  0xe9   : > { %2269 = vmatpush1.bf16.msra.mxu1 %v2268_v15  ;;  %v2304_v58 = vpack.c.bf16 %v1061_v28, %v1059_v63  ;;  %v1064_v15 = vld [vmem:[%s4025_s10 + $0x68] sm:$0xff]  ;;  %v1304_v5 = vld [vmem:[%s4026_s11 + $0x90] sm:$0xff] }
  0xea   : > { %v3169_v21 = vadd.f32 %v1231_v20, %v1230_v37  ;;  %2299 = vmatprep.subr.bf16.mxu0 %v2298_v36  ;;  %2271 = vmatprep.subr.bf16.mxu1 %v2270_v31  ;;  %v1301_v37 = vld [vmem:[%s4026_s11 + $0x78] sm:$0xff]  ;;  %v2306_v57 = vpack.c.bf16 %v1066_v47, %v1064_v15  ;;  %v1063_v36 = vld [vmem:[%s4025_s10 + $0x60] sm:$0xff]  ;;  %v1069_v63 = vld [vmem:[%s4025_s10 + $0x90] sm:$0xff] }
  0xeb   : > { %2301 = vmatpush1.bf16.msra.mxu0 %v2300_v2  ;;  %v2274_v20 = vpack.c.bf16 %v1301_v37, %v1299_v32  ;;  %v2308_v12 = vpack.c.bf16 %v1065_v26, %v1063_v36  ;;  %v1303_v2 = vld [vmem:[%s4026_s11 + $0x88] sm:$0xff]  ;;  %v1302_v31 = vld [vmem:[%s4026_s11 + $0x80] sm:$0xff]  ;;  %v1309_v32 = vld [vmem:[%s4026_s11 + $0xb8] sm:$0xff] }
  0xec   : > { %1233 = vrot.lane.b32.xlu0 %v3169_v21, %s2431_s0  ;;  %2303 = vmatprep.subr.bf16.mxu0 %v2302_v24  ;;  %v2278_v39 = vpack.c.bf16 %v1305_v0, %v1303_v2  ;;  %v2280_v11 = vpack.c.bf16 %v1304_v5, %v1302_v31  ;;  %v1067_v24 = vld [vmem:[%s4025_s10 + $0x80] sm:$0xff]  ;;  %v1308_v45 = vld [vmem:[%s4026_s11 + $0xb0] sm:$0xff]  ;;  %v1074_v15 = vld [vmem:[%s4025_s10 + $0xb8] sm:$0xff] }
  0xed   : > { %2273 = vmatpush1.bf16.msra.mxu1 %v2272_v16  ;;  %v1068_v16 = vld [vmem:[%s4025_s10 + $0x88] sm:$0xff]  ;;  %v2312_v28 = vpack.c.bf16 %v1069_v63, %v1067_v24  ;;  %v1073_v36 = vld [vmem:[%s4025_s10 + $0xb0] sm:$0xff]  ;;  %v1313_v2 = vld [vmem:[%s4026_s11 + $0xd8] sm:$0xff] }
  0xee   : > { %2275 = vmatprep.subr.bf16.mxu1 %v2274_v20  ;;  %v2310_v40 = vpack.c.bf16 %v1070_v55, %v1068_v16  ;;  %v1306_v20 = vld [vmem:[%s4026_s11 + $0xa0] sm:$0xff]  ;;  %v1312_v31 = vld [vmem:[%s4026_s11 + $0xd0] sm:$0xff]  ;;  %v1078_v16 = vld [vmem:[%s4025_s10 + $0xd8] sm:$0xff] }
  0xef   : > { %2305 = vmatpush1.bf16.msra.mxu0 %v2304_v58  ;;  %v1307_v58 = vld [vmem:[%s4026_s11 + $0xa8] sm:$0xff]  ;;  %v2284_v46 = vpack.c.bf16 %v1308_v45, %v1306_v20  ;;  %v1077_v24 = vld [vmem:[%s4025_s10 + $0xd0] sm:$0xff] }
  0xf0   : > { %1236 = vrot.lane.b32.xlu0 %v3169_v21, %s2432_s19  ;;  %2307 = vmatprep.subr.bf16.mxu0 %v2306_v57  ;;  %v2282_v37 = vpack.c.bf16 %v1309_v32, %v1307_v58  ;;  %v1071_v57 = vld [vmem:[%s4025_s10 + $0xa0] sm:$0xff]  ;;  %v1317_v58 = vld [vmem:[%s4026_s11 + $0xf8] sm:$0xff]  ;;  %v1316_v20 = vld [vmem:[%s4026_s11 + $0xf0] sm:$0xff] }
  0xf1   : > { %2277 = vmatpush1.bf16.msra.mxu1 %v2276_v61  ;;  %v1072_v61 = vld [vmem:[%s4025_s10 + $0xa8] sm:$0xff]  ;;  %v2316_v26 = vpack.c.bf16 %v1073_v36, %v1071_v57  ;;  %v1081_v57 = vld [vmem:[%s4025_s10 + $0xf0] sm:$0xff]  ;;  %v2433_v36 = vmov 0.0  }
  0xf2   : > { %2279 = vmatprep.subr.bf16.mxu1 %v2278_v39  ;;  %v2314_v47 = vpack.c.bf16 %v1074_v15, %v1072_v61  ;;  %v1310_v39 = vld [vmem:[%s4026_s11 + $0xc0] sm:$0xff]  ;;  %v1082_v61 = vld [vmem:[%s4025_s10 + $0xf8] sm:$0xff]  ;;  %1382 = vmatprep.mubr.f32.mxu1 %v2433_v36 }
  0xf3   : > { %2309 = vmatpush1.bf16.msra.mxu0 %v2308_v12  ;;  %v1311_v12 = vld [vmem:[%s4026_s11 + $0xc8] sm:$0xff]  ;;  %v2288_v5 = vpack.c.bf16 %v1312_v31, %v1310_v39  ;;  %1639 = vmatprep.mubr.f32.mxu0 %v2433_v36 }
  0xf4   : > { %2311 = vmatprep.subr.bf16.mxu0 %v2310_v40  ;;  %v2286_v0 = vpack.c.bf16 %v1313_v2, %v1311_v12  ;;  %v1075_v40 = vld [vmem:[%s4025_s10 + $0xc0] sm:$0xff]  ;;  %v992_v12 = vpop.permute.xlu1 %991 }
  0xf5   : > { %2281 = vmatpush1.bf16.msra.mxu1 %v2280_v11  ;;  %v1076_v11 = vld [vmem:[%s4025_s10 + $0xc8] sm:$0xff]  ;;  %v2320_v63 = vpack.c.bf16 %v1077_v24, %v1075_v40  ;;  %v1005_v40 = vpop.permute.xlu0 %1004 }
  0xf6   : > { %2283 = vmatprep.subr.bf16.mxu1 %v2282_v37  ;;  %v2318_v55 = vpack.c.bf16 %v1078_v16, %v1076_v11  ;;  %v1314_v37 = vld [vmem:[%s4026_s11 + $0xe0] sm:$0xff] }
  0xf7   : > { %2313 = vmatpush1.bf16.msra.mxu0 %v2312_v28  ;;  %v1315_v28 = vld [vmem:[%s4026_s11 + $0xe8] sm:$0xff]  ;;  %v2292_v45 = vpack.c.bf16 %v1316_v20, %v1314_v37 }
  0xf8   : > { %2315 = vmatprep.subr.bf16.mxu0 %v2314_v47  ;;  %v2290_v32 = vpack.c.bf16 %v1317_v58, %v1315_v28  ;;  %v1079_v47 = vld [vmem:[%s4025_s10 + $0xe0] sm:$0xff]  ;;  %v998_v2 = vpop.permute.xlu1 %997 }
  0xf9   : > { %2285 = vmatpush1.bf16.msra.mxu1 %v2284_v46  ;;  %v1080_v46 = vld [vmem:[%s4025_s10 + $0xe8] sm:$0xff]  ;;  %v1000_v16 = vmul.f32 %v998_v2, %v3120_v51 }
  0xfa   : > { %2287 = vmatprep.subr.bf16.mxu1 %v2286_v0  ;;  %v2322_v15 = vpack.c.bf16 %v1082_v61, %v1080_v46  ;;  %v4184_v0 = vlaneseq  ;;  %v1240_v61 = vmul.f32 %v3169_v21, %v998_v2  ;;  %v4186_v2 = vld [vmem:[#allocation4_spill] sm:$0xff] }
  0xfb   : > { %2317 = vmatpush1.bf16.msra.mxu0 %v2316_v26  ;;  %v2324_v26 = vpack.c.bf16 %v1081_v57, %v1079_v47 }
  0xfc   : > { %2319 = vmatprep.subr.bf16.mxu0 %v2318_v55  ;;  %v818_v39 = vand.u32 127, %v4184_v0 }
  0xfd   : > { %2289 = vmatpush1.bf16.msra.mxu1 %v2288_v5 }
  0xfe   : > { %2291 = vmatprep.subr.bf16.mxu1 %v2290_v32  ;;  %vm981_vm4 = vcmp.eq.s32.totalorder %v818_v39, 0  ;;  %vm985_vm5 = vcmp.eq.s32.totalorder %v818_v39, 127 }
  0xff   : > { %2321 = vmatpush1.bf16.msra.mxu0 %v2320_v63 }
 0x100   : > { %2323 = vmatprep.subr.bf16.mxu0 %v2322_v15 }
 0x101   : > { %2293 = vmatpush1.bf16.msra.mxu1 %v2292_v45 }
 0x103   : > { %2325 = vmatpush1.bf16.msra.mxu0 %v2324_v26 }
 0x151   : > { %v983_v31 = vpop.permute.xlu1 %982 }
 0x152   : > { %v984_v5 = vsel %vm981_vm4, 0.0, %v983_v31 }
 0x153   : > { %v994_v11 = vmul.f32 %v992_v12, %v984_v5 }
 0x155   : > { %v987_v55 = vpop.permute.xlu1 %986  ;;  %v1001_v63 = vadd.f32 %v1000_v16, %v994_v11  ;;  %v4185_v11 = vld [vmem:[#allocation3_spill] sm:$0xff] }
 0x156   : > { %v988_v24 = vsel %vm985_vm5, 0.0, %v987_v55 }
 0x157   : > { %v1007_v28 = vmul.f32 %v1005_v40, %v988_v24 }
 0x159   : > { %v1008_v58 = vadd.f32 %v1007_v28, %v1001_v63  ;;  %v4188_v63 = vld [vmem:[#allocation6_spill] sm:$0xff] }
 0x15b   : > { %v2254_v32 = vmul.f32 -1.442695, %v1008_v58  ;;  %v4189_v58 = vld [vmem:[#allocation7_spill] sm:$0xff] }
 0x15d   : > { %2414 = vpow2.f32 %v2254_v32 }
 0x15e   : > { %v1234_v37 = vpop.permute.xlu0 %1233 }
 0x15f   : > { %v1235_v20 = vsel %vm981_vm4, 0.0, %v1234_v37 }
 0x160   : > { %v1239_v45 = vmul.f32 %v1235_v20, %v992_v12 }
 0x162   : > { %v1237_v15 = vpop.permute.xlu0 %1236  ;;  %v1241_v57 = vadd.f32 %v1240_v61, %v1239_v45 }
 0x163   : > { %v1238_v51 = vsel %vm985_vm5, 0.0, %v1237_v15 }
 0x164   : > { %v1242_v26 = vmul.f32 %v1238_v51, %v1005_v40  ;;  %v4187_v40 = vld [vmem:[#allocation5_spill] sm:$0xff]  ;;  %v4192_v51 = vld [vmem:[#allocation12_spill] sm:$0xff] }
 0x166   : > { %v1243_v0 = vadd.f32 %v1242_v26, %v1241_v57 }
 0x167   : > { %v2415_v46 = vpop.eup %2414 }
 0x168   : > { %v1012_v47 = vadd.f32 1.0, %v2415_v46  ;;  %v2255_v31 = vmul.f32 -1.442695, %v1243_v0 }
 0x16a   : > { %2416 = vrcp.f32 %v1012_v47 }
 0x16b   : > { %2418 = vpow2.f32 %v2255_v31 }
 0x174   : > { %v2417_v5 = vpop.eup %2416 }
 0x175   : > { %v3333_v16 = vrot.slane %v2417_v5, %v4185_v11  ;;  %v2419_v55 = vpop.eup %2418 }
 0x176   : > { %v1247_v21 = vadd.f32 1.0, %v2419_v55  ;;  %v4196_v55 = vld [vmem:[#allocation23_spill] sm:$0xff] }
 0x177   : > { %v1019_v12 = vmul.f32 %v3333_v16, %v2616_v54  ;;  %v1020_v39 = vmul.f32 %v3333_v16, %v4186_v2  ;;  %v1021_v24 = vmul.f32 %v3333_v16, %v4187_v40  ;;  %v1022_v54 = vmul.f32 %v3333_v16, %v4188_v63  ;;  %v4197_v2 = vld [vmem:[#allocation25_spill] sm:$0xff]  ;;  %v4198_v40 = vld [vmem:[#allocation27_spill] sm:$0xff] }
 0x178   : > { %2420 = vrcp.f32 %v1247_v21  ;;  %v1023_v32 = vmul.f32 %v3333_v16, %v4189_v58  ;;  %v1024_v45 = vmul.f32 %v3333_v16, %v2672_v33  ;;  %v1025_v61 = vmul.f32 %v3333_v16, %v2684_v43  ;;  %v4199_v63 = vld [vmem:[#allocation29_spill] sm:$0xff]  ;;  %v4201_v58 = vld [vmem:[#allocation31_spill] sm:$0xff] }
 0x179   : > { %1640 = vmatmul.mubr.f32.vlgmr.msra.gmra.mrb[0].mxu0 %v1019_v12  ;;  %v1026_v33 = vmul.f32 %v3333_v16, %v2696_v53  ;;  %v1027_v43 = vmul.f32 %v3333_v16, %v2708_v1  ;;  %v1028_v53 = vmul.f32 %v3333_v16, %v2720_v13  ;;  %v1029_v1 = vmul.f32 %v3333_v16, %v2732_v29  ;;  %v4190_v29 = vld [vmem:[#allocation8_spill] sm:$0xff] }
 0x17a   : > { %1645 = vmatprep.mubr.f32.mxu0 %v2433_v36  ;;  %v1030_v13 = vmul.f32 %v3333_v16, %v2744_v42  ;;  %v1031_v15 = vmul.f32 %v3333_v16, %v4190_v29  ;;  %v4191_v42 = vld [vmem:[#allocation10_spill] sm:$0xff]  ;;  %v1033_v57 = vmul.f32 %v3333_v16, %v4192_v51  ;;  %v1034_v26 = vmul.f32 %v3333_v16, %v2792_v44 }
 0x17b   : > { %v1032_v47 = vmul.f32 %v3333_v16, %v4191_v42  ;;  %v1035_v0 = vmul.f32 %v3333_v16, %v2804_v62  ;;  %v1036_v44 = vmul.f32 %v3333_v16, %v2816_v18  ;;  %v4193_v62 = vld [vmem:[#allocation17_spill] sm:$0xff]  ;;  %v4194_v18 = vld [vmem:[#allocation19_spill] sm:$0xff]  ;;  %v1040_v21 = vmul.f32 %v3333_v16, %v4196_v55  ;;  %v4209_v29 = vld [vmem:[#allocation42_spill] sm:$0xff] }
 0x17c   : > { %v1037_v31 = vmul.f32 %v3333_v16, %v4193_v62  ;;  %v1038_v5 = vmul.f32 %v3333_v16, %v4194_v18 }
 0x17d   : > { %1646 = vmatmul.mubr.f32.gmra.mrb[2].mxu0 %v1020_v39  ;;  %v1041_v39 = vmul.f32 %v3333_v16, %v4197_v2 }
 0x17e   : > { %1651 = vmatprep.mubr.f32.mxu0 %v2433_v36 }
 0x181   : > { %1652 = vmatmul.mubr.f32.gmra.mrb[4].mxu0 %v1021_v24  ;;  %v1042_v24 = vmul.f32 %v3333_v16, %v4198_v40 }
 0x182   : > { %1657 = vmatprep.mubr.f32.mxu0 %v2433_v36  ;;  %v2421_v28 = vpop.eup %2420 }
 0x183   : > { %v3350_v37 = vrot.slane %v2421_v28, %v4185_v11  ;;  %v4195_v11 = vld [vmem:[#allocation21_spill] sm:$0xff] }
 0x184   : > { %v1039_v12 = vmul.f32 %v3333_v16, %v4195_v11 }
 0x185   : > { %1658 = vmatmul.mubr.f32.gmra.mrb[6].mxu0 %v1022_v54  ;;  %v1254_v20 = vmul.f32 %v3350_v37, %v2640_v8  ;;  %v1255_v46 = vmul.f32 %v3350_v37, %v2643_v9  ;;  %v1256_v8 = vmul.f32 %v3350_v37, %v2655_v17  ;;  %v1257_v9 = vmul.f32 %v3350_v37, %v2665_v27 }
 0x186   : > { %1663 = vmatprep.mubr.f32.mxu0 %v2433_v36  ;;  %v1258_v17 = vmul.f32 %v3350_v37, %v2678_v38  ;;  %v1259_v27 = vmul.f32 %v3350_v37, %v2690_v48  ;;  %v1260_v38 = vmul.f32 %v3350_v37, %v2702_v59  ;;  %v1261_v48 = vmul.f32 %v3350_v37, %v2714_v6 }
 0x187   : > { %1383 = vmatmul.mubr.f32.vlgmr.msra.gmra.mrb[0].mxu1 %v1254_v20  ;;  %v1262_v59 = vmul.f32 %v3350_v37, %v2726_v19  ;;  %v1263_v6 = vmul.f32 %v3350_v37, %v2738_v35  ;;  %v1264_v19 = vmul.f32 %v3350_v37, %v2750_v49  ;;  %v1265_v35 = vmul.f32 %v3350_v37, %v4166_v60 }
 0x188   : > { %1388 = vmatprep.mubr.f32.mxu1 %v2433_v36  ;;  %v1266_v49 = vmul.f32 %v3350_v37, %v4167_v56  ;;  %v1267_v60 = vmul.f32 %v3350_v37, %v4168_v7  ;;  %v1268_v56 = vmul.f32 %v3350_v37, %v4169_v4  ;;  %v1269_v7 = vmul.f32 %v3350_v37, %v4170_v3 }
 0x189   : > { %1664 = vmatmul.mubr.f32.gmra.mrb[8].mxu0 %v1023_v32  ;;  %v1270_v4 = vmul.f32 %v3350_v37, %v4171_v50  ;;  %v1271_v3 = vmul.f32 %v3350_v37, %v4172_v14  ;;  %v1272_v50 = vmul.f32 %v3350_v37, %v4173_v25  ;;  %v1273_v14 = vmul.f32 %v3350_v37, %v4174_v52  ;;  %v4200_v25 = vld [vmem:[#allocation24_spill] sm:$0xff]  ;;  %v4202_v52 = vld [vmem:[#allocation26_spill] sm:$0xff] }
 0x18a   : > { %1669 = vmatprep.mubr.f32.mxu0 %v2433_v36  ;;  %v1043_v54 = vmul.f32 %v3333_v16, %v4199_v63  ;;  %v1274_v28 = vmul.f32 %v3350_v37, %v4200_v25  ;;  %v1044_v32 = vmul.f32 %v3333_v16, %v4201_v58  ;;  %v1275_v20 = vmul.f32 %v3350_v37, %v4202_v52 }
 0x18b   : > { %1389 = vmatmul.mubr.f32.gmra.mrb[2].mxu1 %v1255_v46 }
 0x18c   : > { %1394 = vmatprep.mubr.f32.mxu1 %v2433_v36 }
 0x18d   : > { %1670 = vmatmul.mubr.f32.gmra.mrb[10].mxu0 %v1024_v45  ;;  %v4203_v45 = vld [vmem:[#allocation33_spill] sm:$0xff] }
 0x18e   : > { %1675 = vmatprep.mubr.f32.mxu0 %v2433_v36  ;;  %v1045_v46 = vmul.f32 %v3333_v16, %v4203_v45 }
 0x18f   : > { %1395 = vmatmul.mubr.f32.gmra.mrb[4].mxu1 %v1256_v8 }
 0x190   : > { %1400 = vmatprep.mubr.f32.mxu1 %v2433_v36 }
 0x191   : > { %1676 = vmatmul.mubr.f32.gmra.mrb[12].mxu0 %v1025_v61  ;;  %v4204_v61 = vld [vmem:[#allocation28_spill] sm:$0xff] }
 0x192   : > { %1681 = vmatprep.mubr.f32.mxu0 %v2433_v36  ;;  %v1276_v8 = vmul.f32 %v3350_v37, %v4204_v61 }
 0x193   : > { %1401 = vmatmul.mubr.f32.gmra.mrb[6].mxu1 %v1257_v9 }
 0x194   : > { %1406 = vmatprep.mubr.f32.mxu1 %v2433_v36 }
 0x195   : > { %1682 = vmatmul.mubr.f32.gmra.mrb[14].mxu0 %v1026_v33  ;;  %v4205_v33 = vld [vmem:[#allocation35_spill] sm:$0xff] }
 0x196   : > { %1687 = vmatprep.mubr.f32.mxu0 %v2433_v36  ;;  %v1046_v9 = vmul.f32 %v3333_v16, %v4205_v33 }
 0x197   : > { %1407 = vmatmul.mubr.f32.gmra.mrb[8].mxu1 %v1258_v17  ;;  %v4206_v17 = vld [vmem:[#allocation37_spill] sm:$0xff] }
 0x198   : > { %1412 = vmatprep.mubr.f32.mxu1 %v2433_v36 }
 0x199   : > { %1688 = vmatmul.mubr.f32.gmra.mrb[16].mxu0 %v1027_v43  ;;  %v1277_v43 = vmul.f32 %v3350_v37, %v4178_v22  ;;  %v1279_v22 = vmul.f32 %v3350_v37, %v4180_v30  ;;  %v1281_v30 = vmul.f32 %v3350_v37, %v4182_v41  ;;  %v1285_v41 = vmul.f32 %v3350_v37, %v2983_v34 }
 0x19a   : > { %1693 = vmatprep.mubr.f32.mxu0 %v2433_v36 }
 0x19b   : > { %1413 = vmatmul.mubr.f32.gmra.mrb[10].mxu1 %v1259_v27  ;;  %v1278_v27 = vmul.f32 %v3350_v37, %v4179_v10  ;;  %v1280_v10 = vmul.f32 %v3350_v37, %v4181_v23  ;;  %v4211_v23 = vld [vmem:[#allocation43_spill] sm:$0xff] }
 0x19c   : > { %1418 = vmatprep.mubr.f32.mxu1 %v2433_v36 }
 0x19d   : > { %1694 = vmatmul.mubr.f32.gmra.mrb[18].mxu0 %v1028_v53  ;;  %v1047_v53 = vmul.f32 %v3333_v16, %v4206_v17 }
 0x19e   : > { %1699 = vmatprep.mubr.f32.mxu0 %v2433_v36 }
 0x19f   : > { %1419 = vmatmul.mubr.f32.gmra.mrb[12].mxu1 %v1260_v38 }
 0x1a0   : > { %1424 = vmatprep.mubr.f32.mxu1 %v2433_v36 }
 0x1a1   : > { %1700 = vmatmul.mubr.f32.gmra.mrb[20].mxu0 %v1029_v1  ;;  %v4207_v1 = vld [vmem:[#allocation39_spill] sm:$0xff] }
 0x1a2   : > { %1705 = vmatprep.mubr.f32.mxu0 %v2433_v36  ;;  %v1048_v38 = vmul.f32 %v3333_v16, %v4207_v1 }
 0x1a3   : > { %1425 = vmatmul.mubr.f32.gmra.mrb[14].mxu1 %v1261_v48 }
 0x1a4   : > { %1430 = vmatprep.mubr.f32.mxu1 %v2433_v36 }
 0x1a5   : > { %1706 = vmatmul.mubr.f32.gmra.mrb[22].mxu0 %v1030_v13  ;;  %v4208_v13 = vld [vmem:[#allocation40_spill] sm:$0xff] }
 0x1a6   : > { %1711 = vmatprep.mubr.f32.mxu0 %v2433_v36  ;;  %v1049_v48 = vmul.f32 %v3333_v16, %v4208_v13 }
 0x1a7   : > { %1431 = vmatmul.mubr.f32.gmra.mrb[16].mxu1 %v1262_v59  ;;  %v4210_v59 = vld [vmem:[#allocation41_spill] sm:$0xff] }
 0x1a8   : > { %1436 = vmatprep.mubr.f32.mxu1 %v2433_v36  ;;  %v1282_v42 = vmul.f32 %v3350_v37, %v4210_v59 }
 0x1a9   : > { %1712 = vmatmul.mubr.f32.gmra.mrb[24].mxu0 %v1031_v15  ;;  %v1050_v15 = vmul.f32 %v3333_v16, %v4209_v29  ;;  %v4212_v16 = vld [vmem:[#allocation44_spill] sm:$0xff] }
 0x1aa   : > { %1717 = vmatprep.mubr.f32.mxu0 %v2433_v36 }
 0x1ab   : > { %1437 = vmatmul.mubr.f32.gmra.mrb[18].mxu1 %v1263_v6  ;;  %v1284_v6 = vmul.f32 %v3350_v37, %v4212_v16 }
 0x1ac   : > { %1442 = vmatprep.mubr.f32.mxu1 %v2433_v36 }
 0x1ad   : > { %1718 = vmatmul.mubr.f32.gmra.mrb[26].mxu0 %v1032_v47  ;;  %v1283_v47 = vmul.f32 %v3350_v37, %v4211_v23 }
 0x1ae   : > { %1723 = vmatprep.mubr.f32.mxu0 %v2433_v36 }
 0x1af   : > { %1443 = vmatmul.mubr.f32.gmra.mrb[20].mxu1 %v1264_v19 }
 0x1b0   : > { %1448 = vmatprep.mubr.f32.mxu1 %v2433_v36 }
 0x1b1   : > { %1724 = vmatmul.mubr.f32.gmra.mrb[28].mxu0 %v1033_v57 }
 0x1b2   : > { %1729 = vmatprep.mubr.f32.mxu0 %v2433_v36 }
 0x1b3   : > { %1449 = vmatmul.mubr.f32.gmra.mrb[22].mxu1 %v1265_v35 }
 0x1b4   : > { %1454 = vmatprep.mubr.f32.mxu1 %v2433_v36 }
 0x1b5   : > { %1730 = vmatmul.mubr.f32.gmra.mrb[30].mxu0 %v1034_v26 }
 0x1b6   : > { %1735 = vmatprep.mubr.f32.mxu0 %v2433_v36 }
 0x1b7   : > { %1455 = vmatmul.mubr.f32.gmra.mrb[24].mxu1 %v1266_v49 }
 0x1b8   : > { %1460 = vmatprep.mubr.f32.mxu1 %v2433_v36 }
 0x1b9   : > { %1736 = vmatmul.mubr.f32.gmra.mrb[32].mxu0 %v1035_v0 }
 0x1ba   : > { %1741 = vmatprep.mubr.f32.mxu0 %v2433_v36 }
 0x1bb   : > { %1461 = vmatmul.mubr.f32.gmra.mrb[26].mxu1 %v1267_v60 }
 0x1bc   : > { %1466 = vmatprep.mubr.f32.mxu1 %v2433_v36 }
 0x1bd   : > { %1742 = vmatmul.mubr.f32.gmra.mrb[34].mxu0 %v1036_v44 }
 0x1be   : > { %1747 = vmatprep.mubr.f32.mxu0 %v2433_v36 }
 0x1bf   : > { %1467 = vmatmul.mubr.f32.gmra.mrb[28].mxu1 %v1268_v56 }
 0x1c0   : > { %1472 = vmatprep.mubr.f32.mxu1 %v2433_v36 }
 0x1c1   : > { %1748 = vmatmul.mubr.f32.gmra.mrb[36].mxu0 %v1037_v31 }
 0x1c2   : > { %1753 = vmatprep.mubr.f32.mxu0 %v2433_v36 }
 0x1c3   : > { %1473 = vmatmul.mubr.f32.gmra.mrb[30].mxu1 %v1269_v7 }
 0x1c4   : > { %1478 = vmatprep.mubr.f32.mxu1 %v2433_v36 }
 0x1c5   : > { %1754 = vmatmul.mubr.f32.gmra.mrb[38].mxu0 %v1038_v5 }
 0x1c6   : > { %1759 = vmatprep.mubr.f32.mxu0 %v2433_v36 }
 0x1c7   : > { %1479 = vmatmul.mubr.f32.gmra.mrb[32].mxu1 %v1270_v4 }
 0x1c8   : > { %1484 = vmatprep.mubr.f32.mxu1 %v2433_v36 }
 0x1c9   : > { %1760 = vmatmul.mubr.f32.gmra.mrb[40].mxu0 %v1039_v12 }
 0x1ca   : > { %1765 = vmatprep.mubr.f32.mxu0 %v2433_v36 }
 0x1cb   : > { %1485 = vmatmul.mubr.f32.gmra.mrb[34].mxu1 %v1271_v3 }
 0x1cc   : > { %1490 = vmatprep.mubr.f32.mxu1 %v2433_v36 }
 0x1cd   : > { %1766 = vmatmul.mubr.f32.gmra.mrb[42].mxu0 %v1040_v21 }
 0x1ce   : > { %1771 = vmatprep.mubr.f32.mxu0 %v2433_v36 }
 0x1cf   : > { %1491 = vmatmul.mubr.f32.gmra.mrb[36].mxu1 %v1272_v50 }
 0x1d0   : > { %1496 = vmatprep.mubr.f32.mxu1 %v2433_v36 }
 0x1d1   : > { %1772 = vmatmul.mubr.f32.gmra.mrb[44].mxu0 %v1041_v39 }
 0x1d2   : > { %1777 = vmatprep.mubr.f32.mxu0 %v2433_v36 }
 0x1d3   : > { %1497 = vmatmul.mubr.f32.gmra.mrb[38].mxu1 %v1273_v14 }
 0x1d4   : > { %1502 = vmatprep.mubr.f32.mxu1 %v2433_v36 }
 0x1d5   : > { %1778 = vmatmul.mubr.f32.gmra.mrb[46].mxu0 %v1042_v24 }
 0x1d6   : > { %1783 = vmatprep.mubr.f32.mxu0 %v2433_v36 }
 0x1d7   : > { %1503 = vmatmul.mubr.f32.gmra.mrb[40].mxu1 %v1274_v28 }
 0x1d8   : > { %1508 = vmatprep.mubr.f32.mxu1 %v2433_v36 }
 0x1d9   : > { %1784 = vmatmul.mubr.f32.gmra.mrb[48].mxu0 %v1043_v54 }
 0x1da   : > { %1789 = vmatprep.mubr.f32.mxu0 %v2433_v36 }
 0x1db   : > { %1509 = vmatmul.mubr.f32.gmra.mrb[42].mxu1 %v1275_v20 }
 0x1dc   : > { %1514 = vmatprep.mubr.f32.mxu1 %v2433_v36 }
 0x1dd   : > { %1790 = vmatmul.mubr.f32.gmra.mrb[50].mxu0 %v1044_v32 }
 0x1de   : > { %1795 = vmatprep.mubr.f32.mxu0 %v2433_v36 }
 0x1df   : > { %1515 = vmatmul.mubr.f32.gmra.mrb[44].mxu1 %v1276_v8 }
 0x1e0   : > { %1520 = vmatprep.mubr.f32.mxu1 %v2433_v36 }
 0x1e1   : > { %1796 = vmatmul.mubr.f32.gmra.mrb[52].mxu0 %v1045_v46 }
 0x1e2   : > { %1801 = vmatprep.mubr.f32.mxu0 %v2433_v36 }
 0x1e3   : > { %1521 = vmatmul.mubr.f32.gmra.mrb[46].mxu1 %v1277_v43 }
 0x1e4   : > { %1526 = vmatprep.mubr.f32.mxu1 %v2433_v36 }
 0x1e5   : > { %1802 = vmatmul.mubr.f32.gmra.mrb[54].mxu0 %v1046_v9 }
 0x1e6   : > { %1807 = vmatprep.mubr.f32.mxu0 %v2433_v36 }
 0x1e7   : > { %1527 = vmatmul.mubr.f32.gmra.mrb[48].mxu1 %v1278_v27 }
 0x1e8   : > { %1532 = vmatprep.mubr.f32.mxu1 %v2433_v36 }
 0x1e9   : > { %1808 = vmatmul.mubr.f32.gmra.mrb[56].mxu0 %v1047_v53 }
 0x1ea   : > { %1813 = vmatprep.mubr.f32.mxu0 %v2433_v36 }
 0x1eb   : > { %1533 = vmatmul.mubr.f32.gmra.mrb[50].mxu1 %v1279_v22 }
 0x1ec   : > { %1538 = vmatprep.mubr.f32.mxu1 %v2433_v36 }
 0x1ed   : > { %1814 = vmatmul.mubr.f32.gmra.mrb[58].mxu0 %v1048_v38 }
 0x1ee   : > { %1819 = vmatprep.mubr.f32.mxu0 %v2433_v36 }
 0x1ef   : > { %1539 = vmatmul.mubr.f32.gmra.mrb[52].mxu1 %v1280_v10 }
 0x1f0   : > { %1544 = vmatprep.mubr.f32.mxu1 %v2433_v36 }
 0x1f1   : > { %1820 = vmatmul.mubr.f32.gmra.mrb[60].mxu0 %v1049_v48 }
 0x1f2   : > { %1825 = vmatprep.mubr.f32.mxu0 %v2433_v36 }
 0x1f3   : > { %1545 = vmatmul.mubr.f32.gmra.mrb[54].mxu1 %v1281_v30 }
 0x1f4   : > { %1550 = vmatprep.mubr.f32.mxu1 %v2433_v36 }
 0x1f5   : > { %1826 = vmatmul.mubr.f32.gmra.mrb[62].mxu0 %v1050_v15 }
 0x1f7   : > { %1551 = vmatmul.mubr.f32.gmra.mrb[56].mxu1 %v1282_v42 }
 0x1f8   : > { %1556 = vmatprep.mubr.f32.mxu1 %v2433_v36 }
 0x1fb   : > { %1557 = vmatmul.mubr.f32.gmra.mrb[58].mxu1 %v1283_v47 }
 0x1fc   : > { %1562 = vmatprep.mubr.f32.mxu1 %v2433_v36 }
 0x1ff   : > { %1563 = vmatmul.mubr.f32.gmra.mrb[60].mxu1 %v1284_v6 }
 0x200   : > { %1568 = vmatprep.mubr.f32.mxu1 %v2433_v36 }
 0x203   : > { %1569 = vmatmul.mubr.f32.gmra.mrb[62].mxu1 %v1285_v41 }
 0x24c   : > { %v1641_v51 = vpop.f32.mrb[0].mxu0 }
 0x24d   : > { %v1643_v57 = vpop.f32.mrb[1].mxu0 }
 0x250   : > { %v1647_v19 = vpop.f32.mrb[2].mxu0 }
 0x251   : > { %v1649_v26 = vpop.f32.mrb[3].mxu0 }
 0x254   : > { %v1653_v35 = vpop.f32.mrb[4].mxu0 }
 0x255   : > { %v1655_v0 = vpop.f32.mrb[5].mxu0 }
 0x258   : > { %v1659_v49 = vpop.f32.mrb[6].mxu0 }
 0x259   : > { %v1661_v44 = vpop.f32.mrb[7].mxu0 }
 0x25a   : > { %v1384_v31 = vpop.f32.mrb[0].mxu1 }
 0x25b   : > { %v1386_v34 = vpop.f32.mrb[1].mxu1  ;;  %v3534_v36 = vadd.f32 %v1641_v51, %v1384_v31 }
 0x25c   : > { %v1665_v60 = vpop.f32.mrb[8].mxu0  ;;  %v3536_v56 = vadd.f32 %v1643_v57, %v1386_v34 }
 0x25d   : > { %v1667_v62 = vpop.f32.mrb[9].mxu0  ;;  %1832 = vst [vmem:[%s3532_s29] sm:$0xff] %v3534_v36 }
 0x25e   : > { %1833 = vst [vmem:[%s3532_s29 + $0x8] sm:$0xff] %v3536_v56  ;;  %v1390_v5 = vpop.f32.mrb[2].mxu1 }
 0x25f   : > { %v1392_v7 = vpop.f32.mrb[3].mxu1  ;;  %v3542_v11 = vadd.f32 %v1647_v19, %v1390_v5 }
 0x260   : > { %v1671_v37 = vpop.f32.mrb[10].mxu0  ;;  %v3544_v4 = vadd.f32 %v1649_v26, %v1392_v7 }
 0x261   : > { %v1673_v18 = vpop.f32.mrb[11].mxu0  ;;  %1834 = vst [vmem:[%s3532_s29 + $0x10] sm:$0xff] %v3542_v11 }
 0x262   : > { %1835 = vst [vmem:[%s3532_s29 + $0x18] sm:$0xff] %v3544_v4  ;;  %v1396_v21 = vpop.f32.mrb[4].mxu1 }
 0x263   : > { %v1398_v3 = vpop.f32.mrb[5].mxu1  ;;  %v3550_v2 = vadd.f32 %v1653_v35, %v1396_v21 }
 0x264   : > { %v1677_v12 = vpop.f32.mrb[12].mxu0  ;;  %v3552_v50 = vadd.f32 %v1655_v0, %v1398_v3 }
 0x265   : > { %v1679_v55 = vpop.f32.mrb[13].mxu0  ;;  %1836 = vst [vmem:[%s3532_s29 + $0x20] sm:$0xff] %v3550_v2 }
 0x266   : > { %1837 = vst [vmem:[%s3532_s29 + $0x28] sm:$0xff] %v3552_v50  ;;  %v1402_v24 = vpop.f32.mrb[6].mxu1 }
 0x267   : > { %v1404_v14 = vpop.f32.mrb[7].mxu1  ;;  %v3558_v63 = vadd.f32 %v1659_v49, %v1402_v24 }
 0x268   : > { %v1683_v39 = vpop.f32.mrb[14].mxu0  ;;  %v3560_v25 = vadd.f32 %v1661_v44, %v1404_v14 }
 0x269   : > { %v1685_v40 = vpop.f32.mrb[15].mxu0  ;;  %1838 = vst [vmem:[%s3532_s29 + $0x30] sm:$0xff] %v3558_v63 }
 0x26a   : > { %1839 = vst [vmem:[%s3532_s29 + $0x38] sm:$0xff] %v3560_v25  ;;  %v1408_v58 = vpop.f32.mrb[8].mxu1 }
 0x26b   : > { %v1410_v32 = vpop.f32.mrb[9].mxu1  ;;  %v3566_v52 = vadd.f32 %v1665_v60, %v1408_v58 }
 0x26c   : > { %v1689_v54 = vpop.f32.mrb[16].mxu0  ;;  %v3568_v45 = vadd.f32 %v1667_v62, %v1410_v32 }
 0x26d   : > { %v1691_v28 = vpop.f32.mrb[17].mxu0  ;;  %1840 = vst [vmem:[%s3532_s29 + $0x40] sm:$0xff] %v3566_v52 }
 0x26e   : > { %1841 = vst [vmem:[%s3532_s29 + $0x48] sm:$0xff] %v3568_v45  ;;  %v1414_v61 = vpop.f32.mrb[10].mxu1 }
 0x26f   : > { %v1416_v8 = vpop.f32.mrb[11].mxu1  ;;  %v3574_v33 = vadd.f32 %v1671_v37, %v1414_v61 }
 0x270   : > { %v1695_v20 = vpop.f32.mrb[18].mxu0  ;;  %v3576_v43 = vadd.f32 %v1673_v18, %v1416_v8 }
 0x271   : > { %v1697_v46 = vpop.f32.mrb[19].mxu0  ;;  %1842 = vst [vmem:[%s3532_s29 + $0x50] sm:$0xff] %v3574_v33 }
 0x272   : > { %1843 = vst [vmem:[%s3532_s29 + $0x58] sm:$0xff] %v3576_v43  ;;  %v1420_v53 = vpop.f32.mrb[12].mxu1 }
 0x273   : > { %v1422_v27 = vpop.f32.mrb[13].mxu1  ;;  %v3582_v1 = vadd.f32 %v1677_v12, %v1420_v53 }
 0x274   : > { %v1701_v9 = vpop.f32.mrb[20].mxu0  ;;  %v3584_v22 = vadd.f32 %v1679_v55, %v1422_v27 }
 0x275   : > { %v1703_v17 = vpop.f32.mrb[21].mxu0  ;;  %1844 = vst [vmem:[%s3532_s29 + $0x60] sm:$0xff] %v3582_v1 }
 0x276   : > { %1845 = vst [vmem:[%s3532_s29 + $0x68] sm:$0xff] %v3584_v22  ;;  %v1426_v48 = vpop.f32.mrb[14].mxu1 }
 0x277   : > { %v1428_v10 = vpop.f32.mrb[15].mxu1  ;;  %v3590_v29 = vadd.f32 %v1683_v39, %v1426_v48 }
 0x278   : > { %v1707_v38 = vpop.f32.mrb[22].mxu0  ;;  %v3592_v30 = vadd.f32 %v1685_v40, %v1428_v10 }
 0x279   : > { %v1709_v13 = vpop.f32.mrb[23].mxu0  ;;  %1846 = vst [vmem:[%s3532_s29 + $0x70] sm:$0xff] %v3590_v29 }
 0x27a   : > { %1847 = vst [vmem:[%s3532_s29 + $0x78] sm:$0xff] %v3592_v30  ;;  %v1432_v42 = vpop.f32.mrb[16].mxu1 }
 0x27b   : > { %v1434_v23 = vpop.f32.mrb[17].mxu1  ;;  %v3598_v47 = vadd.f32 %v1689_v54, %v1432_v42 }
 0x27c   : > { %v1713_v15 = vpop.f32.mrb[24].mxu0  ;;  %v3600_v6 = vadd.f32 %v1691_v28, %v1434_v23 }
 0x27d   : > { %v1715_v59 = vpop.f32.mrb[25].mxu0  ;;  %1848 = vst [vmem:[%s3532_s29 + $0x80] sm:$0xff] %v3598_v47 }
 0x27e   : > { %1849 = vst [vmem:[%s3532_s29 + $0x88] sm:$0xff] %v3600_v6  ;;  %v1438_v51 = vpop.f32.mrb[18].mxu1 }
 0x27f   : > { %v1440_v57 = vpop.f32.mrb[19].mxu1  ;;  %v3606_v19 = vadd.f32 %v1695_v20, %v1438_v51 }
 0x280   : > { %v1719_v16 = vpop.f32.mrb[26].mxu0  ;;  %v3608_v35 = vadd.f32 %v1697_v46, %v1440_v57 }
 0x281   : > { %v1721_v41 = vpop.f32.mrb[27].mxu0  ;;  %1850 = vst [vmem:[%s3532_s29 + $0x90] sm:$0xff] %v3606_v19 }
 0x282   : > { %1851 = vst [vmem:[%s3532_s29 + $0x98] sm:$0xff] %v3608_v35  ;;  %v1444_v49 = vpop.f32.mrb[20].mxu1 }
 0x283   : > { %v1446_v44 = vpop.f32.mrb[21].mxu1  ;;  %v3614_v60 = vadd.f32 %v1701_v9, %v1444_v49 }
 0x284   : > { %v1725_v26 = vpop.f32.mrb[28].mxu0  ;;  %v3616_v31 = vadd.f32 %v1703_v17, %v1446_v44 }
 0x285   : > { %v1727_v0 = vpop.f32.mrb[29].mxu0  ;;  %1852 = vst [vmem:[%s3532_s29 + $0xa0] sm:$0xff] %v3614_v60 }
 0x286   : > { %1853 = vst [vmem:[%s3532_s29 + $0xa8] sm:$0xff] %v3616_v31  ;;  %v1450_v37 = vpop.f32.mrb[22].mxu1 }
 0x287   : > { %v1452_v18 = vpop.f32.mrb[23].mxu1  ;;  %v3622_v5 = vadd.f32 %v1707_v38, %v1450_v37 }
 0x288   : > { %v1731_v62 = vpop.f32.mrb[30].mxu0  ;;  %v3624_v12 = vadd.f32 %v1709_v13, %v1452_v18 }
 0x289   : > { %v1733_v34 = vpop.f32.mrb[31].mxu0  ;;  %1854 = vst [vmem:[%s3532_s29 + $0xb0] sm:$0xff] %v3622_v5 }
 0x28a   : > { %1855 = vst [vmem:[%s3532_s29 + $0xb8] sm:$0xff] %v3624_v12  ;;  %v1456_v21 = vpop.f32.mrb[24].mxu1 }
 0x28b   : > { %v1458_v3 = vpop.f32.mrb[25].mxu1  ;;  %v3630_v39 = vadd.f32 %v1713_v15, %v1456_v21 }
 0x28c   : > { %v1737_v7 = vpop.f32.mrb[32].mxu0  ;;  %v3632_v24 = vadd.f32 %v1715_v59, %v1458_v3 }
 0x28d   : > { %v1739_v55 = vpop.f32.mrb[33].mxu0  ;;  %1856 = vst [vmem:[%s3532_s29 + $0xc0] sm:$0xff] %v3630_v39 }
 0x28e   : > { %1857 = vst [vmem:[%s3532_s29 + $0xc8] sm:$0xff] %v3632_v24  ;;  %v1462_v54 = vpop.f32.mrb[26].mxu1 }
 0x28f   : > { %v1464_v28 = vpop.f32.mrb[27].mxu1  ;;  %v3638_v58 = vadd.f32 %v1719_v16, %v1462_v54 }
 0x290   : > { %v1743_v40 = vpop.f32.mrb[34].mxu0  ;;  %v3640_v20 = vadd.f32 %v1721_v41, %v1464_v28 }
 0x291   : > { %v1745_v14 = vpop.f32.mrb[35].mxu0  ;;  %1858 = vst [vmem:[%s3532_s29 + $0xd0] sm:$0xff] %v3638_v58 }
 0x292   : > { %1859 = vst [vmem:[%s3532_s29 + $0xd8] sm:$0xff] %v3640_v20  ;;  %v1468_v61 = vpop.f32.mrb[28].mxu1 }
 0x293   : > { %v1470_v8 = vpop.f32.mrb[29].mxu1  ;;  %v3646_v9 = vadd.f32 %v1725_v26, %v1468_v61 }
 0x294   : > { %v1749_v32 = vpop.f32.mrb[36].mxu0  ;;  %v3648_v53 = vadd.f32 %v1727_v0, %v1470_v8 }
 0x295   : > { %v1751_v46 = vpop.f32.mrb[37].mxu0  ;;  %1860 = vst [vmem:[%s3532_s29 + $0xe0] sm:$0xff] %v3646_v9 }
 0x296   : > { %1861 = vst [vmem:[%s3532_s29 + $0xe8] sm:$0xff] %v3648_v53  ;;  %v1474_v38 = vpop.f32.mrb[30].mxu1 }
 0x297   : > { %v1476_v13 = vpop.f32.mrb[31].mxu1  ;;  %v3654_v48 = vadd.f32 %v1731_v62, %v1474_v38 }
 0x298   : > { %v1755_v17 = vpop.f32.mrb[38].mxu0  ;;  %v3656_v15 = vadd.f32 %v1733_v34, %v1476_v13 }
 0x299   : > { %v1757_v27 = vpop.f32.mrb[39].mxu0  ;;  %1862 = vst [vmem:[%s3532_s29 + $0xf0] sm:$0xff] %v3654_v48 }
 0x29a   : > { %1863 = vst [vmem:[%s3532_s29 + $0xf8] sm:$0xff] %v3656_v15  ;;  %v1480_v42 = vpop.f32.mrb[32].mxu1 }
 0x29b   : > { %v1482_v23 = vpop.f32.mrb[33].mxu1  ;;  %v3662_v16 = vadd.f32 %v1737_v7, %v1480_v42 }
 0x29c   : > { %v1761_v10 = vpop.f32.mrb[40].mxu0  ;;  %v3664_v51 = vadd.f32 %v1739_v55, %v1482_v23 }
 0x29d   : > { %v1763_v59 = vpop.f32.mrb[41].mxu0  ;;  %1864 = vst [vmem:[%s3532_s29 + $0x100] sm:$0xff] %v3662_v16 }
 0x29e   : > { %1865 = vst [vmem:[%s3532_s29 + $0x108] sm:$0xff] %v3664_v51  ;;  %v1486_v26 = vpop.f32.mrb[34].mxu1 }
 0x29f   : > { %v1488_v0 = vpop.f32.mrb[35].mxu1  ;;  %v3670_v49 = vadd.f32 %v1743_v40, %v1486_v26 }
 0x2a0   : > { %v1767_v41 = vpop.f32.mrb[42].mxu0  ;;  %v3672_v62 = vadd.f32 %v1745_v14, %v1488_v0 }
 0x2a1   : > { %v1769_v57 = vpop.f32.mrb[43].mxu0  ;;  %1866 = vst [vmem:[%s3532_s29 + $0x110] sm:$0xff] %v3670_v49 }
 0x2a2   : > { %1867 = vst [vmem:[%s3532_s29 + $0x118] sm:$0xff] %v3672_v62  ;;  %v1492_v37 = vpop.f32.mrb[36].mxu1 }
 0x2a3   : > { %v1494_v18 = vpop.f32.mrb[37].mxu1  ;;  %v3678_v7 = vadd.f32 %v1749_v32, %v1492_v37 }
 0x2a4   : > { %v1773_v44 = vpop.f32.mrb[44].mxu0  ;;  %v3680_v21 = vadd.f32 %v1751_v46, %v1494_v18 }
 0x2a5   : > { %v1775_v34 = vpop.f32.mrb[45].mxu0  ;;  %1868 = vst [vmem:[%s3532_s29 + $0x120] sm:$0xff] %v3678_v7 }
 0x2a6   : > { %1869 = vst [vmem:[%s3532_s29 + $0x128] sm:$0xff] %v3680_v21  ;;  %v1498_v40 = vpop.f32.mrb[38].mxu1 }
 0x2a7   : > { %v1500_v14 = vpop.f32.mrb[39].mxu1  ;;  %v3686_v54 = vadd.f32 %v1755_v17, %v1498_v40 }
 0x2a8   : > { %v1779_v55 = vpop.f32.mrb[46].mxu0  ;;  %v3688_v61 = vadd.f32 %v1757_v27, %v1500_v14 }
 0x2a9   : > { %v1781_v3 = vpop.f32.mrb[47].mxu0  ;;  %1870 = vst [vmem:[%s3532_s29 + $0x130] sm:$0xff] %v3686_v54 }
 0x2aa   : > { %1871 = vst [vmem:[%s3532_s29 + $0x138] sm:$0xff] %v3688_v61  ;;  %v1504_v32 = vpop.f32.mrb[40].mxu1 }
 0x2ab   : > { %v1506_v46 = vpop.f32.mrb[41].mxu1  ;;  %v3694_v38 = vadd.f32 %v1761_v10, %v1504_v32 }
 0x2ac   : > { %v1785_v28 = vpop.f32.mrb[48].mxu0  ;;  %v3696_v42 = vadd.f32 %v1763_v59, %v1506_v46 }
 0x2ad   : > { %v1787_v8 = vpop.f32.mrb[49].mxu0  ;;  %1872 = vst [vmem:[%s3532_s29 + $0x140] sm:$0xff] %v3694_v38 }
 0x2ae   : > { %1873 = vst [vmem:[%s3532_s29 + $0x148] sm:$0xff] %v3696_v42  ;;  %v1510_v17 = vpop.f32.mrb[42].mxu1 }
 0x2af   : > { %v1512_v27 = vpop.f32.mrb[43].mxu1  ;;  %v3702_v26 = vadd.f32 %v1767_v41, %v1510_v17 }
 0x2b0   : > { %v1791_v13 = vpop.f32.mrb[50].mxu0  ;;  %v3704_v37 = vadd.f32 %v1769_v57, %v1512_v27 }
 0x2b1   : > { %v1793_v23 = vpop.f32.mrb[51].mxu0  ;;  %4213 = vst [vmem:[#allocation9_spill] sm:$0xff] %v3702_v26  ;;  %1874 = vst [vmem:[%s3532_s29 + $0x150] sm:$0xff] %v3702_v26 }
 0x2b2   : > { %4214 = vst [vmem:[#allocation11_spill] sm:$0xff] %v3704_v37  ;;  %1875 = vst [vmem:[%s3532_s29 + $0x158] sm:$0xff] %v3704_v37  ;;  %v1516_v10 = vpop.f32.mrb[44].mxu1 }
 0x2b3   : > { %v1518_v59 = vpop.f32.mrb[45].mxu1  ;;  %v3710_v40 = vadd.f32 %v1773_v44, %v1516_v10 }
 0x2b4   : > { %v1797_v0 = vpop.f32.mrb[52].mxu0  ;;  %v3712_v32 = vadd.f32 %v1775_v34, %v1518_v59 }
 0x2b5   : > { %v1799_v18 = vpop.f32.mrb[53].mxu0  ;;  %4215 = vst [vmem:[#allocation13_spill] sm:$0xff] %v3710_v40  ;;  %1876 = vst [vmem:[%s3532_s29 + $0x160] sm:$0xff] %v3710_v40 }
 0x2b6   : > { %4216 = vst [vmem:[#allocation14_spill] sm:$0xff] %v3712_v32  ;;  %1877 = vst [vmem:[%s3532_s29 + $0x168] sm:$0xff] %v3712_v32  ;;  %v1522_v41 = vpop.f32.mrb[46].mxu1 }
 0x2b7   : > { %v1524_v57 = vpop.f32.mrb[47].mxu1  ;;  %v3718_v17 = vadd.f32 %v1779_v55, %v1522_v41 }
 0x2b8   : > { %v1803_v14 = vpop.f32.mrb[54].mxu0  ;;  %v3720_v37 = vadd.f32 %v1781_v3, %v1524_v57 }
 0x2b9   : > { %v1805_v46 = vpop.f32.mrb[55].mxu0  ;;  %1878 = vst [vmem:[%s3532_s29 + $0x170] sm:$0xff] %v3718_v17 }
 0x2ba   : > { %4217 = vst [vmem:[#allocation15_spill] sm:$0xff] %v3720_v37  ;;  %1879 = vst [vmem:[%s3532_s29 + $0x178] sm:$0xff] %v3720_v37  ;;  %v1528_v44 = vpop.f32.mrb[48].mxu1 }
 0x2bb   : > { %v1530_v34 = vpop.f32.mrb[49].mxu1  ;;  %v3726_v10 = vadd.f32 %v1785_v28, %v1528_v44 }
 0x2bc   : > { %v1809_v27 = vpop.f32.mrb[56].mxu0  ;;  %v3728_v32 = vadd.f32 %v1787_v8, %v1530_v34 }
 0x2bd   : > { %v1811_v26 = vpop.f32.mrb[57].mxu0  ;;  %4218 = vst [vmem:[#allocation16_spill] sm:$0xff] %v3726_v10  ;;  %1880 = vst [vmem:[%s3532_s29 + $0x180] sm:$0xff] %v3726_v10 }
 0x2be   : > { %4219 = vst [vmem:[#allocation18_spill] sm:$0xff] %v3728_v32  ;;  %1881 = vst [vmem:[%s3532_s29 + $0x188] sm:$0xff] %v3728_v32  ;;  %v1534_v55 = vpop.f32.mrb[50].mxu1 }
 0x2bf   : > { %v1536_v3 = vpop.f32.mrb[51].mxu1  ;;  %v3734_v41 = vadd.f32 %v1791_v13, %v1534_v55 }
 0x2c0   : > { %v1815_v59 = vpop.f32.mrb[58].mxu0  ;;  %v3736_v37 = vadd.f32 %v1793_v23, %v1536_v3 }
 0x2c1   : > { %v1817_v40 = vpop.f32.mrb[59].mxu0  ;;  %1882 = vst [vmem:[%s3532_s29 + $0x190] sm:$0xff] %v3734_v41 }
 0x2c2   : > { %4220 = vst [vmem:[#allocation20_spill] sm:$0xff] %v3736_v37  ;;  %1883 = vst [vmem:[%s3532_s29 + $0x198] sm:$0xff] %v3736_v37  ;;  %v1540_v8 = vpop.f32.mrb[52].mxu1 }
 0x2c3   : > { %v1542_v44 = vpop.f32.mrb[53].mxu1  ;;  %v3742_v34 = vadd.f32 %v1797_v0, %v1540_v8 }
 0x2c4   : > { %v1821_v57 = vpop.f32.mrb[60].mxu0  ;;  %v3744_v10 = vadd.f32 %v1799_v18, %v1542_v44 }
 0x2c5   : > { %v1823_v28 = vpop.f32.mrb[61].mxu0  ;;  %1884 = vst [vmem:[%s3532_s29 + $0x1a0] sm:$0xff] %v3742_v34 }
 0x2c6   : > { %1885 = vst [vmem:[%s3532_s29 + $0x1a8] sm:$0xff] %v3744_v10  ;;  %v1546_v23 = vpop.f32.mrb[54].mxu1 }
 0x2c7   : > { %v1548_v55 = vpop.f32.mrb[55].mxu1  ;;  %v3750_v3 = vadd.f32 %v1803_v14, %v1546_v23 }
 0x2c8   : > { %v1827_v32 = vpop.f32.mrb[62].mxu0  ;;  %v3752_v37 = vadd.f32 %v1805_v46, %v1548_v55 }
 0x2c9   : > { %v1829_v13 = vpop.f32.mrb[63].mxu0  ;;  %1886 = vst [vmem:[%s3532_s29 + $0x1b0] sm:$0xff] %v3750_v3 }
 0x2ca   : > { %1887 = vst [vmem:[%s3532_s29 + $0x1b8] sm:$0xff] %v3752_v37  ;;  %v1552_v0 = vpop.f32.mrb[56].mxu1 }
 0x2cb   : > { %v1554_v18 = vpop.f32.mrb[57].mxu1  ;;  %v3758_v8 = vadd.f32 %v1809_v27, %v1552_v0 }
 0x2cc   : > { %v3760_v44 = vadd.f32 %v1811_v26, %v1554_v18 }
 0x2cd   : > { %4221 = vst [vmem:[#allocation22_spill] sm:$0xff] %v3758_v8  ;;  %1888 = vst [vmem:[%s3532_s29 + $0x1c0] sm:$0xff] %v3758_v8 }
 0x2ce   : > { %4222 = vst [vmem:[#allocation30_spill] sm:$0xff] %v3760_v44  ;;  %1889 = vst [vmem:[%s3532_s29 + $0x1c8] sm:$0xff] %v3760_v44  ;;  %v1558_v14 = vpop.f32.mrb[58].mxu1 }
 0x2cf   : > { %v1560_v46 = vpop.f32.mrb[59].mxu1  ;;  %v3766_v23 = vadd.f32 %v1815_v59, %v1558_v14 }
 0x2d0   : > { %v3768_v55 = vadd.f32 %v1817_v40, %v1560_v46 }
 0x2d1   : > { %1890 = vst [vmem:[%s3532_s29 + $0x1d0] sm:$0xff] %v3766_v23 }
 0x2d2   : > { %1891 = vst [vmem:[%s3532_s29 + $0x1d8] sm:$0xff] %v3768_v55  ;;  %v1564_v27 = vpop.f32.mrb[60].mxu1 }
 0x2d3   : > { %v1566_v0 = vpop.f32.mrb[61].mxu1  ;;  %v3774_v26 = vadd.f32 %v1821_v57, %v1564_v27  ;;  %v4226_v57 = vlaneseq (!%p2256_p4) }
 0x2d4   : > { %v3776_v18 = vadd.f32 %v1823_v28, %v1566_v0  ;;  %1899 = sbr.rel (%p2256_p4) target bundleno = 731 (0x2db), region = 80  ;;  %v2434_v28 = vmov (!%p2256_p4), 0.0  }
 0x2d5   : > { %1892 = vst [vmem:[%s3532_s29 + $0x1e0] sm:$0xff] %v3774_v26  ;;  %vm1902_vm6 = vcmp.lt.s32.totalorder (!%p2256_p4), %v4226_v57, 256 }
 0x2d6   : > { %4223 = vst [vmem:[#allocation32_spill] sm:$0xff] %v3776_v18  ;;  %1893 = vst [vmem:[%s3532_s29 + $0x1e8] sm:$0xff] %v3776_v18  ;;  %v1570_v44 = vpop.f32.mrb[62].mxu1 }
 0x2d7   : > { %v1572_v8 = vpop.f32.mrb[63].mxu1  ;;  %v3782_v59 = vadd.f32 %v1827_v32, %v1570_v44  ;;  %1904 = vst.msk [vmem:[%s4030_s15] sm:$0x3] (!%p2256_p4), %vm1902_vm6, %v2434_v28  ;;  %1905 = vst.msk [vmem:[%s4031_s16] sm:$0x3] (!%p2256_p4), %vm1902_vm6, %v2434_v28 }
 0x2d8   : > { %v3784_v40 = vadd.f32 %v1829_v13, %v1572_v8 }
 0x2d9   : > { %4224 = vst [vmem:[#allocation34_spill] sm:$0xff] %v3782_v59  ;;  %1894 = vst [vmem:[%s3532_s29 + $0x1f0] sm:$0xff] %v3782_v59 }
 0x2da   : > { %4225 = vst [vmem:[#allocation36_spill] sm:$0xff] %v3784_v40  ;;  %1895 = vst [vmem:[%s3532_s29 + $0x1f8] sm:$0xff] %v3784_v40 }
 0x2db PF: > { %v1907_v32 = vadd.f32 %v3542_v11, %v3534_v36  ;;  %v1944_v13 = vadd.f32 %v3544_v4, %v3536_v56 }
 0x2dd   : > { %v1908_v8 = vadd.f32 %v1907_v32, %v3550_v2  ;;  %v1945_v44 = vadd.f32 %v1944_v13, %v3552_v50 }
 0x2df   : > { %v1909_v14 = vadd.f32 %v1908_v8, %v3558_v63  ;;  %v1946_v46 = vadd.f32 %v1945_v44, %v3560_v25 }
 0x2e1   : > { %v1910_v27 = vadd.f32 %v1909_v14, %v3566_v52  ;;  %v1947_v0 = vadd.f32 %v1946_v46, %v3568_v45 }
 0x2e3   : > { %v1911_v57 = vadd.f32 %v1910_v27, %v3574_v33  ;;  %v1948_v28 = vadd.f32 %v1947_v0, %v3576_v43 }
 0x2e5   : > { %v1912_v40 = vadd.f32 %v1911_v57, %v3582_v1  ;;  %v1949_v59 = vadd.f32 %v1948_v28, %v3584_v22  ;;  %v2006_v57 = vmul.f32 %v3534_v36, %v3534_v36  ;;  %v2009_v28 = vmul.f32 %v3544_v4, %v3544_v4 }
 0x2e6   : > { %v2013_v4 = vmul.f32 %v3560_v25, %v3560_v25  ;;  %v2016_v25 = vmul.f32 %v3574_v33, %v3574_v33 }
 0x2e7   : > { %v1913_v32 = vadd.f32 %v1912_v40, %v3590_v29  ;;  %v1950_v13 = vadd.f32 %v1949_v59, %v3592_v30  ;;  %v2007_v40 = vmul.f32 %v3536_v56, %v3536_v56  ;;  %v2008_v59 = vmul.f32 %v3542_v11, %v3542_v11 }
 0x2e8   : > { %v2012_v11 = vmul.f32 %v3558_v63, %v3558_v63 }
 0x2e9   : > { %v1914_v8 = vadd.f32 %v1913_v32, %v3598_v47  ;;  %v1951_v44 = vadd.f32 %v1950_v13, %v3600_v6 }
 0x2eb   : > { %v1915_v14 = vadd.f32 %v1914_v8, %v3606_v19  ;;  %v1952_v46 = vadd.f32 %v1951_v44, %v3608_v35  ;;  %v2010_v8 = vmul.f32 %v3550_v2, %v3550_v2  ;;  %v2011_v44 = vmul.f32 %v3552_v50, %v3552_v50 }
 0x2ec   : > { %v2014_v2 = vmul.f32 %v3566_v52, %v3566_v52  ;;  %v2015_v50 = vmul.f32 %v3568_v45, %v3568_v45  ;;  %v2018_v45 = vmul.f32 %v3582_v1, %v3582_v1 }
 0x2ed   : > { %v1916_v27 = vadd.f32 %v1915_v14, %v3614_v60  ;;  %v1953_v0 = vadd.f32 %v1952_v46, %v3616_v31  ;;  %v2070_v14 = vadd.f32 %v2008_v59, %v2006_v57  ;;  %v2107_v46 = vadd.f32 %v2009_v28, %v2007_v40 }
 0x2ee   : > { %v2017_v57 = vmul.f32 %v3576_v43, %v3576_v43  ;;  %v2020_v43 = vmul.f32 %v3590_v29, %v3590_v29 }
 0x2ef   : > { %v1917_v32 = vadd.f32 %v1916_v27, %v3622_v5  ;;  %v1954_v13 = vadd.f32 %v1953_v0, %v3624_v12 }
 0x2f1   : > { %v1918_v36 = vadd.f32 %v1917_v32, %v3630_v39  ;;  %v1955_v56 = vadd.f32 %v1954_v13, %v3632_v24  ;;  %v2071_v32 = vadd.f32 %v2070_v14, %v2010_v8  ;;  %v2108_v13 = vadd.f32 %v2107_v46, %v2011_v44 }
 0x2f2   : > { %v2019_v8 = vmul.f32 %v3584_v22, %v3584_v22  ;;  %v2022_v22 = vmul.f32 %v3598_v47, %v3598_v47  ;;  %v2023_v46 = vmul.f32 %v3600_v6, %v3600_v6  ;;  %v2026_v6 = vmul.f32 %v3614_v60, %v3614_v60  ;;  %v4228_v60 = vld [vmem:[#allocation11_spill] sm:$0xff] }
 0x2f3   : > { %v1919_v27 = vadd.f32 %v1918_v36, %v3638_v58  ;;  %v1956_v0 = vadd.f32 %v1955_v56, %v3640_v20  ;;  %v2072_v40 = vadd.f32 %v2071_v32, %v2012_v11  ;;  %v2109_v59 = vadd.f32 %v2108_v13, %v2013_v4 }
 0x2f5   : > { %v1920_v18 = vadd.f32 %v1919_v27, %v3646_v9  ;;  %v1957_v63 = vadd.f32 %v1956_v0, %v3648_v53  ;;  %v2073_v44 = vadd.f32 %v2072_v40, %v2014_v2  ;;  %v2110_v36 = vadd.f32 %v2109_v59, %v2015_v50 }
 0x2f6   : > { %v2025_v50 = vmul.f32 %v3608_v35, %v3608_v35  ;;  %v2028_v35 = vmul.f32 %v3622_v5, %v3622_v5  ;;  %v4230_v5 = vld [vmem:[#allocation14_spill] sm:$0xff] }
 0x2f7   : > { %v1921_v28 = vadd.f32 %v1920_v18, %v3654_v48  ;;  %v1958_v52 = vadd.f32 %v1957_v63, %v3656_v15  ;;  %v2021_v18 = vmul.f32 %v3592_v30, %v3592_v30  ;;  %v2074_v11 = vadd.f32 %v2073_v44, %v2016_v25 }
 0x2f8   : > { %v2111_v4 = vadd.f32 %v2110_v36, %v2017_v57  ;;  %v2024_v30 = vmul.f32 %v3606_v19, %v3606_v19  ;;  %v2027_v25 = vmul.f32 %v3616_v31, %v3616_v31  ;;  %v2030_v31 = vmul.f32 %v3630_v39, %v3630_v39  ;;  %v4231_v39 = vld [vmem:[#allocation15_spill] sm:$0xff] }
 0x2f9   : > { %v1922_v56 = vadd.f32 %v1921_v28, %v3662_v16  ;;  %v1959_v33 = vadd.f32 %v1958_v52, %v3664_v51  ;;  %v2075_v27 = vadd.f32 %v2074_v11, %v2018_v45  ;;  %v2029_v28 = vmul.f32 %v3624_v12, %v3624_v12 }
 0x2fa   : > { %v2112_v0 = vadd.f32 %v2111_v4, %v2019_v8  ;;  %v4227_v8 = vld [vmem:[#allocation9_spill] sm:$0xff]  ;;  %v2032_v12 = vmul.f32 %v3638_v58, %v3638_v58  ;;  %v4233_v58 = vld [vmem:[#allocation18_spill] sm:$0xff] }
 0x2fb   : > { %v1923_v14 = vadd.f32 %v1922_v56, %v3670_v49  ;;  %v1960_v1 = vadd.f32 %v1959_v33, %v3672_v62  ;;  %v2076_v32 = vadd.f32 %v2075_v27, %v2020_v43  ;;  %v2031_v56 = vmul.f32 %v3632_v24, %v3632_v24 }
 0x2fc   : > { %v2113_v13 = vadd.f32 %v2112_v0, %v2021_v18  ;;  %v4229_v18 = vld [vmem:[#allocation13_spill] sm:$0xff]  ;;  %v2034_v24 = vmul.f32 %v3646_v9, %v3646_v9  ;;  %v2035_v0 = vmul.f32 %v3648_v53, %v3648_v53  ;;  %v4234_v9 = vld [vmem:[#allocation20_spill] sm:$0xff]  ;;  %v2038_v53 = vmul.f32 %v3662_v16, %v3662_v16 }
 0x2fd   : > { %v1924_v2 = vadd.f32 %v1923_v14, %v3678_v7  ;;  %v1961_v29 = vadd.f32 %v1960_v1, %v3680_v21  ;;  %v2077_v57 = vadd.f32 %v2076_v32, %v2022_v22  ;;  %v2033_v14 = vmul.f32 %v3640_v20, %v3640_v20 }
 0x2fe   : > { %v2114_v40 = vadd.f32 %v2113_v13, %v2023_v46  ;;  %v2036_v20 = vmul.f32 %v3654_v48, %v3654_v48  ;;  %v2037_v13 = vmul.f32 %v3656_v15, %v3656_v15  ;;  %v2040_v15 = vmul.f32 %v3670_v49, %v3670_v49  ;;  %v4236_v49 = vld [vmem:[#allocation30_spill] sm:$0xff] }
 0x2ff   : > { %v1925_v63 = vadd.f32 %v1924_v2, %v3686_v54  ;;  %v1962_v47 = vadd.f32 %v1961_v29, %v3688_v61  ;;  %v2078_v52 = vadd.f32 %v2077_v57, %v2024_v30  ;;  %v4232_v30 = vld [vmem:[#allocation16_spill] sm:$0xff]  ;;  %v2039_v57 = vmul.f32 %v3664_v51, %v3664_v51 }
 0x300   : > { %v2115_v45 = vadd.f32 %v2114_v40, %v2025_v50  ;;  %v2042_v51 = vmul.f32 %v3678_v7, %v3678_v7 }
 0x301   : > { %v1926_v59 = vadd.f32 %v1925_v63, %v3694_v38  ;;  %v1963_v19 = vadd.f32 %v1962_v47, %v3696_v42  ;;  %v2079_v33 = vadd.f32 %v2078_v52, %v2026_v6 }
 0x302   : > { %v2116_v43 = vadd.f32 %v2115_v45, %v2027_v25 }
 0x303   : > { %v1927_v44 = vadd.f32 %v1926_v59, %v4227_v8  ;;  %v1964_v36 = vadd.f32 %v1963_v19, %v4228_v60  ;;  %v2080_v1 = vadd.f32 %v2079_v33, %v2028_v35  ;;  %v2041_v35 = vmul.f32 %v3672_v62, %v3672_v62 }
 0x304   : > { %v2117_v22 = vadd.f32 %v2116_v43, %v2029_v28  ;;  %v2044_v62 = vmul.f32 %v3686_v54, %v3686_v54  ;;  %v4237_v54 = vld [vmem:[#allocation32_spill] sm:$0xff] }
 0x305   : > { %v1928_v11 = vadd.f32 %v1927_v44, %v4229_v18  ;;  %v1965_v4 = vadd.f32 %v1964_v36, %v4230_v5  ;;  %v2081_v2 = vadd.f32 %v2080_v1, %v2030_v31  ;;  %v2043_v44 = vmul.f32 %v3680_v21, %v3680_v21 }
 0x306   : > { %v2118_v29 = vadd.f32 %v2117_v22, %v2031_v56  ;;  %v4235_v56 = vld [vmem:[#allocation22_spill] sm:$0xff]  ;;  %v2046_v21 = vmul.f32 %v3694_v38, %v3694_v38  ;;  %v2047_v1 = vmul.f32 %v3696_v42, %v3696_v42  ;;  %v4239_v38 = vld [vmem:[#allocation36_spill] sm:$0xff]  ;;  %v2050_v42 = vmul.f32 %v4229_v18, %v4229_v18 }
 0x307   : > { %v1929_v46 = vadd.f32 %v1928_v11, %v3718_v17  ;;  %v1966_v27 = vadd.f32 %v1965_v4, %v4231_v39  ;;  %v2082_v63 = vadd.f32 %v2081_v2, %v2032_v12  ;;  %v2045_v11 = vmul.f32 %v3688_v61, %v3688_v61 }
 0x308   : > { %v2119_v47 = vadd.f32 %v2118_v29, %v2033_v14  ;;  %v2048_v61 = vmul.f32 %v4227_v8, %v4227_v8  ;;  %v2052_v8 = vmul.f32 %v3718_v17, %v3718_v17  ;;  %v2054_v18 = vmul.f32 %v4232_v30, %v4232_v30 }
 0x309   : > { %v1930_v50 = vadd.f32 %v1929_v46, %v4232_v30  ;;  %v1967_v32 = vadd.f32 %v1966_v27, %v4233_v58  ;;  %v2083_v40 = vadd.f32 %v2082_v63, %v2034_v24  ;;  %v2056_v17 = vmul.f32 %v3734_v41, %v3734_v41 }
 0x30a   : > { %v2120_v59 = vadd.f32 %v2119_v47, %v2035_v0  ;;  %v2049_v0 = vmul.f32 %v4228_v60, %v4228_v60  ;;  %v2053_v60 = vmul.f32 %v4231_v39, %v4231_v39  ;;  %v2057_v39 = vmul.f32 %v4234_v9, %v4234_v9 }
 0x30b   : > { %v1931_v6 = vadd.f32 %v1930_v50, %v3734_v41  ;;  %v1968_v25 = vadd.f32 %v1967_v32, %v4234_v9  ;;  %v2084_v28 = vadd.f32 %v2083_v40, %v2036_v20  ;;  %v4238_v50 = vld [vmem:[#allocation34_spill] sm:$0xff]  ;;  %v2058_v30 = vmul.f32 %v3742_v34, %v3742_v34 }
 0x30c   : > { %v2121_v52 = vadd.f32 %v2120_v59, %v2037_v13  ;;  %v2051_v13 = vmul.f32 %v4230_v5, %v4230_v5  ;;  %v2055_v5 = vmul.f32 %v4233_v58, %v4233_v58  ;;  %v2059_v58 = vmul.f32 %v3744_v10, %v3744_v10 }
 0x30d   : > { %v1932_v19 = vadd.f32 %v1931_v6, %v3742_v34  ;;  %v1969_v48 = vadd.f32 %v1968_v25, %v3744_v10  ;;  %v2085_v36 = vadd.f32 %v2084_v28, %v2038_v53  ;;  %v2060_v41 = vmul.f32 %v3750_v3, %v3750_v3 }
 0x30e   : > { %v2122_v31 = vadd.f32 %v2121_v52, %v2039_v57  ;;  %v2061_v9 = vmul.f32 %v3752_v37, %v3752_v37  ;;  %v2062_v34 = vmul.f32 %v4235_v56, %v4235_v56  ;;  %v2063_v10 = vmul.f32 %v4236_v49, %v4236_v49 }
 0x30f   : > { %v1933_v45 = vadd.f32 %v1932_v19, %v3750_v3  ;;  %v1970_v16 = vadd.f32 %v1969_v48, %v3752_v37  ;;  %v2086_v4 = vadd.f32 %v2085_v36, %v2040_v15  ;;  %v2435_v19 = vmov 1966171168  }
 0x310   : > { %v2123_v12 = vadd.f32 %v2122_v31, %v2041_v35  ;;  %v1985_v48 = vunpack.c.l.s4 %v2435_v19  ;;  %v2064_v3 = vmul.f32 %v3766_v23, %v3766_v23  ;;  %v2065_v37 = vmul.f32 %v3768_v55, %v3768_v55 }
 0x311   : > { %v1934_v33 = vadd.f32 %v1933_v45, %v4235_v56  ;;  %v1971_v43 = vadd.f32 %v1970_v16, %v4236_v49  ;;  %v2087_v22 = vadd.f32 %v2086_v4, %v2042_v51  ;;  %v2066_v56 = vmul.f32 %v3774_v26, %v3774_v26 }
 0x312   : > { %v2124_v46 = vadd.f32 %v2123_v12, %v2043_v44  ;;  %v1986_v36 = vunpack.c.0.s8 %v1985_v48  ;;  %v2067_v49 = vmul.f32 %v4237_v54, %v4237_v54 }
 0x313   : > { %v1935_v14 = vadd.f32 %v1934_v33, %v3766_v23  ;;  %v1972_v7 = vadd.f32 %v1971_v43, %v3768_v55  ;;  %v2088_v2 = vadd.f32 %v2087_v22, %v2044_v62  ;;  %v4241_v23 = vlaneseq }
 0x314   : > { %v2125_v29 = vadd.f32 %v2124_v46, %v2045_v11  ;;  %v2068_v55 = vmul.f32 %v4238_v50, %v4238_v50 }
 0x315   : > { %v1936_v27 = vadd.f32 %v1935_v14, %v3774_v26  ;;  %v1973_v24 = vadd.f32 %v1972_v7, %v4237_v54  ;;  %v2089_v63 = vadd.f32 %v2088_v2, %v2046_v21  ;;  %v4240_v7 = vld [vmem:[#allocation2_spill] sm:$0xff]  ;;  %vm3991_vm7 = vcmp.lt.s32.totalorder %v4241_v23, 256 }
 0x316   : > { %v2126_v47 = vadd.f32 %v2125_v29, %v2047_v1  ;;  %v1989_v21 = vsub.s32 %v1986_v36, %v4240_v7 }
 0x317   : > { %v1937_v32 = vadd.f32 %v1936_v27, %v4238_v50  ;;  %v1974_v20 = vadd.f32 %v1973_v24, %v4239_v38  ;;  %v2090_v53 = vadd.f32 %v2089_v63, %v2048_v61 }
 0x318   : > { %v2127_v57 = vadd.f32 %v2126_v47, %v2049_v0  ;;  %v1906_v0 = vld [vmem:[%s4030_s15] sm:$0x3] }
 0x319   : > { %v1938_v6 = vrot.slane %v1937_v32, 4  ;;  %v1975_v25 = vrot.slane %v1974_v20, 4  ;;  %v2091_v15 = vadd.f32 %v2090_v53, %v2050_v42  ;;  %v2069_v42 = vmul.f32 %v4239_v38, %v4239_v38 }
 0x31a   : > { %v2128_v35 = vadd.f32 %v2127_v57, %v2051_v13 }
 0x31b   : > { %v1939_v40 = vadd.f32 %v1938_v6, %v1937_v32  ;;  %v1976_v59 = vadd.f32 %v1975_v25, %v1974_v20  ;;  %v2092_v45 = vadd.f32 %v2091_v15, %v2052_v8 }
 0x31c   : > { %v2129_v16 = vadd.f32 %v2128_v35, %v2053_v60 }
 0x31d   : > { %v1940_v28 = vrot.slane %v1939_v40, 2  ;;  %v1977_v52 = vrot.slane %v1976_v59, 2  ;;  %v2093_v31 = vadd.f32 %v2092_v45, %v2054_v18 }
 0x31e   : > { %v2130_v33 = vadd.f32 %v2129_v16, %v2055_v5 }
 0x31f   : > { %v1941_v51 = vadd.f32 %v1940_v28, %v1939_v40  ;;  %v1978_v44 = vadd.f32 %v1977_v52, %v1976_v59  ;;  %v2094_v11 = vadd.f32 %v2093_v31, %v2056_v17  ;;  %v2005_v28 = vld [vmem:[%s4031_s16] sm:$0x3] }
 0x320   : > { %v2131_v4 = vadd.f32 %v2130_v33, %v2057_v39 }
 0x321   : > { %v1942_v43 = vrot.slane %v1941_v51, 1  ;;  %v1979_v62 = vrot.slane %v1978_v44, 1  ;;  %v2095_v1 = vadd.f32 %v2094_v11, %v2058_v30 }
 0x322   : > { %v2132_v22 = vadd.f32 %v2131_v4, %v2059_v58 }
 0x323   : > { %v1943_v12 = vadd.f32 %v1942_v43, %v1941_v51  ;;  %v1980_v14 = vadd.f32 %v1979_v62, %v1978_v44  ;;  %v2096_v27 = vadd.f32 %v2095_v1, %v2060_v41 }
 0x324   : > { %v2133_v24 = vadd.f32 %v2132_v22, %v2061_v9 }
 0x325   : > { %v1983_v46 = vcombine.low %v1943_v12, %v1980_v14  ;;  %v2097_v2 = vadd.f32 %v2096_v27, %v2062_v34 }
 0x326   : > { %v2134_v29 = vadd.f32 %v2133_v24, %v2063_v10 }
 0x327   : > { %v1990_v61 = vrot.slane %v1983_v46, %v1989_v21  ;;  %v2098_v13 = vadd.f32 %v2097_v2, %v2064_v3 }
 0x328   : > { %v2135_v63 = vadd.f32 %v2134_v29, %v2065_v37 }
 0x329   : > { %v1997_v32 = vrot.slane %v1990_v61, %v1989_v21  ;;  %v2099_v47 = vadd.f32 %v2098_v13, %v2066_v56 }
 0x32a   : > { %v2136_v6 = vadd.f32 %v2135_v63, %v2067_v49 }
 0x32b   : > { %v1999_v26 = vadd.f32 %v1997_v32, %v1906_v0  ;;  %v2100_v54 = vadd.f32 %v2099_v47, %v2068_v55 }
 0x32c   : > { %v2137_v25 = vadd.f32 %v2136_v6, %v2069_v42 }
 0x32d   : > { %2004 = vst.msk [vmem:[%s4030_s15] sm:$0x3] %vm3991_vm7, %v1999_v26  ;;  %v2101_v8 = vrot.slane %v2100_v54, 4 }
 0x32e   : > { %v2138_v60 = vrot.slane %v2137_v25, 4 }
 0x32f   : > { %v2102_v53 = vadd.f32 %v2101_v8, %v2100_v54 }
 0x330   : > { %v2139_v50 = vadd.f32 %v2138_v60, %v2137_v25 }
 0x331   : > { %v2103_v57 = vrot.slane %v2102_v53, 2 }
 0x332   : > { %v2140_v40 = vrot.slane %v2139_v50, 2 }
 0x333   : > { %v2104_v38 = vadd.f32 %v2103_v57, %v2102_v53 }
 0x334   : > { %v2141_v59 = vadd.f32 %v2140_v40, %v2139_v50 }
 0x335   : > { %v2105_v19 = vrot.slane %v2104_v38, 1 }
 0x336   : > { %v2142_v48 = vrot.slane %v2141_v59, 1 }
 0x337   : > { %v2106_v18 = vadd.f32 %v2105_v19, %v2104_v38 }
 0x338   : > { %v2143_v5 = vadd.f32 %v2142_v48, %v2141_v59 }
 0x33a   : > { %v2146_v15 = vcombine.low %v2106_v18, %v2143_v5 }
 0x33c   : > { %v2153_v35 = vrot.slane %v2146_v15, %v1989_v21 }
 0x33e   : > { %v2160_v52 = vrot.slane %v2153_v35, %v1989_v21 }
 0x340   : > { %v2162_v17 = vadd.f32 %v2160_v52, %v2005_v28 }
 0x342   : > { %2163 = vst.msk [vmem:[%s4031_s16] sm:$0x3] %vm3991_vm7, %v2162_v17 }
 0x343 PF: > { %s27_s21 = sadd.s32 1, %s2428_s21  }
 0x344   : > { %p24_p5 = scmp.ge.s32.totalorder %s27_s21, 4  }
 0x346   :  { %26 = sbr.rel (!%p24_p5) target bundleno = 2 (0x2), region = 129 }

// kernel: csp_bottleneck_mca.9
= control target key start
LH: loop header
LB: loop body
LE: loop exit
PB: predicated region body
PF: predicated region fallthrough
CT: control target
= control target key end

     0   :  { %10 = vsyncpa [#allocation3], 0  ;;  %s1206_s0 = inlined_call_operand.vmem [shape: f32[512,256], index: 0, kind: input, shape index: {}]   ;;  %s1207_s1 = inlined_call_operand.vmem [shape: f32[1,256], index: 1, kind: input, shape index: {}]   ;;  %s1208_s2 = inlined_call_operand.vmem [shape: f32[1,256], index: 2, kind: input, shape index: {}]   ;;  %s1209_s3 = inlined_call_operand.vmem [shape: f32[1,256], index: 3, kind: input, shape index: {}]   ;;  %s1210_s4 = inlined_call_operand.vmem [shape: f32[1,256], index: 4, kind: input, shape index: {}]   ;;  %s1211_s5 = inlined_call_operand.hbm [shape: f32[512,256], index: 5, kind: output, shape index: {}]  }
   0x1   :  { %12 = vsyncpa [#allocation3 + $0x1], 0  ;;  %s819_s18 = smov 0   ;;  %s821_s19 = smov 0  }
   0x2   :  { %s823_s20 = smov 0   ;;  %s825_s21 = smov 0  }
   0x3 LB: > { %s840_s22 = sadd.s32 4294967295, %s784_s21   ;;  %s662_s23 = sadd.s32 4294967294, %s784_s21   ;;  %s784_s21 = sphi %s825_s21, %s1217_s21   ;;  %s780_s20 = sphi %s823_s20, %s1216_s20   ;;  %s776_s19 = sphi %s821_s19, %s1215_s19   ;;  %s772_s18 = sphi %s819_s18, %s1214_s18  }
   0x4   : > { %s844_s24 = sadd.s32 1, %s784_s21   ;;  %s135_s25 = sadd.s32 1, %s780_s20 }
   0x5   : > { %s132_s26 = ssub.s32 %s784_s21, %s844_s24  ;;  %p145_p0 = scmp.ne.s32.totalorder %s780_s20, %s776_s19 }
   0x6   : > { %p133_p1 = scmp.eq.s32.totalorder %s132_s26, 0  ;;  %p146_p2 = scmp.eq.s32.totalorder %s840_s22, 1 }
   0x7   : > { %p151_p3 = scmp.ne.s32.totalorder %s776_s19, %s772_s18  ;;  %p152_p4 = scmp.eq.s32.totalorder %s662_s23, 1 }
   0x8   : > { %s855_s27 = scalar_select %p133_p1, %s780_s20, %s135_s25  }
   0x9   : > { %p857_p5 = por %p146_p2, %p145_p0  ;;  %p861_p6 = por %p152_p4, %p151_p3 }
   0xa   : > { %p665_p7 = scmp.ge.s32.totalorder %s784_s21, 1  ;;  %p192_p8 = scmp.lt.s32.totalorder %s784_s21, 3 }
   0xc   : > { %p193_p9 = pnand %p665_p7, %p192_p8 }
   0xd   : > { %v229_v0 = vld [vmem:[%s1207_s1] sm:$0x3] (!%p193_p9)  ;;  %s667_s9 = sshll.u32 (!%p193_p9), %s840_s22, 5  ;;  %v308_v7 = vlaneseq (!%p193_p9)  ;;  %s218_s23 = sand.u32 (!%p193_p9), 1, %s776_s19  }
   0xe   : > { %196 = sbr.rel (%p193_p9) target bundleno = 104 (0x68), region = 40  ;;  %v230_v1 = vld [vmem:[%s1208_s2] sm:$0x3] (!%p193_p9)  ;;  %v234_v2 = vmul.f32 (!%p193_p9), 0.001953125, %v229_v0  ;;  %p222_p10 = scmp.lt.s32.totalorder (!%p193_p9), %s667_s9, 63 }
   0xf   : > { %v235_v3 = vmul.f32 (!%p193_p9), 0.001953125, %v230_v1  ;;  %v309_v8 = vshrl.u32 (!%p193_p9), %v308_v7, 7  ;;  %v231_v9 = vld [vmem:[%s1209_s3] sm:$0x3] (!%p193_p9)  ;;  %s666_s25 = sshll.u32 (!%p193_p9), %s218_s23, 9  ;;  %s678_s30 = sshll.u32 (!%p193_p9), %s840_s22, 13 }
  0x10   : > { %v236_v4 = vmul.f32 (!%p193_p9), %v234_v2, %v234_v2  ;;  %v232_v13 = vld [vmem:[%s1210_s4] sm:$0x3] (!%p193_p9)  ;;  %s933_s26 = scalar_lea.vmem (!%p193_p9), [#allocation2], %s666_s25  ;;  %s1155_s8 = scalar_lea.hbm (!%p193_p9), %s1211_s5, %s678_s30 }
  0x11   : > { %v310_v10 = vsub.s32 (!%p193_p9), 0, %v309_v8  ;;  %v314_v11 = vsub.s32 (!%p193_p9), 1, %v309_v8  ;;  %s600_s6 = sshll.u32 (!%p193_p9), %s933_s26, 4  ;;  %s786_s11 = smov (!%p193_p9), [#allocation2]   ;;  %s1157_s6 = int_to_ptr.vmem [resolvable:$true] %s600_s6 }
  0x12   : > { %v237_v5 = vsub.f32 (!%p193_p9), %v235_v3, %v236_v4  ;;  %s726_s12 = sshll.u32 (!%p193_p9), %s786_s11, 4  ;;  %s727_s12 = int_to_ptr.vmem [resolvable:$false] %s726_s12 }
  0x13   : > { %p729_p0 = scmp.lt.s32.totalorder (!%p193_p9), %s1157_s6, %s727_s12 }
  0x14   : > { %v238_v6 = vadd.f32 (!%p193_p9), 1e-05, %v237_v5 }
  0x15   : > { %s1219_s9 = smov (!%p222_p10, %s667_s9), 63 }
  0x16   : > { %720 = vrsqrt.f32 %v238_v6  ;;  %s676_s10 = sshll.u32 %s1219_s9, 4  ;;  %s1165_s9 = scalar_lea.sflag [#allocation3], %s218_s23 }
  0x17   : > { %s877_s13 = scalar_lea.vmem %s1206_s0, %s676_s10  ;;  %s722_s10 = scalar_lea.vmem %s1157_s6, 8192 }
  0x18   : > { %v243_v15 = vld [vmem:[%s877_s13] sm:$0xff]  ;;  %v244_v16 = vld [vmem:[%s877_s13 + $0x8] sm:$0xff]  ;;  %v245_v17 = vld [vmem:[%s877_s13 + $0x10] sm:$0xff]  ;;  %p723_p11 = scmp.ne.s32.totalorder %s1157_s6, %s722_s10 }
  0x19   : > { %v246_v18 = vld [vmem:[%s877_s13 + $0x18] sm:$0xff]  ;;  %v247_v22 = vld [vmem:[%s877_s13 + $0x20] sm:$0xff]  ;;  %v248_v23 = vld [vmem:[%s877_s13 + $0x28] sm:$0xff] }
  0x1a   : > { %v249_v24 = vld [vmem:[%s877_s13 + $0x30] sm:$0xff]  ;;  %v250_v25 = vld [vmem:[%s877_s13 + $0x38] sm:$0xff]  ;;  %v251_v26 = vld [vmem:[%s877_s13 + $0x40] sm:$0xff]  ;;  %p724_p12 = pnand %p723_p11, %p857_p5 }
  0x1b   : > { %v252_v27 = vld [vmem:[%s877_s13 + $0x48] sm:$0xff]  ;;  %v253_v32 = vld [vmem:[%s877_s13 + $0x50] sm:$0xff]  ;;  %v254_v33 = vld [vmem:[%s877_s13 + $0x58] sm:$0xff] }
  0x1c   : > { %v255_v34 = vld [vmem:[%s877_s13 + $0x60] sm:$0xff]  ;;  %v256_v55 = vld [vmem:[%s877_s13 + $0x68] sm:$0xff]  ;;  %v257_v60 = vld [vmem:[%s877_s13 + $0x70] sm:$0xff]  ;;  %p725_p13 = pneg %p724_p12 }
  0x1d   : > { %v258_v61 = vld [vmem:[%s877_s13 + $0x78] sm:$0xff]  ;;  %v259_v6 = vld [vmem:[%s877_s13 + $0x80] sm:$0xff] }
  0x20   : > { %v721_v12 = vpop.eup %720 }
  0x21   : > { %v240_v14 = vmul.f32 %v721_v12, %v231_v9  ;;  %v261_v12 = vld [vmem:[%s877_s13 + $0x90] sm:$0xff] }
  0x23   : > { %v241_v19 = vmul.f32 %v240_v14, %v234_v2  ;;  %v889_v20 = vrot.slane %v240_v14, %v310_v10  ;;  %v891_v21 = vrot.slane %v240_v14, %v314_v11 }
  0x25   : > { %v242_v28 = vsub.f32 %v232_v13, %v241_v19  ;;  %v318_v29 = vmul.f32 %v889_v20, %v243_v15  ;;  %v319_v30 = vmul.f32 %v891_v21, %v244_v16  ;;  %v320_v31 = vmul.f32 %v889_v20, %v245_v17  ;;  %v262_v13 = vld [vmem:[%s877_s13 + $0x98] sm:$0xff] }
  0x26   : > { %v321_v35 = vmul.f32 %v891_v21, %v246_v18  ;;  %v322_v36 = vmul.f32 %v889_v20, %v247_v22  ;;  %v323_v37 = vmul.f32 %v891_v21, %v248_v23  ;;  %v324_v38 = vmul.f32 %v889_v20, %v249_v24  ;;  %v263_v18 = vld [vmem:[%s877_s13 + $0xa0] sm:$0xff] }
  0x27   : > { %v912_v39 = vrot.slane %v242_v28, %v310_v10  ;;  %v914_v40 = vrot.slane %v242_v28, %v314_v11  ;;  %v325_v41 = vmul.f32 %v891_v21, %v250_v25  ;;  %v326_v42 = vmul.f32 %v889_v20, %v251_v26  ;;  %v260_v11 = vld [vmem:[%s877_s13 + $0x88] sm:$0xff] }
  0x28   : > { %v327_v43 = vmul.f32 %v891_v21, %v252_v27  ;;  %v328_v44 = vmul.f32 %v889_v20, %v253_v32  ;;  %v329_v45 = vmul.f32 %v891_v21, %v254_v33  ;;  %v330_v46 = vmul.f32 %v889_v20, %v255_v34 }
  0x29   : > { %v393_v47 = vadd.f32 %v912_v39, %v318_v29  ;;  %v394_v48 = vadd.f32 %v914_v40, %v319_v30  ;;  %v395_v49 = vadd.f32 %v912_v39, %v320_v31  ;;  %v396_v50 = vadd.f32 %v914_v40, %v321_v35  ;;  %v264_v29 = vld [vmem:[%s877_s13 + $0xa8] sm:$0xff]  ;;  %v265_v30 = vld [vmem:[%s877_s13 + $0xb0] sm:$0xff]  ;;  %v266_v31 = vld [vmem:[%s877_s13 + $0xb8] sm:$0xff] }
  0x2a   : > { %v397_v51 = vadd.f32 %v912_v39, %v322_v36  ;;  %v398_v52 = vadd.f32 %v914_v40, %v323_v37  ;;  %v399_v53 = vadd.f32 %v912_v39, %v324_v38  ;;  %v400_v54 = vadd.f32 %v914_v40, %v325_v41 }
  0x2b   : > { %v457_v56 = vmax.f32 %v393_v47, 0.0  ;;  %v458_v57 = vmax.f32 %v394_v48, 0.0  ;;  %v459_v58 = vmax.f32 %v395_v49, 0.0  ;;  %v460_v59 = vmax.f32 %v396_v50, 0.0  ;;  %v268_v47 = vld [vmem:[%s877_s13 + $0xc8] sm:$0xff]  ;;  %v269_v48 = vld [vmem:[%s877_s13 + $0xd0] sm:$0xff] }
  0x2c   : > { %v461_v62 = vmax.f32 %v397_v51, 0.0  ;;  %v462_v63 = vmax.f32 %v398_v52, 0.0  ;;  %v463_v0 = vmax.f32 %v399_v53, 0.0  ;;  %v464_v1 = vmax.f32 %v400_v54, 0.0  ;;  %v270_v49 = vld [vmem:[%s877_s13 + $0xd8] sm:$0xff]  ;;  %v271_v54 = vld [vmem:[%s877_s13 + $0xe0] sm:$0xff] }
  0x2d   : > { %521 = vst [vmem:[%s933_s26] sm:$0xff] %v457_v56  ;;  %522 = vst [vmem:[%s933_s26 + $0x8] sm:$0xff] %v458_v57  ;;  %v401_v2 = vadd.f32 %v912_v39, %v326_v42  ;;  %v402_v3 = vadd.f32 %v914_v40, %v327_v43  ;;  %v403_v4 = vadd.f32 %v912_v39, %v328_v44  ;;  %v267_v42 = vld [vmem:[%s877_s13 + $0xc0] sm:$0xff] }
  0x2e   : > { %523 = vst [vmem:[%s933_s26 + $0x10] sm:$0xff] %v459_v58  ;;  %524 = vst [vmem:[%s933_s26 + $0x18] sm:$0xff] %v460_v59  ;;  %v404_v5 = vadd.f32 %v914_v40, %v329_v45  ;;  %v405_v7 = vadd.f32 %v912_v39, %v330_v46  ;;  %v331_v8 = vmul.f32 %v891_v21, %v256_v55 }
  0x2f   : > { %525 = vst [vmem:[%s933_s26 + $0x20] sm:$0xff] %v461_v62  ;;  %526 = vst [vmem:[%s933_s26 + $0x28] sm:$0xff] %v462_v63  ;;  %v332_v9 = vmul.f32 %v889_v20, %v257_v60  ;;  %v333_v10 = vmul.f32 %v891_v21, %v258_v61  ;;  %v465_v14 = vmax.f32 %v401_v2, 0.0  ;;  %v466_v15 = vmax.f32 %v402_v3, 0.0  ;;  %v272_v63 = vld [vmem:[%s877_s13 + $0xe8] sm:$0xff] }
  0x30   : > { %527 = vst [vmem:[%s933_s26 + $0x30] sm:$0xff] %v463_v0  ;;  %528 = vst [vmem:[%s933_s26 + $0x38] sm:$0xff] %v464_v1  ;;  %v467_v16 = vmax.f32 %v403_v4, 0.0  ;;  %v468_v17 = vmax.f32 %v404_v5, 0.0  ;;  %v469_v19 = vmax.f32 %v405_v7, 0.0  ;;  %v406_v22 = vadd.f32 %v914_v40, %v331_v8  ;;  %v273_v0 = vld [vmem:[%s877_s13 + $0xf0] sm:$0xff] }
  0x31   : > { %v407_v23 = vadd.f32 %v912_v39, %v332_v9  ;;  %v408_v24 = vadd.f32 %v914_v40, %v333_v10  ;;  %529 = vst [vmem:[%s933_s26 + $0x40] sm:$0xff] %v465_v14  ;;  %530 = vst [vmem:[%s933_s26 + $0x48] sm:$0xff] %v466_v15  ;;  %v334_v25 = vmul.f32 %v889_v20, %v259_v6  ;;  %v274_v1 = vld [vmem:[%s877_s13 + $0xf8] sm:$0xff]  ;;  %v275_v10 = vld [vmem:[%s877_s13 + $0x100] sm:$0xff] }
  0x32   : > { %531 = vst [vmem:[%s933_s26 + $0x50] sm:$0xff] %v467_v16  ;;  %532 = vst [vmem:[%s933_s26 + $0x58] sm:$0xff] %v468_v17  ;;  %v335_v26 = vmul.f32 %v891_v21, %v260_v11  ;;  %v336_v27 = vmul.f32 %v889_v20, %v261_v12  ;;  %v337_v28 = vmul.f32 %v891_v21, %v262_v13  ;;  %v470_v32 = vmax.f32 %v406_v22, 0.0  ;;  %v276_v15 = vld [vmem:[%s877_s13 + $0x108] sm:$0xff]  ;;  %v277_v16 = vld [vmem:[%s877_s13 + $0x110] sm:$0xff] }
  0x33   : > { %533 = vst [vmem:[%s933_s26 + $0x60] sm:$0xff] %v469_v19  ;;  %v471_v33 = vmax.f32 %v407_v23, 0.0  ;;  %v472_v34 = vmax.f32 %v408_v24, 0.0  ;;  %v338_v35 = vmul.f32 %v889_v20, %v263_v18  ;;  %v409_v36 = vadd.f32 %v912_v39, %v334_v25  ;;  %v278_v17 = vld [vmem:[%s877_s13 + $0x118] sm:$0xff]  ;;  %v279_v24 = vld [vmem:[%s877_s13 + $0x120] sm:$0xff] }
  0x34   : > { %v410_v37 = vadd.f32 %v914_v40, %v335_v26  ;;  %v411_v38 = vadd.f32 %v912_v39, %v336_v27  ;;  %v412_v41 = vadd.f32 %v914_v40, %v337_v28  ;;  %534 = vst [vmem:[%s933_s26 + $0x68] sm:$0xff] %v470_v32  ;;  %v339_v44 = vmul.f32 %v891_v21, %v264_v29 }
  0x35   : > { %535 = vst [vmem:[%s933_s26 + $0x70] sm:$0xff] %v471_v33  ;;  %536 = vst [vmem:[%s933_s26 + $0x78] sm:$0xff] %v472_v34  ;;  %v413_v43 = vadd.f32 %v912_v39, %v338_v35  ;;  %v340_v45 = vmul.f32 %v889_v20, %v265_v30  ;;  %v341_v46 = vmul.f32 %v891_v21, %v266_v31  ;;  %v473_v50 = vmax.f32 %v409_v36, 0.0  ;;  %v280_v33 = vld [vmem:[%s877_s13 + $0x128] sm:$0xff]  ;;  %v281_v34 = vld [vmem:[%s877_s13 + $0x130] sm:$0xff] }
  0x36   : > { %v474_v51 = vmax.f32 %v410_v37, 0.0  ;;  %v475_v52 = vmax.f32 %v411_v38, 0.0  ;;  %v476_v53 = vmax.f32 %v412_v41, 0.0  ;;  %v414_v56 = vadd.f32 %v914_v40, %v339_v44  ;;  %v282_v35 = vld [vmem:[%s877_s13 + $0x138] sm:$0xff] }
  0x37   : > { %v477_v55 = vmax.f32 %v413_v43, 0.0  ;;  %v415_v57 = vadd.f32 %v912_v39, %v340_v45  ;;  %v416_v58 = vadd.f32 %v914_v40, %v341_v46  ;;  %537 = vst [vmem:[%s933_s26 + $0x80] sm:$0xff] %v473_v50  ;;  %v342_v59 = vmul.f32 %v889_v20, %v267_v42  ;;  %v283_v46 = vld [vmem:[%s877_s13 + $0x140] sm:$0xff] }
  0x38   : > { %538 = vst [vmem:[%s933_s26 + $0x88] sm:$0xff] %v474_v51  ;;  %539 = vst [vmem:[%s933_s26 + $0x90] sm:$0xff] %v475_v52  ;;  %v343_v60 = vmul.f32 %v891_v21, %v268_v47  ;;  %v344_v61 = vmul.f32 %v889_v20, %v269_v48  ;;  %v345_v62 = vmul.f32 %v891_v21, %v270_v49  ;;  %v478_v2 = vmax.f32 %v414_v56, 0.0  ;;  %v284_v51 = vld [vmem:[%s877_s13 + $0x148] sm:$0xff]  ;;  %v285_v52 = vld [vmem:[%s877_s13 + $0x150] sm:$0xff] }
  0x39   : > { %540 = vst [vmem:[%s933_s26 + $0x98] sm:$0xff] %v476_v53  ;;  %541 = vst [vmem:[%s933_s26 + $0xa0] sm:$0xff] %v477_v55  ;;  %v479_v3 = vmax.f32 %v415_v57, 0.0  ;;  %v480_v4 = vmax.f32 %v416_v58, 0.0  ;;  %v346_v5 = vmul.f32 %v889_v20, %v271_v54  ;;  %v417_v6 = vadd.f32 %v912_v39, %v342_v59  ;;  %v286_v53 = vld [vmem:[%s877_s13 + $0x158] sm:$0xff]  ;;  %v287_v58 = vld [vmem:[%s877_s13 + $0x160] sm:$0xff] }
  0x3a   : > { %v418_v7 = vadd.f32 %v914_v40, %v343_v60  ;;  %v419_v8 = vadd.f32 %v912_v39, %v344_v61  ;;  %v420_v9 = vadd.f32 %v914_v40, %v345_v62  ;;  %542 = vst [vmem:[%s933_s26 + $0xa8] sm:$0xff] %v478_v2  ;;  %v347_v12 = vmul.f32 %v891_v21, %v272_v63 }
  0x3b   : > { %543 = vst [vmem:[%s933_s26 + $0xb0] sm:$0xff] %v479_v3  ;;  %544 = vst [vmem:[%s933_s26 + $0xb8] sm:$0xff] %v480_v4  ;;  %v421_v11 = vadd.f32 %v912_v39, %v346_v5  ;;  %v348_v13 = vmul.f32 %v889_v20, %v273_v0  ;;  %v349_v14 = vmul.f32 %v891_v21, %v274_v1  ;;  %v481_v18 = vmax.f32 %v417_v6, 0.0  ;;  %v288_v3 = vld [vmem:[%s877_s13 + $0x168] sm:$0xff]  ;;  %v289_v4 = vld [vmem:[%s877_s13 + $0x170] sm:$0xff] }
  0x3c   : > { %v482_v19 = vmax.f32 %v418_v7, 0.0  ;;  %v483_v22 = vmax.f32 %v419_v8, 0.0  ;;  %v484_v23 = vmax.f32 %v420_v9, 0.0  ;;  %v422_v26 = vadd.f32 %v914_v40, %v347_v12  ;;  %v290_v5 = vld [vmem:[%s877_s13 + $0x178] sm:$0xff] }
  0x3d   : > { %v485_v25 = vmax.f32 %v421_v11, 0.0  ;;  %v423_v27 = vadd.f32 %v912_v39, %v348_v13  ;;  %v424_v28 = vadd.f32 %v914_v40, %v349_v14  ;;  %545 = vst [vmem:[%s933_s26 + $0xc0] sm:$0xff] %v481_v18  ;;  %v350_v29 = vmul.f32 %v889_v20, %v275_v10  ;;  %v291_v14 = vld [vmem:[%s877_s13 + $0x180] sm:$0xff] }
  0x3e   : > { %546 = vst [vmem:[%s933_s26 + $0xc8] sm:$0xff] %v482_v19  ;;  %547 = vst [vmem:[%s933_s26 + $0xd0] sm:$0xff] %v483_v22  ;;  %v351_v30 = vmul.f32 %v891_v21, %v276_v15  ;;  %v352_v31 = vmul.f32 %v889_v20, %v277_v16  ;;  %v353_v32 = vmul.f32 %v891_v21, %v278_v17  ;;  %v486_v36 = vmax.f32 %v422_v26, 0.0  ;;  %v292_v19 = vld [vmem:[%s877_s13 + $0x188] sm:$0xff]  ;;  %v293_v22 = vld [vmem:[%s877_s13 + $0x190] sm:$0xff] }
  0x3f   : > { %548 = vst [vmem:[%s933_s26 + $0xd8] sm:$0xff] %v484_v23  ;;  %549 = vst [vmem:[%s933_s26 + $0xe0] sm:$0xff] %v485_v25  ;;  %v487_v37 = vmax.f32 %v423_v27, 0.0  ;;  %v488_v38 = vmax.f32 %v424_v28, 0.0  ;;  %v354_v41 = vmul.f32 %v889_v20, %v279_v24  ;;  %v425_v42 = vadd.f32 %v912_v39, %v350_v29  ;;  %v294_v23 = vld [vmem:[%s877_s13 + $0x198] sm:$0xff]  ;;  %v295_v28 = vld [vmem:[%s877_s13 + $0x1a0] sm:$0xff] }
  0x40   : > { %v426_v43 = vadd.f32 %v914_v40, %v351_v30  ;;  %v427_v44 = vadd.f32 %v912_v39, %v352_v31  ;;  %v428_v45 = vadd.f32 %v914_v40, %v353_v32  ;;  %550 = vst [vmem:[%s933_s26 + $0xe8] sm:$0xff] %v486_v36  ;;  %v355_v48 = vmul.f32 %v891_v21, %v280_v33 }
  0x41   : > { %551 = vst [vmem:[%s933_s26 + $0xf0] sm:$0xff] %v487_v37  ;;  %552 = vst [vmem:[%s933_s26 + $0xf8] sm:$0xff] %v488_v38  ;;  %v429_v47 = vadd.f32 %v912_v39, %v354_v41  ;;  %v356_v49 = vmul.f32 %v889_v20, %v281_v34  ;;  %v357_v50 = vmul.f32 %v891_v21, %v282_v35  ;;  %v489_v54 = vmax.f32 %v425_v42, 0.0  ;;  %v296_v37 = vld [vmem:[%s877_s13 + $0x1a8] sm:$0xff]  ;;  %v297_v38 = vld [vmem:[%s877_s13 + $0x1b0] sm:$0xff] }
  0x42   : > { %v490_v55 = vmax.f32 %v426_v43, 0.0  ;;  %v491_v56 = vmax.f32 %v427_v44, 0.0  ;;  %v492_v57 = vmax.f32 %v428_v45, 0.0  ;;  %v430_v60 = vadd.f32 %v914_v40, %v355_v48  ;;  %v298_v41 = vld [vmem:[%s877_s13 + $0x1b8] sm:$0xff] }
  0x43   : > { %v493_v59 = vmax.f32 %v429_v47, 0.0  ;;  %v431_v61 = vadd.f32 %v912_v39, %v356_v49  ;;  %v432_v62 = vadd.f32 %v914_v40, %v357_v50  ;;  %553 = vst [vmem:[%s933_s26 + $0x100] sm:$0xff] %v489_v54  ;;  %v358_v63 = vmul.f32 %v889_v20, %v283_v46  ;;  %v299_v50 = vld [vmem:[%s877_s13 + $0x1c0] sm:$0xff] }
  0x44   : > { %554 = vst [vmem:[%s933_s26 + $0x108] sm:$0xff] %v490_v55  ;;  %555 = vst [vmem:[%s933_s26 + $0x110] sm:$0xff] %v491_v56  ;;  %v359_v0 = vmul.f32 %v891_v21, %v284_v51  ;;  %v360_v1 = vmul.f32 %v889_v20, %v285_v52  ;;  %v361_v2 = vmul.f32 %v891_v21, %v286_v53  ;;  %v494_v6 = vmax.f32 %v430_v60, 0.0  ;;  %v300_v55 = vld [vmem:[%s877_s13 + $0x1c8] sm:$0xff]  ;;  %v301_v56 = vld [vmem:[%s877_s13 + $0x1d0] sm:$0xff] }
  0x45   : > { %556 = vst [vmem:[%s933_s26 + $0x118] sm:$0xff] %v492_v57  ;;  %557 = vst [vmem:[%s933_s26 + $0x120] sm:$0xff] %v493_v59  ;;  %v495_v7 = vmax.f32 %v431_v61, 0.0  ;;  %v496_v8 = vmax.f32 %v432_v62, 0.0  ;;  %v362_v9 = vmul.f32 %v889_v20, %v287_v58  ;;  %v433_v10 = vadd.f32 %v912_v39, %v358_v63  ;;  %v302_v57 = vld [vmem:[%s877_s13 + $0x1d8] sm:$0xff]  ;;  %v303_v62 = vld [vmem:[%s877_s13 + $0x1e0] sm:$0xff] }
  0x46   : > { %v434_v11 = vadd.f32 %v914_v40, %v359_v0  ;;  %v435_v12 = vadd.f32 %v912_v39, %v360_v1  ;;  %v436_v13 = vadd.f32 %v914_v40, %v361_v2  ;;  %558 = vst [vmem:[%s933_s26 + $0x128] sm:$0xff] %v494_v6  ;;  %v363_v16 = vmul.f32 %v891_v21, %v288_v3 }
  0x47   : > { %559 = vst [vmem:[%s933_s26 + $0x130] sm:$0xff] %v495_v7  ;;  %560 = vst [vmem:[%s933_s26 + $0x138] sm:$0xff] %v496_v8  ;;  %v437_v15 = vadd.f32 %v912_v39, %v362_v9  ;;  %v364_v17 = vmul.f32 %v889_v20, %v289_v4  ;;  %v365_v18 = vmul.f32 %v891_v21, %v290_v5  ;;  %v497_v24 = vmax.f32 %v433_v10, 0.0  ;;  %v304_v7 = vld [vmem:[%s877_s13 + $0x1e8] sm:$0xff]  ;;  %v305_v8 = vld [vmem:[%s877_s13 + $0x1f0] sm:$0xff] }
  0x48   : > { %v498_v25 = vmax.f32 %v434_v11, 0.0  ;;  %v499_v26 = vmax.f32 %v435_v12, 0.0  ;;  %v500_v27 = vmax.f32 %v436_v13, 0.0  ;;  %v438_v30 = vadd.f32 %v914_v40, %v363_v16  ;;  %v306_v9 = vld [vmem:[%s877_s13 + $0x1f8] sm:$0xff]  ;;  %s728_s13 = scalar_lea.vmem %s727_s12, 16384 }
  0x49   : > { %v501_v29 = vmax.f32 %v437_v15, 0.0  ;;  %v439_v31 = vadd.f32 %v912_v39, %v364_v17  ;;  %v440_v32 = vadd.f32 %v914_v40, %v365_v18  ;;  %561 = vst [vmem:[%s933_s26 + $0x140] sm:$0xff] %v497_v24  ;;  %v366_v33 = vmul.f32 %v889_v20, %v291_v14  ;;  %p730_p1 = scmp.lt.s32.totalorder %s728_s13, %s722_s10 }
  0x4a   : > { %562 = vst [vmem:[%s933_s26 + $0x148] sm:$0xff] %v498_v25  ;;  %563 = vst [vmem:[%s933_s26 + $0x150] sm:$0xff] %v499_v26  ;;  %v367_v34 = vmul.f32 %v891_v21, %v292_v19  ;;  %v368_v35 = vmul.f32 %v889_v20, %v293_v22  ;;  %v369_v36 = vmul.f32 %v891_v21, %v294_v23  ;;  %v502_v42 = vmax.f32 %v438_v30, 0.0 }
  0x4b   : > { %564 = vst [vmem:[%s933_s26 + $0x158] sm:$0xff] %v500_v27  ;;  %565 = vst [vmem:[%s933_s26 + $0x160] sm:$0xff] %v501_v29  ;;  %v503_v43 = vmax.f32 %v439_v31, 0.0  ;;  %v504_v44 = vmax.f32 %v440_v32, 0.0  ;;  %v370_v45 = vmul.f32 %v889_v20, %v295_v28  ;;  %v441_v46 = vadd.f32 %v912_v39, %v366_v33  ;;  %p731_p2 = por %p730_p1, %p729_p0 }
  0x4c   : > { %v442_v47 = vadd.f32 %v914_v40, %v367_v34  ;;  %v443_v48 = vadd.f32 %v912_v39, %v368_v35  ;;  %v444_v49 = vadd.f32 %v914_v40, %v369_v36  ;;  %566 = vst [vmem:[%s933_s26 + $0x168] sm:$0xff] %v502_v42  ;;  %v371_v52 = vmul.f32 %v891_v21, %v296_v37 }
  0x4d   : > { %567 = vst [vmem:[%s933_s26 + $0x170] sm:$0xff] %v503_v43  ;;  %568 = vst [vmem:[%s933_s26 + $0x178] sm:$0xff] %v504_v44  ;;  %v445_v51 = vadd.f32 %v912_v39, %v370_v45  ;;  %v372_v53 = vmul.f32 %v889_v20, %v297_v38  ;;  %v373_v54 = vmul.f32 %v891_v21, %v298_v41  ;;  %v505_v58 = vmax.f32 %v441_v46, 0.0  ;;  %p732_p3 = pnand %p731_p2, %p725_p13 }
  0x4e   : > { %v506_v59 = vmax.f32 %v442_v47, 0.0  ;;  %v507_v60 = vmax.f32 %v443_v48, 0.0  ;;  %v508_v61 = vmax.f32 %v444_v49, 0.0  ;;  %v446_v0 = vadd.f32 %v914_v40, %v371_v52 }
  0x4f   : > { %v509_v63 = vmax.f32 %v445_v51, 0.0  ;;  %v447_v1 = vadd.f32 %v912_v39, %v372_v53  ;;  %v448_v2 = vadd.f32 %v914_v40, %v373_v54  ;;  %569 = vst [vmem:[%s933_s26 + $0x180] sm:$0xff] %v505_v58  ;;  %v374_v3 = vmul.f32 %v889_v20, %v299_v50 }
  0x50   : > { %570 = vst [vmem:[%s933_s26 + $0x188] sm:$0xff] %v506_v59  ;;  %571 = vst [vmem:[%s933_s26 + $0x190] sm:$0xff] %v507_v60  ;;  %v375_v4 = vmul.f32 %v891_v21, %v300_v55  ;;  %v376_v5 = vmul.f32 %v889_v20, %v301_v56  ;;  %v377_v6 = vmul.f32 %v891_v21, %v302_v57  ;;  %v510_v10 = vmax.f32 %v446_v0, 0.0 }
  0x51   : > { %572 = vst [vmem:[%s933_s26 + $0x198] sm:$0xff] %v508_v61  ;;  %573 = vst [vmem:[%s933_s26 + $0x1a0] sm:$0xff] %v509_v63  ;;  %v511_v11 = vmax.f32 %v447_v1, 0.0  ;;  %v512_v12 = vmax.f32 %v448_v2, 0.0  ;;  %v378_v13 = vmul.f32 %v889_v20, %v303_v62  ;;  %v449_v14 = vadd.f32 %v912_v39, %v374_v3 }
  0x52   : > { %v450_v15 = vadd.f32 %v914_v40, %v375_v4  ;;  %v451_v16 = vadd.f32 %v912_v39, %v376_v5  ;;  %v452_v17 = vadd.f32 %v914_v40, %v377_v6  ;;  %574 = vst [vmem:[%s933_s26 + $0x1a8] sm:$0xff] %v510_v10  ;;  %v379_v19 = vmul.f32 %v891_v21, %v304_v7 }
  0x53   : > { %575 = vst [vmem:[%s933_s26 + $0x1b0] sm:$0xff] %v511_v11  ;;  %576 = vst [vmem:[%s933_s26 + $0x1b8] sm:$0xff] %v512_v12  ;;  %v453_v18 = vadd.f32 %v912_v39, %v378_v13  ;;  %v380_v22 = vmul.f32 %v889_v20, %v305_v8  ;;  %v381_v23 = vmul.f32 %v891_v21, %v306_v9  ;;  %v513_v24 = vmax.f32 %v449_v14, 0.0 }
  0x54   : > { %v514_v25 = vmax.f32 %v450_v15, 0.0  ;;  %v515_v26 = vmax.f32 %v451_v16, 0.0  ;;  %v516_v27 = vmax.f32 %v452_v17, 0.0  ;;  %v454_v29 = vadd.f32 %v914_v40, %v379_v19 }
  0x55   : > { %v517_v28 = vmax.f32 %v453_v18, 0.0  ;;  %v455_v30 = vadd.f32 %v912_v39, %v380_v22  ;;  %v456_v20 = vadd.f32 %v914_v40, %v381_v23  ;;  %577 = vst [vmem:[%s933_s26 + $0x1c0] sm:$0xff] %v513_v24 }
  0x56   : > { %578 = vst [vmem:[%s933_s26 + $0x1c8] sm:$0xff] %v514_v25  ;;  %579 = vst [vmem:[%s933_s26 + $0x1d0] sm:$0xff] %v515_v26  ;;  %v518_v21 = vmax.f32 %v454_v29, 0.0 }
  0x57   : > { %580 = vst [vmem:[%s933_s26 + $0x1d8] sm:$0xff] %v516_v27  ;;  %581 = vst [vmem:[%s933_s26 + $0x1e0] sm:$0xff] %v517_v28  ;;  %v519_v39 = vmax.f32 %v455_v30, 0.0  ;;  %v520_v31 = vmax.f32 %v456_v20, 0.0 }
  0x58   : > { %582 = vst [vmem:[%s933_s26 + $0x1e8] sm:$0xff] %v518_v21 }
  0x59   : > { %583 = vst [vmem:[%s933_s26 + $0x1f0] sm:$0xff] %v519_v39  ;;  %584 = vst [vmem:[%s933_s26 + $0x1f8] sm:$0xff] %v520_v31 }
  0x5a   : > { %735 = shalt.err (!%p732_p3)
}
  0x5b   : > { %s736_s14 = scalar_lea.hbm %s1155_s8, 8192  ;;  %s740_s17 = scalar_lea.hbm %s1211_s5, 16384 }
  0x5c   : > { %p737_p4 = scmp.ne.s32.totalorder %s1155_s8, %s736_s14  ;;  %p741_p9 = scmp.lt.u32.totalorder %s1155_s8, %s1211_s5 }
  0x5d   : > { %p742_p10 = scmp.lt.u32.totalorder %s740_s17, %s736_s14  ;;  %p744_p12 = scmp.lt.u32.totalorder %s736_s14, %s1155_s8 }
  0x5e   : > { %p738_p7 = pnand %p737_p4, %p857_p5 }
  0x5f   : > { %p743_p11 = por %p742_p10, %p741_p9 }
  0x60   : > { %p739_p8 = pneg %p738_p7 }
  0x61   : > { %p745_p13 = por %p744_p12, %p743_p11 }
  0x63   : > { %p746_p0 = pnand %p745_p13, %p739_p8 }
  0x65   : > { %749 = shalt.err (!%p746_p0)
}
  0x66   : > { %s787_s26 = smov 256   ;;  %s788_s30 = smov 16  }
  0x67   : > { %679 = dma.vmem_to_hbm [thread:$0]  (%p857_p5), %s1157_s6, 8192, %s1155_s8, %s1165_s9, %s787_s26, %s787_s26, %s788_s30  }
  0x68 PF: > { %p685_p1 = scmp.ge.s32.totalorder %s784_s21, 2  ;;  %s615_s22 = sand.u32 1, %s772_s18  }
  0x69   : > { %s616_s7 = scalar_lea.sflag [#allocation3], %s615_s22 }
  0x6a   : > { %p682_p2 = pnand %p685_p1, %p861_p6 }
  0x6c   : > { %767 = dma.done.wait (!%p682_p2), %s616_s7, 8192  }
  0x6d   : > { %769 = vsyncadd (!%p682_p2), %s616_s7, 4294959104  ;;  %p15_p3 = scmp.ge.s32.totalorder %s844_s24, 4   ;;  %s1214_s18 = smov %s776_s19 }
  0x6e   : > { %s1215_s19 = smov %s780_s20  ;;  %s1216_s20 = smov %s855_s27 }
  0x6f   : > { %s1217_s21 = smov %s844_s24  ;;  %17 = sbr.rel (!%p15_p3) target bundleno = 3 (0x3), region = 75 }
  0x76   :  { %621 = vsyncpa [#allocation3], 1 }
  0x77   :  { %623 = vsyncpa [#allocation3 + $0x1], 1 }

// kernel: csp_bottleneck_mca.6
= control target key start
LH: loop header
LB: loop body
LE: loop exit
PB: predicated region body
PF: predicated region fallthrough
CT: control target
= control target key end

     0   :  { %s5479_s27 = smov 0   ;;  %s6937_s0 = inlined_call_operand.vmem [shape: f32[2,18,18,128], index: 0, kind: input, shape index: {}]   ;;  %s6938_s1 = inlined_call_operand.vmem [shape: f32[1,128], index: 1, kind: input, shape index: {}]   ;;  %s6939_s2 = inlined_call_operand.vmem [shape: f32[1,128], index: 2, kind: input, shape index: {}]   ;;  %s6940_s3 = inlined_call_operand.vmem [shape: f32[1,128], index: 3, kind: input, shape index: {}]   ;;  %s6941_s4 = inlined_call_operand.vmem [shape: f32[1,128], index: 4, kind: input, shape index: {}]   ;;  %s6942_s5 = inlined_call_operand.vmem [shape: f32[9,128,128], index: 5, kind: input, shape index: {}]   ;;  %s6943_s6 = inlined_call_operand.vmem [shape: f32[2,16,16,128], index: 6, kind: output, shape index: {0}]   ;;  %s6944_s7 = inlined_call_operand.vmem [shape: f32[1,128], index: 7, kind: output, shape index: {1}]   ;;  %s6945_s8 = inlined_call_operand.vmem [shape: f32[1,128], index: 8, kind: output, shape index: {2}]  }
   0x1 LB: > { %s5485_s28 = sadd.s32 4294967295, %s5430_s27   ;;  %p3531_p0 = scmp.ge.s32.totalorder %s5430_s27, 1  ;;  %s5430_s27 = sphi %s5479_s27, %s19_s27  }
   0x2   : > { %p257_p1 = scmp.lt.s32.totalorder %s5430_s27, 3 }
   0x4   : > { %p258_p2 = pnand %p3531_p0, %p257_p1 }
   0x6   : > { %261 = sbr.rel (%p258_p2) target bundleno = 642 (0x282), region = 44 }
   0xd   : > { %v3535_v0 = vld [vmem:[%s6942_s5 + $0x80] sm:$0xff]  ;;  %v3536_v1 = vld [vmem:[%s6942_s5 + $0x88] sm:$0xff]  ;;  %v3537_v5 = vld [vmem:[%s6942_s5 + $0x90] sm:$0xff]  ;;  %v5432_v7 = vmov 0.0   ;;  %p291_p3 = scmp.lt.s32.totalorder %s5485_s28, 1  ;;  %v370_v50 = vlaneseq  ;;  %p3663_p4 = scmp.ne.s32.totalorder %s5485_s28, 0 }
   0xe   : > { %v3583_v2 = vld [vmem:[%s6942_s5 + $0x200] sm:$0xff]  ;;  %v4819_v3 = vpack.c.bf16 %v3536_v1, %v3535_v0  ;;  %v3584_v4 = vld [vmem:[%s6942_s5 + $0x208] sm:$0xff]  ;;  %v3538_v6 = vld [vmem:[%s6942_s5 + $0x98] sm:$0xff]  ;;  %565 = vst [vmem:[#allocation2] sm:$0xff] %v5432_v7 }
   0xf   : > { %566 = vst [vmem:[#allocation2 + $0x8] sm:$0xff] %v5432_v7  ;;  %567 = vst [vmem:[#allocation2 + $0x10] sm:$0x3] %v5432_v7  ;;  %v5507_v8 = vpack.c.bf16 %v3584_v4, %v3583_v2  ;;  %v4823_v9 = vpack.c.bf16 %v3538_v6, %v3537_v5  ;;  %v3585_v10 = vld [vmem:[%s6942_s5 + $0x210] sm:$0xff]  ;;  %v3586_v11 = vld [vmem:[%s6942_s5 + $0x218] sm:$0xff]  ;;  %s5606_s29 = scalar_select %p291_p3, %s5485_s28, 1 }
  0x10   : > { %616 = vst [vmem:[#allocation2 + $0x198] sm:$0xff] %v5432_v7  ;;  %617 = vst [vmem:[#allocation2 + $0x1a0] sm:$0xff] %v5432_v7  ;;  %v3539_v12 = vld [vmem:[%s6942_s5 + $0xa0] sm:$0xff]  ;;  %4820 = vmatprep.subr.bf16.mxu1 %v4819_v3  ;;  %v5518_v13 = vpack.c.bf16 %v3586_v11, %v3585_v10  ;;  %v3540_v14 = vld [vmem:[%s6942_s5 + $0xa8] sm:$0xff]  ;;  %v5626_v57 = vshrl.u32 %v370_v50, 7 }
  0x11   : > { %618 = vst [vmem:[#allocation2 + $0x1a8] sm:$0x3] %v5432_v7  ;;  %v3587_v15 = vld [vmem:[%s6942_s5 + $0x220] sm:$0xff]  ;;  %v3588_v16 = vld [vmem:[%s6942_s5 + $0x228] sm:$0xff]  ;;  %4822 = vmatpush3.bf16.msra.mxu1 %v4819_v3  ;;  %4948 = vmatprep.subr.bf16.mxu0 %v5507_v8  ;;  %v4827_v17 = vpack.c.bf16 %v3540_v14, %v3539_v12  ;;  %v3541_v19 = vld [vmem:[%s6942_s5 + $0xb0] sm:$0xff]  ;;  %s5379_s16 = smul.u32 432, %s5606_s29 }
  0x12   : > { %6967 = vst [vmem:[#allocation3_spill] sm:$0xff] %v5518_v13  ;;  %4824 = vmatprep.subr.bf16.mxu1 %v4823_v9  ;;  %4950 = vmatpush3.bf16.msra.mxu0 %v5507_v8  ;;  %v5532_v18 = vpack.c.bf16 %v3588_v16, %v3587_v15  ;;  %v3542_v20 = vld [vmem:[%s6942_s5 + $0xb8] sm:$0xff]  ;;  %v3589_v21 = vld [vmem:[%s6942_s5 + $0x230] sm:$0xff]  ;;  %v3543_v24 = vld [vmem:[%s6942_s5 + $0xc0] sm:$0xff]  ;;  %v372_v5 = vsub.s32 0, %v5626_v57  ;;  %v5669_v7 = vadd.s32 16, %v5626_v57 }
  0x13   : > { %4952 = vmatprep.subr.bf16.mxu0 %v5518_v13  ;;  %v3590_v22 = vld [vmem:[%s6942_s5 + $0x238] sm:$0xff]  ;;  %v4831_v23 = vpack.c.bf16 %v3542_v20, %v3541_v19  ;;  %v3544_v26 = vld [vmem:[%s6942_s5 + $0xc8] sm:$0xff]  ;;  %v3591_v27 = vld [vmem:[%s6942_s5 + $0x240] sm:$0xff]  ;;  %s5646_s30 = scalar_lea.vmem %s6937_s0, %s5379_s16  ;;  %vm493_vm0 = vcmp.ge.s32.totalorder %v5626_v57, 1  ;;  %s3666_s22 = sshll.u32 %s5606_s29, 8 }
  0x14   : > { %6968 = vst [vmem:[#allocation4_spill] sm:$0xff] %v5532_v18  ;;  %v5551_v25 = vpack.c.bf16 %v3590_v22, %v3589_v21  ;;  %v3592_v29 = vld [vmem:[%s6942_s5 + $0x248] sm:$0xff]  ;;  %v301_v30 = vld [vmem:[%s6938_s1] sm:$0x1]  ;;  %v4835_v34 = vpack.c.bf16 %v3544_v26, %v3543_v24  ;;  %v3545_v36 = vld [vmem:[%s6942_s5 + $0xd0] sm:$0xff]  ;;  %vm504_vm1 = vcmp.le.s32.totalorder %v5669_v7, 16  ;;  %s6689_s25 = scalar_lea.vmem %s6943_s6, %s3666_s22 }
  0x15   : > { %4826 = vmatpush3.bf16.msra.mxu1 %v4823_v9  ;;  %v302_v31 = vld [vmem:[%s6939_s2] sm:$0x1]  ;;  %v5568_v32 = vmul.f32 0.001953125, %v301_v30  ;;  %v5572_v35 = vpack.c.bf16 %v3592_v29, %v3591_v27  ;;  %v3546_v37 = vld [vmem:[%s6942_s5 + $0xd8] sm:$0xff]  ;;  %v3593_v39 = vld [vmem:[%s6942_s5 + $0x250] sm:$0xff] }
  0x16   : > { %4828 = vmatprep.subr.bf16.mxu1 %v4827_v17  ;;  %4954 = vmatpush3.bf16.msra.mxu0 %v5518_v13  ;;  %6969 = vst [vmem:[#allocation5_spill] sm:$0xff] %v5551_v25  ;;  %v667_v28 = vld [vmem:[#allocation2 + $0x1] sm:$0xff]  ;;  %v307_v33 = vmul.f32 0.001953125, %v302_v31  ;;  %v3594_v40 = vld [vmem:[%s6942_s5 + $0x258] sm:$0xff]  ;;  %v4839_v42 = vpack.c.bf16 %v3546_v37, %v3545_v36  ;;  %v3549_v52 = vld [vmem:[%s6942_s5 + $0xf0] sm:$0xff] }
  0x17   : > { %4956 = vmatprep.subr.bf16.mxu0 %v5532_v18  ;;  %4131 = vmatprep.mubr.f32.mxu1 %v667_v28  ;;  %6970 = vst [vmem:[#allocation6_spill] sm:$0xff] %v5572_v35  ;;  %v308_v38 = vmul.f32 %v5568_v32, %v5568_v32  ;;  %v5591_v43 = vpack.c.bf16 %v3594_v40, %v3593_v39  ;;  %v3547_v44 = vld [vmem:[%s6942_s5 + $0xe0] sm:$0xff]  ;;  %v3548_v45 = vld [vmem:[%s6942_s5 + $0xe8] sm:$0xff]  ;;  %v3550_v53 = vld [vmem:[%s6942_s5 + $0xf8] sm:$0xff] }
  0x18   : > { %v3595_v47 = vld [vmem:[%s6942_s5 + $0x260] sm:$0xff]  ;;  %v3596_v48 = vld [vmem:[%s6942_s5 + $0x268] sm:$0xff]  ;;  %v4843_v49 = vpack.c.bf16 %v3548_v45, %v3547_v44  ;;  %v3597_v54 = vld [vmem:[%s6942_s5 + $0x270] sm:$0xff]  ;;  %v4847_v56 = vpack.c.bf16 %v3550_v53, %v3549_v52 }
  0x19   : > { %4830 = vmatpush3.bf16.msra.mxu1 %v4827_v17  ;;  %v309_v41 = vsub.f32 %v307_v33, %v308_v38  ;;  %6971 = vst [vmem:[#allocation7_spill] sm:$0xff] %v5591_v43  ;;  %v5610_v51 = vpack.c.bf16 %v3596_v48, %v3595_v47  ;;  %v3598_v55 = vld [vmem:[%s6942_s5 + $0x278] sm:$0xff]  ;;  %v303_v59 = vld [vmem:[%s6940_s3] sm:$0x1]  ;;  %v652_v61 = vld [vmem:[%s6942_s5 + $0x8] sm:$0xff] }
  0x1a   : > { %4832 = vmatprep.subr.bf16.mxu1 %v4831_v23  ;;  %4958 = vmatpush3.bf16.msra.mxu0 %v5532_v18  ;;  %v5629_v58 = vpack.c.bf16 %v3598_v55, %v3597_v54  ;;  %v651_v60 = vld [vmem:[%s6942_s5] sm:$0xff]  ;;  %v3600_v63 = vld [vmem:[%s6942_s5 + $0x288] sm:$0xff]  ;;  %v3601_v0 = vld [vmem:[%s6942_s5 + $0x290] sm:$0xff] }
  0x1b   : > { %4960 = vmatprep.subr.bf16.mxu0 %v5551_v25  ;;  %v310_v46 = vadd.f32 1e-05, %v309_v41  ;;  %6972 = vst [vmem:[#allocation8_spill] sm:$0xff] %v5610_v51  ;;  %v3599_v62 = vld [vmem:[%s6942_s5 + $0x280] sm:$0xff]  ;;  %v3602_v1 = vld [vmem:[%s6942_s5 + $0x298] sm:$0xff]  ;;  %v653_v2 = vld [vmem:[%s6942_s5 + $0x10] sm:$0xff]  ;;  %v4851_v6 = vpack.c.bf16 %v652_v61, %v651_v60 }
  0x1c   : > { %6973 = vst [vmem:[#allocation9_spill] sm:$0xff] %v5629_v58  ;;  %v654_v3 = vld [vmem:[%s6942_s5 + $0x18] sm:$0xff]  ;;  %v3603_v4 = vld [vmem:[%s6942_s5 + $0x2a0] sm:$0xff]  ;;  %v3604_v9 = vld [vmem:[%s6942_s5 + $0x2a8] sm:$0xff]  ;;  %v5686_v19 = vpack.c.bf16 %v3600_v63, %v3599_v62  ;;  %v5710_v31 = vpack.c.bf16 %v3602_v1, %v3601_v0 }
  0x1d   : > { %4834 = vmatpush3.bf16.msra.mxu1 %v4831_v23  ;;  %5390 = vrsqrt.f32 %v310_v46  ;;  %v3605_v10 = vld [vmem:[%s6942_s5 + $0x2b0] sm:$0xff]  ;;  %v3606_v11 = vld [vmem:[%s6942_s5 + $0x2b8] sm:$0xff]  ;;  %v304_v15 = vld [vmem:[%s6941_s4] sm:$0x1]  ;;  %v4855_v36 = vpack.c.bf16 %v654_v3, %v653_v2  ;;  %v5714_v37 = vpack.c.bf16 %v3604_v9, %v3603_v4 }
  0x1e   : > { %4836 = vmatprep.subr.bf16.mxu1 %v4835_v34  ;;  %4962 = vmatpush3.bf16.msra.mxu0 %v5551_v25  ;;  %v668_v14 = vld [vmem:[#allocation2 + $0x9] sm:$0xff]  ;;  %v318_v16 = vld [vmem:[%s5646_s30 + $0x18] sm:$0xff]  ;;  %v319_v17 = vld [vmem:[%s5646_s30 + $0x20] sm:$0xff]  ;;  %v5722_v41 = vpack.c.bf16 %v3606_v11, %v3605_v10 }
  0x1f   : > { %4964 = vmatprep.subr.bf16.mxu0 %v5572_v35  ;;  %v320_v20 = vld [vmem:[%s5646_s30 + $0x28] sm:$0x3]  ;;  %v655_v21 = vld [vmem:[%s6942_s5 + $0x20] sm:$0xff]  ;;  %v657_v23 = vld [vmem:[%s6942_s5 + $0x30] sm:$0xff] }
  0x20   : > { %v656_v22 = vld [vmem:[%s6942_s5 + $0x28] sm:$0xff]  ;;  %v321_v26 = vld [vmem:[%s5646_s30 + $0x30] sm:$0xff]  ;;  %v658_v27 = vld [vmem:[%s6942_s5 + $0x38] sm:$0xff] }
  0x21   : > { %4838 = vmatpush3.bf16.msra.mxu1 %v4835_v34  ;;  %v659_v28 = vld [vmem:[%s6942_s5 + $0x40] sm:$0xff]  ;;  %v660_v29 = vld [vmem:[%s6942_s5 + $0x48] sm:$0xff]  ;;  %v322_v30 = vld [vmem:[%s5646_s30 + $0x38] sm:$0xff]  ;;  %v5734_v47 = vpack.c.bf16 %v656_v22, %v655_v21  ;;  %v5736_v48 = vpack.c.bf16 %v658_v27, %v657_v23 }
  0x22   : > { %4840 = vmatprep.subr.bf16.mxu1 %v4839_v42  ;;  %4966 = vmatpush3.bf16.msra.mxu0 %v5572_v35  ;;  %v323_v33 = vld [vmem:[%s5646_s30 + $0x40] sm:$0x3]  ;;  %v324_v34 = vld [vmem:[%s5646_s30 + $0x48] sm:$0xff]  ;;  %v325_v40 = vld [vmem:[%s5646_s30 + $0x50] sm:$0xff] }
  0x23   : > { %4968 = vmatprep.subr.bf16.mxu0 %v5591_v43  ;;  %v662_v44 = vld [vmem:[%s6942_s5 + $0x58] sm:$0xff]  ;;  %v327_v45 = vld [vmem:[%s5646_s30 + $0x60] sm:$0xff]  ;;  %v328_v46 = vld [vmem:[%s5646_s30 + $0x68] sm:$0xff] }
  0x24   : > { %v331_v60 = vld [vmem:[%s5646_s30 + $0x80] sm:$0xff]  ;;  %v332_v22 = vld [vmem:[%s5646_s30 + $0x88] sm:$0x3]  ;;  %v3565_v13 = vld [vmem:[%s6942_s5 + $0x170] sm:$0xff] }
  0x25   : > { %4842 = vmatpush3.bf16.msra.mxu1 %v4839_v42  ;;  %v661_v42 = vld [vmem:[%s6942_s5 + $0x50] sm:$0xff]  ;;  %v3555_v25 = vld [vmem:[%s6942_s5 + $0x120] sm:$0xff]  ;;  %v3556_v18 = vld [vmem:[%s6942_s5 + $0x128] sm:$0xff] }
  0x26   : > { %4844 = vmatprep.subr.bf16.mxu1 %v4843_v49  ;;  %4970 = vmatpush3.bf16.msra.mxu0 %v5591_v43  ;;  %v5740_v50 = vpack.c.bf16 %v662_v44, %v661_v42  ;;  %v6212_v43 = vld [vmem:[#allocation2] sm:$0xff]  ;;  %v3650_v57 = vld [vmem:[%s6942_s5 + $0x418] sm:$0xff] }
  0x27   : > { %4972 = vmatprep.subr.bf16.mxu0 %v5610_v51  ;;  %v5391_v12 = vpop.eup %5390 }
  0x28   : > { %v312_v24 = vmul.f32 %v5391_v12, %v303_v59  ;;  %v330_v59 = vld [vmem:[%s5646_s30 + $0x78] sm:$0xff] }
  0x29   : > { %4846 = vmatpush3.bf16.msra.mxu1 %v4843_v49  ;;  %v5738_v49 = vpack.c.bf16 %v660_v29, %v659_v28  ;;  %v333_v28 = vld [vmem:[%s5646_s30 + $0x90] sm:$0xff]  ;;  %v334_v29 = vld [vmem:[%s5646_s30 + $0x98] sm:$0xff] }
  0x2a   : > { %4848 = vmatprep.subr.bf16.mxu1 %v4847_v56  ;;  %4974 = vmatpush3.bf16.msra.mxu0 %v5610_v51  ;;  %v313_v38 = vmul.f32 %v312_v24, %v5568_v32  ;;  %v5718_v39 = vrot.slane %v312_v24, %v372_v5  ;;  %v326_v32 = vld [vmem:[%s5646_s30 + $0x58] sm:$0x3] }
  0x2b   : > { %4976 = vmatprep.subr.bf16.mxu0 %v5629_v58 }
  0x2c   : > { %v314_v52 = vsub.f32 %v304_v15, %v313_v38  ;;  %v378_v53 = vmul.f32 %v5718_v39, %v318_v16  ;;  %v379_v54 = vmul.f32 %v5718_v39, %v319_v17  ;;  %v380_v55 = vmul.f32 %v5718_v39, %v320_v20  ;;  %v335_v38 = vld [vmem:[%s5646_s30 + $0xa0] sm:$0x3] }
  0x2d   : > { %4850 = vmatpush3.bf16.msra.mxu1 %v4847_v56  ;;  %v329_v56 = vld [vmem:[%s5646_s30 + $0x70] sm:$0x3]  ;;  %v381_v61 = vmul.f32 %v5718_v39, %v321_v26  ;;  %v382_v62 = vmul.f32 %v5718_v39, %v322_v30  ;;  %v383_v63 = vmul.f32 %v5718_v39, %v323_v33  ;;  %v384_v0 = vmul.f32 %v5718_v39, %v324_v34 }
  0x2e   : > { %4978 = vmatpush3.bf16.msra.mxu0 %v5629_v58  ;;  %4852 = vmatprep.subr.bf16.mxu1 %v4851_v6  ;;  %v5752_v1 = vrot.slane %v314_v52, %v372_v5  ;;  %v385_v2 = vmul.f32 %v5718_v39, %v325_v40  ;;  %v386_v3 = vmul.f32 %v5718_v39, %v326_v32  ;;  %v336_v40 = vld [vmem:[%s5646_s30 + $0xa8] sm:$0xff] }
  0x2f   : > { %4980 = vmatprep.subr.bf16.mxu0 %v5686_v19  ;;  %v387_v4 = vmul.f32 %v5718_v39, %v327_v45  ;;  %v389_v9 = vmul.f32 %v5718_v39, %v329_v56  ;;  %v390_v10 = vmul.f32 %v5718_v39, %v330_v59  ;;  %v391_v11 = vmul.f32 %v5718_v39, %v331_v60  ;;  %v338_v56 = vld [vmem:[%s5646_s30 + $0xb8] sm:$0x3]  ;;  %v339_v59 = vld [vmem:[%s5646_s30 + $0xc0] sm:$0xff] }
  0x30   : > { %4132 = vmatmul.mubr.f32.vlgmr.msra.gmra.mrb[0].mxu1 %v668_v14  ;;  %v5762_v12 = vadd.f32 %v5752_v1, %v378_v53  ;;  %v5765_v5 = vadd.f32 %v5752_v1, %v379_v54  ;;  %v440_v14 = vadd.f32 %v5752_v1, %v380_v55  ;;  %v5769_v15 = vadd.f32 %v5752_v1, %v381_v61 }
  0x31   : > { %4854 = vmatpush3.bf16.msra.mxu1 %v4851_v6  ;;  %v388_v6 = vmul.f32 %v5718_v39, %v328_v46  ;;  %v5772_v16 = vadd.f32 %v5752_v1, %v382_v62  ;;  %v443_v17 = vadd.f32 %v5752_v1, %v383_v63  ;;  %v5776_v20 = vadd.f32 %v5752_v1, %v384_v0  ;;  %v337_v46 = vld [vmem:[%s5646_s30 + $0xb0] sm:$0xff]  ;;  %v340_v63 = vld [vmem:[%s5646_s30 + $0xc8] sm:$0xff] }
  0x32   : > { %4856 = vmatprep.subr.bf16.mxu1 %v4855_v36  ;;  %v5779_v21 = vadd.f32 %v5752_v1, %v385_v2  ;;  %v514_v23 = vsel %vm493_vm0, %v5762_v12, 0.0  ;;  %569 = vst [vmem:[#allocation2 + $0x20] sm:$0xff] %v5765_v5  ;;  %v516_v24 = vsel %vm504_vm1, %v440_v14, 0.0  ;;  %v517_v26 = vsel %vm493_vm0, %v5769_v15, 0.0  ;;  %v341_v14 = vld [vmem:[%s5646_s30 + $0xd0] sm:$0x3] }
  0x33   : > { %v446_v27 = vadd.f32 %v5752_v1, %v386_v3  ;;  %568 = vst [vmem:[#allocation2 + $0x18] sm:$0xff] %v514_v23  ;;  %570 = vst [vmem:[#allocation2 + $0x28] sm:$0x3] %v516_v24  ;;  %v519_v30 = vsel %vm504_vm1, %v443_v17, 0.0  ;;  %v520_v33 = vsel %vm493_vm0, %v5776_v20, 0.0  ;;  %v5803_v34 = vadd.f32 %v5752_v1, %v387_v4  ;;  %v342_v17 = vld [vmem:[%s5646_s30 + $0xd8] sm:$0xff] }
  0x34   : > { %571 = vst [vmem:[#allocation2 + $0x30] sm:$0xff] %v517_v26  ;;  %572 = vst [vmem:[#allocation2 + $0x38] sm:$0xff] %v5772_v16  ;;  %v449_v44 = vadd.f32 %v5752_v1, %v389_v9  ;;  %v5814_v32 = vadd.f32 %v5752_v1, %v390_v10  ;;  %v5817_v45 = vadd.f32 %v5752_v1, %v391_v11 }
  0x35   : > { %4858 = vmatpush3.bf16.msra.mxu1 %v4855_v36  ;;  %575 = vst [vmem:[#allocation2 + $0x50] sm:$0xff] %v5779_v21  ;;  %v5806_v36 = vadd.f32 %v5752_v1, %v388_v6  ;;  %573 = vst [vmem:[#allocation2 + $0x40] sm:$0x3] %v519_v30  ;;  %v522_v42 = vsel %vm504_vm1, %v446_v27, 0.0  ;;  %v523_v52 = vsel %vm493_vm0, %v5803_v34, 0.0  ;;  %v392_v53 = vmul.f32 %v5718_v39, %v332_v22  ;;  %v343_v27 = vld [vmem:[%s5646_s30 + $0xe0] sm:$0xff] }
  0x36   : > { %4860 = vmatprep.subr.bf16.mxu1 %v5734_v47  ;;  %574 = vst [vmem:[#allocation2 + $0x48] sm:$0xff] %v520_v33  ;;  %576 = vst [vmem:[#allocation2 + $0x58] sm:$0x3] %v522_v42  ;;  %v393_v54 = vmul.f32 %v5718_v39, %v333_v28  ;;  %v394_v55 = vmul.f32 %v5718_v39, %v334_v29  ;;  %v525_v60 = vsel %vm504_vm1, %v449_v44, 0.0  ;;  %v526_v61 = vsel %vm493_vm0, %v5814_v32, 0.0  ;;  %v345_v29 = vld [vmem:[%s5646_s30 + $0xf0] sm:$0xff] }
  0x37   : > { %578 = vst [vmem:[#allocation2 + $0x68] sm:$0xff] %v5806_v36  ;;  %577 = vst [vmem:[#allocation2 + $0x60] sm:$0xff] %v523_v52  ;;  %v396_v62 = vmul.f32 %v5718_v39, %v336_v40  ;;  %v452_v0 = vadd.f32 %v5752_v1, %v392_v53  ;;  %v397_v4 = vmul.f32 %v5718_v39, %v337_v46  ;;  %v344_v28 = vld [vmem:[%s5646_s30 + $0xe8] sm:$0x3] }
  0x38   : > { %581 = vst [vmem:[#allocation2 + $0x80] sm:$0xff] %v5817_v45  ;;  %579 = vst [vmem:[#allocation2 + $0x70] sm:$0x3] %v525_v60  ;;  %v5842_v2 = vadd.f32 %v5752_v1, %v393_v54  ;;  %v5845_v3 = vadd.f32 %v5752_v1, %v394_v55  ;;  %v398_v10 = vmul.f32 %v5718_v39, %v338_v56  ;;  %v346_v54 = vld [vmem:[%s5646_s30 + $0xf8] sm:$0xff]  ;;  %v3607_v55 = vld [vmem:[%s6942_s5 + $0x2c0] sm:$0xff] }
  0x39   : > { %4862 = vmatpush3.bf16.msra.mxu1 %v5734_v47  ;;  %v395_v47 = vmul.f32 %v5718_v39, %v335_v38  ;;  %580 = vst [vmem:[#allocation2 + $0x78] sm:$0xff] %v526_v61  ;;  %v5850_v9 = vadd.f32 %v5752_v1, %v396_v62  ;;  %v399_v11 = vmul.f32 %v5718_v39, %v339_v59  ;;  %v528_v22 = vsel %vm504_vm1, %v452_v0, 0.0 }
  0x3a   : > { %4864 = vmatprep.subr.bf16.mxu1 %v5736_v48  ;;  %v529_v23 = vsel %vm493_vm0, %v5842_v2, 0.0  ;;  %584 = vst [vmem:[#allocation2 + $0x98] sm:$0xff] %v5845_v3  ;;  %v5863_v24 = vadd.f32 %v5752_v1, %v397_v4  ;;  %v400_v26 = vmul.f32 %v5718_v39, %v340_v63  ;;  %v669_v30 = vld [vmem:[#allocation2 + $0x19] sm:$0xff]  ;;  %v670_v33 = vld [vmem:[#allocation2 + $0x21] sm:$0xff]  ;;  %582 = vst [vmem:[#allocation2 + $0x88] sm:$0x3] %v528_v22 }
  0x3b   : > { %v455_v6 = vadd.f32 %v5752_v1, %v395_v47  ;;  %v671_v38 = vld [vmem:[#allocation2 + $0x31] sm:$0xff]  ;;  %583 = vst [vmem:[#allocation2 + $0x90] sm:$0xff] %v529_v23  ;;  %v532_v42 = vsel %vm493_vm0, %v5850_v9, 0.0  ;;  %v5877_v44 = vadd.f32 %v5752_v1, %v399_v11  ;;  %4134 = vmatprep.mubr.f32.mxu1 %v669_v30  ;;  %4451 = vmatprep.mubr.f32.mxu0 %v669_v30  ;;  %v347_v47 = vld [vmem:[%s5646_s30 + $0x100] sm:$0x3]  ;;  %v3608_v11 = vld [vmem:[%s6942_s5 + $0x2c8] sm:$0xff] }
  0x3c   : > { %586 = vst [vmem:[#allocation2 + $0xa8] sm:$0xff] %v532_v42  ;;  %587 = vst [vmem:[#allocation2 + $0xb0] sm:$0xff] %v5863_v24  ;;  %v5882_v46 = vadd.f32 %v5752_v1, %v400_v26  ;;  %v401_v52 = vmul.f32 %v5718_v39, %v341_v14  ;;  %v402_v53 = vmul.f32 %v5718_v39, %v342_v17  ;;  %4135 = vmatmul.mubr.f32.gmra.mrb[2].mxu1 %v670_v33  ;;  %v672_v62 = vld [vmem:[#allocation2 + $0x39] sm:$0xff]  ;;  %v352_v42 = vld [vmem:[%s5646_s30 + $0x128] sm:$0xff] }
  0x3d   : > { %4866 = vmatpush3.bf16.msra.mxu1 %v5736_v48  ;;  %v531_v40 = vsel %vm504_vm1, %v455_v6, 0.0  ;;  %v458_v48 = vadd.f32 %v5752_v1, %v398_v10  ;;  %4452 = vmatmul.mubr.f32.vlgmr.msra.gmra.mrb[0].mxu0 %v670_v33  ;;  %v535_v59 = vsel %vm493_vm0, %v5877_v44, 0.0  ;;  %v403_v60 = vmul.f32 %v5718_v39, %v343_v27  ;;  %v348_v6 = vld [vmem:[%s5646_s30 + $0x108] sm:$0xff]  ;;  %v349_v10 = vld [vmem:[%s5646_s30 + $0x110] sm:$0xff]  ;;  %v350_v23 = vld [vmem:[%s5646_s30 + $0x118] sm:$0x3] }
  0x3e   : > { %4868 = vmatprep.subr.bf16.mxu1 %v5738_v49  ;;  %585 = vst [vmem:[#allocation2 + $0xa0] sm:$0x3] %v531_v40  ;;  %v404_v61 = vmul.f32 %v5718_v39, %v344_v28  ;;  %4982 = vmatpush3.bf16.msra.mxu0 %v5686_v19  ;;  %589 = vst [vmem:[#allocation2 + $0xc0] sm:$0xff] %v535_v59  ;;  %v461_v63 = vadd.f32 %v5752_v1, %v401_v52  ;;  %v673_v19 = vld [vmem:[#allocation2 + $0x49] sm:$0xff]  ;;  %v351_v30 = vld [vmem:[%s5646_s30 + $0x120] sm:$0xff] }
  0x3f   : > { %v534_v56 = vsel %vm504_vm1, %v458_v48, 0.0  ;;  %4137 = vmatprep.mubr.f32.mxu1 %v671_v38  ;;  %590 = vst [vmem:[#allocation2 + $0xc8] sm:$0xff] %v5882_v46  ;;  %v5902_v0 = vadd.f32 %v5752_v1, %v402_v53  ;;  %v405_v4 = vmul.f32 %v5718_v39, %v345_v29  ;;  %4454 = vmatprep.mubr.f32.mxu0 %v671_v38  ;;  %v353_v48 = vld [vmem:[%s5646_s30 + $0x130] sm:$0x3] }
  0x40   : > { %588 = vst [vmem:[#allocation2 + $0xb8] sm:$0x3] %v534_v56  ;;  %4984 = vmatprep.subr.bf16.mxu0 %v5710_v31  ;;  %v5912_v14 = vadd.f32 %v5752_v1, %v403_v60  ;;  %v464_v17 = vadd.f32 %v5752_v1, %v404_v61  ;;  %v406_v22 = vmul.f32 %v5718_v39, %v346_v54  ;;  %v537_v26 = vsel %vm504_vm1, %v461_v63, 0.0  ;;  %v674_v52 = vld [vmem:[#allocation2 + $0x51] sm:$0xff]  ;;  %v355_v61 = vld [vmem:[%s5646_s30 + $0x140] sm:$0xff] }
  0x41   : > { %v538_v27 = vsel %vm493_vm0, %v5902_v0, 0.0  ;;  %4870 = vmatpush3.bf16.msra.mxu1 %v5738_v49  ;;  %v5924_v28 = vadd.f32 %v5752_v1, %v405_v4  ;;  %v407_v29 = vmul.f32 %v5718_v39, %v347_v47  ;;  %4455 = vmatmul.mubr.f32.gmra.mrb[2].mxu0 %v672_v62  ;;  %591 = vst [vmem:[#allocation2 + $0xd0] sm:$0x3] %v537_v26  ;;  %v354_v60 = vld [vmem:[%s5646_s30 + $0x138] sm:$0xff] }
  0x42   : > { %4138 = vmatmul.mubr.f32.gmra.mrb[4].mxu1 %v672_v62  ;;  %592 = vst [vmem:[#allocation2 + $0xd8] sm:$0xff] %v538_v27  ;;  %593 = vst [vmem:[#allocation2 + $0xe0] sm:$0xff] %v5912_v14  ;;  %v540_v33 = vsel %vm504_vm1, %v464_v17, 0.0  ;;  %v5932_v38 = vadd.f32 %v5752_v1, %v406_v22  ;;  %v408_v49 = vmul.f32 %v5718_v39, %v348_v6  ;;  %4986 = vmatpush3.bf16.msra.mxu0 %v5710_v31  ;;  %v675_v31 = vld [vmem:[#allocation2 + $0x61] sm:$0xff]  ;;  %v3610_v47 = vld [vmem:[%s6942_s5 + $0x2d8] sm:$0xff] }
  0x43   : > { %v409_v40 = vmul.f32 %v5718_v39, %v349_v10  ;;  %4140 = vmatprep.mubr.f32.mxu1 %v673_v19  ;;  %v5939_v53 = vpack.c.bf16 %v3608_v11, %v3607_v55  ;;  %594 = vst [vmem:[#allocation2 + $0xe8] sm:$0x3] %v540_v33  ;;  %v541_v54 = vsel %vm493_vm0, %v5924_v28, 0.0  ;;  %v467_v56 = vadd.f32 %v5752_v1, %v407_v29  ;;  %v3609_v55 = vld [vmem:[%s6942_s5 + $0x2d0] sm:$0xff]  ;;  %v663_v17 = vld [vmem:[%s6942_s5 + $0x60] sm:$0xff]  ;;  %v664_v22 = vld [vmem:[%s6942_s5 + $0x68] sm:$0xff] }
  0x44   : > { %v410_v59 = vmul.f32 %v5718_v39, %v350_v23  ;;  %4457 = vmatprep.mubr.f32.mxu0 %v673_v19  ;;  %4988 = vmatprep.subr.bf16.mxu0 %v5714_v37  ;;  %595 = vst [vmem:[#allocation2 + $0xf0] sm:$0xff] %v541_v54  ;;  %596 = vst [vmem:[#allocation2 + $0xf8] sm:$0xff] %v5932_v38  ;;  %v5957_v62 = vadd.f32 %v5752_v1, %v408_v49  ;;  %v356_v23 = vld [vmem:[%s5646_s30 + $0x148] sm:$0x3]  ;;  %v357_v33 = vld [vmem:[%s5646_s30 + $0x150] sm:$0xff] }
  0x45   : > { %v5960_v63 = vadd.f32 %v5752_v1, %v409_v40  ;;  %v411_v4 = vmul.f32 %v5718_v39, %v351_v30  ;;  %v543_v6 = vsel %vm504_vm1, %v467_v56, 0.0  ;;  %4872 = vmatprep.subr.bf16.mxu1 %v5740_v50  ;;  %v412_v19 = vmul.f32 %v5718_v39, %v352_v42  ;;  %4458 = vmatmul.mubr.f32.gmra.mrb[4].mxu0 %v674_v52  ;;  %v358_v49 = vld [vmem:[%s5646_s30 + $0x158] sm:$0xff]  ;;  %v359_v40 = vld [vmem:[%s5646_s30 + $0x160] sm:$0x3]  ;;  %v676_v42 = vld [vmem:[#allocation2 + $0x69] sm:$0xff] }
  0x46   : > { %v470_v10 = vadd.f32 %v5752_v1, %v410_v59  ;;  %v413_v11 = vmul.f32 %v5718_v39, %v353_v48  ;;  %4141 = vmatmul.mubr.f32.gmra.mrb[6].mxu1 %v674_v52  ;;  %597 = vst [vmem:[#allocation2 + $0x100] sm:$0x3] %v543_v6  ;;  %v544_v26 = vsel %vm493_vm0, %v5957_v62, 0.0  ;;  %v414_v29 = vmul.f32 %v5718_v39, %v354_v60  ;;  %v360_v59 = vld [vmem:[%s5646_s30 + $0x168] sm:$0xff]  ;;  %v361_v60 = vld [vmem:[%s5646_s30 + $0x170] sm:$0xff] }
  0x47   : > { %599 = vst [vmem:[#allocation2 + $0x110] sm:$0xff] %v5960_v63  ;;  %v5981_v27 = vadd.f32 %v5752_v1, %v411_v4  ;;  %v415_v30 = vmul.f32 %v5718_v39, %v355_v61  ;;  %4990 = vmatpush3.bf16.msra.mxu0 %v5714_v37  ;;  %4143 = vmatprep.mubr.f32.mxu1 %v675_v31  ;;  %598 = vst [vmem:[#allocation2 + $0x108] sm:$0xff] %v544_v26  ;;  %v677_v61 = vld [vmem:[#allocation2 + $0x79] sm:$0xff]  ;;  %v6182_v58 = vld [vmem:[#allocation2 + $0xaa] sm:$0xff] }
  0x48   : > { %v5989_v48 = vpack.c.bf16 %v3610_v47, %v3609_v55  ;;  %v546_v52 = vsel %vm504_vm1, %v470_v10, 0.0  ;;  %v5994_v54 = vadd.f32 %v5752_v1, %v412_v19  ;;  %v473_v56 = vadd.f32 %v5752_v1, %v413_v11  ;;  %4460 = vmatprep.mubr.f32.mxu0 %v675_v31  ;;  %4992 = vmatprep.subr.bf16.mxu0 %v5722_v41  ;;  %v6194_v51 = vld [vmem:[#allocation2 + $0xb2] sm:$0xff] }
  0x49   : > { %600 = vst [vmem:[#allocation2 + $0x118] sm:$0x3] %v546_v52  ;;  %v547_v37 = vsel %vm493_vm0, %v5981_v27, 0.0  ;;  %v6004_v55 = vadd.f32 %v5752_v1, %v414_v29  ;;  %v6007_v47 = vadd.f32 %v5752_v1, %v415_v30  ;;  %v4875_v4 = vpack.c.bf16 %v664_v22, %v663_v17  ;;  %4874 = vmatpush3.bf16.msra.mxu1 %v5740_v50  ;;  %v3611_v52 = vld [vmem:[%s6942_s5 + $0x2e0] sm:$0xff] }
  0x4a   : > { %601 = vst [vmem:[#allocation2 + $0x120] sm:$0xff] %v547_v37  ;;  %602 = vst [vmem:[#allocation2 + $0x128] sm:$0xff] %v5994_v54  ;;  %v549_v31 = vsel %vm504_vm1, %v473_v56, 0.0  ;;  %v416_v6 = vmul.f32 %v5718_v39, %v356_v23  ;;  %v417_v10 = vmul.f32 %v5718_v39, %v357_v33  ;;  %v418_v19 = vmul.f32 %v5718_v39, %v358_v49  ;;  %v678_v23 = vld [vmem:[#allocation2 + $0x81] sm:$0xff]  ;;  %v362_v33 = vld [vmem:[%s5646_s30 + $0x178] sm:$0x3] }
  0x4b   : > { %4144 = vmatmul.mubr.f32.gmra.mrb[8].mxu1 %v676_v42  ;;  %4461 = vmatmul.mubr.f32.gmra.mrb[6].mxu0 %v676_v42  ;;  %603 = vst [vmem:[#allocation2 + $0x130] sm:$0x3] %v549_v31  ;;  %v550_v50 = vsel %vm493_vm0, %v6004_v55, 0.0  ;;  %605 = vst [vmem:[#allocation2 + $0x140] sm:$0xff] %v6007_v47  ;;  %v419_v11 = vmul.f32 %v5718_v39, %v359_v40  ;;  %v420_v17 = vmul.f32 %v5718_v39, %v360_v59  ;;  %v679_v49 = vld [vmem:[#allocation2 + $0x91] sm:$0xff]  ;;  %v3612_v56 = vld [vmem:[%s6942_s5 + $0x2e8] sm:$0xff] }
  0x4c   : > { %v421_v22 = vmul.f32 %v5718_v39, %v361_v60  ;;  %4994 = vmatpush3.bf16.msra.mxu0 %v5722_v41  ;;  %4146 = vmatprep.mubr.f32.mxu1 %v677_v61  ;;  %604 = vst [vmem:[#allocation2 + $0x138] sm:$0xff] %v550_v50  ;;  %v476_v26 = vadd.f32 %v5752_v1, %v416_v6  ;;  %v666_v6 = vld [vmem:[%s6942_s5 + $0x78] sm:$0xff]  ;;  %v364_v50 = vld [vmem:[%s5646_s30 + $0x188] sm:$0xff] }
  0x4d   : > { %v6026_v29 = vadd.f32 %v5752_v1, %v417_v10  ;;  %v6029_v30 = vadd.f32 %v5752_v1, %v418_v19  ;;  %4463 = vmatprep.mubr.f32.mxu0 %v677_v61  ;;  %4996 = vmatprep.subr.bf16.mxu0 %v5939_v53  ;;  %v479_v40 = vadd.f32 %v5752_v1, %v419_v11  ;;  %v665_v61 = vld [vmem:[%s6942_s5 + $0x70] sm:$0xff]  ;;  %v363_v19 = vld [vmem:[%s5646_s30 + $0x180] sm:$0xff] }
  0x4e   : > { %v6035_v41 = vadd.f32 %v5752_v1, %v420_v17  ;;  %v6038_v42 = vadd.f32 %v5752_v1, %v421_v22  ;;  %4876 = vmatprep.subr.bf16.mxu1 %v4875_v4  ;;  %v552_v59 = vsel %vm504_vm1, %v476_v26, 0.0  ;;  %v422_v10 = vmul.f32 %v5718_v39, %v362_v33  ;;  %v680_v11 = vld [vmem:[#allocation2 + $0x99] sm:$0xff]  ;;  %v365_v17 = vld [vmem:[%s5646_s30 + $0x190] sm:$0x3] }
  0x4f   : > { %v553_v60 = vsel %vm493_vm0, %v6026_v29, 0.0  ;;  %608 = vst [vmem:[#allocation2 + $0x158] sm:$0xff] %v6029_v30  ;;  %4147 = vmatmul.mubr.f32.gmra.mrb[10].mxu1 %v678_v23  ;;  %4464 = vmatmul.mubr.f32.gmra.mrb[8].mxu0 %v678_v23  ;;  %606 = vst [vmem:[#allocation2 + $0x148] sm:$0x3] %v552_v59  ;;  %v555_v37 = vsel %vm504_vm1, %v479_v40, 0.0  ;;  %v681_v22 = vld [vmem:[#allocation2 + $0xa9] sm:$0xff]  ;;  %v5003_v23 = vpack.c.bf16 %v3612_v56, %v3611_v52 }
  0x50   : > { %607 = vst [vmem:[#allocation2 + $0x150] sm:$0xff] %v553_v60  ;;  %v556_v31 = vsel %vm493_vm0, %v6035_v41, 0.0  ;;  %611 = vst [vmem:[#allocation2 + $0x170] sm:$0xff] %v6038_v42  ;;  %4998 = vmatpush3.bf16.msra.mxu0 %v5939_v53  ;;  %4149 = vmatprep.mubr.f32.mxu1 %v679_v49  ;;  %v482_v26 = vadd.f32 %v5752_v1, %v422_v10  ;;  %v3613_v33 = vld [vmem:[%s6942_s5 + $0x2f0] sm:$0xff]  ;;  %v3614_v53 = vld [vmem:[%s6942_s5 + $0x2f8] sm:$0xff]  ;;  %v4879_v40 = vpack.c.bf16 %v666_v6, %v665_v61 }
  0x51   : > { %609 = vst [vmem:[#allocation2 + $0x160] sm:$0x3] %v555_v37  ;;  %610 = vst [vmem:[#allocation2 + $0x168] sm:$0xff] %v556_v31  ;;  %4466 = vmatprep.mubr.f32.mxu0 %v679_v49  ;;  %5000 = vmatprep.subr.bf16.mxu0 %v5989_v48  ;;  %v423_v59 = vmul.f32 %v5718_v39, %v363_v19  ;;  %v424_v49 = vmul.f32 %v5718_v39, %v364_v50  ;;  %v682_v60 = vld [vmem:[#allocation2 + $0xb1] sm:$0xff]  ;;  %v683_v61 = vld [vmem:[#allocation2 + $0xc1] sm:$0xff] }
  0x52   : > { %4878 = vmatpush3.bf16.msra.mxu1 %v4875_v4  ;;  %v558_v52 = vsel %vm504_vm1, %v482_v26, 0.0  ;;  %v425_v56 = vmul.f32 %v5718_v39, %v365_v17  ;;  %v5007_v31 = vpack.c.bf16 %v3614_v53, %v3613_v33  ;;  %v3615_v39 = vld [vmem:[%s6942_s5 + $0x300] sm:$0xff]  ;;  %v3552_v19 = vld [vmem:[%s6942_s5 + $0x108] sm:$0xff]  ;;  %v3617_v33 = vld [vmem:[%s6942_s5 + $0x310] sm:$0xff] }
  0x53   : > { %4150 = vmatmul.mubr.f32.gmra.mrb[12].mxu1 %v680_v11  ;;  %4467 = vmatmul.mubr.f32.gmra.mrb[10].mxu0 %v680_v11  ;;  %612 = vst [vmem:[#allocation2 + $0x178] sm:$0x3] %v558_v52  ;;  %v6084_v37 = vadd.f32 %v5752_v1, %v423_v59  ;;  %v6087_v4 = vadd.f32 %v5752_v1, %v424_v49  ;;  %v684_v11 = vld [vmem:[#allocation2 + $0xc9] sm:$0xff]  ;;  %v685_v17 = vld [vmem:[#allocation2 + $0xd9] sm:$0xff]  ;;  %v687_v49 = vld [vmem:[#allocation2 + $0xf1] sm:$0xff] }
  0x54   : > { %5002 = vmatpush3.bf16.msra.mxu0 %v5989_v48  ;;  %4152 = vmatprep.mubr.f32.mxu1 %v681_v22  ;;  %v485_v6 = vadd.f32 %v5752_v1, %v425_v56  ;;  %v3616_v48 = vld [vmem:[%s6942_s5 + $0x308] sm:$0xff]  ;;  %v3551_v1 = vld [vmem:[%s6942_s5 + $0x100] sm:$0xff]  ;;  %v3618_v53 = vld [vmem:[%s6942_s5 + $0x318] sm:$0xff] }
  0x55   : > { %4469 = vmatprep.mubr.f32.mxu0 %v681_v22  ;;  %5004 = vmatprep.subr.bf16.mxu0 %v5003_v23  ;;  %v559_v10 = vsel %vm493_vm0, %v6084_v37, 0.0  ;;  %614 = vst [vmem:[#allocation2 + $0x188] sm:$0xff] %v6087_v4  ;;  %v5011_v22 = vpack.c.bf16 %v3616_v48, %v3615_v39  ;;  %v6108_v26 = vld [vmem:[#allocation2 + $0x1a] sm:$0xff]  ;;  %v6116_v7 = vpack.c.bf16 %v3552_v19, %v3551_v1  ;;  %v6118_v59 = vld [vmem:[#allocation2 + $0x22] sm:$0xff]  ;;  %v6121_v56 = vld [vmem:[#allocation2 + $0x32] sm:$0xff] }
  0x56   : > { %4880 = vmatprep.subr.bf16.mxu1 %v4879_v40  ;;  %613 = vst [vmem:[#allocation2 + $0x180] sm:$0xff] %v559_v10  ;;  %v561_v50 = vsel %vm504_vm1, %v485_v6, 0.0  ;;  %v5015_v52 = vpack.c.bf16 %v3618_v53, %v3617_v33  ;;  %v689_v6 = vld [vmem:[#allocation2 + $0x109] sm:$0xff]  ;;  %v3622_v1 = vld [vmem:[%s6942_s5 + $0x338] sm:$0xff]  ;;  %v3623_v33 = vld [vmem:[%s6942_s5 + $0x340] sm:$0xff] }
  0x57   : > { %4153 = vmatmul.mubr.f32.gmra.mrb[14].mxu1 %v682_v60  ;;  %4470 = vmatmul.mubr.f32.gmra.mrb[12].mxu0 %v682_v60  ;;  %615 = vst [vmem:[#allocation2 + $0x190] sm:$0x3] %v561_v50  ;;  %v3620_v60 = vld [vmem:[%s6942_s5 + $0x328] sm:$0xff]  ;;  %v3621_v10 = vld [vmem:[%s6942_s5 + $0x330] sm:$0xff] }
  0x58   : > { %5006 = vmatpush3.bf16.msra.mxu0 %v5003_v23  ;;  %4155 = vmatprep.mubr.f32.mxu1 %v683_v61  ;;  %v686_v23 = vld [vmem:[#allocation2 + $0xe1] sm:$0xff]  ;;  %v6134_v39 = vld [vmem:[#allocation2 + $0x4a] sm:$0xff]  ;;  %v6144_v50 = vld [vmem:[#allocation2 + $0x52] sm:$0xff] }
  0x59   : > { %4472 = vmatprep.mubr.f32.mxu0 %v683_v61  ;;  %5008 = vmatprep.subr.bf16.mxu0 %v5007_v31  ;;  %v688_v61 = vld [vmem:[#allocation2 + $0xf9] sm:$0xff]  ;;  %v690_v19 = vld [vmem:[#allocation2 + $0x111] sm:$0xff]  ;;  %v3624_v53 = vld [vmem:[%s6942_s5 + $0x348] sm:$0xff] }
  0x5a   : > { %4882 = vmatpush3.bf16.msra.mxu1 %v4879_v40  ;;  %v3619_v40 = vld [vmem:[%s6942_s5 + $0x320] sm:$0xff] }
  0x5b   : > { %4156 = vmatmul.mubr.f32.gmra.mrb[16].mxu1 %v684_v11  ;;  %4473 = vmatmul.mubr.f32.gmra.mrb[14].mxu0 %v684_v11  ;;  %v5019_v48 = vpack.c.bf16 %v3620_v60, %v3619_v40  ;;  %v691_v11 = vld [vmem:[#allocation2 + $0x121] sm:$0xff]  ;;  %v5027_v60 = vpack.c.bf16 %v3624_v53, %v3623_v33 }
  0x5c   : > { %5010 = vmatpush3.bf16.msra.mxu0 %v5007_v31  ;;  %4158 = vmatprep.mubr.f32.mxu1 %v685_v17  ;;  %v6131_v31 = vld [vmem:[#allocation2 + $0x3a] sm:$0xff]  ;;  %v6146_v17 = vld [vmem:[#allocation2 + $0x62] sm:$0xff] }
  0x5d   : > { %4531 = vmatprep.mubr.f32.mxu0 %v6108_v26  ;;  %5012 = vmatprep.subr.bf16.mxu0 %v5011_v22  ;;  %v6158_v40 = vld [vmem:[#allocation2 + $0x7a] sm:$0xff]  ;;  %v3628_v53 = vld [vmem:[%s6942_s5 + $0x368] sm:$0xff] }
  0x5e   : > { %4884 = vmatprep.subr.bf16.mxu1 %v6116_v7  ;;  %v3627_v33 = vld [vmem:[%s6942_s5 + $0x360] sm:$0xff] }
  0x5f   : > { %4159 = vmatmul.mubr.f32.gmra.mrb[18].mxu1 %v686_v23  ;;  %4532 = vmatmul.mubr.f32.vlgmr.msra.gmra.mrb[0].mxu0 %v6118_v59  ;;  %v692_v23 = vld [vmem:[#allocation2 + $0x129] sm:$0xff] }
  0x60   : > { %5014 = vmatpush3.bf16.msra.mxu0 %v5011_v22  ;;  %4161 = vmatprep.mubr.f32.mxu1 %v687_v49  ;;  %v5023_v22 = vpack.c.bf16 %v3622_v1, %v3621_v10  ;;  %v6156_v49 = vld [vmem:[#allocation2 + $0x6a] sm:$0xff]  ;;  %v694_v10 = vld [vmem:[#allocation2 + $0x141] sm:$0xff] }
  0x61   : > { %4534 = vmatprep.mubr.f32.mxu0 %v6121_v56  ;;  %5016 = vmatprep.subr.bf16.mxu0 %v5015_v52  ;;  %v6168_v1 = vld [vmem:[#allocation2 + $0x82] sm:$0xff] }
  0x63   : > { %4162 = vmatmul.mubr.f32.gmra.mrb[20].mxu1 %v688_v61  ;;  %4535 = vmatmul.mubr.f32.gmra.mrb[2].mxu0 %v6131_v31  ;;  %v3625_v61 = vld [vmem:[%s6942_s5 + $0x350] sm:$0xff] }
  0x64   : > { %4164 = vmatprep.mubr.f32.mxu1 %v689_v6  ;;  %4537 = vmatprep.mubr.f32.mxu0 %v6134_v39  ;;  %v3626_v6 = vld [vmem:[%s6942_s5 + $0x358] sm:$0xff] }
  0x65   : > { %5018 = vmatpush3.bf16.msra.mxu0 %v5015_v52  ;;  %v693_v52 = vld [vmem:[#allocation2 + $0x139] sm:$0xff] }
  0x66   : > { %5020 = vmatprep.subr.bf16.mxu0 %v5019_v48 }
  0x67   : > { %4165 = vmatmul.mubr.f32.gmra.mrb[22].mxu1 %v690_v19  ;;  %4538 = vmatmul.mubr.f32.gmra.mrb[4].mxu0 %v6144_v50  ;;  %v6170_v19 = vld [vmem:[#allocation2 + $0x92] sm:$0xff] }
  0x68   : > { %4167 = vmatprep.mubr.f32.mxu1 %v691_v11  ;;  %4540 = vmatprep.mubr.f32.mxu0 %v6146_v17  ;;  %v5031_v11 = vpack.c.bf16 %v3626_v6, %v3625_v61  ;;  %v5035_v61 = vpack.c.bf16 %v3628_v53, %v3627_v33  ;;  %v3629_v6 = vld [vmem:[%s6942_s5 + $0x370] sm:$0xff] }
  0x69   : > { %5022 = vmatpush3.bf16.msra.mxu0 %v5019_v48  ;;  %v695_v48 = vld [vmem:[#allocation2 + $0x151] sm:$0xff] }
  0x6a   : > { %5024 = vmatprep.subr.bf16.mxu0 %v5023_v22  ;;  %v3553_v33 = vld [vmem:[%s6942_s5 + $0x110] sm:$0xff] }
  0x6b   : > { %4168 = vmatmul.mubr.f32.gmra.mrb[24].mxu1 %v692_v23  ;;  %4541 = vmatmul.mubr.f32.gmra.mrb[6].mxu0 %v6156_v49  ;;  %v696_v23 = vld [vmem:[#allocation2 + $0x159] sm:$0xff] }
  0x6c   : > { %4170 = vmatprep.mubr.f32.mxu1 %v693_v52  ;;  %4543 = vmatprep.mubr.f32.mxu0 %v6158_v40  ;;  %v6180_v52 = vld [vmem:[#allocation2 + $0x9a] sm:$0xff] }
  0x6d   : > { %5026 = vmatpush3.bf16.msra.mxu0 %v5023_v22  ;;  %v697_v22 = vld [vmem:[#allocation2 + $0x169] sm:$0xff] }
  0x6e   : > { %5028 = vmatprep.subr.bf16.mxu0 %v5027_v60 }
  0x6f   : > { %4171 = vmatmul.mubr.f32.gmra.mrb[26].mxu1 %v694_v10  ;;  %4544 = vmatmul.mubr.f32.gmra.mrb[8].mxu0 %v6168_v1  ;;  %v3630_v10 = vld [vmem:[%s6942_s5 + $0x378] sm:$0xff] }
  0x70   : > { %4173 = vmatprep.mubr.f32.mxu1 %v695_v48  ;;  %4546 = vmatprep.mubr.f32.mxu0 %v6170_v19  ;;  %v6192_v48 = vld [vmem:[#allocation2 + $0x171] sm:$0xff]  ;;  %v5039_v53 = vpack.c.bf16 %v3630_v10, %v3629_v6  ;;  %v6218_v10 = vld [vmem:[#allocation2 + $0xda] sm:$0xff] }
  0x71   : > { %5030 = vmatpush3.bf16.msra.mxu0 %v5027_v60  ;;  %6974 = vst [vmem:[#allocation10_spill] sm:$0xff] %v6192_v48  ;;  %v6196_v60 = vld [vmem:[#allocation2 + $0xc2] sm:$0xff]  ;;  %v6216_v6 = vld [vmem:[#allocation2 + $0xca] sm:$0xff] }
  0x72   : > { %5032 = vmatprep.subr.bf16.mxu0 %v5031_v11 }
  0x73   : > { %4174 = vmatmul.mubr.f32.gmra.mrb[28].mxu1 %v696_v23  ;;  %4547 = vmatmul.mubr.f32.gmra.mrb[10].mxu0 %v6180_v52  ;;  %v3554_v23 = vld [vmem:[%s6942_s5 + $0x118] sm:$0xff] }
  0x74   : > { %4176 = vmatprep.mubr.f32.mxu1 %v697_v22  ;;  %4549 = vmatprep.mubr.f32.mxu0 %v6182_v58  ;;  %v3631_v22 = vld [vmem:[%s6942_s5 + $0x380] sm:$0xff] }
  0x75   : > { %5034 = vmatpush3.bf16.msra.mxu0 %v5031_v11  ;;  %v3632_v11 = vld [vmem:[%s6942_s5 + $0x388] sm:$0xff] }
  0x76   : > { %5036 = vmatprep.subr.bf16.mxu0 %v5035_v61  ;;  %v6220_v35 = vpack.c.bf16 %v3632_v11, %v3631_v22  ;;  %v3558_v22 = vld [vmem:[%s6942_s5 + $0x138] sm:$0xff]  ;;  %v3561_v11 = vld [vmem:[%s6942_s5 + $0x150] sm:$0xff] }
  0x77   : > { %4177 = vmatmul.mubr.f32.gmra.mrb[30].mxu1 %v6192_v48  ;;  %4550 = vmatmul.mubr.f32.gmra.mrb[12].mxu0 %v6194_v51  ;;  %v4887_v48 = vpack.c.bf16 %v3554_v23, %v3553_v33  ;;  %v6237_v33 = vld [vmem:[#allocation2 + $0xf2] sm:$0xff]  ;;  %v4891_v23 = vpack.c.bf16 %v3556_v18, %v3555_v25  ;;  %v6252_v18 = vld [vmem:[#allocation2 + $0xfa] sm:$0xff]  ;;  %v6254_v25 = vld [vmem:[#allocation2 + $0x10a] sm:$0xff] }
  0x78   : > { %4211 = vmatprep.mubr.f32.mxu1 %v6212_v43  ;;  %4552 = vmatprep.mubr.f32.mxu0 %v6196_v60 }
  0x79   : > { %5038 = vmatpush3.bf16.msra.mxu0 %v5035_v61  ;;  %v6234_v61 = vld [vmem:[#allocation2 + $0xe2] sm:$0xff] }
  0x7a   : > { %5040 = vmatprep.subr.bf16.mxu0 %v5039_v53 }
  0x7b   : > { %4212 = vmatmul.mubr.f32.vlgmr.msra.gmra.mrb[0].mxu1 %v6212_v43  ;;  %4553 = vmatmul.mubr.f32.gmra.mrb[14].mxu0 %v6216_v6 }
  0x7c   : > { %5395 = vmatprep.mubr.msk.f32.mxu1 %vm493_vm0, %v5762_v12  ;;  %4555 = vmatprep.mubr.f32.mxu0 %v6218_v10  ;;  %v3557_v12 = vld [vmem:[%s6942_s5 + $0x130] sm:$0xff] }
  0x7d   : > { %4886 = vmatpush3.bf16.msra.mxu1 %v6116_v7  ;;  %5042 = vmatpush3.bf16.msra.mxu0 %v5039_v53  ;;  %v3559_v7 = vld [vmem:[%s6942_s5 + $0x140] sm:$0xff] }
  0x7e   : > { %4888 = vmatprep.subr.bf16.mxu1 %v4887_v48  ;;  %5044 = vmatprep.subr.bf16.mxu0 %v6220_v35  ;;  %v6270_v53 = vld [vmem:[#allocation2 + $0x122] sm:$0xff] }
  0x7f   : > { %4215 = vmatmul.mubr.f32.gmra.mrb[2].mxu1 %v5765_v5  ;;  %4556 = vmatmul.mubr.f32.gmra.mrb[16].mxu0 %v6234_v61  ;;  %v4895_v5 = vpack.c.bf16 %v3558_v22, %v3557_v12  ;;  %v3562_v12 = vld [vmem:[%s6942_s5 + $0x158] sm:$0xff] }
  0x80   : > { %5396 = vmatprep.mubr.msk.f32.mxu1 %vm493_vm0, %v5769_v15  ;;  %4558 = vmatprep.mubr.f32.mxu0 %v6237_v33  ;;  %v3560_v15 = vld [vmem:[%s6942_s5 + $0x148] sm:$0xff]  ;;  %v6286_v22 = vld [vmem:[#allocation2 + $0x13a] sm:$0xff] }
  0x81   : > { %4890 = vmatpush3.bf16.msra.mxu1 %v4887_v48  ;;  %v6268_v48 = vld [vmem:[#allocation2 + $0x112] sm:$0xff]  ;;  %6976 = vst [vmem:[#allocation12_spill] sm:$0xff] %v6286_v22 }
  0x82   : > { %4892 = vmatprep.subr.bf16.mxu1 %v4891_v23 }
  0x83   : > { %4218 = vmatmul.mubr.f32.gmra.mrb[4].mxu1 %v5772_v16  ;;  %4559 = vmatmul.mubr.f32.gmra.mrb[18].mxu0 %v6252_v18  ;;  %v4899_v16 = vpack.c.bf16 %v3560_v15, %v3559_v7  ;;  %v3563_v7 = vld [vmem:[%s6942_s5 + $0x160] sm:$0xff]  ;;  %v3564_v15 = vld [vmem:[%s6942_s5 + $0x168] sm:$0xff] }
  0x84   : > { %5397 = vmatprep.mubr.msk.f32.mxu1 %vm493_vm0, %v5776_v20  ;;  %4561 = vmatprep.mubr.f32.mxu0 %v6254_v25 }
  0x85   : > { %4894 = vmatpush3.bf16.msra.mxu1 %v4891_v23  ;;  %v6284_v23 = vld [vmem:[#allocation2 + $0x12a] sm:$0xff] }
  0x86   : > { %4896 = vmatprep.subr.bf16.mxu1 %v4895_v5  ;;  %6975 = vst [vmem:[#allocation11_spill] sm:$0xff] %v6284_v23 }
  0x87   : > { %4221 = vmatmul.mubr.f32.gmra.mrb[6].mxu1 %v5779_v21  ;;  %4562 = vmatmul.mubr.f32.gmra.mrb[20].mxu0 %v6268_v48  ;;  %v4903_v21 = vpack.c.bf16 %v3562_v12, %v3561_v11  ;;  %v6302_v11 = vld [vmem:[#allocation2 + $0x152] sm:$0xff]  ;;  %v4907_v12 = vpack.c.bf16 %v3564_v15, %v3563_v7  ;;  %v6318_v7 = vld [vmem:[#allocation2 + $0x16a] sm:$0xff] }
  0x88   : > { %5398 = vmatprep.mubr.msk.f32.mxu1 %vm493_vm0, %v5803_v34  ;;  %4564 = vmatprep.mubr.f32.mxu0 %v6270_v53  ;;  %6978 = vst [vmem:[#allocation14_spill] sm:$0xff] %v6302_v11 }
  0x89   : > { %4898 = vmatpush3.bf16.msra.mxu1 %v4895_v5  ;;  %v6300_v5 = vld [vmem:[#allocation2 + $0x142] sm:$0xff] }
  0x8a   : > { %4900 = vmatprep.subr.bf16.mxu1 %v4899_v16  ;;  %6977 = vst [vmem:[#allocation13_spill] sm:$0xff] %v6300_v5 }
  0x8b   : > { %4224 = vmatmul.mubr.f32.gmra.mrb[8].mxu1 %v5806_v36  ;;  %4565 = vmatmul.mubr.f32.gmra.mrb[22].mxu0 %v6284_v23  ;;  %v3566_v23 = vld [vmem:[%s6942_s5 + $0x178] sm:$0xff] }
  0x8c   : > { %5399 = vmatprep.mubr.msk.f32.mxu1 %vm493_vm0, %v5814_v32  ;;  %4567 = vmatprep.mubr.f32.mxu0 %v6286_v22  ;;  %v4911_v15 = vpack.c.bf16 %v3566_v23, %v3565_v13  ;;  %v3568_v22 = vld [vmem:[%s6942_s5 + $0x188] sm:$0xff] }
  0x8d   : > { %4902 = vmatpush3.bf16.msra.mxu1 %v4899_v16  ;;  %v6316_v16 = vld [vmem:[#allocation2 + $0x15a] sm:$0xff]  ;;  %v2115_v13 = vld [vmem:[#allocation2 + $0x182] sm:$0xff] }
  0x8e   : > { %4904 = vmatprep.subr.bf16.mxu1 %v4903_v21  ;;  %6979 = vst [vmem:[#allocation15_spill] sm:$0xff] %v6316_v16 }
  0x8f   : > { %4227 = vmatmul.mubr.f32.gmra.mrb[10].mxu1 %v5817_v45  ;;  %4568 = vmatmul.mubr.f32.gmra.mrb[24].mxu0 %v6300_v5  ;;  %v3567_v5 = vld [vmem:[%s6942_s5 + $0x180] sm:$0xff] }
  0x90   : > { %5400 = vmatprep.mubr.msk.f32.mxu1 %vm493_vm0, %v5842_v2  ;;  %4570 = vmatprep.mubr.f32.mxu0 %v6302_v11  ;;  %v6334_v23 = vpack.c.bf16 %v3568_v22, %v3567_v5  ;;  %v6341_v11 = vld [vmem:[#allocation2 + $0x30] sm:$0xff]  ;;  %v3634_v22 = vld [vmem:[%s6942_s5 + $0x398] sm:$0xff] }
  0x91   : > { %4906 = vmatpush3.bf16.msra.mxu1 %v4903_v21  ;;  %v6332_v21 = vld [vmem:[#allocation2 + $0x172] sm:$0xff]  ;;  %6980 = vst [vmem:[#allocation16_spill] sm:$0xff] %v6341_v11 }
  0x92   : > { %4908 = vmatprep.subr.bf16.mxu1 %v4907_v12  ;;  %v6355_v5 = vld [vmem:[#allocation2 + $0x38] sm:$0xff] }
  0x93   : > { %4230 = vmatmul.mubr.f32.gmra.mrb[12].mxu1 %v5845_v3  ;;  %4571 = vmatmul.mubr.f32.gmra.mrb[26].mxu0 %v6316_v16  ;;  %v2116_v16 = vld [vmem:[#allocation2 + $0x18a] sm:$0xff] }
  0x94   : > { %5401 = vmatprep.mubr.msk.f32.mxu1 %vm493_vm0, %v5850_v9  ;;  %4573 = vmatprep.mubr.f32.mxu0 %v6318_v7 }
  0x95   : > { %4910 = vmatpush3.bf16.msra.mxu1 %v4907_v12  ;;  %v3633_v12 = vld [vmem:[%s6942_s5 + $0x390] sm:$0xff] }
  0x96   : > { %4912 = vmatprep.subr.bf16.mxu1 %v4911_v15 }
  0x97   : > { %4233 = vmatmul.mubr.f32.gmra.mrb[14].mxu1 %v5863_v24  ;;  %4574 = vmatmul.mubr.f32.gmra.mrb[28].mxu0 %v6332_v21 }
  0x98   : > { %5402 = vmatprep.mubr.msk.f32.mxu1 %vm493_vm0, %v5877_v44  ;;  %4576 = vmatprep.mubr.f32.mxu0 %v2115_v13  ;;  %v3635_v13 = vld [vmem:[%s6942_s5 + $0x3a0] sm:$0xff] }
  0x99   : > { %4914 = vmatpush3.bf16.msra.mxu1 %v4911_v15  ;;  %v5047_v15 = vpack.c.bf16 %v3634_v22, %v3633_v12  ;;  %v3638_v22 = vld [vmem:[%s6942_s5 + $0x3b8] sm:$0xff] }
  0x9a   : > { %4916 = vmatprep.subr.bf16.mxu1 %v6334_v23 }
  0x9b   : > { %4236 = vmatmul.mubr.f32.gmra.mrb[16].mxu1 %v5882_v46  ;;  %4577 = vmatmul.mubr.f32.gmra.mrb[30].mxu0 %v2116_v16  ;;  %v3636_v16 = vld [vmem:[%s6942_s5 + $0x3a8] sm:$0xff] }
  0x9c   : > { %5403 = vmatprep.mubr.msk.f32.mxu1 %vm493_vm0, %v5902_v0  ;;  %4611 = vmatprep.mubr.f32.mxu0 %v6341_v11  ;;  %v6369_v11 = vld [vmem:[#allocation2 + $0x50] sm:$0xff]  ;;  %v5051_v12 = vpack.c.bf16 %v3636_v16, %v3635_v13  ;;  %v3639_v13 = vld [vmem:[%s6942_s5 + $0x3c0] sm:$0xff]  ;;  %v3640_v16 = vld [vmem:[%s6942_s5 + $0x3c8] sm:$0xff] }
  0x9f   : > { %4239 = vmatmul.mubr.f32.gmra.mrb[18].mxu1 %v5912_v14  ;;  %4612 = vmatmul.mubr.f32.vlgmr.msra.gmra.mrb[0].mxu0 %v6355_v5 }
  0xa0   : > { %5046 = vmatpush3.bf16.msra.mxu0 %v6220_v35  ;;  %5404 = vmatprep.mubr.msk.f32.mxu1 %vm493_vm0, %v5924_v28  ;;  %v3637_v35 = vld [vmem:[%s6942_s5 + $0x3b0] sm:$0xff] }
  0xa1   : > { %5405 = vmatprep.mubr.msk.f32.mxu0 %vm493_vm0, %v5776_v20  ;;  %5048 = vmatprep.subr.bf16.mxu0 %v5047_v15  ;;  %v5055_v20 = vpack.c.bf16 %v3638_v22, %v3637_v35  ;;  %v3646_v35 = vld [vmem:[%s6942_s5 + $0x3f8] sm:$0xff] }
  0xa3   : > { %4242 = vmatmul.mubr.f32.gmra.mrb[20].mxu1 %v5932_v38  ;;  %4615 = vmatmul.mubr.f32.gmra.mrb[2].mxu0 %v6369_v11 }
  0xa4   : > { %5406 = vmatprep.mubr.msk.f32.mxu1 %vm493_vm0, %v5957_v62  ;;  %5407 = vmatprep.mubr.msk.f32.mxu0 %vm493_vm0, %v5803_v34  ;;  %v5059_v34 = vpack.c.bf16 %v3640_v16, %v3639_v13  ;;  %v3648_v13 = vld [vmem:[%s6942_s5 + $0x408] sm:$0xff] }
  0xa5   : > { %5050 = vmatpush3.bf16.msra.mxu0 %v5047_v15  ;;  %v3642_v15 = vld [vmem:[%s6942_s5 + $0x3d8] sm:$0xff]  ;;  %v1167_v16 = vld [vmem:[#allocation2 + $0xa] sm:$0xff] }
  0xa6   : > { %5052 = vmatprep.subr.bf16.mxu0 %v5051_v12 }
  0xa7   : > { %4245 = vmatmul.mubr.f32.gmra.mrb[22].mxu1 %v5960_v63  ;;  %4618 = vmatmul.mubr.f32.gmra.mrb[4].mxu0 %v5806_v36  ;;  %v3641_v36 = vld [vmem:[%s6942_s5 + $0x3d0] sm:$0xff] }
  0xa8   : > { %5408 = vmatprep.mubr.msk.f32.mxu1 %vm493_vm0, %v5981_v27  ;;  %5409 = vmatprep.mubr.msk.f32.mxu0 %vm493_vm0, %v5814_v32  ;;  %v5063_v32 = vpack.c.bf16 %v3642_v15, %v3641_v36  ;;  %v3571_v36 = vld [vmem:[%s6942_s5 + $0x1a0] sm:$0xff]  ;;  %v3572_v15 = vld [vmem:[%s6942_s5 + $0x1a8] sm:$0xff] }
  0xa9   : > { %5054 = vmatpush3.bf16.msra.mxu0 %v5051_v12  ;;  %v3644_v12 = vld [vmem:[%s6942_s5 + $0x3e8] sm:$0xff] }
  0xaa   : > { %5056 = vmatprep.subr.bf16.mxu0 %v5055_v20 }
  0xab   : > { %4248 = vmatmul.mubr.f32.gmra.mrb[24].mxu1 %v5994_v54  ;;  %4621 = vmatmul.mubr.f32.gmra.mrb[6].mxu0 %v5817_v45  ;;  %v3643_v45 = vld [vmem:[%s6942_s5 + $0x3e0] sm:$0xff] }
  0xac   : > { %5410 = vmatprep.mubr.msk.f32.mxu1 %vm493_vm0, %v6004_v55  ;;  %5411 = vmatprep.mubr.msk.f32.mxu0 %vm493_vm0, %v5842_v2  ;;  %v5067_v2 = vpack.c.bf16 %v3644_v12, %v3643_v45  ;;  %v6983_v12 = vld [vmem:[#allocation13_spill] sm:$0xff] }
  0xad   : > { %5058 = vmatpush3.bf16.msra.mxu0 %v5055_v20  ;;  %v3570_v20 = vld [vmem:[%s6942_s5 + $0x198] sm:$0xff] }
  0xae   : > { %5060 = vmatprep.subr.bf16.mxu0 %v5059_v34 }
  0xaf   : > { %4251 = vmatmul.mubr.f32.gmra.mrb[26].mxu1 %v6007_v47  ;;  %4624 = vmatmul.mubr.f32.gmra.mrb[8].mxu0 %v5845_v3  ;;  %v3645_v3 = vld [vmem:[%s6942_s5 + $0x3f0] sm:$0xff] }
  0xb0   : > { %5412 = vmatprep.mubr.msk.f32.mxu1 %vm493_vm0, %v6026_v29  ;;  %5413 = vmatprep.mubr.msk.f32.mxu0 %vm493_vm0, %v5850_v9  ;;  %v1166_v9 = vld [vmem:[#allocation2 + $0x2] sm:$0xff]  ;;  %v5071_v22 = vpack.c.bf16 %v3646_v35, %v3645_v3 }
  0xb1   : > { %5062 = vmatpush3.bf16.msra.mxu0 %v5059_v34  ;;  %v3660_v3 = vld [vmem:[%s6942_s5 + $0x468] sm:$0xff] }
  0xb2   : > { %5064 = vmatprep.subr.bf16.mxu0 %v5063_v32  ;;  %v6984_v35 = vld [vmem:[#allocation14_spill] sm:$0xff] }
  0xb3   : > { %4254 = vmatmul.mubr.f32.gmra.mrb[28].mxu1 %v6029_v30  ;;  %4627 = vmatmul.mubr.f32.gmra.mrb[10].mxu0 %v5863_v24  ;;  %v3569_v24 = vld [vmem:[%s6942_s5 + $0x190] sm:$0xff] }
  0xb4   : > { %5414 = vmatprep.mubr.msk.f32.mxu1 %vm493_vm0, %v6035_v41  ;;  %5415 = vmatprep.mubr.msk.f32.mxu0 %vm493_vm0, %v5877_v44  ;;  %v3647_v44 = vld [vmem:[%s6942_s5 + $0x400] sm:$0xff] }
  0xb5   : > { %5066 = vmatpush3.bf16.msra.mxu0 %v5063_v32  ;;  %v6461_v34 = vpack.c.bf16 %v3648_v13, %v3647_v44  ;;  %v2708_v32 = vld [vmem:[#allocation2 + $0xa9] sm:$0xff]  ;;  %v3662_v13 = vld [vmem:[%s6942_s5 + $0x478] sm:$0xff] }
  0xb6   : > { %5068 = vmatprep.subr.bf16.mxu0 %v5067_v2  ;;  %v3661_v44 = vld [vmem:[%s6942_s5 + $0x470] sm:$0xff] }
  0xb7   : > { %4257 = vmatmul.mubr.f32.gmra.mrb[30].mxu1 %v6038_v42  ;;  %4630 = vmatmul.mubr.f32.gmra.mrb[12].mxu0 %v5882_v46  ;;  %v4919_v46 = vpack.c.bf16 %v3570_v20, %v3569_v24  ;;  %v2710_v24 = vld [vmem:[#allocation2 + $0xc1] sm:$0xff]  ;;  %v6985_v20 = vld [vmem:[#allocation15_spill] sm:$0xff] }
  0xb8   : > { %4291 = vmatprep.mubr.f32.mxu1 %v1166_v9  ;;  %5416 = vmatprep.mubr.msk.f32.mxu0 %vm493_vm0, %v5902_v0  ;;  %v4923_v0 = vpack.c.bf16 %v3572_v15, %v3571_v36  ;;  %v2709_v9 = vld [vmem:[#allocation2 + $0xb1] sm:$0xff]  ;;  %v5103_v36 = vpack.c.bf16 %v3662_v13, %v3661_v44  ;;  %v1474_v15 = vld [vmem:[#allocation2 + $0x20] sm:$0xff]  ;;  %v1501_v13 = vld [vmem:[#allocation2 + $0x168] sm:$0xff] }
  0xb9   : > { %5070 = vmatpush3.bf16.msra.mxu0 %v5067_v2  ;;  %v3659_v2 = vld [vmem:[%s6942_s5 + $0x460] sm:$0xff] }
  0xba   : > { %5072 = vmatprep.subr.bf16.mxu0 %v5071_v22  ;;  %v3013_v44 = vld [vmem:[#allocation2 + $0x9a] sm:$0xff] }
  0xbb   : > { %4292 = vmatmul.mubr.f32.vlgmr.msra.gmra.mrb[0].mxu1 %v1167_v16  ;;  %4633 = vmatmul.mubr.f32.gmra.mrb[14].mxu0 %v5912_v14  ;;  %v3573_v14 = vld [vmem:[%s6942_s5 + $0x1b0] sm:$0xff] }
  0xbc   : > { %4294 = vmatprep.mubr.f32.mxu1 %v6108_v26  ;;  %5417 = vmatprep.mubr.msk.f32.mxu0 %vm493_vm0, %v5924_v28  ;;  %v3574_v26 = vld [vmem:[%s6942_s5 + $0x1b8] sm:$0xff]  ;;  %v2711_v16 = vld [vmem:[#allocation2 + $0xc9] sm:$0xff] }
  0xbd   : > { %4918 = vmatpush3.bf16.msra.mxu1 %v6334_v23  ;;  %5074 = vmatpush3.bf16.msra.mxu0 %v5071_v22  ;;  %v4927_v28 = vpack.c.bf16 %v3574_v26, %v3573_v14  ;;  %v6982_v23 = vld [vmem:[#allocation12_spill] sm:$0xff]  ;;  %v5099_v22 = vpack.c.bf16 %v3660_v3, %v3659_v2 }
  0xbe   : > { %4920 = vmatprep.subr.bf16.mxu1 %v4919_v46  ;;  %5076 = vmatprep.subr.bf16.mxu0 %v6461_v34  ;;  %v6611_v14 = vld [vmem:[#allocation2 + $0xf1] sm:$0xff]  ;;  %v6616_v26 = vld [vmem:[#allocation2 + $0xf9] sm:$0xff] }
  0xbf   : > { %4295 = vmatmul.mubr.f32.gmra.mrb[2].mxu1 %v6118_v59  ;;  %4636 = vmatmul.mubr.f32.gmra.mrb[16].mxu0 %v5932_v38  ;;  %v3575_v38 = vld [vmem:[%s6942_s5 + $0x1c0] sm:$0xff]  ;;  %v3576_v59 = vld [vmem:[%s6942_s5 + $0x1c8] sm:$0xff]  ;;  %v1497_v2 = vld [vmem:[#allocation2 + $0x138] sm:$0xff] }
  0xc0   : > { %4297 = vmatprep.mubr.f32.mxu1 %v6121_v56  ;;  %5418 = vmatprep.mubr.msk.f32.mxu0 %vm493_vm0, %v5957_v62  ;;  %v4931_v62 = vpack.c.bf16 %v3576_v59, %v3575_v38  ;;  %v3578_v56 = vld [vmem:[%s6942_s5 + $0x1d8] sm:$0xff]  ;;  %v6987_v38 = vld [vmem:[#allocation3_spill] sm:$0xff] }
  0xc1   : > { %4922 = vmatpush3.bf16.msra.mxu1 %v4919_v46  ;;  %v1473_v46 = vld [vmem:[#allocation2 + $0x18] sm:$0xff] }
  0xc2   : > { %4924 = vmatprep.subr.bf16.mxu1 %v4923_v0  ;;  %v6625_v59 = vld [vmem:[#allocation2 + $0x111] sm:$0xff]  ;;  %v3010_v3 = vld [vmem:[#allocation2 + $0x7a] sm:$0xff] }
  0xc3   : > { %4298 = vmatmul.mubr.f32.gmra.mrb[4].mxu1 %v6131_v31  ;;  %4639 = vmatmul.mubr.f32.gmra.mrb[18].mxu0 %v5960_v63  ;;  %v3577_v63 = vld [vmem:[%s6942_s5 + $0x1d0] sm:$0xff]  ;;  %v3580_v31 = vld [vmem:[%s6942_s5 + $0x1e8] sm:$0xff] }
  0xc4   : > { %4300 = vmatprep.mubr.f32.mxu1 %v6134_v39  ;;  %5419 = vmatprep.mubr.msk.f32.mxu0 %vm493_vm0, %v5981_v27  ;;  %v4935_v27 = vpack.c.bf16 %v3578_v56, %v3577_v63  ;;  %v3582_v39 = vld [vmem:[%s6942_s5 + $0x1f8] sm:$0xff]  ;;  %v6627_v63 = vld [vmem:[#allocation2 + $0x121] sm:$0xff]  ;;  %v6634_v56 = vld [vmem:[#allocation2 + $0x129] sm:$0xff] }
  0xc5   : > { %4926 = vmatpush3.bf16.msra.mxu1 %v4923_v0  ;;  %v6609_v0 = vld [vmem:[#allocation2 + $0xe1] sm:$0xff] }
  0xc6   : > { %4928 = vmatprep.subr.bf16.mxu1 %v4927_v28 }
  0xc7   : > { %4301 = vmatmul.mubr.f32.gmra.mrb[6].mxu1 %v6144_v50  ;;  %4642 = vmatmul.mubr.f32.gmra.mrb[20].mxu0 %v5994_v54  ;;  %v3579_v54 = vld [vmem:[%s6942_s5 + $0x1e0] sm:$0xff] }
  0xc8   : > { %4303 = vmatprep.mubr.f32.mxu1 %v6146_v17  ;;  %5420 = vmatprep.mubr.msk.f32.mxu0 %vm493_vm0, %v6004_v55  ;;  %v4939_v55 = vpack.c.bf16 %v3580_v31, %v3579_v54  ;;  %v2702_v50 = vld [vmem:[#allocation2 + $0x61] sm:$0xff]  ;;  %v6636_v54 = vld [vmem:[#allocation2 + $0x139] sm:$0xff] }
  0xc9   : > { %4930 = vmatpush3.bf16.msra.mxu1 %v4927_v28  ;;  %v6619_v28 = vld [vmem:[#allocation2 + $0x109] sm:$0xff]  ;;  %v6989_v31 = vld [vmem:[#allocation5_spill] sm:$0xff] }
  0xca   : > { %4932 = vmatprep.subr.bf16.mxu1 %v4931_v62 }
  0xcb   : > { %4304 = vmatmul.mubr.f32.gmra.mrb[8].mxu1 %v6156_v49  ;;  %4645 = vmatmul.mubr.f32.gmra.mrb[22].mxu0 %v6007_v47  ;;  %v3581_v47 = vld [vmem:[%s6942_s5 + $0x1f0] sm:$0xff] }
  0xcc   : > { %4306 = vmatprep.mubr.f32.mxu1 %v6158_v40  ;;  %5421 = vmatprep.mubr.msk.f32.mxu0 %vm493_vm0, %v6026_v29  ;;  %v4943_v29 = vpack.c.bf16 %v3582_v39, %v3581_v47  ;;  %v3653_v49 = vld [vmem:[%s6942_s5 + $0x430] sm:$0xff]  ;;  %v3654_v40 = vld [vmem:[%s6942_s5 + $0x438] sm:$0xff] }
  0xcd   : > { %4934 = vmatpush3.bf16.msra.mxu1 %v4931_v62  ;;  %v1479_v62 = vld [vmem:[#allocation2 + $0x60] sm:$0xff]  ;;  %v1483_v47 = vld [vmem:[#allocation2 + $0x90] sm:$0xff] }
  0xce   : > { %4936 = vmatprep.subr.bf16.mxu1 %v4935_v27  ;;  %v6644_v39 = vld [vmem:[#allocation2 + $0x151] sm:$0xff] }
  0xcf   : > { %4307 = vmatmul.mubr.f32.gmra.mrb[10].mxu1 %v6168_v1  ;;  %4648 = vmatmul.mubr.f32.gmra.mrb[24].mxu0 %v6029_v30  ;;  %v2698_v30 = vld [vmem:[#allocation2 + $0x31] sm:$0xff]  ;;  %v2703_v1 = vld [vmem:[#allocation2 + $0x69] sm:$0xff] }
  0xd0   : > { %4309 = vmatprep.mubr.f32.mxu1 %v6170_v19  ;;  %5422 = vmatprep.mubr.msk.f32.mxu0 %vm493_vm0, %v6035_v41  ;;  %v2704_v19 = vld [vmem:[#allocation2 + $0x79] sm:$0xff] }
  0xd1   : > { %4938 = vmatpush3.bf16.msra.mxu1 %v4935_v27  ;;  %v1481_v27 = vld [vmem:[#allocation2 + $0x78] sm:$0xff] }
  0xd2   : > { %4940 = vmatprep.subr.bf16.mxu1 %v4939_v55 }
  0xd3   : > { %4310 = vmatmul.mubr.f32.gmra.mrb[12].mxu1 %v6180_v52  ;;  %4651 = vmatmul.mubr.f32.gmra.mrb[26].mxu0 %v6038_v42  ;;  %v2700_v42 = vld [vmem:[#allocation2 + $0x49] sm:$0xff]  ;;  %v5087_v52 = vpack.c.bf16 %v3654_v40, %v3653_v49  ;;  %v1489_v40 = vld [vmem:[#allocation2 + $0xd8] sm:$0xff] }
  0xd4   : > { %4312 = vmatprep.mubr.f32.mxu1 %v6182_v58  ;;  %5423 = vmatprep.mubr.msk.f32.mxu0 %vm493_vm0, %v6084_v37  ;;  %v3649_v58 = vld [vmem:[%s6942_s5 + $0x410] sm:$0xff]  ;;  %v3651_v37 = vld [vmem:[%s6942_s5 + $0x420] sm:$0xff] }
  0xd5   : > { %4942 = vmatpush3.bf16.msra.mxu1 %v4939_v55  ;;  %v5079_v41 = vpack.c.bf16 %v3650_v57, %v3649_v58  ;;  %v6642_v55 = vld [vmem:[#allocation2 + $0x141] sm:$0xff]  ;;  %v6650_v58 = vld [vmem:[#allocation2 + $0x159] sm:$0xff]  ;;  %v6664_v49 = vld [vmem:[#allocation2 + $0x189] sm:$0xff] }
  0xd6   : > { %4944 = vmatprep.subr.bf16.mxu1 %v4943_v29  ;;  %v1485_v57 = vld [vmem:[#allocation2 + $0xa8] sm:$0xff] }
  0xd7   : > { %4313 = vmatmul.mubr.f32.gmra.mrb[14].mxu1 %v6194_v51  ;;  %4654 = vmatmul.mubr.f32.gmra.mrb[28].mxu0 %v6087_v4  ;;  %v2699_v51 = vld [vmem:[#allocation2 + $0x39] sm:$0xff]  ;;  %v3652_v4 = vld [vmem:[%s6942_s5 + $0x428] sm:$0xff] }
  0xd8   : > { %4315 = vmatprep.mubr.f32.mxu1 %v6196_v60  ;;  %4656 = vmatprep.mubr.f32.mxu0 %v6212_v43  ;;  %v5083_v17 = vpack.c.bf16 %v3652_v4, %v3651_v37  ;;  %v3655_v60 = vld [vmem:[%s6942_s5 + $0x440] sm:$0xff] }
  0xd9   : > { %4946 = vmatpush3.bf16.msra.mxu1 %v4943_v29  ;;  %v6990_v29 = vld [vmem:[#allocation6_spill] sm:$0xff]  ;;  %v1487_v37 = vld [vmem:[#allocation2 + $0xc0] sm:$0xff] }
  0xda   : > { %5107 = vmatprep.subr.bf16.mxu1 %v5507_v8  ;;  %v6658_v4 = vld [vmem:[#allocation2 + $0x181] sm:$0xff] }
  0xdb   : > { %4316 = vmatmul.mubr.f32.gmra.mrb[16].mxu1 %v6216_v6  ;;  %4657 = vmatmul.mubr.f32.gmra.mrb[30].mxu0 %v6212_v43  ;;  %v2701_v43 = vld [vmem:[#allocation2 + $0x51] sm:$0xff]  ;;  %v3656_v6 = vld [vmem:[%s6942_s5 + $0x448] sm:$0xff] }
  0xdc   : > { %4318 = vmatprep.mubr.f32.mxu1 %v6218_v10  ;;  %4691 = vmatprep.mubr.f32.mxu0 %v2698_v30  ;;  %v2705_v10 = vld [vmem:[#allocation2 + $0x81] sm:$0xff]  ;;  %v1484_v30 = vld [vmem:[#allocation2 + $0x98] sm:$0xff] }
  0xdf   : > { %4319 = vmatmul.mubr.f32.gmra.mrb[18].mxu1 %v6234_v61  ;;  %4692 = vmatmul.mubr.f32.vlgmr.msra.gmra.mrb[0].mxu0 %v2699_v51  ;;  %v2706_v61 = vld [vmem:[#allocation2 + $0x91] sm:$0xff]  ;;  %v6652_v51 = vld [vmem:[#allocation2 + $0x169] sm:$0xff] }
  0xe0   : > { %5078 = vmatpush3.bf16.msra.mxu0 %v6461_v34  ;;  %4321 = vmatprep.mubr.f32.mxu1 %v6237_v33  ;;  %v5091_v33 = vpack.c.bf16 %v3656_v6, %v3655_v60  ;;  %v6605_v34 = vld [vmem:[#allocation2 + $0xd9] sm:$0xff]  ;;  %v2729_v60 = vld [vmem:[#allocation2 + $0x1a1] sm:$0xff]  ;;  %v1491_v6 = vld [vmem:[#allocation2 + $0xf0] sm:$0xff] }
  0xe1   : > { %4694 = vmatprep.mubr.f32.mxu0 %v2700_v42  ;;  %5080 = vmatprep.subr.bf16.mxu0 %v5079_v41  ;;  %v1486_v42 = vld [vmem:[#allocation2 + $0xb0] sm:$0xff] }
  0xe3   : > { %4322 = vmatmul.mubr.f32.gmra.mrb[20].mxu1 %v6252_v18  ;;  %4695 = vmatmul.mubr.f32.gmra.mrb[2].mxu0 %v2701_v43  ;;  %v6981_v18 = vld [vmem:[#allocation11_spill] sm:$0xff]  ;;  %v6992_v43 = vld [vmem:[#allocation8_spill] sm:$0xff] }
  0xe4   : > { %4324 = vmatprep.mubr.f32.mxu1 %v6254_v25  ;;  %4697 = vmatprep.mubr.f32.mxu0 %v2702_v50  ;;  %v3657_v25 = vld [vmem:[%s6942_s5 + $0x450] sm:$0xff]  ;;  %v6993_v50 = vld [vmem:[#allocation10_spill] sm:$0xff] }
  0xe5   : > { %5082 = vmatpush3.bf16.msra.mxu0 %v5079_v41  ;;  %v6991_v41 = vld [vmem:[#allocation7_spill] sm:$0xff] }
  0xe6   : > { %5084 = vmatprep.subr.bf16.mxu0 %v5083_v17 }
  0xe7   : > { %4325 = vmatmul.mubr.f32.gmra.mrb[22].mxu1 %v6268_v48  ;;  %4698 = vmatmul.mubr.f32.gmra.mrb[4].mxu0 %v2703_v1  ;;  %v3658_v48 = vld [vmem:[%s6942_s5 + $0x458] sm:$0xff] }
  0xe8   : > { %4327 = vmatprep.mubr.f32.mxu1 %v6270_v53  ;;  %4700 = vmatprep.mubr.f32.mxu0 %v2704_v19  ;;  %v2707_v53 = vld [vmem:[#allocation2 + $0x99] sm:$0xff]  ;;  %v5095_v45 = vpack.c.bf16 %v3658_v48, %v3657_v25  ;;  %v3006_v25 = vld [vmem:[#allocation2 + $0x4a] sm:$0xff] }
  0xe9   : > { %5086 = vmatpush3.bf16.msra.mxu0 %v5083_v17  ;;  %v1488_v17 = vld [vmem:[#allocation2 + $0xc8] sm:$0xff]  ;;  %v2728_v1 = vld [vmem:[#allocation2 + $0x199] sm:$0xff]  ;;  %v1494_v48 = vld [vmem:[#allocation2 + $0x110] sm:$0xff] }
  0xea   : > { %5088 = vmatprep.subr.bf16.mxu0 %v5087_v52  ;;  %v6994_v19 = vld [vmem:[#allocation9_spill] sm:$0xff] }
  0xeb   : > { %4328 = vmatmul.mubr.f32.gmra.mrb[24].mxu1 %v6981_v18  ;;  %4701 = vmatmul.mubr.f32.gmra.mrb[6].mxu0 %v2705_v10  ;;  %v3004_v10 = vld [vmem:[#allocation2 + $0x32] sm:$0xff]  ;;  %v1493_v18 = vld [vmem:[#allocation2 + $0x108] sm:$0xff] }
  0xec   : > { %4330 = vmatprep.mubr.f32.mxu1 %v6982_v23  ;;  %4703 = vmatprep.mubr.f32.mxu0 %v2706_v61  ;;  %v1492_v61 = vld [vmem:[#allocation2 + $0xf8] sm:$0xff] }
  0xed   : > { %5090 = vmatpush3.bf16.msra.mxu0 %v5087_v52  ;;  %v1490_v52 = vld [vmem:[#allocation2 + $0xe0] sm:$0xff]  ;;  %v3007_v23 = vld [vmem:[#allocation2 + $0x52] sm:$0xff] }
  0xee   : > { %5092 = vmatprep.subr.bf16.mxu0 %v5091_v33 }
  0xef   : > { %4331 = vmatmul.mubr.f32.gmra.mrb[26].mxu1 %v6983_v12  ;;  %4704 = vmatmul.mubr.f32.gmra.mrb[8].mxu0 %v2707_v53  ;;  %v1495_v53 = vld [vmem:[#allocation2 + $0x120] sm:$0xff]  ;;  %v3009_v12 = vld [vmem:[#allocation2 + $0x6a] sm:$0xff] }
  0xf0   : > { %4333 = vmatprep.mubr.f32.mxu1 %v6984_v35  ;;  %4706 = vmatprep.mubr.f32.mxu0 %v2708_v32  ;;  %v3008_v32 = vld [vmem:[#allocation2 + $0x62] sm:$0xff] }
  0xf1   : > { %5094 = vmatpush3.bf16.msra.mxu0 %v5091_v33  ;;  %v3005_v33 = vld [vmem:[#allocation2 + $0x3a] sm:$0xff] }
  0xf2   : > { %5096 = vmatprep.subr.bf16.mxu0 %v5095_v45  ;;  %v1498_v35 = vld [vmem:[#allocation2 + $0x140] sm:$0xff] }
  0xf3   : > { %4334 = vmatmul.mubr.f32.gmra.mrb[28].mxu1 %v6985_v20  ;;  %4707 = vmatmul.mubr.f32.gmra.mrb[10].mxu0 %v2709_v9  ;;  %v3011_v9 = vld [vmem:[#allocation2 + $0x82] sm:$0xff]  ;;  %v1500_v20 = vld [vmem:[#allocation2 + $0x158] sm:$0xff] }
  0xf4   : > { %4336 = vmatprep.mubr.f32.mxu1 %v6318_v7  ;;  %4709 = vmatprep.mubr.f32.mxu0 %v2710_v24  ;;  %v6986_v7 = vld [vmem:[#allocation16_spill] sm:$0xff]  ;;  %v1499_v24 = vld [vmem:[#allocation2 + $0x150] sm:$0xff] }
  0xf5   : > { %5098 = vmatpush3.bf16.msra.mxu0 %v5095_v45  ;;  %v1496_v45 = vld [vmem:[#allocation2 + $0x128] sm:$0xff] }
  0xf6   : > { %5100 = vmatprep.subr.bf16.mxu0 %v5099_v22 }
  0xf7   : > { %4337 = vmatmul.mubr.f32.gmra.mrb[30].mxu1 %v6332_v21  ;;  %4710 = vmatmul.mubr.f32.gmra.mrb[12].mxu0 %v2711_v16  ;;  %v1477_v21 = vld [vmem:[#allocation2 + $0x48] sm:$0xff] }
  0xf8   : > { %4371 = vmatprep.mubr.f32.mxu1 %v1473_v46  ;;  %4712 = vmatprep.mubr.f32.mxu0 %v6605_v34  ;;  %v3014_v16 = vld [vmem:[#allocation2 + $0xaa] sm:$0xff] }
  0xf9   : > { %5102 = vmatpush3.bf16.msra.mxu0 %v5099_v22  ;;  %v3012_v22 = vld [vmem:[#allocation2 + $0x92] sm:$0xff] }
  0xfa   : > { %5104 = vmatprep.subr.bf16.mxu0 %v5103_v36  ;;  %v1502_v46 = vld [vmem:[#allocation2 + $0x170] sm:$0xff] }
  0xfb   : > { %4372 = vmatmul.mubr.f32.vlgmr.msra.gmra.mrb[0].mxu1 %v1474_v15  ;;  %4713 = vmatmul.mubr.f32.gmra.mrb[14].mxu0 %v6609_v0  ;;  %v3016_v15 = vld [vmem:[#allocation2 + $0xc2] sm:$0xff] }
  0xfc   : > { %4374 = vmatprep.mubr.f32.mxu1 %v6986_v7  ;;  %4715 = vmatprep.mubr.f32.mxu0 %v6611_v14  ;;  %v5393_v7 = vld [vmem:[#allocation2 + $0x180] sm:$0xff] }
  0xfd   : > { %5115 = vmatpush3.bf16.msra.mxu1 %v5507_v8  ;;  %5106 = vmatpush3.bf16.msra.mxu0 %v5103_v36  ;;  %v6988_v8 = vld [vmem:[#allocation4_spill] sm:$0xff] }
  0xfe   : > { %5108 = vmatprep.subr.bf16.mxu1 %v6987_v38  ;;  %v3015_v36 = vld [vmem:[#allocation2 + $0xb2] sm:$0xff] }
  0xff   : > { %4375 = vmatmul.mubr.f32.gmra.mrb[2].mxu1 %v6355_v5  ;;  %4716 = vmatmul.mubr.f32.gmra.mrb[16].mxu0 %v6616_v26  ;;  %v1480_v5 = vld [vmem:[#allocation2 + $0x68] sm:$0xff] }
 0x100   : > { %4377 = vmatprep.mubr.f32.mxu1 %v1477_v21  ;;  %4718 = vmatprep.mubr.f32.mxu0 %v6619_v28  ;;  %v3017_v21 = vld [vmem:[#allocation2 + $0xca] sm:$0xff] }
 0x101   : > { %5116 = vmatpush3.bf16.msra.mxu1 %v6987_v38  ;;  %v3018_v38 = vld [vmem:[#allocation2 + $0xda] sm:$0xff] }
 0x102   : > { %5109 = vmatprep.subr.bf16.mxu1 %v6988_v8 }
 0x103   : > { %4378 = vmatmul.mubr.f32.gmra.mrb[4].mxu1 %v6369_v11  ;;  %4719 = vmatmul.mubr.f32.gmra.mrb[18].mxu0 %v6625_v59  ;;  %v1482_v11 = vld [vmem:[#allocation2 + $0x80] sm:$0xff] }
 0x104   : > { %4380 = vmatprep.mubr.f32.mxu1 %v1479_v62  ;;  %4721 = vmatprep.mubr.f32.mxu0 %v6627_v63  ;;  %v5394_v62 = vld [vmem:[#allocation2 + $0x188] sm:$0xff] }
 0x105   : > { %5117 = vmatpush3.bf16.msra.mxu1 %v6988_v8  ;;  %v3019_v8 = vld [vmem:[#allocation2 + $0xe2] sm:$0xff] }
 0x106   : > { %5110 = vmatprep.subr.bf16.mxu1 %v6989_v31 }
 0x107   : > { %4381 = vmatmul.mubr.f32.gmra.mrb[6].mxu1 %v1480_v5  ;;  %4722 = vmatmul.mubr.f32.gmra.mrb[20].mxu0 %v6634_v56  ;;  %v3020_v5 = vld [vmem:[#allocation2 + $0xf2] sm:$0xff] }
 0x108   : > { %4383 = vmatprep.mubr.f32.mxu1 %v1481_v27  ;;  %4724 = vmatprep.mubr.f32.mxu0 %v6636_v54  ;;  %v3021_v27 = vld [vmem:[#allocation2 + $0xfa] sm:$0xff] }
 0x109   : > { %5118 = vmatpush3.bf16.msra.mxu1 %v6989_v31  ;;  %v3022_v31 = vld [vmem:[#allocation2 + $0x10a] sm:$0xff] }
 0x10a   : > { %5111 = vmatprep.subr.bf16.mxu1 %v6990_v29 }
 0x10b   : > { %4384 = vmatmul.mubr.f32.gmra.mrb[8].mxu1 %v1482_v11  ;;  %4725 = vmatmul.mubr.f32.gmra.mrb[22].mxu0 %v6642_v55  ;;  %v3023_v11 = vld [vmem:[#allocation2 + $0x112] sm:$0xff] }
 0x10c   : > { %4386 = vmatprep.mubr.f32.mxu1 %v1483_v47  ;;  %4727 = vmatprep.mubr.f32.mxu0 %v6644_v39  ;;  %v3024_v47 = vld [vmem:[#allocation2 + $0x122] sm:$0xff] }
 0x10d   : > { %5119 = vmatpush3.bf16.msra.mxu1 %v6990_v29  ;;  %v3034_v29 = vld [vmem:[#allocation2 + $0x19a] sm:$0xff] }
 0x10e   : > { %5112 = vmatprep.subr.bf16.mxu1 %v6991_v41 }
 0x10f   : > { %4387 = vmatmul.mubr.f32.gmra.mrb[10].mxu1 %v1484_v30  ;;  %4728 = vmatmul.mubr.f32.gmra.mrb[24].mxu0 %v6650_v58 }
 0x110   : > { %4389 = vmatprep.mubr.f32.mxu1 %v1485_v57  ;;  %4730 = vmatprep.mubr.f32.mxu0 %v6652_v51 }
 0x111   : > { %5120 = vmatpush3.bf16.msra.mxu1 %v6991_v41 }
 0x112   : > { %5113 = vmatprep.subr.bf16.mxu1 %v6992_v43 }
 0x113   : > { %4390 = vmatmul.mubr.f32.gmra.mrb[12].mxu1 %v1486_v42  ;;  %4731 = vmatmul.mubr.f32.gmra.mrb[26].mxu0 %v6993_v50 }
 0x114   : > { %4392 = vmatprep.mubr.f32.mxu1 %v1487_v37  ;;  %4733 = vmatprep.mubr.f32.mxu0 %v6658_v4 }
 0x115   : > { %5121 = vmatpush3.bf16.msra.mxu1 %v6992_v43 }
 0x116   : > { %5114 = vmatprep.subr.bf16.mxu1 %v6994_v19 }
 0x117   : > { %4393 = vmatmul.mubr.f32.gmra.mrb[14].mxu1 %v1488_v17  ;;  %4734 = vmatmul.mubr.f32.gmra.mrb[28].mxu0 %v6664_v49 }
 0x118   : > { %4395 = vmatprep.mubr.f32.mxu1 %v1489_v40  ;;  %4736 = vmatprep.mubr.f32.mxu0 %v2728_v1 }
 0x119   : > { %5122 = vmatpush3.bf16.msra.mxu1 %v6994_v19 }
 0x11b   : > { %4396 = vmatmul.mubr.f32.gmra.mrb[16].mxu1 %v1490_v52  ;;  %4737 = vmatmul.mubr.f32.gmra.mrb[30].mxu0 %v2729_v60 }
 0x11c   : > { %4398 = vmatprep.mubr.f32.mxu1 %v1491_v6  ;;  %4771 = vmatprep.mubr.f32.mxu0 %v3004_v10 }
 0x11f   : > { %4399 = vmatmul.mubr.f32.gmra.mrb[18].mxu1 %v1492_v61  ;;  %4772 = vmatmul.mubr.f32.vlgmr.msra.gmra.mrb[0].mxu0 %v3005_v33 }
 0x120   : > { %4401 = vmatprep.mubr.f32.mxu1 %v1493_v18  ;;  %4774 = vmatprep.mubr.f32.mxu0 %v3006_v25 }
 0x123   : > { %4402 = vmatmul.mubr.f32.gmra.mrb[20].mxu1 %v1494_v48  ;;  %4775 = vmatmul.mubr.f32.gmra.mrb[2].mxu0 %v3007_v23 }
 0x124   : > { %4404 = vmatprep.mubr.f32.mxu1 %v1495_v53  ;;  %4777 = vmatprep.mubr.f32.mxu0 %v3008_v32 }
 0x127   : > { %4405 = vmatmul.mubr.f32.gmra.mrb[22].mxu1 %v1496_v45  ;;  %4778 = vmatmul.mubr.f32.gmra.mrb[4].mxu0 %v3009_v12 }
 0x128   : > { %4407 = vmatprep.mubr.f32.mxu1 %v1497_v2  ;;  %4780 = vmatprep.mubr.f32.mxu0 %v3010_v3 }
 0x12b   : > { %4408 = vmatmul.mubr.f32.gmra.mrb[24].mxu1 %v1498_v35  ;;  %4781 = vmatmul.mubr.f32.gmra.mrb[6].mxu0 %v3011_v9 }
 0x12c   : > { %4410 = vmatprep.mubr.f32.mxu1 %v1499_v24  ;;  %4783 = vmatprep.mubr.f32.mxu0 %v3012_v22 }
 0x12f   : > { %4411 = vmatmul.mubr.f32.gmra.mrb[26].mxu1 %v1500_v20  ;;  %4784 = vmatmul.mubr.f32.gmra.mrb[8].mxu0 %v3013_v44 }
 0x130   : > { %4413 = vmatprep.mubr.f32.mxu1 %v1501_v13  ;;  %4786 = vmatprep.mubr.f32.mxu0 %v3014_v16 }
 0x133   : > { %4414 = vmatmul.mubr.f32.gmra.mrb[28].mxu1 %v1502_v46  ;;  %4787 = vmatmul.mubr.f32.gmra.mrb[10].mxu0 %v3015_v36 }
 0x134   : > { %4416 = vmatprep.mubr.f32.mxu1 %v5393_v7  ;;  %4789 = vmatprep.mubr.f32.mxu0 %v3016_v15 }
 0x137   : > { %4417 = vmatmul.mubr.f32.gmra.mrb[30].mxu1 %v5394_v62  ;;  %4790 = vmatmul.mubr.f32.gmra.mrb[12].mxu0 %v3017_v21 }
 0x138   : > { %4475 = vmatprep.mubr.f32.mxu1 %v6605_v34  ;;  %4792 = vmatprep.mubr.f32.mxu0 %v3018_v38  ;;  %v3025_v34 = vld [vmem:[#allocation2 + $0x12a] sm:$0xff] }
 0x13b   : > { %4476 = vmatmul.mubr.f32.vlgmr.msra.gmra.mrb[16].mxu1 %v6609_v0  ;;  %4793 = vmatmul.mubr.f32.gmra.mrb[14].mxu0 %v3019_v8  ;;  %v3026_v0 = vld [vmem:[#allocation2 + $0x13a] sm:$0xff] }
 0x13c   : > { %4478 = vmatprep.mubr.f32.mxu1 %v6611_v14  ;;  %4795 = vmatprep.mubr.f32.mxu0 %v3020_v5  ;;  %v3027_v14 = vld [vmem:[#allocation2 + $0x142] sm:$0xff] }
 0x13f   : > { %4479 = vmatmul.mubr.f32.gmra.mrb[18].mxu1 %v6616_v26  ;;  %4796 = vmatmul.mubr.f32.gmra.mrb[16].mxu0 %v3021_v27  ;;  %v3028_v26 = vld [vmem:[#allocation2 + $0x152] sm:$0xff] }
 0x140   : > { %4481 = vmatprep.mubr.f32.mxu1 %v6619_v28  ;;  %4798 = vmatprep.mubr.f32.mxu0 %v3022_v31  ;;  %v3029_v28 = vld [vmem:[#allocation2 + $0x15a] sm:$0xff] }
 0x143   : > { %4482 = vmatmul.mubr.f32.gmra.mrb[20].mxu1 %v6625_v59  ;;  %4799 = vmatmul.mubr.f32.gmra.mrb[18].mxu0 %v3023_v11  ;;  %v3030_v59 = vld [vmem:[#allocation2 + $0x16a] sm:$0xff] }
 0x144   : > { %4484 = vmatprep.mubr.f32.mxu1 %v6627_v63  ;;  %4801 = vmatprep.mubr.f32.mxu0 %v3024_v47  ;;  %v1808_v63 = vld [vmem:[#allocation2 + $0x171] sm:$0xff] }
 0x147   : > { %4485 = vmatmul.mubr.f32.gmra.mrb[22].mxu1 %v6634_v56  ;;  %4802 = vmatmul.mubr.f32.gmra.mrb[20].mxu0 %v3025_v34  ;;  %v3031_v56 = vld [vmem:[#allocation2 + $0x172] sm:$0xff] }
 0x148   : > { %4487 = vmatprep.mubr.f32.mxu1 %v6636_v54  ;;  %4804 = vmatprep.mubr.f32.mxu0 %v3026_v0  ;;  %v3032_v54 = vld [vmem:[#allocation2 + $0x182] sm:$0xff] }
 0x14b   : > { %4488 = vmatmul.mubr.f32.gmra.mrb[24].mxu1 %v6642_v55  ;;  %4805 = vmatmul.mubr.f32.gmra.mrb[22].mxu0 %v3027_v14  ;;  %v3033_v55 = vld [vmem:[#allocation2 + $0x18a] sm:$0xff] }
 0x14c   : > { %4490 = vmatprep.mubr.f32.mxu1 %v6644_v39  ;;  %4807 = vmatprep.mubr.f32.mxu0 %v3028_v26  ;;  %v3035_v39 = vld [vmem:[#allocation2 + $0x1a2] sm:$0xff] }
 0x14f   : > { %4491 = vmatmul.mubr.f32.gmra.mrb[26].mxu1 %v6650_v58  ;;  %4808 = vmatmul.mubr.f32.gmra.mrb[24].mxu0 %v3029_v28 }
 0x150   : > { %4493 = vmatprep.mubr.f32.mxu1 %v6652_v51  ;;  %4810 = vmatprep.mubr.f32.mxu0 %v3030_v59 }
 0x153   : > { %4494 = vmatmul.mubr.f32.gmra.mrb[28].mxu1 %v1808_v63  ;;  %4811 = vmatmul.mubr.f32.gmra.mrb[26].mxu0 %v3031_v56 }
 0x154   : > { %4496 = vmatprep.mubr.f32.mxu1 %v6658_v4  ;;  %4813 = vmatprep.mubr.f32.mxu0 %v3032_v54 }
 0x157   : > { %4497 = vmatmul.mubr.f32.gmra.mrb[30].mxu1 %v6664_v49  ;;  %4814 = vmatmul.mubr.f32.gmra.mrb[28].mxu0 %v3033_v55 }
 0x158   : > { %4816 = vmatprep.mubr.f32.mxu0 %v3034_v29 }
 0x15b   : > { %4817 = vmatmul.mubr.f32.gmra.mrb[30].mxu0 %v3035_v39 }
 0x1ce   : > { %v4373_v30 = vpop.f32.mrb[0].mxu1 }
 0x1cf   : > { %v1588_v58 = vpop.f32.mrb[1].mxu1 }
 0x1d2   : > { %v4376_v57 = vpop.f32.mrb[2].mxu1 }
 0x1d3   : > { %v1598_v51 = vpop.f32.mrb[3].mxu1 }
 0x1d6   : > { %v4379_v41 = vpop.f32.mrb[4].mxu1 }
 0x1d7   : > { %v1608_v42 = vpop.f32.mrb[5].mxu1 }
 0x1da   : > { %v4382_v37 = vpop.f32.mrb[6].mxu1 }
 0x1db   : > { %v1618_v43 = vpop.f32.mrb[7].mxu1 }
 0x1de   : > { %v4385_v50 = vpop.f32.mrb[8].mxu1 }
 0x1df   : > { %v1628_v4 = vpop.f32.mrb[9].mxu1 }
 0x1e2   : > { %v4388_v17 = vpop.f32.mrb[10].mxu1 }
 0x1e3   : > { %v1638_v40 = vpop.f32.mrb[11].mxu1 }
 0x1e6   : > { %v4391_v1 = vpop.f32.mrb[12].mxu1 }
 0x1e7   : > { %v1648_v19 = vpop.f32.mrb[13].mxu1 }
 0x1ea   : > { %v4394_v49 = vpop.f32.mrb[14].mxu1 }
 0x1eb   : > { %v1658_v52 = vpop.f32.mrb[15].mxu1 }
 0x1f2   : > { %v4773_v60 = vpop.f32.mrb[0].mxu0 }
 0x1f3   : > { %v6691_v6 = vadd.f32 %v4773_v60, %v4373_v30  ;;  %v3119_v10 = vpop.f32.mrb[1].mxu0 }
 0x1f4   : > { %v6693_v61 = vadd.f32 %v3119_v10, %v1588_v58 }
 0x1f5   : > { %3311 = vst [vmem:[%s6689_s25 + $0x8] sm:$0xff] %v6691_v6 }
 0x1f6   : > { %3310 = vst [vmem:[%s6689_s25] sm:$0xff] %v6693_v61  ;;  %v4776_v33 = vpop.f32.mrb[2].mxu0 }
 0x1f7   : > { %v6699_v18 = vadd.f32 %v4776_v33, %v4376_v57  ;;  %v3129_v25 = vpop.f32.mrb[3].mxu0 }
 0x1f8   : > { %v6701_v48 = vadd.f32 %v3129_v25, %v1598_v51 }
 0x1f9   : > { %3313 = vst [vmem:[%s6689_s25 + $0x18] sm:$0xff] %v6699_v18 }
 0x1fa   : > { %3312 = vst [vmem:[%s6689_s25 + $0x10] sm:$0xff] %v6701_v48  ;;  %v4779_v23 = vpop.f32.mrb[4].mxu0 }
 0x1fb   : > { %v6707_v53 = vadd.f32 %v4779_v23, %v4379_v41  ;;  %v3139_v32 = vpop.f32.mrb[5].mxu0 }
 0x1fc   : > { %v6709_v45 = vadd.f32 %v3139_v32, %v1608_v42 }
 0x1fd   : > { %3315 = vst [vmem:[%s6689_s25 + $0x28] sm:$0xff] %v6707_v53 }
 0x1fe   : > { %3314 = vst [vmem:[%s6689_s25 + $0x20] sm:$0xff] %v6709_v45  ;;  %v4782_v12 = vpop.f32.mrb[6].mxu0 }
 0x1ff   : > { %v6715_v2 = vadd.f32 %v4782_v12, %v4382_v37  ;;  %v3149_v3 = vpop.f32.mrb[7].mxu0 }
 0x200   : > { %v6717_v35 = vadd.f32 %v3149_v3, %v1618_v43 }
 0x201   : > { %3317 = vst [vmem:[%s6689_s25 + $0x38] sm:$0xff] %v6715_v2 }
 0x202   : > { %3316 = vst [vmem:[%s6689_s25 + $0x30] sm:$0xff] %v6717_v35  ;;  %v4785_v9 = vpop.f32.mrb[8].mxu0 }
 0x203   : > { %v6723_v24 = vadd.f32 %v4785_v9, %v4385_v50  ;;  %v3159_v22 = vpop.f32.mrb[9].mxu0 }
 0x204   : > { %v6725_v20 = vadd.f32 %v3159_v22, %v1628_v4 }
 0x205   : > { %3319 = vst [vmem:[%s6689_s25 + $0x48] sm:$0xff] %v6723_v24 }
 0x206   : > { %3318 = vst [vmem:[%s6689_s25 + $0x40] sm:$0xff] %v6725_v20  ;;  %v4788_v44 = vpop.f32.mrb[10].mxu0 }
 0x207   : > { %v6731_v13 = vadd.f32 %v4788_v44, %v4388_v17  ;;  %v3169_v16 = vpop.f32.mrb[11].mxu0 }
 0x208   : > { %v6733_v46 = vadd.f32 %v3169_v16, %v1638_v40 }
 0x209   : > { %3321 = vst [vmem:[%s6689_s25 + $0x58] sm:$0xff] %v6731_v13 }
 0x20a   : > { %3320 = vst [vmem:[%s6689_s25 + $0x50] sm:$0xff] %v6733_v46  ;;  %v4791_v36 = vpop.f32.mrb[12].mxu0 }
 0x20b   : > { %v6739_v15 = vadd.f32 %v4791_v36, %v4391_v1  ;;  %v3179_v7 = vpop.f32.mrb[13].mxu0 }
 0x20c   : > { %v6741_v21 = vadd.f32 %v3179_v7, %v1648_v19 }
 0x20d   : > { %3323 = vst [vmem:[%s6689_s25 + $0x68] sm:$0xff] %v6739_v15 }
 0x20e   : > { %3322 = vst [vmem:[%s6689_s25 + $0x60] sm:$0xff] %v6741_v21  ;;  %v4477_v38 = vpop.f32.mrb[16].mxu1  ;;  %v4794_v62 = vpop.f32.mrb[14].mxu0 }
 0x20f   : > { %v6747_v8 = vadd.f32 %v4794_v62, %v4394_v49  ;;  %v1974_v5 = vpop.f32.mrb[17].mxu1  ;;  %v3189_v27 = vpop.f32.mrb[15].mxu0 }
 0x210   : > { %v6749_v31 = vadd.f32 %v3189_v27, %v1658_v52 }
 0x211   : > { %3325 = vst [vmem:[%s6689_s25 + $0x78] sm:$0xff] %v6747_v8 }
 0x212   : > { %3324 = vst [vmem:[%s6689_s25 + $0x70] sm:$0xff] %v6749_v31  ;;  %v4480_v11 = vpop.f32.mrb[18].mxu1  ;;  %v4797_v47 = vpop.f32.mrb[16].mxu0 }
 0x213   : > { %v6755_v34 = vadd.f32 %v4797_v47, %v4477_v38  ;;  %v1984_v0 = vpop.f32.mrb[19].mxu1  ;;  %v3199_v14 = vpop.f32.mrb[17].mxu0 }
 0x214   : > { %v6757_v26 = vadd.f32 %v3199_v14, %v1974_v5  ;;  %v5433_v5 = vmov (!%p3663_p4), 0.0  }
 0x215   : > { %3327 = vst [vmem:[%s6689_s25 + $0x88] sm:$0xff] %v6755_v34  ;;  %3346 = vst [vmem:[%s6944_s7] sm:$0x1] (!%p3663_p4), %v5433_v5 }
 0x216   : > { %3326 = vst [vmem:[%s6689_s25 + $0x80] sm:$0xff] %v6757_v26  ;;  %v4483_v28 = vpop.f32.mrb[20].mxu1  ;;  %v4800_v59 = vpop.f32.mrb[18].mxu0  ;;  %3347 = vst [vmem:[%s6945_s8] sm:$0x1] (!%p3663_p4), %v5433_v5 }
 0x217   : > { %v6763_v63 = vadd.f32 %v4800_v59, %v4480_v11  ;;  %v1994_v56 = vpop.f32.mrb[21].mxu1  ;;  %v3209_v54 = vpop.f32.mrb[19].mxu0 }
 0x218   : > { %v6765_v55 = vadd.f32 %v3209_v54, %v1984_v0 }
 0x219   : > { %3329 = vst [vmem:[%s6689_s25 + $0x98] sm:$0xff] %v6763_v63 }
 0x21a   : > { %3328 = vst [vmem:[%s6689_s25 + $0x90] sm:$0xff] %v6765_v55  ;;  %v4486_v29 = vpop.f32.mrb[22].mxu1  ;;  %v4803_v39 = vpop.f32.mrb[20].mxu0 }
 0x21b   : > { %v6771_v30 = vadd.f32 %v4803_v39, %v4483_v28  ;;  %v2004_v58 = vpop.f32.mrb[23].mxu1  ;;  %v3219_v57 = vpop.f32.mrb[21].mxu0 }
 0x21c   : > { %v6773_v51 = vadd.f32 %v3219_v57, %v1994_v56 }
 0x21d   : > { %3331 = vst [vmem:[%s6689_s25 + $0xa8] sm:$0xff] %v6771_v30 }
 0x21e   : > { %3330 = vst [vmem:[%s6689_s25 + $0xa0] sm:$0xff] %v6773_v51  ;;  %v4489_v41 = vpop.f32.mrb[24].mxu1  ;;  %v4806_v42 = vpop.f32.mrb[22].mxu0 }
 0x21f   : > { %v6779_v37 = vadd.f32 %v4806_v42, %v4486_v29  ;;  %v2014_v43 = vpop.f32.mrb[25].mxu1  ;;  %v3229_v50 = vpop.f32.mrb[23].mxu0 }
 0x220   : > { %v6781_v4 = vadd.f32 %v3229_v50, %v2004_v58 }
 0x221   : > { %3333 = vst [vmem:[%s6689_s25 + $0xb8] sm:$0xff] %v6779_v37 }
 0x222   : > { %3332 = vst [vmem:[%s6689_s25 + $0xb0] sm:$0xff] %v6781_v4  ;;  %v4492_v17 = vpop.f32.mrb[26].mxu1  ;;  %v4809_v40 = vpop.f32.mrb[24].mxu0 }
 0x223   : > { %v6787_v1 = vadd.f32 %v4809_v40, %v4489_v41  ;;  %v2024_v19 = vpop.f32.mrb[27].mxu1  ;;  %v3239_v49 = vpop.f32.mrb[25].mxu0 }
 0x224   : > { %v6789_v52 = vadd.f32 %v3239_v49, %v2014_v43 }
 0x225   : > { %3335 = vst [vmem:[%s6689_s25 + $0xc8] sm:$0xff] %v6787_v1 }
 0x226   : > { %3334 = vst [vmem:[%s6689_s25 + $0xc0] sm:$0xff] %v6789_v52  ;;  %v4495_v60 = vpop.f32.mrb[28].mxu1  ;;  %v4812_v10 = vpop.f32.mrb[26].mxu0 }
 0x227   : > { %v6795_v33 = vadd.f32 %v4812_v10, %v4492_v17  ;;  %v2034_v25 = vpop.f32.mrb[29].mxu1  ;;  %v3249_v23 = vpop.f32.mrb[27].mxu0 }
 0x228   : > { %v6797_v32 = vadd.f32 %v3249_v23, %v2024_v19 }
 0x229   : > { %3337 = vst [vmem:[%s6689_s25 + $0xd8] sm:$0xff] %v6795_v33 }
 0x22a   : > { %3336 = vst [vmem:[%s6689_s25 + $0xd0] sm:$0xff] %v6797_v32  ;;  %v4498_v12 = vpop.f32.mrb[30].mxu1  ;;  %v4815_v3 = vpop.f32.mrb[28].mxu0 }
 0x22b   : > { %v6803_v9 = vadd.f32 %v4815_v3, %v4495_v60  ;;  %v2044_v22 = vpop.f32.mrb[31].mxu1  ;;  %v3259_v44 = vpop.f32.mrb[29].mxu0 }
 0x22c   : > { %v6805_v16 = vadd.f32 %v3259_v44, %v2034_v25  ;;  %3345 = sbr.rel (%p3663_p4) target bundleno = 563 (0x233), region = 48 }
 0x22d   : > { %3339 = vst [vmem:[%s6689_s25 + $0xe8] sm:$0xff] %v6803_v9 }
 0x22e   : > { %3338 = vst [vmem:[%s6689_s25 + $0xe0] sm:$0xff] %v6805_v16  ;;  %v4818_v36 = vpop.f32.mrb[30].mxu0 }
 0x22f   : > { %v6811_v7 = vadd.f32 %v4818_v36, %v4498_v12  ;;  %v3269_v38 = vpop.f32.mrb[31].mxu0 }
 0x230   : > { %v6813_v62 = vadd.f32 %v3269_v38, %v2044_v22 }
 0x231   : > { %3341 = vst [vmem:[%s6689_s25 + $0xf8] sm:$0xff] %v6811_v7 }
 0x232   : > { %3340 = vst [vmem:[%s6689_s25 + $0xf0] sm:$0xff] %v6813_v62 }
 0x233 PF: > { %v3349_v27 = vadd.f32 %v6693_v61, %v6691_v6  ;;  %v3389_v0 = vmul.f32 %v6693_v61, %v6693_v61  ;;  %v3390_v14 = vmul.f32 %v6691_v6, %v6691_v6  ;;  %v3391_v59 = vmul.f32 %v6701_v48, %v6701_v48 }
 0x234   : > { %v3392_v54 = vmul.f32 %v6699_v18, %v6699_v18  ;;  %v3393_v58 = vmul.f32 %v6709_v45, %v6709_v45  ;;  %v3394_v6 = vmul.f32 %v6707_v53, %v6707_v53  ;;  %v3395_v42 = vmul.f32 %v6717_v35, %v6717_v35 }
 0x235   : > { %v3350_v11 = vadd.f32 %v6701_v48, %v3349_v27  ;;  %v3421_v29 = vadd.f32 %v3390_v14, %v3389_v0  ;;  %v3396_v50 = vmul.f32 %v6715_v2, %v6715_v2  ;;  %v3397_v40 = vmul.f32 %v6725_v20, %v6725_v20 }
 0x236   : > { %v3398_v49 = vmul.f32 %v6723_v24, %v6723_v24  ;;  %v3399_v10 = vmul.f32 %v6733_v46, %v6733_v46  ;;  %v3400_v23 = vmul.f32 %v6731_v13, %v6731_v13  ;;  %v3401_v3 = vmul.f32 %v6741_v21, %v6741_v21 }
 0x237   : > { %v3351_v47 = vadd.f32 %v6699_v18, %v3350_v11  ;;  %v3422_v61 = vadd.f32 %v3421_v29, %v3391_v59  ;;  %v3402_v44 = vmul.f32 %v6739_v15, %v6739_v15  ;;  %v3403_v38 = vmul.f32 %v6749_v31, %v6749_v31 }
 0x238   : > { %v3404_v27 = vmul.f32 %v6747_v8, %v6747_v8  ;;  %v3406_v14 = vmul.f32 %v6755_v34, %v6755_v34  ;;  %v3407_v59 = vmul.f32 %v6765_v55, %v6765_v55 }
 0x239   : > { %v3352_v28 = vadd.f32 %v6709_v45, %v3351_v47  ;;  %v3423_v41 = vadd.f32 %v3422_v61, %v3392_v54  ;;  %v3405_v47 = vmul.f32 %v6757_v26, %v6757_v26  ;;  %v3408_v54 = vmul.f32 %v6763_v63, %v6763_v63 }
 0x23a   : > { %v3410_v61 = vmul.f32 %v6771_v30, %v6771_v30 }
 0x23b   : > { %v3353_v56 = vadd.f32 %v6707_v53, %v3352_v28  ;;  %v3424_v43 = vadd.f32 %v3423_v41, %v3393_v58 }
 0x23d   : > { %v3354_v39 = vadd.f32 %v6717_v35, %v3353_v56  ;;  %v3425_v17 = vadd.f32 %v3424_v43, %v3394_v6  ;;  %v3411_v6 = vmul.f32 %v6781_v4, %v6781_v4  ;;  %v3413_v43 = vmul.f32 %v6789_v52, %v6789_v52 }
 0x23f   : > { %v3355_v57 = vadd.f32 %v6715_v2, %v3354_v39  ;;  %v3426_v19 = vadd.f32 %v3425_v17, %v3395_v42  ;;  %v3409_v39 = vmul.f32 %v6773_v51, %v6773_v51 }
 0x241   : > { %v3356_v48 = vadd.f32 %v6725_v20, %v3355_v57  ;;  %v3427_v60 = vadd.f32 %v3426_v19, %v3396_v50  ;;  %v3414_v50 = vmul.f32 %v6787_v1, %v6787_v1  ;;  %v3416_v19 = vmul.f32 %v6795_v33, %v6795_v33 }
 0x243   : > { %v3357_v18 = vadd.f32 %v6723_v24, %v3356_v48  ;;  %v3428_v25 = vadd.f32 %v3427_v60, %v3397_v40  ;;  %v3412_v48 = vmul.f32 %v6779_v37, %v6779_v37 }
 0x245   : > { %v3358_v45 = vadd.f32 %v6733_v46, %v3357_v18  ;;  %v3429_v12 = vadd.f32 %v3428_v25, %v3398_v49  ;;  %v3417_v49 = vmul.f32 %v6805_v16, %v6805_v16  ;;  %v3419_v25 = vmul.f32 %v6813_v62, %v6813_v62 }
 0x247   : > { %v3359_v53 = vadd.f32 %v6731_v13, %v3358_v45  ;;  %v3430_v22 = vadd.f32 %v3429_v12, %v3399_v10  ;;  %v3415_v45 = vmul.f32 %v6797_v32, %v6797_v32 }
 0x249   : > { %v3360_v35 = vadd.f32 %v6741_v21, %v3359_v53  ;;  %v3431_v36 = vadd.f32 %v3430_v22, %v3400_v23 }
 0x24b   : > { %v3361_v2 = vadd.f32 %v6739_v15, %v3360_v35  ;;  %v3432_v5 = vadd.f32 %v3431_v36, %v3401_v3  ;;  %v3418_v35 = vmul.f32 %v6803_v9, %v6803_v9 }
 0x24d   : > { %v3362_v20 = vadd.f32 %v6749_v31, %v3361_v2  ;;  %v3433_v11 = vadd.f32 %v3432_v5, %v3402_v44 }
 0x24f   : > { %v3363_v24 = vadd.f32 %v6747_v8, %v3362_v20  ;;  %v3434_v0 = vadd.f32 %v3433_v11, %v3403_v38 }
 0x251   : > { %v3364_v46 = vadd.f32 %v6757_v26, %v3363_v24  ;;  %v3435_v28 = vadd.f32 %v3434_v0, %v3404_v27 }
 0x253   : > { %v3365_v13 = vadd.f32 %v6755_v34, %v3364_v46  ;;  %v3436_v56 = vadd.f32 %v3435_v28, %v3405_v47 }
 0x255   : > { %v3366_v21 = vadd.f32 %v6765_v55, %v3365_v13  ;;  %v3437_v29 = vadd.f32 %v3436_v56, %v3406_v14  ;;  %v3388_v13 = vld [vmem:[%s6945_s8] sm:$0x1] }
 0x257   : > { %v3367_v15 = vadd.f32 %v6763_v63, %v3366_v21  ;;  %v3438_v58 = vadd.f32 %v3437_v29, %v3407_v59 }
 0x259   : > { %v3368_v31 = vadd.f32 %v6773_v51, %v3367_v15  ;;  %v3439_v57 = vadd.f32 %v3438_v58, %v3408_v54 }
 0x25b   : > { %v3369_v8 = vadd.f32 %v6771_v30, %v3368_v31  ;;  %v3440_v41 = vadd.f32 %v3439_v57, %v3409_v39 }
 0x25d   : > { %v3370_v26 = vadd.f32 %v6781_v4, %v3369_v8  ;;  %v3441_v42 = vadd.f32 %v3440_v41, %v3410_v61 }
 0x25f   : > { %v3371_v34 = vadd.f32 %v6779_v37, %v3370_v26  ;;  %v3442_v18 = vadd.f32 %v3441_v42, %v3411_v6 }
 0x261   : > { %v3372_v55 = vadd.f32 %v6789_v52, %v3371_v34  ;;  %v3443_v17 = vadd.f32 %v3442_v18, %v3412_v48 }
 0x263   : > { %v3373_v63 = vadd.f32 %v6787_v1, %v3372_v55  ;;  %v3444_v40 = vadd.f32 %v3443_v17, %v3413_v43 }
 0x265   : > { %v3374_v51 = vadd.f32 %v6797_v32, %v3373_v63  ;;  %v3445_v53 = vadd.f32 %v3444_v40, %v3414_v50 }
 0x267   : > { %v3375_v30 = vadd.f32 %v6795_v33, %v3374_v51  ;;  %v3446_v60 = vadd.f32 %v3445_v53, %v3415_v45  ;;  %v3420_v33 = vmul.f32 %v6811_v7, %v6811_v7 }
 0x269   : > { %v3376_v4 = vadd.f32 %v6805_v16, %v3375_v30  ;;  %v3447_v10 = vadd.f32 %v3446_v60, %v3416_v19 }
 0x26b   : > { %v3377_v37 = vadd.f32 %v6803_v9, %v3376_v4  ;;  %v3448_v2 = vadd.f32 %v3447_v10, %v3417_v49  ;;  %v3348_v9 = vld [vmem:[%s6944_s7] sm:$0x1] }
 0x26d   : > { %v3378_v52 = vadd.f32 %v6813_v62, %v3377_v37  ;;  %v3449_v12 = vadd.f32 %v3448_v2, %v3418_v35 }
 0x26f   : > { %v3379_v1 = vadd.f32 %v6811_v7, %v3378_v52  ;;  %v3450_v3 = vadd.f32 %v3449_v12, %v3419_v25 }
 0x271   : > { %v3380_v32 = vrot.slane %v3379_v1, 4  ;;  %v3451_v22 = vadd.f32 %v3450_v3, %v3420_v33 }
 0x273   : > { %v3381_v23 = vadd.f32 %v3380_v32, %v3379_v1  ;;  %v3452_v44 = vrot.slane %v3451_v22, 4 }
 0x275   : > { %v3382_v20 = vrot.slane %v3381_v23, 2  ;;  %v3453_v46 = vadd.f32 %v3452_v44, %v3451_v22 }
 0x277   : > { %v3383_v16 = vadd.f32 %v3382_v20, %v3381_v23  ;;  %v3454_v62 = vrot.slane %v3453_v46, 2 }
 0x279   : > { %v3384_v24 = vrot.slane %v3383_v16, 1  ;;  %v3455_v7 = vadd.f32 %v3454_v62, %v3453_v46 }
 0x27b   : > { %v3385_v36 = vadd.f32 %v3384_v24, %v3383_v16  ;;  %v3456_v5 = vrot.slane %v3455_v7, 1 }
 0x27d   : > { %v3386_v38 = vadd.f32 %v3385_v36, %v3348_v9  ;;  %v3457_v27 = vadd.f32 %v3456_v5, %v3455_v7 }
 0x27f   : > { %3387 = vst [vmem:[%s6944_s7] sm:$0x1] %v3386_v38  ;;  %v3458_v11 = vadd.f32 %v3457_v27, %v3388_v13 }
 0x281   : > { %3459 = vst [vmem:[%s6945_s8] sm:$0x1] %v3458_v11 }
 0x282 PF: > { %s19_s27 = sadd.s32 1, %s5430_s27  }
 0x283   : > { %p16_p5 = scmp.ge.s32.totalorder %s19_s27, 4  }
 0x285   :  { %18 = sbr.rel (!%p16_p5) target bundleno = 1 (0x1), region = 104 }

// kernel: csp_bottleneck_mca.7
= control target key start
LH: loop header
LB: loop body
LE: loop exit
PB: predicated region body
PF: predicated region fallthrough
CT: control target
= control target key end

     0   :  { %s5531_s27 = smov 0   ;;  %s7038_s0 = inlined_call_operand.vmem [shape: f32[2,18,18,128], index: 0, kind: input, shape index: {}]   ;;  %s7039_s1 = inlined_call_operand.vmem [shape: f32[1,128], index: 1, kind: input, shape index: {}]   ;;  %s7040_s2 = inlined_call_operand.vmem [shape: f32[1,128], index: 2, kind: input, shape index: {}]   ;;  %s7041_s3 = inlined_call_operand.vmem [shape: f32[1,128], index: 3, kind: input, shape index: {}]   ;;  %s7042_s4 = inlined_call_operand.vmem [shape: f32[1,128], index: 4, kind: input, shape index: {}]   ;;  %s7043_s5 = inlined_call_operand.vmem [shape: f32[9,128,128], index: 5, kind: input, shape index: {}]   ;;  %s7044_s6 = inlined_call_operand.vmem [shape: f32[2,16,16,128], index: 6, kind: output, shape index: {0}]   ;;  %s7045_s7 = inlined_call_operand.vmem [shape: f32[1,128], index: 7, kind: output, shape index: {1}]   ;;  %s7046_s8 = inlined_call_operand.vmem [shape: f32[1,128], index: 8, kind: output, shape index: {2}]  }
   0x1 LB: > { %s5537_s28 = sadd.s32 4294967295, %s5482_s27   ;;  %p3585_p0 = scmp.ge.s32.totalorder %s5482_s27, 1  ;;  %s5482_s27 = sphi %s5531_s27, %s19_s27  }
   0x2   : > { %p257_p1 = scmp.lt.s32.totalorder %s5482_s27, 3 }
   0x4   : > { %p258_p2 = pnand %p3585_p0, %p257_p1 }
   0x6   : > { %261 = sbr.rel (%p258_p2) target bundleno = 642 (0x282), region = 44 }
   0xd   : > { %v3589_v0 = vld [vmem:[%s7043_s5 + $0x80] sm:$0xff]  ;;  %v3590_v1 = vld [vmem:[%s7043_s5 + $0x88] sm:$0xff]  ;;  %v3591_v5 = vld [vmem:[%s7043_s5 + $0x90] sm:$0xff]  ;;  %v5484_v7 = vmov 0.0   ;;  %p291_p3 = scmp.lt.s32.totalorder %s5537_s28, 1  ;;  %v370_v50 = vlaneseq  ;;  %p3717_p4 = scmp.ne.s32.totalorder %s5537_s28, 0 }
   0xe   : > { %v3637_v2 = vld [vmem:[%s7043_s5 + $0x200] sm:$0xff]  ;;  %v4873_v3 = vpack.c.bf16 %v3590_v1, %v3589_v0  ;;  %v3638_v4 = vld [vmem:[%s7043_s5 + $0x208] sm:$0xff]  ;;  %v3592_v6 = vld [vmem:[%s7043_s5 + $0x98] sm:$0xff]  ;;  %619 = vst [vmem:[#allocation2] sm:$0xff] %v5484_v7 }
   0xf   : > { %620 = vst [vmem:[#allocation2 + $0x8] sm:$0xff] %v5484_v7  ;;  %621 = vst [vmem:[#allocation2 + $0x10] sm:$0x3] %v5484_v7  ;;  %v5559_v8 = vpack.c.bf16 %v3638_v4, %v3637_v2  ;;  %v4877_v9 = vpack.c.bf16 %v3592_v6, %v3591_v5  ;;  %v3639_v10 = vld [vmem:[%s7043_s5 + $0x210] sm:$0xff]  ;;  %v3640_v11 = vld [vmem:[%s7043_s5 + $0x218] sm:$0xff]  ;;  %s5658_s29 = scalar_select %p291_p3, %s5537_s28, 1 }
  0x10   : > { %670 = vst [vmem:[#allocation2 + $0x198] sm:$0xff] %v5484_v7  ;;  %671 = vst [vmem:[#allocation2 + $0x1a0] sm:$0xff] %v5484_v7  ;;  %v3593_v12 = vld [vmem:[%s7043_s5 + $0xa0] sm:$0xff]  ;;  %4874 = vmatprep.subr.bf16.mxu1 %v4873_v3  ;;  %v5570_v13 = vpack.c.bf16 %v3640_v11, %v3639_v10  ;;  %v3594_v14 = vld [vmem:[%s7043_s5 + $0xa8] sm:$0xff]  ;;  %v5678_v57 = vshrl.u32 %v370_v50, 7 }
  0x11   : > { %672 = vst [vmem:[#allocation2 + $0x1a8] sm:$0x3] %v5484_v7  ;;  %v3641_v15 = vld [vmem:[%s7043_s5 + $0x220] sm:$0xff]  ;;  %v3642_v16 = vld [vmem:[%s7043_s5 + $0x228] sm:$0xff]  ;;  %4876 = vmatpush3.bf16.msra.mxu1 %v4873_v3  ;;  %5002 = vmatprep.subr.bf16.mxu0 %v5559_v8  ;;  %v4881_v17 = vpack.c.bf16 %v3594_v14, %v3593_v12  ;;  %v3595_v19 = vld [vmem:[%s7043_s5 + $0xb0] sm:$0xff]  ;;  %s5433_s16 = smul.u32 432, %s5658_s29 }
  0x12   : > { %7079 = vst [vmem:[#allocation3_spill] sm:$0xff] %v5570_v13  ;;  %4878 = vmatprep.subr.bf16.mxu1 %v4877_v9  ;;  %5004 = vmatpush3.bf16.msra.mxu0 %v5559_v8  ;;  %v5584_v18 = vpack.c.bf16 %v3642_v16, %v3641_v15  ;;  %v3596_v20 = vld [vmem:[%s7043_s5 + $0xb8] sm:$0xff]  ;;  %v3643_v21 = vld [vmem:[%s7043_s5 + $0x230] sm:$0xff]  ;;  %v3597_v24 = vld [vmem:[%s7043_s5 + $0xc0] sm:$0xff]  ;;  %v372_v7 = vsub.s32 0, %v5678_v57  ;;  %v5727_v10 = vadd.s32 16, %v5678_v57 }
  0x13   : > { %5006 = vmatprep.subr.bf16.mxu0 %v5570_v13  ;;  %v3644_v22 = vld [vmem:[%s7043_s5 + $0x238] sm:$0xff]  ;;  %v4885_v23 = vpack.c.bf16 %v3596_v20, %v3595_v19  ;;  %v3598_v26 = vld [vmem:[%s7043_s5 + $0xc8] sm:$0xff]  ;;  %v3645_v27 = vld [vmem:[%s7043_s5 + $0x240] sm:$0xff]  ;;  %s5701_s10 = scalar_lea.vmem %s7038_s0, %s5433_s16  ;;  %vm547_vm0 = vcmp.ge.s32.totalorder %v5678_v57, 1 }
  0x14   : > { %7080 = vst [vmem:[#allocation4_spill] sm:$0xff] %v5584_v18  ;;  %v5603_v25 = vpack.c.bf16 %v3644_v22, %v3643_v21  ;;  %v3646_v29 = vld [vmem:[%s7043_s5 + $0x248] sm:$0xff]  ;;  %v301_v30 = vld [vmem:[%s7039_s1] sm:$0x1]  ;;  %v4889_v34 = vpack.c.bf16 %v3598_v26, %v3597_v24  ;;  %v3599_v36 = vld [vmem:[%s7043_s5 + $0xd0] sm:$0xff]  ;;  %vm558_vm1 = vcmp.le.s32.totalorder %v5727_v10, 16 }
  0x15   : > { %4880 = vmatpush3.bf16.msra.mxu1 %v4877_v9  ;;  %v302_v31 = vld [vmem:[%s7040_s2] sm:$0x1]  ;;  %v5620_v32 = vmul.f32 0.001953125, %v301_v30  ;;  %v5624_v35 = vpack.c.bf16 %v3646_v29, %v3645_v27  ;;  %v3600_v37 = vld [vmem:[%s7043_s5 + $0xd8] sm:$0xff]  ;;  %v3647_v39 = vld [vmem:[%s7043_s5 + $0x250] sm:$0xff] }
  0x16   : > { %4882 = vmatprep.subr.bf16.mxu1 %v4881_v17  ;;  %5008 = vmatpush3.bf16.msra.mxu0 %v5570_v13  ;;  %7081 = vst [vmem:[#allocation5_spill] sm:$0xff] %v5603_v25  ;;  %v721_v28 = vld [vmem:[#allocation2 + $0x1] sm:$0xff]  ;;  %v307_v33 = vmul.f32 0.001953125, %v302_v31  ;;  %v3648_v40 = vld [vmem:[%s7043_s5 + $0x258] sm:$0xff]  ;;  %v4893_v42 = vpack.c.bf16 %v3600_v37, %v3599_v36  ;;  %v3603_v52 = vld [vmem:[%s7043_s5 + $0xf0] sm:$0xff] }
  0x17   : > { %5010 = vmatprep.subr.bf16.mxu0 %v5584_v18  ;;  %4185 = vmatprep.mubr.f32.mxu1 %v721_v28  ;;  %7082 = vst [vmem:[#allocation6_spill] sm:$0xff] %v5624_v35  ;;  %v308_v38 = vmul.f32 %v5620_v32, %v5620_v32  ;;  %v5643_v43 = vpack.c.bf16 %v3648_v40, %v3647_v39  ;;  %v3601_v44 = vld [vmem:[%s7043_s5 + $0xe0] sm:$0xff]  ;;  %v3602_v45 = vld [vmem:[%s7043_s5 + $0xe8] sm:$0xff]  ;;  %v3604_v53 = vld [vmem:[%s7043_s5 + $0xf8] sm:$0xff] }
  0x18   : > { %v3649_v47 = vld [vmem:[%s7043_s5 + $0x260] sm:$0xff]  ;;  %v3650_v48 = vld [vmem:[%s7043_s5 + $0x268] sm:$0xff]  ;;  %v4897_v49 = vpack.c.bf16 %v3602_v45, %v3601_v44  ;;  %v3651_v54 = vld [vmem:[%s7043_s5 + $0x270] sm:$0xff]  ;;  %v4901_v56 = vpack.c.bf16 %v3604_v53, %v3603_v52 }
  0x19   : > { %4884 = vmatpush3.bf16.msra.mxu1 %v4881_v17  ;;  %v309_v41 = vsub.f32 %v307_v33, %v308_v38  ;;  %7083 = vst [vmem:[#allocation7_spill] sm:$0xff] %v5643_v43  ;;  %v5662_v51 = vpack.c.bf16 %v3650_v48, %v3649_v47  ;;  %v3652_v55 = vld [vmem:[%s7043_s5 + $0x278] sm:$0xff]  ;;  %v705_v58 = vld [vmem:[%s7043_s5] sm:$0xff]  ;;  %v706_v61 = vld [vmem:[%s7043_s5 + $0x8] sm:$0xff] }
  0x1a   : > { %4886 = vmatprep.subr.bf16.mxu1 %v4885_v23  ;;  %5012 = vmatpush3.bf16.msra.mxu0 %v5584_v18  ;;  %v5684_v59 = vpack.c.bf16 %v3652_v55, %v3651_v54  ;;  %v303_v60 = vld [vmem:[%s7041_s3] sm:$0x1]  ;;  %v3654_v63 = vld [vmem:[%s7043_s5 + $0x288] sm:$0xff]  ;;  %v3655_v0 = vld [vmem:[%s7043_s5 + $0x290] sm:$0xff]  ;;  %v4905_v9 = vpack.c.bf16 %v706_v61, %v705_v58 }
  0x1b   : > { %5014 = vmatprep.subr.bf16.mxu0 %v5603_v25  ;;  %v310_v46 = vadd.f32 1e-05, %v309_v41  ;;  %7084 = vst [vmem:[#allocation8_spill] sm:$0xff] %v5662_v51  ;;  %v3653_v62 = vld [vmem:[%s7043_s5 + $0x280] sm:$0xff]  ;;  %v3656_v1 = vld [vmem:[%s7043_s5 + $0x298] sm:$0xff]  ;;  %v707_v2 = vld [vmem:[%s7043_s5 + $0x10] sm:$0xff] }
  0x1c   : > { %7085 = vst [vmem:[#allocation9_spill] sm:$0xff] %v5684_v59  ;;  %v708_v3 = vld [vmem:[%s7043_s5 + $0x18] sm:$0xff]  ;;  %v3657_v4 = vld [vmem:[%s7043_s5 + $0x2a0] sm:$0xff]  ;;  %v3658_v5 = vld [vmem:[%s7043_s5 + $0x2a8] sm:$0xff]  ;;  %v5744_v21 = vpack.c.bf16 %v3654_v63, %v3653_v62 }
  0x1d   : > { %4888 = vmatpush3.bf16.msra.mxu1 %v4885_v23  ;;  %5444 = vrsqrt.f32 %v310_v46  ;;  %v3659_v6 = vld [vmem:[%s7043_s5 + $0x2b0] sm:$0xff]  ;;  %v3660_v11 = vld [vmem:[%s7043_s5 + $0x2b8] sm:$0xff]  ;;  %v709_v12 = vld [vmem:[%s7043_s5 + $0x20] sm:$0xff]  ;;  %v4909_v38 = vpack.c.bf16 %v708_v3, %v707_v2  ;;  %v5772_v39 = vpack.c.bf16 %v3658_v5, %v3657_v4 }
  0x1e   : > { %4890 = vmatprep.subr.bf16.mxu1 %v4889_v34  ;;  %5016 = vmatpush3.bf16.msra.mxu0 %v5603_v25  ;;  %v710_v14 = vld [vmem:[%s7043_s5 + $0x28] sm:$0xff]  ;;  %v304_v17 = vld [vmem:[%s7042_s4] sm:$0x1]  ;;  %v318_v19 = vld [vmem:[%s5701_s10 + $0x18] sm:$0xff]  ;;  %v5774_v40 = vpack.c.bf16 %v3660_v11, %v3659_v6 }
  0x1f   : > { %5018 = vmatprep.subr.bf16.mxu0 %v5624_v35  ;;  %v722_v16 = vld [vmem:[#allocation2 + $0x9] sm:$0xff]  ;;  %v319_v20 = vld [vmem:[%s5701_s10 + $0x20] sm:$0xff]  ;;  %v712_v29 = vld [vmem:[%s7043_s5 + $0x38] sm:$0xff]  ;;  %v5782_v45 = vpack.c.bf16 %v710_v14, %v709_v12 }
  0x20   : > { %v320_v22 = vld [vmem:[%s5701_s10 + $0x28] sm:$0x3]  ;;  %v3661_v23 = vld [vmem:[%s7043_s5 + $0x2c0] sm:$0xff]  ;;  %v711_v26 = vld [vmem:[%s7043_s5 + $0x30] sm:$0xff] }
  0x21   : > { %4892 = vmatpush3.bf16.msra.mxu1 %v4889_v34  ;;  %v3662_v24 = vld [vmem:[%s7043_s5 + $0x2c8] sm:$0xff]  ;;  %v321_v28 = vld [vmem:[%s5701_s10 + $0x30] sm:$0xff]  ;;  %v713_v30 = vld [vmem:[%s7043_s5 + $0x40] sm:$0xff]  ;;  %v5768_v34 = vpack.c.bf16 %v3656_v1, %v3655_v0  ;;  %v5796_v52 = vpack.c.bf16 %v712_v29, %v711_v26 }
  0x22   : > { %4894 = vmatprep.subr.bf16.mxu1 %v4893_v42  ;;  %5020 = vmatpush3.bf16.msra.mxu0 %v5624_v35  ;;  %v714_v31 = vld [vmem:[%s7043_s5 + $0x48] sm:$0xff]  ;;  %v322_v33 = vld [vmem:[%s5701_s10 + $0x38] sm:$0xff]  ;;  %v323_v36 = vld [vmem:[%s5701_s10 + $0x40] sm:$0x3]  ;;  %v5794_v50 = vpack.c.bf16 %v3662_v24, %v3661_v23 }
  0x23   : > { %5022 = vmatprep.subr.bf16.mxu0 %v5643_v43  ;;  %v324_v37 = vld [vmem:[%s5701_s10 + $0x48] sm:$0xff]  ;;  %v325_v44 = vld [vmem:[%s5701_s10 + $0x50] sm:$0xff]  ;;  %v716_v47 = vld [vmem:[%s7043_s5 + $0x58] sm:$0xff]  ;;  %v5798_v53 = vpack.c.bf16 %v714_v31, %v713_v30 }
  0x24   : > { %v715_v46 = vld [vmem:[%s7043_s5 + $0x50] sm:$0xff]  ;;  %v327_v48 = vld [vmem:[%s5701_s10 + $0x60] sm:$0xff]  ;;  %v330_v62 = vld [vmem:[%s5701_s10 + $0x78] sm:$0xff] }
  0x25   : > { %4896 = vmatpush3.bf16.msra.mxu1 %v4893_v42  ;;  %v5800_v54 = vpack.c.bf16 %v716_v47, %v715_v46  ;;  %v329_v61 = vld [vmem:[%s5701_s10 + $0x70] sm:$0x3]  ;;  %v331_v63 = vld [vmem:[%s5701_s10 + $0x80] sm:$0xff]  ;;  %v332_v46 = vld [vmem:[%s5701_s10 + $0x88] sm:$0x3] }
  0x26   : > { %4898 = vmatprep.subr.bf16.mxu1 %v4897_v49  ;;  %5024 = vmatpush3.bf16.msra.mxu0 %v5643_v43  ;;  %v333_v47 = vld [vmem:[%s5701_s10 + $0x90] sm:$0xff]  ;;  %v6291_v43 = vld [vmem:[#allocation2] sm:$0xff]  ;;  %v3610_v18 = vld [vmem:[%s7043_s5 + $0x128] sm:$0xff] }
  0x27   : > { %5026 = vmatprep.subr.bf16.mxu0 %v5662_v51  ;;  %v5445_v15 = vpop.eup %5444  ;;  %v3609_v25 = vld [vmem:[%s7043_s5 + $0x120] sm:$0xff]  ;;  %v3704_v57 = vld [vmem:[%s7043_s5 + $0x418] sm:$0xff] }
  0x28   : > { %v312_v27 = vmul.f32 %v5445_v15, %v303_v60 }
  0x29   : > { %4900 = vmatpush3.bf16.msra.mxu1 %v4897_v49  ;;  %v328_v49 = vld [vmem:[%s5701_s10 + $0x68] sm:$0xff] }
  0x2a   : > { %4902 = vmatprep.subr.bf16.mxu1 %v4901_v56  ;;  %5028 = vmatpush3.bf16.msra.mxu0 %v5662_v51  ;;  %v313_v41 = vmul.f32 %v312_v27, %v5620_v32  ;;  %v5778_v42 = vrot.slane %v312_v27, %v372_v7  ;;  %v326_v32 = vld [vmem:[%s5701_s10 + $0x58] sm:$0x3] }
  0x2b   : > { %5030 = vmatprep.subr.bf16.mxu0 %v5684_v59 }
  0x2c   : > { %v314_v55 = vsub.f32 %v304_v17, %v313_v41  ;;  %v379_v58 = vmul.f32 %v5778_v42, %v319_v20  ;;  %v380_v60 = vmul.f32 %v5778_v42, %v320_v22  ;;  %v381_v0 = vmul.f32 %v5778_v42, %v321_v28 }
  0x2d   : > { %4904 = vmatpush3.bf16.msra.mxu1 %v4901_v56  ;;  %v378_v56 = vmul.f32 %v5778_v42, %v318_v19  ;;  %v382_v1 = vmul.f32 %v5778_v42, %v322_v33  ;;  %v383_v2 = vmul.f32 %v5778_v42, %v323_v36  ;;  %v384_v3 = vmul.f32 %v5778_v42, %v324_v37 }
  0x2e   : > { %5032 = vmatpush3.bf16.msra.mxu0 %v5684_v59  ;;  %4906 = vmatprep.subr.bf16.mxu1 %v4905_v9  ;;  %v5812_v4 = vrot.slane %v314_v55, %v372_v7  ;;  %v385_v5 = vmul.f32 %v5778_v42, %v325_v44  ;;  %v386_v6 = vmul.f32 %v5778_v42, %v326_v32 }
  0x2f   : > { %5034 = vmatprep.subr.bf16.mxu0 %v5744_v21  ;;  %v387_v11 = vmul.f32 %v5778_v42, %v327_v48  ;;  %v388_v12 = vmul.f32 %v5778_v42, %v328_v49  ;;  %v390_v14 = vmul.f32 %v5778_v42, %v330_v62  ;;  %v391_v15 = vmul.f32 %v5778_v42, %v331_v63  ;;  %v334_v62 = vld [vmem:[%s5701_s10 + $0x98] sm:$0xff] }
  0x30   : > { %4186 = vmatmul.mubr.f32.vlgmr.msra.gmra.mrb[0].mxu1 %v722_v16  ;;  %v5822_v16 = vadd.f32 %v5812_v4, %v378_v56  ;;  %v5825_v7 = vadd.f32 %v5812_v4, %v379_v58  ;;  %v440_v17 = vadd.f32 %v5812_v4, %v380_v60  ;;  %v5829_v19 = vadd.f32 %v5812_v4, %v381_v0 }
  0x31   : > { %4908 = vmatpush3.bf16.msra.mxu1 %v4905_v9  ;;  %v389_v9 = vmul.f32 %v5778_v42, %v329_v61  ;;  %v5832_v20 = vadd.f32 %v5812_v4, %v382_v1  ;;  %v443_v22 = vadd.f32 %v5812_v4, %v383_v2  ;;  %v5836_v23 = vadd.f32 %v5812_v4, %v384_v3  ;;  %v335_v2 = vld [vmem:[%s5701_s10 + $0xa0] sm:$0x3]  ;;  %v336_v3 = vld [vmem:[%s5701_s10 + $0xa8] sm:$0xff] }
  0x32   : > { %4910 = vmatprep.subr.bf16.mxu1 %v4909_v38  ;;  %v5839_v24 = vadd.f32 %v5812_v4, %v385_v5  ;;  %v7057_v26 = vmax.f32 %v5822_v16, 0.0  ;;  %v7054_v27 = vmax.f32 %v5825_v7, 0.0  ;;  %v494_v28 = vmax.f32 %v440_v17, 0.0 }
  0x33   : > { %v7053_v29 = vmax.f32 %v5829_v19, 0.0  ;;  %v7052_v30 = vmax.f32 %v5832_v20, 0.0  ;;  %v497_v31 = vmax.f32 %v443_v22, 0.0  ;;  %v7051_v33 = vmax.f32 %v5836_v23, 0.0 }
  0x34   : > { %v7050_v36 = vmax.f32 %v5839_v24, 0.0  ;;  %v568_v37 = vsel %vm547_vm0, %v7057_v26, 0.0  ;;  %623 = vst [vmem:[#allocation2 + $0x20] sm:$0xff] %v7054_v27  ;;  %v446_v44 = vadd.f32 %v5812_v4, %v386_v6  ;;  %v5874_v49 = vadd.f32 %v5812_v4, %v387_v11 }
  0x35   : > { %4912 = vmatpush3.bf16.msra.mxu1 %v4909_v38  ;;  %v570_v38 = vsel %vm558_vm1, %v494_v28, 0.0  ;;  %v571_v41 = vsel %vm547_vm0, %v7053_v29, 0.0  ;;  %622 = vst [vmem:[#allocation2 + $0x18] sm:$0xff] %v568_v37  ;;  %626 = vst [vmem:[#allocation2 + $0x38] sm:$0xff] %v7052_v30  ;;  %v573_v32 = vsel %vm558_vm1, %v497_v31, 0.0  ;;  %v574_v48 = vsel %vm547_vm0, %v7051_v33, 0.0 }
  0x36   : > { %4914 = vmatprep.subr.bf16.mxu1 %v5782_v45  ;;  %624 = vst [vmem:[#allocation2 + $0x28] sm:$0x3] %v570_v38  ;;  %625 = vst [vmem:[#allocation2 + $0x30] sm:$0xff] %v571_v41  ;;  %v5877_v55 = vadd.f32 %v5812_v4, %v388_v12  ;;  %v500_v56 = vmax.f32 %v446_v44, 0.0  ;;  %v449_v58 = vadd.f32 %v5812_v4, %v389_v9  ;;  %v7049_v63 = vmax.f32 %v5874_v49, 0.0  ;;  %v337_v9 = vld [vmem:[%s5701_s10 + $0xb0] sm:$0xff] }
  0x37   : > { %629 = vst [vmem:[#allocation2 + $0x50] sm:$0xff] %v7050_v36  ;;  %627 = vst [vmem:[#allocation2 + $0x40] sm:$0x3] %v573_v32  ;;  %v450_v60 = vadd.f32 %v5812_v4, %v390_v14  ;;  %v5883_v61 = vadd.f32 %v5812_v4, %v391_v15  ;;  %v393_v1 = vmul.f32 %v5778_v42, %v333_v47  ;;  %v338_v28 = vld [vmem:[%s5701_s10 + $0xb8] sm:$0x3]  ;;  %v339_v31 = vld [vmem:[%s5701_s10 + $0xc0] sm:$0xff] }
  0x38   : > { %628 = vst [vmem:[#allocation2 + $0x48] sm:$0xff] %v574_v48  ;;  %v7048_v0 = vmax.f32 %v5877_v55, 0.0  ;;  %v576_v5 = vsel %vm558_vm1, %v500_v56, 0.0  ;;  %v503_v6 = vmax.f32 %v449_v58, 0.0  ;;  %v577_v14 = vsel %vm547_vm0, %v7049_v63, 0.0  ;;  %v340_v48 = vld [vmem:[%s5701_s10 + $0xc8] sm:$0xff] }
  0x39   : > { %4916 = vmatpush3.bf16.msra.mxu1 %v5782_v45  ;;  %v392_v45 = vmul.f32 %v5778_v42, %v332_v46  ;;  %v5895_v11 = vmax.f32 %v450_v60, 0.0  ;;  %v7047_v12 = vmax.f32 %v5883_v61, 0.0  ;;  %630 = vst [vmem:[#allocation2 + $0x58] sm:$0x3] %v576_v5  ;;  %v394_v17 = vmul.f32 %v5778_v42, %v334_v62  ;;  %631 = vst [vmem:[#allocation2 + $0x60] sm:$0xff] %v577_v14  ;;  %v342_v58 = vld [vmem:[%s5701_s10 + $0xd8] sm:$0xff] }
  0x3a   : > { %4918 = vmatprep.subr.bf16.mxu1 %v5796_v52  ;;  %632 = vst [vmem:[#allocation2 + $0x68] sm:$0xff] %v7048_v0  ;;  %v453_v22 = vadd.f32 %v5812_v4, %v393_v1  ;;  %v579_v37 = vsel %vm558_vm1, %v503_v6, 0.0  ;;  %v395_v41 = vmul.f32 %v5778_v42, %v335_v2  ;;  %v396_v44 = vmul.f32 %v5778_v42, %v336_v3  ;;  %v341_v56 = vld [vmem:[%s5701_s10 + $0xd0] sm:$0x3]  ;;  %v358_v36 = vld [vmem:[%s5701_s10 + $0x158] sm:$0xff] }
  0x3b   : > { %v452_v15 = vadd.f32 %v5812_v4, %v392_v45  ;;  %v580_v38 = vsel %vm547_vm0, %v5895_v11, 0.0  ;;  %635 = vst [vmem:[#allocation2 + $0x80] sm:$0xff] %v7047_v12  ;;  %633 = vst [vmem:[#allocation2 + $0x70] sm:$0x3] %v579_v37  ;;  %v454_v46 = vadd.f32 %v5812_v4, %v394_v17  ;;  %v397_v32 = vmul.f32 %v5778_v42, %v337_v9  ;;  %v343_v37 = vld [vmem:[%s5701_s10 + $0xe0] sm:$0xff]  ;;  %v357_v63 = vld [vmem:[%s5701_s10 + $0x150] sm:$0xff] }
  0x3c   : > { %634 = vst [vmem:[#allocation2 + $0x78] sm:$0xff] %v580_v38  ;;  %v5922_v47 = vmax.f32 %v453_v22, 0.0  ;;  %v723_v60 = vld [vmem:[#allocation2 + $0x19] sm:$0xff]  ;;  %v455_v1 = vadd.f32 %v5812_v4, %v395_v41  ;;  %v456_v2 = vadd.f32 %v5812_v4, %v396_v44  ;;  %v398_v3 = vmul.f32 %v5778_v42, %v338_v28 }
  0x3d   : > { %4920 = vmatpush3.bf16.msra.mxu1 %v5796_v52  ;;  %v506_v52 = vmax.f32 %v452_v15, 0.0  ;;  %v724_v62 = vld [vmem:[#allocation2 + $0x21] sm:$0xff]  ;;  %v725_v45 = vld [vmem:[#allocation2 + $0x31] sm:$0xff]  ;;  %v399_v5 = vmul.f32 %v5778_v42, %v339_v31  ;;  %4188 = vmatprep.mubr.f32.mxu1 %v723_v60  ;;  %v5934_v9 = vmax.f32 %v454_v46, 0.0  ;;  %v457_v15 = vadd.f32 %v5812_v4, %v397_v32 }
  0x3e   : > { %4922 = vmatprep.subr.bf16.mxu1 %v5798_v53  ;;  %4505 = vmatprep.mubr.f32.mxu0 %v723_v60  ;;  %v583_v14 = vsel %vm547_vm0, %v5922_v47, 0.0  ;;  %v509_v17 = vmax.f32 %v455_v1, 0.0  ;;  %v5940_v22 = vmax.f32 %v456_v2, 0.0  ;;  %v458_v28 = vadd.f32 %v5812_v4, %v398_v3  ;;  %v726_v38 = vld [vmem:[#allocation2 + $0x39] sm:$0xff]  ;;  %v344_v32 = vld [vmem:[%s5701_s10 + $0xe8] sm:$0x3] }
  0x3f   : > { %v582_v6 = vsel %vm558_vm1, %v506_v52, 0.0  ;;  %4189 = vmatmul.mubr.f32.gmra.mrb[2].mxu1 %v724_v62  ;;  %4506 = vmatmul.mubr.f32.vlgmr.msra.gmra.mrb[0].mxu0 %v724_v62  ;;  %637 = vst [vmem:[#allocation2 + $0x90] sm:$0xff] %v583_v14  ;;  %v400_v31 = vmul.f32 %v5778_v42, %v340_v48  ;;  %638 = vst [vmem:[#allocation2 + $0x98] sm:$0xff] %v5934_v9  ;;  %v5947_v41 = vmax.f32 %v457_v15, 0.0  ;;  %v345_v60 = vld [vmem:[%s5701_s10 + $0xf0] sm:$0xff]  ;;  %v7086_v13 = vmax.f32 %v5822_v16, 0.0 }
  0x40   : > { %636 = vst [vmem:[#allocation2 + $0x88] sm:$0x3] %v582_v6  ;;  %5036 = vmatpush3.bf16.msra.mxu0 %v5744_v21  ;;  %4191 = vmatprep.mubr.f32.mxu1 %v725_v45  ;;  %v459_v44 = vadd.f32 %v5812_v4, %v399_v5  ;;  %v401_v52 = vmul.f32 %v5778_v42, %v341_v56  ;;  %v727_v48 = vld [vmem:[#allocation2 + $0x49] sm:$0xff]  ;;  %v585_v21 = vsel %vm558_vm1, %v509_v17, 0.0  ;;  %v586_v62 = vsel %vm547_vm0, %v5940_v22, 0.0  ;;  %v346_v5 = vld [vmem:[%s5701_s10 + $0xf8] sm:$0xff] }
  0x41   : > { %v402_v46 = vmul.f32 %v5778_v42, %v342_v58  ;;  %4508 = vmatprep.mubr.f32.mxu0 %v725_v45  ;;  %5038 = vmatprep.subr.bf16.mxu0 %v5768_v34  ;;  %v512_v1 = vmax.f32 %v458_v28, 0.0  ;;  %v460_v2 = vadd.f32 %v5812_v4, %v400_v31  ;;  %639 = vst [vmem:[#allocation2 + $0xa0] sm:$0x3] %v585_v21  ;;  %640 = vst [vmem:[#allocation2 + $0xa8] sm:$0xff] %v586_v62  ;;  %v347_v28 = vld [vmem:[%s5701_s10 + $0x100] sm:$0x3] }
  0x42   : > { %641 = vst [vmem:[#allocation2 + $0xb0] sm:$0xff] %v5947_v41  ;;  %v5962_v56 = vmax.f32 %v459_v44, 0.0  ;;  %v461_v58 = vadd.f32 %v5812_v4, %v401_v52  ;;  %v403_v45 = vmul.f32 %v5778_v42, %v343_v37  ;;  %4924 = vmatpush3.bf16.msra.mxu1 %v5798_v53  ;;  %v404_v15 = vmul.f32 %v5778_v42, %v344_v32  ;;  %v728_v31 = vld [vmem:[#allocation2 + $0x51] sm:$0xff]  ;;  %v359_v33 = vld [vmem:[%s5701_s10 + $0x160] sm:$0x3] }
  0x43   : > { %v462_v3 = vadd.f32 %v5812_v4, %v402_v46  ;;  %4192 = vmatmul.mubr.f32.gmra.mrb[4].mxu1 %v726_v38  ;;  %4509 = vmatmul.mubr.f32.gmra.mrb[2].mxu0 %v726_v38  ;;  %v588_v6 = vsel %vm558_vm1, %v512_v1, 0.0  ;;  %v5971_v14 = vmax.f32 %v460_v2, 0.0  ;;  %v405_v17 = vmul.f32 %v5778_v42, %v345_v60  ;;  %v3663_v53 = vld [vmem:[%s7043_s5 + $0x2d0] sm:$0xff]  ;;  %v348_v46 = vld [vmem:[%s5701_s10 + $0x108] sm:$0xff]  ;;  %v3664_v32 = vld [vmem:[%s7043_s5 + $0x2d8] sm:$0xff] }
  0x44   : > { %5040 = vmatpush3.bf16.msra.mxu0 %v5768_v34  ;;  %4194 = vmatprep.mubr.f32.mxu1 %v727_v48  ;;  %642 = vst [vmem:[#allocation2 + $0xb8] sm:$0x3] %v588_v6  ;;  %v589_v37 = vsel %vm547_vm0, %v5962_v56, 0.0  ;;  %v515_v38 = vmax.f32 %v461_v58, 0.0  ;;  %v463_v44 = vadd.f32 %v5812_v4, %v403_v45  ;;  %v729_v34 = vld [vmem:[#allocation2 + $0x61] sm:$0xff]  ;;  %v464_v60 = vadd.f32 %v5812_v4, %v404_v15  ;;  %v349_v1 = vld [vmem:[%s5701_s10 + $0x110] sm:$0xff] }
  0x45   : > { %v5984_v52 = vmax.f32 %v462_v3, 0.0  ;;  %4511 = vmatprep.mubr.f32.mxu0 %v727_v48  ;;  %5042 = vmatprep.subr.bf16.mxu0 %v5772_v39  ;;  %643 = vst [vmem:[#allocation2 + $0xc0] sm:$0xff] %v589_v37  ;;  %644 = vst [vmem:[#allocation2 + $0xc8] sm:$0xff] %v5971_v14  ;;  %v406_v21 = vmul.f32 %v5778_v42, %v346_v5  ;;  %v465_v62 = vadd.f32 %v5812_v4, %v405_v17  ;;  %v350_v17 = vld [vmem:[%s5701_s10 + $0x118] sm:$0x3]  ;;  %v351_v37 = vld [vmem:[%s5701_s10 + $0x120] sm:$0xff] }
  0x46   : > { %v591_v48 = vsel %vm558_vm1, %v515_v38, 0.0  ;;  %v5998_v2 = vmax.f32 %v463_v44, 0.0  ;;  %v407_v45 = vmul.f32 %v5778_v42, %v347_v28  ;;  %4926 = vmatprep.subr.bf16.mxu1 %v5800_v54  ;;  %v518_v3 = vmax.f32 %v464_v60, 0.0  ;;  %v352_v38 = vld [vmem:[%s5701_s10 + $0x128] sm:$0xff]  ;;  %v3612_v16 = vld [vmem:[%s7043_s5 + $0x138] sm:$0xff] }
  0x47   : > { %v592_v58 = vsel %vm547_vm0, %v5984_v52, 0.0  ;;  %4195 = vmatmul.mubr.f32.gmra.mrb[6].mxu1 %v728_v31  ;;  %4512 = vmatmul.mubr.f32.gmra.mrb[4].mxu0 %v728_v31  ;;  %645 = vst [vmem:[#allocation2 + $0xd0] sm:$0x3] %v591_v48  ;;  %v466_v5 = vadd.f32 %v5812_v4, %v406_v21  ;;  %v6006_v6 = vmax.f32 %v465_v62, 0.0  ;;  %v408_v15 = vmul.f32 %v5778_v42, %v348_v46  ;;  %v730_v28 = vld [vmem:[#allocation2 + $0x69] sm:$0xff]  ;;  %v354_v62 = vld [vmem:[%s5701_s10 + $0x138] sm:$0xff] }
  0x48   : > { %646 = vst [vmem:[#allocation2 + $0xd8] sm:$0xff] %v592_v58  ;;  %5044 = vmatpush3.bf16.msra.mxu0 %v5772_v39  ;;  %4197 = vmatprep.mubr.f32.mxu1 %v729_v34  ;;  %v6013_v44 = vpack.c.bf16 %v3664_v32, %v3663_v53  ;;  %647 = vst [vmem:[#allocation2 + $0xe0] sm:$0xff] %v5998_v2  ;;  %v467_v31 = vadd.f32 %v5812_v4, %v407_v45  ;;  %v353_v21 = vld [vmem:[%s5701_s10 + $0x130] sm:$0x3]  ;;  %v731_v46 = vld [vmem:[#allocation2 + $0x79] sm:$0xff]  ;;  %v594_v39 = vsel %vm558_vm1, %v518_v3, 0.0 }
  0x49   : > { %v409_v60 = vmul.f32 %v5778_v42, %v349_v1  ;;  %4514 = vmatprep.mubr.f32.mxu0 %v729_v34  ;;  %5046 = vmatprep.subr.bf16.mxu0 %v5774_v40  ;;  %v6023_v48 = vmax.f32 %v466_v5, 0.0  ;;  %v595_v53 = vsel %vm547_vm0, %v6006_v6, 0.0  ;;  %v468_v32 = vadd.f32 %v5812_v4, %v408_v15  ;;  %648 = vst [vmem:[#allocation2 + $0xe8] sm:$0x3] %v594_v39  ;;  %v355_v3 = vld [vmem:[%s5701_s10 + $0x140] sm:$0xff]  ;;  %v6264_v59 = vld [vmem:[#allocation2 + $0xaa] sm:$0xff] }
  0x4a   : > { %649 = vst [vmem:[#allocation2 + $0xf0] sm:$0xff] %v595_v53  ;;  %v521_v1 = vmax.f32 %v467_v31, 0.0  ;;  %v410_v34 = vmul.f32 %v5778_v42, %v350_v17  ;;  %4928 = vmatpush3.bf16.msra.mxu1 %v5800_v54  ;;  %v411_v45 = vmul.f32 %v5778_v42, %v351_v37  ;;  %v412_v15 = vmul.f32 %v5778_v42, %v352_v38  ;;  %v717_v17 = vld [vmem:[%s7043_s5 + $0x60] sm:$0xff]  ;;  %v718_v54 = vld [vmem:[%s7043_s5 + $0x68] sm:$0xff]  ;;  %v733_v53 = vld [vmem:[#allocation2 + $0x91] sm:$0xff] }
  0x4b   : > { %v469_v58 = vadd.f32 %v5812_v4, %v409_v60  ;;  %4198 = vmatmul.mubr.f32.gmra.mrb[8].mxu1 %v730_v28  ;;  %4515 = vmatmul.mubr.f32.gmra.mrb[6].mxu0 %v730_v28  ;;  %650 = vst [vmem:[#allocation2 + $0xf8] sm:$0xff] %v6023_v48  ;;  %v6035_v5 = vmax.f32 %v468_v32, 0.0  ;;  %v413_v39 = vmul.f32 %v5778_v42, %v353_v21  ;;  %v732_v37 = vld [vmem:[#allocation2 + $0x81] sm:$0xff]  ;;  %v6274_v51 = vld [vmem:[#allocation2 + $0xb2] sm:$0xff] }
  0x4c   : > { %v414_v31 = vmul.f32 %v5778_v42, %v354_v62  ;;  %5048 = vmatpush3.bf16.msra.mxu0 %v5774_v40  ;;  %4200 = vmatprep.mubr.f32.mxu1 %v731_v46  ;;  %v3665_v38 = vld [vmem:[%s7043_s5 + $0x2e0] sm:$0xff]  ;;  %v3666_v28 = vld [vmem:[%s7043_s5 + $0x2e8] sm:$0xff]  ;;  %v597_v60 = vsel %vm558_vm1, %v521_v1, 0.0  ;;  %v470_v62 = vadd.f32 %v5812_v4, %v410_v34  ;;  %v471_v40 = vadd.f32 %v5812_v4, %v411_v45 }
  0x4d   : > { %v6055_v21 = vmax.f32 %v469_v58, 0.0  ;;  %4517 = vmatprep.mubr.f32.mxu0 %v731_v46  ;;  %5050 = vmatprep.subr.bf16.mxu0 %v5794_v50  ;;  %651 = vst [vmem:[#allocation2 + $0x100] sm:$0x3] %v597_v60  ;;  %v598_v32 = vsel %vm547_vm0, %v6035_v5, 0.0  ;;  %v472_v12 = vadd.f32 %v5812_v4, %v412_v15  ;;  %v473_v1 = vadd.f32 %v5812_v4, %v413_v39  ;;  %v356_v34 = vld [vmem:[%s5701_s10 + $0x148] sm:$0x3] }
  0x4e   : > { %v415_v58 = vmul.f32 %v5778_v42, %v355_v3  ;;  %652 = vst [vmem:[#allocation2 + $0x108] sm:$0xff] %v598_v32  ;;  %v524_v46 = vmax.f32 %v470_v62, 0.0  ;;  %v6068_v45 = vmax.f32 %v471_v40, 0.0  ;;  %v474_v60 = vadd.f32 %v5812_v4, %v414_v31  ;;  %v360_v62 = vld [vmem:[%s5701_s10 + $0x168] sm:$0xff]  ;;  %v734_v31 = vld [vmem:[#allocation2 + $0x99] sm:$0xff] }
  0x4f   : > { %653 = vst [vmem:[#allocation2 + $0x110] sm:$0xff] %v6055_v21  ;;  %v6071_v0 = vpack.c.bf16 %v718_v54, %v717_v17  ;;  %4201 = vmatmul.mubr.f32.gmra.mrb[10].mxu1 %v732_v37  ;;  %4518 = vmatmul.mubr.f32.gmra.mrb[8].mxu0 %v732_v37  ;;  %v6075_v15 = vpack.c.bf16 %v3666_v28, %v3665_v38  ;;  %v6077_v3 = vmax.f32 %v472_v12, 0.0  ;;  %v527_v39 = vmax.f32 %v473_v1, 0.0  ;;  %v361_v38 = vld [vmem:[%s5701_s10 + $0x170] sm:$0xff]  ;;  %v3668_v40 = vld [vmem:[%s7043_s5 + $0x2f8] sm:$0xff] }
  0x50   : > { %v475_v32 = vadd.f32 %v5812_v4, %v415_v58  ;;  %5052 = vmatpush3.bf16.msra.mxu0 %v5794_v50  ;;  %4203 = vmatprep.mubr.f32.mxu1 %v733_v53  ;;  %v600_v17 = vsel %vm558_vm1, %v524_v46, 0.0  ;;  %v601_v54 = vsel %vm547_vm0, %v6068_v45, 0.0  ;;  %v6088_v37 = vmax.f32 %v474_v60, 0.0  ;;  %v735_v28 = vld [vmem:[#allocation2 + $0xa9] sm:$0xff]  ;;  %v6262_v26 = vld [vmem:[#allocation2 + $0x9a] sm:$0xff] }
  0x51   : > { %v416_v12 = vmul.f32 %v5778_v42, %v356_v34  ;;  %4520 = vmatprep.mubr.f32.mxu0 %v733_v53  ;;  %5054 = vmatprep.subr.bf16.mxu0 %v6013_v44  ;;  %v3667_v50 = vld [vmem:[%s7043_s5 + $0x2f0] sm:$0xff]  ;;  %654 = vst [vmem:[#allocation2 + $0x118] sm:$0x3] %v600_v17  ;;  %655 = vst [vmem:[#allocation2 + $0x120] sm:$0xff] %v601_v54  ;;  %v603_v1 = vsel %vm558_vm1, %v527_v39, 0.0  ;;  %v417_v53 = vmul.f32 %v5778_v42, %v357_v63 }
  0x52   : > { %656 = vst [vmem:[#allocation2 + $0x128] sm:$0xff] %v6077_v3  ;;  %v6102_v58 = vmax.f32 %v475_v32, 0.0  ;;  %v418_v34 = vmul.f32 %v5778_v42, %v358_v36  ;;  %657 = vst [vmem:[#allocation2 + $0x130] sm:$0x3] %v603_v1  ;;  %v604_v46 = vsel %vm547_vm0, %v6088_v37, 0.0  ;;  %4930 = vmatprep.subr.bf16.mxu1 %v6071_v0  ;;  %v419_v17 = vmul.f32 %v5778_v42, %v359_v33  ;;  %v719_v63 = vld [vmem:[%s7043_s5 + $0x70] sm:$0xff] }
  0x53   : > { %v476_v60 = vadd.f32 %v5812_v4, %v416_v12  ;;  %v420_v39 = vmul.f32 %v5778_v42, %v360_v62  ;;  %v720_v36 = vld [vmem:[%s7043_s5 + $0x78] sm:$0xff]  ;;  %4204 = vmatmul.mubr.f32.gmra.mrb[12].mxu1 %v734_v31  ;;  %4521 = vmatmul.mubr.f32.gmra.mrb[10].mxu0 %v734_v31  ;;  %658 = vst [vmem:[#allocation2 + $0x138] sm:$0xff] %v604_v46  ;;  %v737_v46 = vld [vmem:[#allocation2 + $0xc1] sm:$0xff] }
  0x54   : > { %659 = vst [vmem:[#allocation2 + $0x140] sm:$0xff] %v6102_v58  ;;  %v477_v32 = vadd.f32 %v5812_v4, %v417_v53  ;;  %v478_v54 = vadd.f32 %v5812_v4, %v418_v34  ;;  %v421_v33 = vmul.f32 %v5778_v42, %v361_v38  ;;  %v362_v62 = vld [vmem:[%s5701_s10 + $0x178] sm:$0x3]  ;;  %5056 = vmatpush3.bf16.msra.mxu0 %v6013_v44 }
  0x55   : > { %4206 = vmatprep.mubr.f32.mxu1 %v735_v28  ;;  %v736_v12 = vld [vmem:[#allocation2 + $0xb1] sm:$0xff]  ;;  %v5061_v1 = vpack.c.bf16 %v3668_v40, %v3667_v50  ;;  %v530_v30 = vmax.f32 %v476_v60, 0.0  ;;  %v479_v29 = vadd.f32 %v5812_v4, %v419_v17  ;;  %v480_v31 = vadd.f32 %v5812_v4, %v420_v39  ;;  %4523 = vmatprep.mubr.f32.mxu0 %v735_v28  ;;  %v3669_v50 = vld [vmem:[%s7043_s5 + $0x300] sm:$0xff]  ;;  %v3670_v40 = vld [vmem:[%s7043_s5 + $0x308] sm:$0xff] }
  0x56   : > { %5058 = vmatprep.subr.bf16.mxu0 %v6075_v15  ;;  %v6128_v53 = vmax.f32 %v477_v32, 0.0  ;;  %v6130_v34 = vmax.f32 %v478_v54, 0.0  ;;  %v481_v38 = vadd.f32 %v5812_v4, %v421_v33  ;;  %v4933_v44 = vpack.c.bf16 %v720_v36, %v719_v63  ;;  %4932 = vmatpush3.bf16.msra.mxu1 %v6071_v0  ;;  %v364_v33 = vld [vmem:[%s5701_s10 + $0x188] sm:$0xff] }
  0x57   : > { %v606_v28 = vsel %vm558_vm1, %v530_v30, 0.0  ;;  %v533_v60 = vmax.f32 %v479_v29, 0.0  ;;  %v6142_v17 = vmax.f32 %v480_v31, 0.0  ;;  %v422_v39 = vmul.f32 %v5778_v42, %v362_v62  ;;  %4207 = vmatmul.mubr.f32.gmra.mrb[14].mxu1 %v736_v12  ;;  %4524 = vmatmul.mubr.f32.gmra.mrb[12].mxu0 %v736_v12  ;;  %v363_v30 = vld [vmem:[%s5701_s10 + $0x180] sm:$0xff]  ;;  %v738_v29 = vld [vmem:[#allocation2 + $0xc9] sm:$0xff] }
  0x58   : > { %660 = vst [vmem:[#allocation2 + $0x148] sm:$0x3] %v606_v28  ;;  %v607_v63 = vsel %vm547_vm0, %v6128_v53, 0.0  ;;  %662 = vst [vmem:[#allocation2 + $0x158] sm:$0xff] %v6130_v34  ;;  %v6149_v36 = vmax.f32 %v481_v38, 0.0  ;;  %5060 = vmatpush3.bf16.msra.mxu0 %v6075_v15  ;;  %4209 = vmatprep.mubr.f32.mxu1 %v737_v46  ;;  %v739_v12 = vld [vmem:[#allocation2 + $0xd9] sm:$0xff]  ;;  %v5065_v31 = vpack.c.bf16 %v3670_v40, %v3669_v50 }
  0x59   : > { %661 = vst [vmem:[#allocation2 + $0x150] sm:$0xff] %v607_v63  ;;  %v609_v0 = vsel %vm558_vm1, %v533_v60, 0.0  ;;  %v610_v32 = vsel %vm547_vm0, %v6142_v17, 0.0  ;;  %v482_v54 = vadd.f32 %v5812_v4, %v422_v39  ;;  %v365_v62 = vld [vmem:[%s5701_s10 + $0x190] sm:$0x3]  ;;  %4526 = vmatprep.mubr.f32.mxu0 %v737_v46  ;;  %5062 = vmatprep.subr.bf16.mxu0 %v5061_v1  ;;  %v6162_v15 = vld [vmem:[#allocation2 + $0x1a] sm:$0xff]  ;;  %v423_v46 = vmul.f32 %v5778_v42, %v363_v30 }
  0x5a   : > { %663 = vst [vmem:[#allocation2 + $0x160] sm:$0x3] %v609_v0  ;;  %664 = vst [vmem:[#allocation2 + $0x168] sm:$0xff] %v610_v32  ;;  %v3671_v38 = vld [vmem:[%s7043_s5 + $0x310] sm:$0xff]  ;;  %v3672_v28 = vld [vmem:[%s7043_s5 + $0x318] sm:$0xff]  ;;  %4934 = vmatprep.subr.bf16.mxu1 %v4933_v44  ;;  %v424_v39 = vmul.f32 %v5778_v42, %v364_v33  ;;  %v425_v63 = vmul.f32 %v5778_v42, %v365_v62  ;;  %s3720_s10 = sshll.u32 %s5658_s29, 8 }
  0x5b   : > { %665 = vst [vmem:[#allocation2 + $0x170] sm:$0xff] %v6149_v36  ;;  %v536_v60 = vmax.f32 %v482_v54, 0.0  ;;  %4210 = vmatmul.mubr.f32.gmra.mrb[16].mxu1 %v738_v29  ;;  %4527 = vmatmul.mubr.f32.gmra.mrb[14].mxu0 %v738_v29  ;;  %v3605_v50 = vld [vmem:[%s7043_s5 + $0x100] sm:$0xff]  ;;  %v3606_v40 = vld [vmem:[%s7043_s5 + $0x108] sm:$0xff]  ;;  %v6184_v29 = vadd.f32 %v5812_v4, %v423_v46  ;;  %v741_v54 = vld [vmem:[#allocation2 + $0xf1] sm:$0xff]  ;;  %v5069_v27 = vpack.c.bf16 %v3672_v28, %v3671_v38  ;;  %s6790_s25 = scalar_lea.vmem %s7044_s6, %s3720_s10 }
  0x5c   : > { %5064 = vmatpush3.bf16.msra.mxu0 %v5061_v1  ;;  %4212 = vmatprep.mubr.f32.mxu1 %v739_v12  ;;  %v740_v0 = vld [vmem:[#allocation2 + $0xe1] sm:$0xff]  ;;  %v6188_v33 = vadd.f32 %v5812_v4, %v424_v39  ;;  %v485_v42 = vadd.f32 %v5812_v4, %v425_v63  ;;  %v6191_v1 = vld [vmem:[#allocation2 + $0x32] sm:$0xff]  ;;  %v6193_v62 = vpack.c.bf16 %v3606_v40, %v3605_v50  ;;  %v743_v40 = vld [vmem:[#allocation2 + $0x109] sm:$0xff] }
  0x5d   : > { %v6179_v32 = vld [vmem:[#allocation2 + $0x22] sm:$0xff]  ;;  %v612_v30 = vsel %vm558_vm1, %v536_v60, 0.0  ;;  %4585 = vmatprep.mubr.f32.mxu0 %v6162_v15  ;;  %5066 = vmatprep.subr.bf16.mxu0 %v5065_v31  ;;  %v7056_v12 = vmax.f32 %v6184_v29, 0.0  ;;  %v6204_v46 = vld [vmem:[#allocation2 + $0x3a] sm:$0xff]  ;;  %v6211_v39 = vld [vmem:[#allocation2 + $0x4a] sm:$0xff] }
  0x5e   : > { %666 = vst [vmem:[#allocation2 + $0x178] sm:$0x3] %v612_v30  ;;  %4936 = vmatpush3.bf16.msra.mxu1 %v4933_v44  ;;  %v3673_v38 = vld [vmem:[%s7043_s5 + $0x320] sm:$0xff]  ;;  %v3674_v28 = vld [vmem:[%s7043_s5 + $0x328] sm:$0xff]  ;;  %v7055_v4 = vmax.f32 %v6188_v33, 0.0  ;;  %v539_v60 = vmax.f32 %v485_v42, 0.0 }
  0x5f   : > { %4213 = vmatmul.mubr.f32.gmra.mrb[18].mxu1 %v740_v0  ;;  %4586 = vmatmul.mubr.f32.vlgmr.msra.gmra.mrb[0].mxu0 %v6179_v32  ;;  %v742_v44 = vld [vmem:[#allocation2 + $0xf9] sm:$0xff]  ;;  %v613_v50 = vsel %vm547_vm0, %v7056_v12, 0.0  ;;  %v5073_v63 = vpack.c.bf16 %v3674_v28, %v3673_v38  ;;  %v3675_v0 = vld [vmem:[%s7043_s5 + $0x330] sm:$0xff]  ;;  %v745_v42 = vld [vmem:[#allocation2 + $0x121] sm:$0xff] }
  0x60   : > { %5068 = vmatpush3.bf16.msra.mxu0 %v5065_v31  ;;  %4215 = vmatprep.mubr.f32.mxu1 %v741_v54  ;;  %667 = vst [vmem:[#allocation2 + $0x180] sm:$0xff] %v613_v50  ;;  %668 = vst [vmem:[#allocation2 + $0x188] sm:$0xff] %v7055_v4  ;;  %v615_v31 = vsel %vm558_vm1, %v539_v60, 0.0  ;;  %v3676_v30 = vld [vmem:[%s7043_s5 + $0x338] sm:$0xff]  ;;  %v6228_v38 = vld [vmem:[#allocation2 + $0x62] sm:$0xff] }
  0x61   : > { %4588 = vmatprep.mubr.f32.mxu0 %v6191_v1  ;;  %5070 = vmatprep.subr.bf16.mxu0 %v5069_v27  ;;  %669 = vst [vmem:[#allocation2 + $0x190] sm:$0x3] %v615_v31  ;;  %v744_v10 = vld [vmem:[#allocation2 + $0x111] sm:$0xff]  ;;  %v5077_v28 = vpack.c.bf16 %v3676_v30, %v3675_v0  ;;  %v3677_v60 = vld [vmem:[%s7043_s5 + $0x340] sm:$0xff] }
  0x62   : > { %4938 = vmatprep.subr.bf16.mxu1 %v6193_v62  ;;  %v6226_v54 = vld [vmem:[#allocation2 + $0x52] sm:$0xff]  ;;  %v6238_v50 = vld [vmem:[#allocation2 + $0x6a] sm:$0xff]  ;;  %v6240_v31 = vld [vmem:[#allocation2 + $0x7a] sm:$0xff] }
  0x63   : > { %4216 = vmatmul.mubr.f32.gmra.mrb[20].mxu1 %v742_v44  ;;  %4589 = vmatmul.mubr.f32.gmra.mrb[2].mxu0 %v6204_v46  ;;  %v3678_v44 = vld [vmem:[%s7043_s5 + $0x348] sm:$0xff]  ;;  %v3679_v30 = vld [vmem:[%s7043_s5 + $0x350] sm:$0xff] }
  0x64   : > { %4218 = vmatprep.mubr.f32.mxu1 %v743_v40  ;;  %4591 = vmatprep.mubr.f32.mxu0 %v6211_v39  ;;  %v747_v40 = vld [vmem:[#allocation2 + $0x139] sm:$0xff]  ;;  %v5081_v0 = vpack.c.bf16 %v3678_v44, %v3677_v60  ;;  %v6250_v4 = vld [vmem:[#allocation2 + $0x82] sm:$0xff] }
  0x65   : > { %5072 = vmatpush3.bf16.msra.mxu0 %v5069_v27  ;;  %v746_v27 = vld [vmem:[#allocation2 + $0x129] sm:$0xff]  ;;  %v6252_v12 = vld [vmem:[#allocation2 + $0x92] sm:$0xff]  ;;  %v3681_v44 = vld [vmem:[%s7043_s5 + $0x360] sm:$0xff] }
  0x66   : > { %5074 = vmatprep.subr.bf16.mxu0 %v5073_v63 }
  0x67   : > { %4219 = vmatmul.mubr.f32.gmra.mrb[22].mxu1 %v744_v10  ;;  %4592 = vmatmul.mubr.f32.gmra.mrb[4].mxu0 %v6226_v54  ;;  %v3680_v10 = vld [vmem:[%s7043_s5 + $0x358] sm:$0xff] }
  0x68   : > { %4221 = vmatprep.mubr.f32.mxu1 %v745_v42  ;;  %4594 = vmatprep.mubr.f32.mxu0 %v6228_v38  ;;  %v748_v42 = vld [vmem:[#allocation2 + $0x141] sm:$0xff]  ;;  %v5085_v60 = vpack.c.bf16 %v3680_v10, %v3679_v30  ;;  %v3683_v10 = vld [vmem:[%s7043_s5 + $0x370] sm:$0xff] }
  0x69   : > { %5076 = vmatpush3.bf16.msra.mxu0 %v5073_v63  ;;  %v749_v63 = vld [vmem:[#allocation2 + $0x151] sm:$0xff] }
  0x6a   : > { %5078 = vmatprep.subr.bf16.mxu0 %v5077_v28 }
  0x6b   : > { %4222 = vmatmul.mubr.f32.gmra.mrb[24].mxu1 %v746_v27  ;;  %4595 = vmatmul.mubr.f32.gmra.mrb[6].mxu0 %v6238_v50  ;;  %v3682_v27 = vld [vmem:[%s7043_s5 + $0x368] sm:$0xff] }
  0x6c   : > { %4224 = vmatprep.mubr.f32.mxu1 %v747_v40  ;;  %4597 = vmatprep.mubr.f32.mxu0 %v6240_v31  ;;  %v750_v40 = vld [vmem:[#allocation2 + $0x159] sm:$0xff]  ;;  %v5089_v30 = vpack.c.bf16 %v3682_v27, %v3681_v44  ;;  %v3607_v44 = vld [vmem:[%s7043_s5 + $0x110] sm:$0xff] }
  0x6d   : > { %5080 = vmatpush3.bf16.msra.mxu0 %v5077_v28  ;;  %v751_v28 = vld [vmem:[#allocation2 + $0x169] sm:$0xff] }
  0x6e   : > { %5082 = vmatprep.subr.bf16.mxu0 %v5081_v0 }
  0x6f   : > { %4225 = vmatmul.mubr.f32.gmra.mrb[26].mxu1 %v748_v42  ;;  %4598 = vmatmul.mubr.f32.gmra.mrb[8].mxu0 %v6250_v4  ;;  %v3684_v42 = vld [vmem:[%s7043_s5 + $0x378] sm:$0xff] }
  0x70   : > { %4227 = vmatprep.mubr.f32.mxu1 %v749_v63  ;;  %4600 = vmatprep.mubr.f32.mxu0 %v6252_v12  ;;  %v752_v63 = vld [vmem:[#allocation2 + $0x171] sm:$0xff]  ;;  %v5093_v27 = vpack.c.bf16 %v3684_v42, %v3683_v10  ;;  %v6297_v42 = vld [vmem:[#allocation2 + $0xda] sm:$0xff] }
  0x71   : > { %5084 = vmatpush3.bf16.msra.mxu0 %v5081_v0  ;;  %v6276_v0 = vld [vmem:[#allocation2 + $0xc2] sm:$0xff]  ;;  %v6295_v10 = vld [vmem:[#allocation2 + $0xca] sm:$0xff] }
  0x72   : > { %5086 = vmatprep.subr.bf16.mxu0 %v5085_v60 }
  0x73   : > { %4228 = vmatmul.mubr.f32.gmra.mrb[28].mxu1 %v750_v40  ;;  %4601 = vmatmul.mubr.f32.gmra.mrb[10].mxu0 %v6262_v26  ;;  %v3608_v40 = vld [vmem:[%s7043_s5 + $0x118] sm:$0xff] }
  0x74   : > { %4230 = vmatprep.mubr.f32.mxu1 %v751_v28  ;;  %4603 = vmatprep.mubr.f32.mxu0 %v6264_v59  ;;  %v3685_v28 = vld [vmem:[%s7043_s5 + $0x380] sm:$0xff] }
  0x75   : > { %5088 = vmatpush3.bf16.msra.mxu0 %v5085_v60  ;;  %v3686_v60 = vld [vmem:[%s7043_s5 + $0x388] sm:$0xff] }
  0x76   : > { %5090 = vmatprep.subr.bf16.mxu0 %v5089_v30  ;;  %v6299_v35 = vpack.c.bf16 %v3686_v60, %v3685_v28  ;;  %v7087_v28 = vmax.f32 %v5825_v7, 0.0  ;;  %v3614_v60 = vld [vmem:[%s7043_s5 + $0x148] sm:$0xff] }
  0x77   : > { %4231 = vmatmul.mubr.f32.gmra.mrb[30].mxu1 %v752_v63  ;;  %4604 = vmatmul.mubr.f32.gmra.mrb[12].mxu0 %v6274_v51  ;;  %v4941_v63 = vpack.c.bf16 %v3608_v40, %v3607_v44  ;;  %v6317_v44 = vld [vmem:[#allocation2 + $0xf2] sm:$0xff]  ;;  %v4945_v40 = vpack.c.bf16 %v3610_v18, %v3609_v25  ;;  %v6334_v18 = vld [vmem:[#allocation2 + $0xfa] sm:$0xff]  ;;  %v6336_v25 = vld [vmem:[#allocation2 + $0x10a] sm:$0xff] }
  0x78   : > { %4265 = vmatprep.mubr.f32.mxu1 %v6291_v43  ;;  %4606 = vmatprep.mubr.f32.mxu0 %v6276_v0 }
  0x79   : > { %5092 = vmatpush3.bf16.msra.mxu0 %v5089_v30  ;;  %v6314_v30 = vld [vmem:[#allocation2 + $0xe2] sm:$0xff] }
  0x7a   : > { %5094 = vmatprep.subr.bf16.mxu0 %v5093_v27 }
  0x7b   : > { %4266 = vmatmul.mubr.f32.vlgmr.msra.gmra.mrb[0].mxu1 %v6291_v43  ;;  %4607 = vmatmul.mubr.f32.gmra.mrb[14].mxu0 %v6295_v10 }
  0x7c   : > { %5449 = vmatprep.mubr.msk.f32.mxu1 %vm547_vm0, %v7086_v13  ;;  %4609 = vmatprep.mubr.f32.mxu0 %v6297_v42  ;;  %v3611_v13 = vld [vmem:[%s7043_s5 + $0x130] sm:$0xff] }
  0x7d   : > { %4940 = vmatpush3.bf16.msra.mxu1 %v6193_v62  ;;  %5096 = vmatpush3.bf16.msra.mxu0 %v5093_v27  ;;  %v7088_v62 = vmax.f32 %v5829_v19, 0.0  ;;  %v4949_v7 = vpack.c.bf16 %v3612_v16, %v3611_v13  ;;  %v7089_v27 = vmax.f32 %v5832_v20, 0.0  ;;  %v3613_v19 = vld [vmem:[%s7043_s5 + $0x140] sm:$0xff]  ;;  %v7091_v16 = vmax.f32 %v5839_v24, 0.0 }
  0x7e   : > { %4942 = vmatprep.subr.bf16.mxu1 %v4941_v63  ;;  %5098 = vmatprep.subr.bf16.mxu0 %v6299_v35  ;;  %v6354_v20 = vld [vmem:[#allocation2 + $0x122] sm:$0xff]  ;;  %v4953_v13 = vpack.c.bf16 %v3614_v60, %v3613_v19  ;;  %v6372_v24 = vld [vmem:[#allocation2 + $0x13a] sm:$0xff]  ;;  %v7093_v60 = vmax.f32 %v5877_v55, 0.0  ;;  %v6389_v55 = vld [vmem:[#allocation2 + $0x152] sm:$0xff] }
  0x7f   : > { %4269 = vmatmul.mubr.f32.gmra.mrb[2].mxu1 %v7087_v28  ;;  %4610 = vmatmul.mubr.f32.gmra.mrb[16].mxu0 %v6314_v30  ;;  %v7090_v28 = vmax.f32 %v5836_v23, 0.0  ;;  %v3615_v23 = vld [vmem:[%s7043_s5 + $0x150] sm:$0xff] }
  0x80   : > { %5450 = vmatprep.mubr.msk.f32.mxu1 %vm547_vm0, %v7088_v62  ;;  %4612 = vmatprep.mubr.f32.mxu0 %v6317_v44  ;;  %v3616_v62 = vld [vmem:[%s7043_s5 + $0x158] sm:$0xff] }
  0x81   : > { %4944 = vmatpush3.bf16.msra.mxu1 %v4941_v63  ;;  %v6352_v63 = vld [vmem:[#allocation2 + $0x112] sm:$0xff]  ;;  %v4957_v19 = vpack.c.bf16 %v3616_v62, %v3615_v23  ;;  %v7094_v23 = vmax.f32 %v5883_v61, 0.0  ;;  %v6406_v61 = vld [vmem:[#allocation2 + $0x16a] sm:$0xff] }
  0x82   : > { %4946 = vmatprep.subr.bf16.mxu1 %v4945_v40  ;;  %v3619_v62 = vld [vmem:[%s7043_s5 + $0x170] sm:$0xff] }
  0x83   : > { %4272 = vmatmul.mubr.f32.gmra.mrb[4].mxu1 %v7089_v27  ;;  %4613 = vmatmul.mubr.f32.gmra.mrb[18].mxu0 %v6334_v18  ;;  %v7092_v27 = vmax.f32 %v5874_v49, 0.0  ;;  %v3617_v49 = vld [vmem:[%s7043_s5 + $0x160] sm:$0xff] }
  0x84   : > { %5451 = vmatprep.mubr.msk.f32.mxu1 %vm547_vm0, %v7090_v28  ;;  %4615 = vmatprep.mubr.f32.mxu0 %v6336_v25  ;;  %v3618_v28 = vld [vmem:[%s7043_s5 + $0x168] sm:$0xff] }
  0x85   : > { %4948 = vmatpush3.bf16.msra.mxu1 %v4945_v40  ;;  %v6370_v40 = vld [vmem:[#allocation2 + $0x12a] sm:$0xff] }
  0x86   : > { %4950 = vmatprep.subr.bf16.mxu1 %v4949_v7 }
  0x87   : > { %4275 = vmatmul.mubr.f32.gmra.mrb[6].mxu1 %v7091_v16  ;;  %4616 = vmatmul.mubr.f32.gmra.mrb[20].mxu0 %v6352_v63  ;;  %v4961_v16 = vpack.c.bf16 %v3618_v28, %v3617_v49  ;;  %v3621_v49 = vld [vmem:[%s7043_s5 + $0x180] sm:$0xff]  ;;  %v3622_v28 = vld [vmem:[%s7043_s5 + $0x188] sm:$0xff] }
  0x88   : > { %5452 = vmatprep.mubr.msk.f32.mxu1 %vm547_vm0, %v7092_v27  ;;  %4618 = vmatprep.mubr.f32.mxu0 %v6354_v20  ;;  %v3620_v27 = vld [vmem:[%s7043_s5 + $0x178] sm:$0xff] }
  0x89   : > { %4952 = vmatpush3.bf16.msra.mxu1 %v4949_v7  ;;  %v6387_v7 = vld [vmem:[#allocation2 + $0x142] sm:$0xff] }
  0x8a   : > { %4954 = vmatprep.subr.bf16.mxu1 %v4953_v13 }
  0x8b   : > { %4278 = vmatmul.mubr.f32.gmra.mrb[8].mxu1 %v7093_v60  ;;  %4619 = vmatmul.mubr.f32.gmra.mrb[22].mxu0 %v6370_v40  ;;  %v4965_v60 = vpack.c.bf16 %v3620_v27, %v3619_v62  ;;  %v6422_v62 = vpack.c.bf16 %v3622_v28, %v3621_v49  ;;  %v2170_v27 = vld [vmem:[#allocation2 + $0x18a] sm:$0xff]  ;;  %v3688_v49 = vld [vmem:[%s7043_s5 + $0x398] sm:$0xff] }
  0x8c   : > { %5453 = vmatprep.mubr.msk.f32.mxu1 %vm547_vm0, %v5895_v11  ;;  %4621 = vmatprep.mubr.f32.mxu0 %v6372_v24 }
  0x8d   : > { %4956 = vmatpush3.bf16.msra.mxu1 %v4953_v13  ;;  %v6404_v13 = vld [vmem:[#allocation2 + $0x15a] sm:$0xff] }
  0x8e   : > { %4958 = vmatprep.subr.bf16.mxu1 %v4957_v19  ;;  %7095 = vst [vmem:[#allocation10_spill] sm:$0xff] %v6404_v13 }
  0x8f   : > { %4281 = vmatmul.mubr.f32.gmra.mrb[10].mxu1 %v7094_v23  ;;  %4622 = vmatmul.mubr.f32.gmra.mrb[24].mxu0 %v6387_v7  ;;  %v2169_v23 = vld [vmem:[#allocation2 + $0x182] sm:$0xff] }
  0x90   : > { %5454 = vmatprep.mubr.msk.f32.mxu1 %vm547_vm0, %v5922_v47  ;;  %4624 = vmatprep.mubr.f32.mxu0 %v6389_v55 }
  0x91   : > { %4960 = vmatpush3.bf16.msra.mxu1 %v4957_v19  ;;  %v6420_v19 = vld [vmem:[#allocation2 + $0x172] sm:$0xff] }
  0x92   : > { %4962 = vmatprep.subr.bf16.mxu1 %v4961_v16  ;;  %7096 = vst [vmem:[#allocation11_spill] sm:$0xff] %v6420_v19 }
  0x93   : > { %4284 = vmatmul.mubr.f32.gmra.mrb[12].mxu1 %v5934_v9  ;;  %4625 = vmatmul.mubr.f32.gmra.mrb[26].mxu0 %v6404_v13  ;;  %v6429_v13 = vld [vmem:[#allocation2 + $0x30] sm:$0xff] }
  0x94   : > { %5455 = vmatprep.mubr.msk.f32.mxu1 %vm547_vm0, %v5940_v22  ;;  %4627 = vmatprep.mubr.f32.mxu0 %v6406_v61  ;;  %7097 = vst [vmem:[#allocation12_spill] sm:$0xff] %v6429_v13 }
  0x95   : > { %4964 = vmatpush3.bf16.msra.mxu1 %v4961_v16  ;;  %v3687_v16 = vld [vmem:[%s7043_s5 + $0x390] sm:$0xff] }
  0x96   : > { %4966 = vmatprep.subr.bf16.mxu1 %v4965_v60  ;;  %v5101_v28 = vpack.c.bf16 %v3688_v49, %v3687_v16  ;;  %v6459_v16 = vld [vmem:[#allocation2 + $0x50] sm:$0xff]  ;;  %v6462_v49 = vld [vmem:[#allocation2 + $0x60] sm:$0xff] }
  0x97   : > { %4287 = vmatmul.mubr.f32.gmra.mrb[14].mxu1 %v5947_v41  ;;  %4628 = vmatmul.mubr.f32.gmra.mrb[28].mxu0 %v6420_v19  ;;  %v3689_v19 = vld [vmem:[%s7043_s5 + $0x3a0] sm:$0xff]  ;;  %7100 = vst [vmem:[#allocation15_spill] sm:$0xff] %v6459_v16 }
  0x98   : > { %5456 = vmatprep.mubr.msk.f32.mxu1 %vm547_vm0, %v5962_v56  ;;  %4630 = vmatprep.mubr.f32.mxu0 %v2169_v23  ;;  %v6445_v23 = vld [vmem:[#allocation2 + $0x48] sm:$0xff] }
  0x99   : > { %4968 = vmatpush3.bf16.msra.mxu1 %v4965_v60  ;;  %v6443_v60 = vld [vmem:[#allocation2 + $0x38] sm:$0xff]  ;;  %7099 = vst [vmem:[#allocation14_spill] sm:$0xff] %v6445_v23 }
  0x9a   : > { %4970 = vmatprep.subr.bf16.mxu1 %v6422_v62  ;;  %7098 = vst [vmem:[#allocation13_spill] sm:$0xff] %v6443_v60 }
  0x9b   : > { %4290 = vmatmul.mubr.f32.gmra.mrb[16].mxu1 %v5971_v14  ;;  %4631 = vmatmul.mubr.f32.gmra.mrb[30].mxu0 %v2170_v27  ;;  %v3690_v27 = vld [vmem:[%s7043_s5 + $0x3a8] sm:$0xff] }
  0x9c   : > { %5457 = vmatprep.mubr.msk.f32.mxu1 %vm547_vm0, %v5984_v52  ;;  %4665 = vmatprep.mubr.f32.mxu0 %v6429_v13  ;;  %v3692_v13 = vld [vmem:[%s7043_s5 + $0x3b8] sm:$0xff] }
  0x9f   : > { %4293 = vmatmul.mubr.f32.gmra.mrb[18].mxu1 %v5998_v2  ;;  %4666 = vmatmul.mubr.f32.vlgmr.msra.gmra.mrb[0].mxu0 %v6443_v60  ;;  %v5105_v60 = vpack.c.bf16 %v3690_v27, %v3689_v19  ;;  %v3693_v27 = vld [vmem:[%s7043_s5 + $0x3c0] sm:$0xff] }
  0xa0   : > { %5100 = vmatpush3.bf16.msra.mxu0 %v6299_v35  ;;  %5458 = vmatprep.mubr.msk.f32.mxu1 %vm547_vm0, %v6006_v6  ;;  %v3691_v35 = vld [vmem:[%s7043_s5 + $0x3b0] sm:$0xff] }
  0xa1   : > { %4668 = vmatprep.mubr.f32.mxu0 %v6445_v23  ;;  %5102 = vmatprep.subr.bf16.mxu0 %v5101_v28  ;;  %v6476_v23 = vld [vmem:[#allocation2 + $0x68] sm:$0xff]  ;;  %v5109_v19 = vpack.c.bf16 %v3692_v13, %v3691_v35  ;;  %v6492_v13 = vld [vmem:[#allocation2 + $0x80] sm:$0xff]  ;;  %v3695_v35 = vld [vmem:[%s7043_s5 + $0x3d0] sm:$0xff] }
  0xa2   : > { %7101 = vst [vmem:[#allocation16_spill] sm:$0xff] %v6476_v23 }
  0xa3   : > { %4296 = vmatmul.mubr.f32.gmra.mrb[20].mxu1 %v6023_v48  ;;  %4669 = vmatmul.mubr.f32.gmra.mrb[2].mxu0 %v6459_v16  ;;  %v3694_v16 = vld [vmem:[%s7043_s5 + $0x3c8] sm:$0xff] }
  0xa4   : > { %5459 = vmatprep.mubr.msk.f32.mxu1 %vm547_vm0, %v6035_v5  ;;  %4671 = vmatprep.mubr.f32.mxu0 %v6462_v49 }
  0xa5   : > { %5104 = vmatpush3.bf16.msra.mxu0 %v5101_v28  ;;  %v5113_v28 = vpack.c.bf16 %v3694_v16, %v3693_v27  ;;  %v3698_v16 = vld [vmem:[%s7043_s5 + $0x3e8] sm:$0xff]  ;;  %v3624_v27 = vld [vmem:[%s7043_s5 + $0x198] sm:$0xff] }
  0xa6   : > { %5106 = vmatprep.subr.bf16.mxu0 %v5105_v60 }
  0xa7   : > { %4299 = vmatmul.mubr.f32.gmra.mrb[22].mxu1 %v6055_v21  ;;  %4672 = vmatmul.mubr.f32.gmra.mrb[4].mxu0 %v6476_v23  ;;  %v3696_v23 = vld [vmem:[%s7043_s5 + $0x3d8] sm:$0xff] }
  0xa8   : > { %5460 = vmatprep.mubr.msk.f32.mxu1 %vm547_vm0, %v6068_v45  ;;  %5461 = vmatprep.mubr.msk.f32.mxu0 %vm547_vm0, %v5895_v11  ;;  %v5117_v11 = vpack.c.bf16 %v3696_v23, %v3695_v35  ;;  %v3700_v23 = vld [vmem:[%s7043_s5 + $0x3f8] sm:$0xff]  ;;  %v1221_v35 = vld [vmem:[#allocation2 + $0xa] sm:$0xff] }
  0xa9   : > { %5108 = vmatpush3.bf16.msra.mxu0 %v5105_v60  ;;  %v3697_v60 = vld [vmem:[%s7043_s5 + $0x3e0] sm:$0xff] }
  0xaa   : > { %5110 = vmatprep.subr.bf16.mxu0 %v5109_v19 }
  0xab   : > { %4302 = vmatmul.mubr.f32.gmra.mrb[24].mxu1 %v6077_v3  ;;  %4675 = vmatmul.mubr.f32.gmra.mrb[6].mxu0 %v6492_v13 }
  0xac   : > { %5462 = vmatprep.mubr.msk.f32.mxu1 %vm547_vm0, %v6088_v37  ;;  %5463 = vmatprep.mubr.msk.f32.mxu0 %vm547_vm0, %v5922_v47  ;;  %v5121_v47 = vpack.c.bf16 %v3698_v16, %v3697_v60  ;;  %v3625_v60 = vld [vmem:[%s7043_s5 + $0x1a0] sm:$0xff]  ;;  %v3626_v16 = vld [vmem:[%s7043_s5 + $0x1a8] sm:$0xff] }
  0xad   : > { %5112 = vmatpush3.bf16.msra.mxu0 %v5109_v19 }
  0xae   : > { %5114 = vmatprep.subr.bf16.mxu0 %v5113_v28 }
  0xaf   : > { %4305 = vmatmul.mubr.f32.gmra.mrb[26].mxu1 %v6102_v58  ;;  %4678 = vmatmul.mubr.f32.gmra.mrb[8].mxu0 %v5934_v9  ;;  %v3699_v9 = vld [vmem:[%s7043_s5 + $0x3f0] sm:$0xff] }
  0xb0   : > { %5464 = vmatprep.mubr.msk.f32.mxu1 %vm547_vm0, %v6128_v53  ;;  %5465 = vmatprep.mubr.msk.f32.mxu0 %vm547_vm0, %v5940_v22  ;;  %v1220_v22 = vld [vmem:[#allocation2 + $0x2] sm:$0xff]  ;;  %v5125_v19 = vpack.c.bf16 %v3700_v23, %v3699_v9 }
  0xb1   : > { %5116 = vmatpush3.bf16.msra.mxu0 %v5113_v28  ;;  %v3702_v28 = vld [vmem:[%s7043_s5 + $0x408] sm:$0xff] }
  0xb2   : > { %5118 = vmatprep.subr.bf16.mxu0 %v5117_v11  ;;  %v3714_v23 = vld [vmem:[%s7043_s5 + $0x468] sm:$0xff] }
  0xb3   : > { %4308 = vmatmul.mubr.f32.gmra.mrb[28].mxu1 %v6130_v34  ;;  %4681 = vmatmul.mubr.f32.gmra.mrb[10].mxu0 %v5947_v41  ;;  %v3623_v41 = vld [vmem:[%s7043_s5 + $0x190] sm:$0xff] }
  0xb4   : > { %5466 = vmatprep.mubr.msk.f32.mxu1 %vm547_vm0, %v6142_v17  ;;  %5467 = vmatprep.mubr.msk.f32.mxu0 %vm547_vm0, %v5962_v56  ;;  %v3701_v56 = vld [vmem:[%s7043_s5 + $0x400] sm:$0xff] }
  0xb5   : > { %5120 = vmatpush3.bf16.msra.mxu0 %v5117_v11  ;;  %v6553_v11 = vpack.c.bf16 %v3702_v28, %v3701_v56  ;;  %v1527_v56 = vld [vmem:[#allocation2 + $0x18] sm:$0xff] }
  0xb6   : > { %5122 = vmatprep.subr.bf16.mxu0 %v5121_v47  ;;  %v6699_v28 = vld [vmem:[#allocation2 + $0xd9] sm:$0xff] }
  0xb7   : > { %4311 = vmatmul.mubr.f32.gmra.mrb[30].mxu1 %v6149_v36  ;;  %4684 = vmatmul.mubr.f32.gmra.mrb[12].mxu0 %v5971_v14  ;;  %v4973_v14 = vpack.c.bf16 %v3624_v27, %v3623_v41  ;;  %v3716_v27 = vld [vmem:[%s7043_s5 + $0x478] sm:$0xff] }
  0xb8   : > { %4345 = vmatprep.mubr.f32.mxu1 %v1220_v22  ;;  %5468 = vmatprep.mubr.msk.f32.mxu0 %vm547_vm0, %v5984_v52  ;;  %v4977_v52 = vpack.c.bf16 %v3626_v16, %v3625_v60  ;;  %v2764_v22 = vld [vmem:[#allocation2 + $0xc1] sm:$0xff]  ;;  %v6705_v16 = vld [vmem:[#allocation2 + $0xf1] sm:$0xff] }
  0xb9   : > { %5124 = vmatpush3.bf16.msra.mxu0 %v5121_v47  ;;  %v2762_v47 = vld [vmem:[#allocation2 + $0xa9] sm:$0xff]  ;;  %v6703_v60 = vld [vmem:[#allocation2 + $0xe1] sm:$0xff] }
  0xba   : > { %5126 = vmatprep.subr.bf16.mxu0 %v5125_v19 }
  0xbb   : > { %4346 = vmatmul.mubr.f32.vlgmr.msra.gmra.mrb[0].mxu1 %v1221_v35  ;;  %4687 = vmatmul.mubr.f32.gmra.mrb[14].mxu0 %v5998_v2  ;;  %v3627_v2 = vld [vmem:[%s7043_s5 + $0x1b0] sm:$0xff] }
  0xbc   : > { %4348 = vmatprep.mubr.f32.mxu1 %v6162_v15  ;;  %5469 = vmatprep.mubr.msk.f32.mxu0 %vm547_vm0, %v6006_v6  ;;  %v3628_v15 = vld [vmem:[%s7043_s5 + $0x1b8] sm:$0xff] }
  0xbd   : > { %4972 = vmatpush3.bf16.msra.mxu1 %v6422_v62  ;;  %5128 = vmatpush3.bf16.msra.mxu0 %v5125_v19  ;;  %v4981_v6 = vpack.c.bf16 %v3628_v15, %v3627_v2  ;;  %v3712_v62 = vld [vmem:[%s7043_s5 + $0x458] sm:$0xff]  ;;  %v7104_v19 = vld [vmem:[#allocation10_spill] sm:$0xff]  ;;  %v7107_v15 = vld [vmem:[#allocation3_spill] sm:$0xff] }
  0xbe   : > { %4974 = vmatprep.subr.bf16.mxu1 %v4973_v14  ;;  %5130 = vmatprep.subr.bf16.mxu0 %v6553_v11  ;;  %v6713_v2 = vld [vmem:[#allocation2 + $0x109] sm:$0xff] }
  0xbf   : > { %4349 = vmatmul.mubr.f32.gmra.mrb[2].mxu1 %v6179_v32  ;;  %4690 = vmatmul.mubr.f32.gmra.mrb[16].mxu0 %v6023_v48  ;;  %v3629_v48 = vld [vmem:[%s7043_s5 + $0x1c0] sm:$0xff]  ;;  %v3630_v32 = vld [vmem:[%s7043_s5 + $0x1c8] sm:$0xff] }
  0xc0   : > { %4351 = vmatprep.mubr.f32.mxu1 %v6191_v1  ;;  %5470 = vmatprep.mubr.msk.f32.mxu0 %vm547_vm0, %v6035_v5  ;;  %v4985_v5 = vpack.c.bf16 %v3630_v32, %v3629_v48  ;;  %v3632_v1 = vld [vmem:[%s7043_s5 + $0x1d8] sm:$0xff]  ;;  %v7109_v48 = vld [vmem:[#allocation14_spill] sm:$0xff] }
  0xc1   : > { %4976 = vmatpush3.bf16.msra.mxu1 %v4973_v14  ;;  %v7105_v14 = vld [vmem:[#allocation11_spill] sm:$0xff] }
  0xc2   : > { %4978 = vmatprep.subr.bf16.mxu1 %v4977_v52  ;;  %v6720_v32 = vld [vmem:[#allocation2 + $0x111] sm:$0xff] }
  0xc3   : > { %4352 = vmatmul.mubr.f32.gmra.mrb[4].mxu1 %v6204_v46  ;;  %4693 = vmatmul.mubr.f32.gmra.mrb[18].mxu0 %v6055_v21  ;;  %v3631_v21 = vld [vmem:[%s7043_s5 + $0x1d0] sm:$0xff]  ;;  %v3634_v46 = vld [vmem:[%s7043_s5 + $0x1e8] sm:$0xff] }
  0xc4   : > { %4354 = vmatprep.mubr.f32.mxu1 %v6211_v39  ;;  %5471 = vmatprep.mubr.msk.f32.mxu0 %vm547_vm0, %v6068_v45  ;;  %v4989_v45 = vpack.c.bf16 %v3632_v1, %v3631_v21  ;;  %v3636_v39 = vld [vmem:[%s7043_s5 + $0x1f8] sm:$0xff]  ;;  %v7111_v21 = vld [vmem:[#allocation15_spill] sm:$0xff] }
  0xc5   : > { %4980 = vmatpush3.bf16.msra.mxu1 %v4977_v52  ;;  %v6710_v52 = vld [vmem:[#allocation2 + $0xf9] sm:$0xff]  ;;  %v6730_v1 = vld [vmem:[#allocation2 + $0x129] sm:$0xff] }
  0xc6   : > { %4982 = vmatprep.subr.bf16.mxu1 %v4981_v6 }
  0xc7   : > { %4355 = vmatmul.mubr.f32.gmra.mrb[6].mxu1 %v6226_v54  ;;  %4696 = vmatmul.mubr.f32.gmra.mrb[20].mxu0 %v6077_v3  ;;  %v3633_v3 = vld [vmem:[%s7043_s5 + $0x1e0] sm:$0xff] }
  0xc8   : > { %4357 = vmatprep.mubr.f32.mxu1 %v6228_v38  ;;  %5472 = vmatprep.mubr.msk.f32.mxu0 %vm547_vm0, %v6088_v37  ;;  %v4993_v37 = vpack.c.bf16 %v3634_v46, %v3633_v3  ;;  %v3707_v38 = vld [vmem:[%s7043_s5 + $0x430] sm:$0xff]  ;;  %v6732_v3 = vld [vmem:[#allocation2 + $0x139] sm:$0xff] }
  0xc9   : > { %4984 = vmatpush3.bf16.msra.mxu1 %v4981_v6  ;;  %v7108_v6 = vld [vmem:[#allocation13_spill] sm:$0xff] }
  0xca   : > { %4986 = vmatprep.subr.bf16.mxu1 %v4985_v5  ;;  %v7112_v46 = vld [vmem:[#allocation5_spill] sm:$0xff] }
  0xcb   : > { %4358 = vmatmul.mubr.f32.gmra.mrb[8].mxu1 %v6238_v50  ;;  %4699 = vmatmul.mubr.f32.gmra.mrb[22].mxu0 %v6102_v58  ;;  %v3635_v58 = vld [vmem:[%s7043_s5 + $0x1f0] sm:$0xff]  ;;  %v3708_v50 = vld [vmem:[%s7043_s5 + $0x438] sm:$0xff] }
  0xcc   : > { %4360 = vmatprep.mubr.f32.mxu1 %v6240_v31  ;;  %5473 = vmatprep.mubr.msk.f32.mxu0 %vm547_vm0, %v6128_v53  ;;  %v4997_v53 = vpack.c.bf16 %v3636_v39, %v3635_v58  ;;  %v2757_v31 = vld [vmem:[#allocation2 + $0x69] sm:$0xff]  ;;  %v6739_v58 = vld [vmem:[#allocation2 + $0x141] sm:$0xff]  ;;  %v6741_v39 = vld [vmem:[#allocation2 + $0x151] sm:$0xff] }
  0xcd   : > { %4988 = vmatpush3.bf16.msra.mxu1 %v4985_v5  ;;  %v6722_v5 = vld [vmem:[#allocation2 + $0x121] sm:$0xff] }
  0xce   : > { %4990 = vmatprep.subr.bf16.mxu1 %v4989_v45 }
  0xcf   : > { %4361 = vmatmul.mubr.f32.gmra.mrb[10].mxu1 %v6250_v4  ;;  %4702 = vmatmul.mubr.f32.gmra.mrb[24].mxu0 %v6130_v34  ;;  %v7102_v34 = vmax.f32 %v6184_v29, 0.0  ;;  %v2754_v29 = vld [vmem:[#allocation2 + $0x49] sm:$0xff]  ;;  %v2756_v4 = vld [vmem:[#allocation2 + $0x61] sm:$0xff] }
  0xd0   : > { %4363 = vmatprep.mubr.f32.mxu1 %v6252_v12  ;;  %5474 = vmatprep.mubr.msk.f32.mxu0 %vm547_vm0, %v6142_v17  ;;  %v7103_v17 = vmax.f32 %v6188_v33, 0.0  ;;  %v3705_v33 = vld [vmem:[%s7043_s5 + $0x420] sm:$0xff]  ;;  %v3706_v12 = vld [vmem:[%s7043_s5 + $0x428] sm:$0xff] }
  0xd1   : > { %4992 = vmatpush3.bf16.msra.mxu1 %v4989_v45  ;;  %v5137_v54 = vpack.c.bf16 %v3706_v12, %v3705_v33  ;;  %v1535_v45 = vld [vmem:[#allocation2 + $0x78] sm:$0xff]  ;;  %v1542_v12 = vld [vmem:[#allocation2 + $0xc8] sm:$0xff] }
  0xd2   : > { %4994 = vmatprep.subr.bf16.mxu1 %v4993_v37  ;;  %v7116_v33 = vld [vmem:[#allocation8_spill] sm:$0xff] }
  0xd3   : > { %4364 = vmatmul.mubr.f32.gmra.mrb[12].mxu1 %v6262_v26  ;;  %4705 = vmatmul.mubr.f32.gmra.mrb[26].mxu0 %v6149_v36  ;;  %v2752_v26 = vld [vmem:[#allocation2 + $0x31] sm:$0xff] }
  0xd4   : > { %4366 = vmatprep.mubr.f32.mxu1 %v6264_v59  ;;  %5475 = vmatprep.mubr.msk.f32.mxu0 %vm547_vm0, %v7102_v34  ;;  %v3703_v59 = vld [vmem:[%s7043_s5 + $0x410] sm:$0xff]  ;;  %v1538_v34 = vld [vmem:[#allocation2 + $0x98] sm:$0xff] }
  0xd5   : > { %4996 = vmatpush3.bf16.msra.mxu1 %v4993_v37  ;;  %v5133_v36 = vpack.c.bf16 %v3704_v57, %v3703_v59  ;;  %v7113_v37 = vld [vmem:[#allocation16_spill] sm:$0xff]  ;;  %v6750_v59 = vld [vmem:[#allocation2 + $0x169] sm:$0xff] }
  0xd6   : > { %4998 = vmatprep.subr.bf16.mxu1 %v4997_v53  ;;  %v7115_v57 = vld [vmem:[#allocation7_spill] sm:$0xff] }
  0xd7   : > { %4367 = vmatmul.mubr.f32.gmra.mrb[14].mxu1 %v6274_v51  ;;  %4708 = vmatmul.mubr.f32.gmra.mrb[28].mxu0 %v7103_v17  ;;  %v2753_v51 = vld [vmem:[#allocation2 + $0x39] sm:$0xff] }
  0xd8   : > { %4369 = vmatprep.mubr.f32.mxu1 %v6276_v0  ;;  %4710 = vmatprep.mubr.f32.mxu0 %v6291_v43  ;;  %v2758_v0 = vld [vmem:[#allocation2 + $0x79] sm:$0xff] }
  0xd9   : > { %5000 = vmatpush3.bf16.msra.mxu1 %v4997_v53  ;;  %v7114_v53 = vld [vmem:[#allocation6_spill] sm:$0xff]  ;;  %v6748_v17 = vld [vmem:[#allocation2 + $0x159] sm:$0xff] }
  0xda   : > { %5161 = vmatprep.subr.bf16.mxu1 %v5559_v8 }
  0xdb   : > { %4370 = vmatmul.mubr.f32.gmra.mrb[16].mxu1 %v6295_v10  ;;  %4711 = vmatmul.mubr.f32.gmra.mrb[30].mxu0 %v6291_v43  ;;  %v2755_v43 = vld [vmem:[#allocation2 + $0x51] sm:$0xff]  ;;  %v5141_v10 = vpack.c.bf16 %v3708_v50, %v3707_v38  ;;  %v7117_v38 = vld [vmem:[#allocation9_spill] sm:$0xff] }
  0xdc   : > { %4372 = vmatprep.mubr.f32.mxu1 %v6297_v42  ;;  %4745 = vmatprep.mubr.f32.mxu0 %v2752_v26  ;;  %v3709_v42 = vld [vmem:[%s7043_s5 + $0x440] sm:$0xff]  ;;  %v1539_v26 = vld [vmem:[#allocation2 + $0xa8] sm:$0xff] }
  0xdd   : > { %v1544_v50 = vld [vmem:[#allocation2 + $0xe0] sm:$0xff] }
  0xdf   : > { %4373 = vmatmul.mubr.f32.gmra.mrb[18].mxu1 %v6314_v30  ;;  %4746 = vmatmul.mubr.f32.vlgmr.msra.gmra.mrb[0].mxu0 %v2753_v51  ;;  %v3710_v30 = vld [vmem:[%s7043_s5 + $0x448] sm:$0xff]  ;;  %v6756_v51 = vld [vmem:[#allocation2 + $0x171] sm:$0xff] }
  0xe0   : > { %5132 = vmatpush3.bf16.msra.mxu0 %v6553_v11  ;;  %4375 = vmatprep.mubr.f32.mxu1 %v6317_v44  ;;  %v2759_v44 = vld [vmem:[#allocation2 + $0x81] sm:$0xff] }
  0xe1   : > { %4748 = vmatprep.mubr.f32.mxu0 %v2754_v29  ;;  %5134 = vmatprep.subr.bf16.mxu0 %v5133_v36  ;;  %v1528_v11 = vld [vmem:[#allocation2 + $0x20] sm:$0xff] }
  0xe2   : > { %v6758_v29 = vld [vmem:[#allocation2 + $0x181] sm:$0xff] }
  0xe3   : > { %4376 = vmatmul.mubr.f32.gmra.mrb[20].mxu1 %v6334_v18  ;;  %4749 = vmatmul.mubr.f32.gmra.mrb[2].mxu0 %v2755_v43  ;;  %v2760_v18 = vld [vmem:[#allocation2 + $0x91] sm:$0xff]  ;;  %v6764_v43 = vld [vmem:[#allocation2 + $0x189] sm:$0xff] }
  0xe4   : > { %4378 = vmatprep.mubr.f32.mxu1 %v6336_v25  ;;  %4751 = vmatprep.mubr.f32.mxu0 %v2756_v4  ;;  %v5145_v25 = vpack.c.bf16 %v3710_v30, %v3709_v42  ;;  %v1543_v4 = vld [vmem:[#allocation2 + $0xd8] sm:$0xff] }
  0xe5   : > { %5136 = vmatpush3.bf16.msra.mxu0 %v5133_v36  ;;  %v1541_v36 = vld [vmem:[#allocation2 + $0xc0] sm:$0xff]  ;;  %v1546_v42 = vld [vmem:[#allocation2 + $0xf8] sm:$0xff] }
  0xe6   : > { %5138 = vmatprep.subr.bf16.mxu0 %v5137_v54  ;;  %v3059_v30 = vld [vmem:[#allocation2 + $0x3a] sm:$0xff] }
  0xe7   : > { %4379 = vmatmul.mubr.f32.gmra.mrb[22].mxu1 %v6352_v63  ;;  %4752 = vmatmul.mubr.f32.gmra.mrb[4].mxu0 %v2757_v31  ;;  %v3711_v63 = vld [vmem:[%s7043_s5 + $0x450] sm:$0xff]  ;;  %v2783_v31 = vld [vmem:[#allocation2 + $0x1a1] sm:$0xff] }
  0xe8   : > { %4381 = vmatprep.mubr.f32.mxu1 %v6354_v20  ;;  %4754 = vmatprep.mubr.f32.mxu0 %v2758_v0  ;;  %v2761_v20 = vld [vmem:[#allocation2 + $0x99] sm:$0xff]  ;;  %v5149_v9 = vpack.c.bf16 %v3712_v62, %v3711_v63  ;;  %v1545_v0 = vld [vmem:[#allocation2 + $0xf0] sm:$0xff] }
  0xe9   : > { %5140 = vmatpush3.bf16.msra.mxu0 %v5137_v54  ;;  %v2782_v54 = vld [vmem:[#allocation2 + $0x199] sm:$0xff] }
  0xea   : > { %5142 = vmatprep.subr.bf16.mxu0 %v5141_v10  ;;  %v3061_v63 = vld [vmem:[#allocation2 + $0x52] sm:$0xff]  ;;  %v1549_v62 = vld [vmem:[#allocation2 + $0x120] sm:$0xff] }
  0xeb   : > { %4382 = vmatmul.mubr.f32.gmra.mrb[24].mxu1 %v6370_v40  ;;  %4755 = vmatmul.mubr.f32.gmra.mrb[6].mxu0 %v2759_v44  ;;  %v3713_v40 = vld [vmem:[%s7043_s5 + $0x460] sm:$0xff]  ;;  %v1547_v44 = vld [vmem:[#allocation2 + $0x108] sm:$0xff] }
  0xec   : > { %4384 = vmatprep.mubr.f32.mxu1 %v6372_v24  ;;  %4757 = vmatprep.mubr.f32.mxu0 %v2760_v18  ;;  %v2763_v24 = vld [vmem:[#allocation2 + $0xb1] sm:$0xff]  ;;  %v5153_v41 = vpack.c.bf16 %v3714_v23, %v3713_v40  ;;  %v3064_v23 = vld [vmem:[#allocation2 + $0x7a] sm:$0xff] }
  0xed   : > { %5144 = vmatpush3.bf16.msra.mxu0 %v5141_v10  ;;  %v3058_v10 = vld [vmem:[#allocation2 + $0x32] sm:$0xff]  ;;  %v3060_v18 = vld [vmem:[#allocation2 + $0x4a] sm:$0xff] }
  0xee   : > { %5146 = vmatprep.subr.bf16.mxu0 %v5145_v25  ;;  %v1551_v40 = vld [vmem:[#allocation2 + $0x138] sm:$0xff] }
  0xef   : > { %4385 = vmatmul.mubr.f32.gmra.mrb[26].mxu1 %v6387_v7  ;;  %4758 = vmatmul.mubr.f32.gmra.mrb[8].mxu0 %v2761_v20  ;;  %v3715_v7 = vld [vmem:[%s7043_s5 + $0x470] sm:$0xff]  ;;  %v3062_v20 = vld [vmem:[#allocation2 + $0x62] sm:$0xff] }
  0xf0   : > { %4387 = vmatprep.mubr.f32.mxu1 %v6389_v55  ;;  %4760 = vmatprep.mubr.f32.mxu0 %v2762_v47  ;;  %v2765_v55 = vld [vmem:[#allocation2 + $0xc9] sm:$0xff]  ;;  %v5157_v35 = vpack.c.bf16 %v3716_v27, %v3715_v7  ;;  %v1554_v7 = vld [vmem:[#allocation2 + $0x158] sm:$0xff] }
  0xf1   : > { %5148 = vmatpush3.bf16.msra.mxu0 %v5145_v25  ;;  %v1548_v25 = vld [vmem:[#allocation2 + $0x110] sm:$0xff]  ;;  %v1550_v47 = vld [vmem:[#allocation2 + $0x128] sm:$0xff]  ;;  %v3067_v27 = vld [vmem:[#allocation2 + $0x9a] sm:$0xff] }
  0xf2   : > { %5150 = vmatprep.subr.bf16.mxu0 %v5149_v9 }
  0xf3   : > { %4388 = vmatmul.mubr.f32.gmra.mrb[28].mxu1 %v7104_v19  ;;  %4761 = vmatmul.mubr.f32.gmra.mrb[10].mxu0 %v2763_v24  ;;  %v1552_v24 = vld [vmem:[#allocation2 + $0x140] sm:$0xff]  ;;  %v3066_v19 = vld [vmem:[#allocation2 + $0x92] sm:$0xff] }
  0xf4   : > { %4390 = vmatprep.mubr.f32.mxu1 %v6406_v61  ;;  %4763 = vmatprep.mubr.f32.mxu0 %v2764_v22  ;;  %v7106_v61 = vld [vmem:[#allocation12_spill] sm:$0xff]  ;;  %v3065_v22 = vld [vmem:[#allocation2 + $0x82] sm:$0xff] }
  0xf5   : > { %5152 = vmatpush3.bf16.msra.mxu0 %v5149_v9  ;;  %v3063_v9 = vld [vmem:[#allocation2 + $0x6a] sm:$0xff] }
  0xf6   : > { %5154 = vmatprep.subr.bf16.mxu0 %v5153_v41 }
  0xf7   : > { %4391 = vmatmul.mubr.f32.gmra.mrb[30].mxu1 %v7105_v14  ;;  %4764 = vmatmul.mubr.f32.gmra.mrb[12].mxu0 %v2765_v55  ;;  %v1555_v55 = vld [vmem:[#allocation2 + $0x168] sm:$0xff]  ;;  %v3069_v14 = vld [vmem:[#allocation2 + $0xb2] sm:$0xff] }
  0xf8   : > { %4425 = vmatprep.mubr.f32.mxu1 %v1527_v56  ;;  %4766 = vmatprep.mubr.f32.mxu0 %v6699_v28  ;;  %v3068_v56 = vld [vmem:[#allocation2 + $0xaa] sm:$0xff] }
  0xf9   : > { %5156 = vmatpush3.bf16.msra.mxu0 %v5153_v41  ;;  %v1553_v41 = vld [vmem:[#allocation2 + $0x150] sm:$0xff] }
  0xfa   : > { %5158 = vmatprep.subr.bf16.mxu0 %v5157_v35 }
  0xfb   : > { %4426 = vmatmul.mubr.f32.vlgmr.msra.gmra.mrb[0].mxu1 %v1528_v11  ;;  %4767 = vmatmul.mubr.f32.gmra.mrb[14].mxu0 %v6703_v60  ;;  %v3070_v11 = vld [vmem:[#allocation2 + $0xc2] sm:$0xff] }
  0xfc   : > { %4428 = vmatprep.mubr.f32.mxu1 %v7106_v61  ;;  %4769 = vmatprep.mubr.f32.mxu0 %v6705_v16  ;;  %v5447_v61 = vld [vmem:[#allocation2 + $0x180] sm:$0xff] }
  0xfd   : > { %5169 = vmatpush3.bf16.msra.mxu1 %v5559_v8  ;;  %5160 = vmatpush3.bf16.msra.mxu0 %v5157_v35  ;;  %v7110_v8 = vld [vmem:[#allocation4_spill] sm:$0xff]  ;;  %v1556_v35 = vld [vmem:[#allocation2 + $0x170] sm:$0xff] }
  0xfe   : > { %5162 = vmatprep.subr.bf16.mxu1 %v7107_v15 }
  0xff   : > { %4429 = vmatmul.mubr.f32.gmra.mrb[2].mxu1 %v7108_v6  ;;  %4770 = vmatmul.mubr.f32.gmra.mrb[16].mxu0 %v6710_v52  ;;  %v3072_v6 = vld [vmem:[#allocation2 + $0xda] sm:$0xff] }
 0x100   : > { %4431 = vmatprep.mubr.f32.mxu1 %v7109_v48  ;;  %4772 = vmatprep.mubr.f32.mxu0 %v6713_v2  ;;  %v5448_v48 = vld [vmem:[#allocation2 + $0x188] sm:$0xff] }
 0x101   : > { %5170 = vmatpush3.bf16.msra.mxu1 %v7107_v15  ;;  %v3071_v15 = vld [vmem:[#allocation2 + $0xca] sm:$0xff] }
 0x102   : > { %5163 = vmatprep.subr.bf16.mxu1 %v7110_v8 }
 0x103   : > { %4432 = vmatmul.mubr.f32.gmra.mrb[4].mxu1 %v7111_v21  ;;  %4773 = vmatmul.mubr.f32.gmra.mrb[18].mxu0 %v6720_v32  ;;  %v3074_v21 = vld [vmem:[#allocation2 + $0xf2] sm:$0xff] }
 0x104   : > { %4434 = vmatprep.mubr.f32.mxu1 %v6462_v49  ;;  %4775 = vmatprep.mubr.f32.mxu0 %v6722_v5  ;;  %v1537_v49 = vld [vmem:[#allocation2 + $0x90] sm:$0xff] }
 0x105   : > { %5171 = vmatpush3.bf16.msra.mxu1 %v7110_v8  ;;  %v3073_v8 = vld [vmem:[#allocation2 + $0xe2] sm:$0xff] }
 0x106   : > { %5164 = vmatprep.subr.bf16.mxu1 %v7112_v46 }
 0x107   : > { %4435 = vmatmul.mubr.f32.gmra.mrb[6].mxu1 %v7113_v37  ;;  %4776 = vmatmul.mubr.f32.gmra.mrb[20].mxu0 %v6730_v1  ;;  %v3077_v37 = vld [vmem:[#allocation2 + $0x112] sm:$0xff] }
 0x108   : > { %4437 = vmatprep.mubr.f32.mxu1 %v1535_v45  ;;  %4778 = vmatprep.mubr.f32.mxu0 %v6732_v3  ;;  %v3075_v45 = vld [vmem:[#allocation2 + $0xfa] sm:$0xff] }
 0x109   : > { %5172 = vmatpush3.bf16.msra.mxu1 %v7112_v46  ;;  %v3076_v46 = vld [vmem:[#allocation2 + $0x10a] sm:$0xff] }
 0x10a   : > { %5165 = vmatprep.subr.bf16.mxu1 %v7114_v53 }
 0x10b   : > { %4438 = vmatmul.mubr.f32.gmra.mrb[8].mxu1 %v6492_v13  ;;  %4779 = vmatmul.mubr.f32.gmra.mrb[22].mxu0 %v6739_v58  ;;  %v1540_v13 = vld [vmem:[#allocation2 + $0xb0] sm:$0xff] }
 0x10c   : > { %4440 = vmatprep.mubr.f32.mxu1 %v1537_v49  ;;  %4781 = vmatprep.mubr.f32.mxu0 %v6741_v39  ;;  %v3078_v49 = vld [vmem:[#allocation2 + $0x122] sm:$0xff] }
 0x10d   : > { %5173 = vmatpush3.bf16.msra.mxu1 %v7114_v53 }
 0x10e   : > { %5166 = vmatprep.subr.bf16.mxu1 %v7115_v57 }
 0x10f   : > { %4441 = vmatmul.mubr.f32.gmra.mrb[10].mxu1 %v1538_v34  ;;  %4782 = vmatmul.mubr.f32.gmra.mrb[24].mxu0 %v6748_v17 }
 0x110   : > { %4443 = vmatprep.mubr.f32.mxu1 %v1539_v26  ;;  %4784 = vmatprep.mubr.f32.mxu0 %v6750_v59 }
 0x111   : > { %5174 = vmatpush3.bf16.msra.mxu1 %v7115_v57 }
 0x112   : > { %5167 = vmatprep.subr.bf16.mxu1 %v7116_v33 }
 0x113   : > { %4444 = vmatmul.mubr.f32.gmra.mrb[12].mxu1 %v1540_v13  ;;  %4785 = vmatmul.mubr.f32.gmra.mrb[26].mxu0 %v6756_v51 }
 0x114   : > { %4446 = vmatprep.mubr.f32.mxu1 %v1541_v36  ;;  %4787 = vmatprep.mubr.f32.mxu0 %v6758_v29 }
 0x115   : > { %5175 = vmatpush3.bf16.msra.mxu1 %v7116_v33 }
 0x116   : > { %5168 = vmatprep.subr.bf16.mxu1 %v7117_v38 }
 0x117   : > { %4447 = vmatmul.mubr.f32.gmra.mrb[14].mxu1 %v1542_v12  ;;  %4788 = vmatmul.mubr.f32.gmra.mrb[28].mxu0 %v6764_v43 }
 0x118   : > { %4449 = vmatprep.mubr.f32.mxu1 %v1543_v4  ;;  %4790 = vmatprep.mubr.f32.mxu0 %v2782_v54 }
 0x119   : > { %5176 = vmatpush3.bf16.msra.mxu1 %v7117_v38 }
 0x11b   : > { %4450 = vmatmul.mubr.f32.gmra.mrb[16].mxu1 %v1544_v50  ;;  %4791 = vmatmul.mubr.f32.gmra.mrb[30].mxu0 %v2783_v31 }
 0x11c   : > { %4452 = vmatprep.mubr.f32.mxu1 %v1545_v0  ;;  %4825 = vmatprep.mubr.f32.mxu0 %v3058_v10 }
 0x11f   : > { %4453 = vmatmul.mubr.f32.gmra.mrb[18].mxu1 %v1546_v42  ;;  %4826 = vmatmul.mubr.f32.vlgmr.msra.gmra.mrb[0].mxu0 %v3059_v30 }
 0x120   : > { %4455 = vmatprep.mubr.f32.mxu1 %v1547_v44  ;;  %4828 = vmatprep.mubr.f32.mxu0 %v3060_v18 }
 0x123   : > { %4456 = vmatmul.mubr.f32.gmra.mrb[20].mxu1 %v1548_v25  ;;  %4829 = vmatmul.mubr.f32.gmra.mrb[2].mxu0 %v3061_v63 }
 0x124   : > { %4458 = vmatprep.mubr.f32.mxu1 %v1549_v62  ;;  %4831 = vmatprep.mubr.f32.mxu0 %v3062_v20 }
 0x127   : > { %4459 = vmatmul.mubr.f32.gmra.mrb[22].mxu1 %v1550_v47  ;;  %4832 = vmatmul.mubr.f32.gmra.mrb[4].mxu0 %v3063_v9 }
 0x128   : > { %4461 = vmatprep.mubr.f32.mxu1 %v1551_v40  ;;  %4834 = vmatprep.mubr.f32.mxu0 %v3064_v23 }
 0x12b   : > { %4462 = vmatmul.mubr.f32.gmra.mrb[24].mxu1 %v1552_v24  ;;  %4835 = vmatmul.mubr.f32.gmra.mrb[6].mxu0 %v3065_v22 }
 0x12c   : > { %4464 = vmatprep.mubr.f32.mxu1 %v1553_v41  ;;  %4837 = vmatprep.mubr.f32.mxu0 %v3066_v19 }
 0x12f   : > { %4465 = vmatmul.mubr.f32.gmra.mrb[26].mxu1 %v1554_v7  ;;  %4838 = vmatmul.mubr.f32.gmra.mrb[8].mxu0 %v3067_v27 }
 0x130   : > { %4467 = vmatprep.mubr.f32.mxu1 %v1555_v55  ;;  %4840 = vmatprep.mubr.f32.mxu0 %v3068_v56 }
 0x133   : > { %4468 = vmatmul.mubr.f32.gmra.mrb[28].mxu1 %v1556_v35  ;;  %4841 = vmatmul.mubr.f32.gmra.mrb[10].mxu0 %v3069_v14 }
 0x134   : > { %4470 = vmatprep.mubr.f32.mxu1 %v5447_v61  ;;  %4843 = vmatprep.mubr.f32.mxu0 %v3070_v11 }
 0x137   : > { %4471 = vmatmul.mubr.f32.gmra.mrb[30].mxu1 %v5448_v48  ;;  %4844 = vmatmul.mubr.f32.gmra.mrb[12].mxu0 %v3071_v15 }
 0x138   : > { %4529 = vmatprep.mubr.f32.mxu1 %v6699_v28  ;;  %4846 = vmatprep.mubr.f32.mxu0 %v3072_v6  ;;  %v3079_v28 = vld [vmem:[#allocation2 + $0x12a] sm:$0xff] }
 0x13b   : > { %4530 = vmatmul.mubr.f32.vlgmr.msra.gmra.mrb[16].mxu1 %v6703_v60  ;;  %4847 = vmatmul.mubr.f32.gmra.mrb[14].mxu0 %v3073_v8  ;;  %v3080_v60 = vld [vmem:[#allocation2 + $0x13a] sm:$0xff] }
 0x13c   : > { %4532 = vmatprep.mubr.f32.mxu1 %v6705_v16  ;;  %4849 = vmatprep.mubr.f32.mxu0 %v3074_v21  ;;  %v3081_v16 = vld [vmem:[#allocation2 + $0x142] sm:$0xff] }
 0x13f   : > { %4533 = vmatmul.mubr.f32.gmra.mrb[18].mxu1 %v6710_v52  ;;  %4850 = vmatmul.mubr.f32.gmra.mrb[16].mxu0 %v3075_v45  ;;  %v3082_v52 = vld [vmem:[#allocation2 + $0x152] sm:$0xff] }
 0x140   : > { %4535 = vmatprep.mubr.f32.mxu1 %v6713_v2  ;;  %4852 = vmatprep.mubr.f32.mxu0 %v3076_v46  ;;  %v3083_v2 = vld [vmem:[#allocation2 + $0x15a] sm:$0xff] }
 0x143   : > { %4536 = vmatmul.mubr.f32.gmra.mrb[20].mxu1 %v6720_v32  ;;  %4853 = vmatmul.mubr.f32.gmra.mrb[18].mxu0 %v3077_v37  ;;  %v3084_v32 = vld [vmem:[#allocation2 + $0x16a] sm:$0xff] }
 0x144   : > { %4538 = vmatprep.mubr.f32.mxu1 %v6722_v5  ;;  %4855 = vmatprep.mubr.f32.mxu0 %v3078_v49  ;;  %v3085_v5 = vld [vmem:[#allocation2 + $0x172] sm:$0xff] }
 0x147   : > { %4539 = vmatmul.mubr.f32.gmra.mrb[22].mxu1 %v6730_v1  ;;  %4856 = vmatmul.mubr.f32.gmra.mrb[20].mxu0 %v3079_v28  ;;  %v3086_v1 = vld [vmem:[#allocation2 + $0x182] sm:$0xff] }
 0x148   : > { %4541 = vmatprep.mubr.f32.mxu1 %v6732_v3  ;;  %4858 = vmatprep.mubr.f32.mxu0 %v3080_v60  ;;  %v3087_v3 = vld [vmem:[#allocation2 + $0x18a] sm:$0xff] }
 0x14b   : > { %4542 = vmatmul.mubr.f32.gmra.mrb[24].mxu1 %v6739_v58  ;;  %4859 = vmatmul.mubr.f32.gmra.mrb[22].mxu0 %v3081_v16  ;;  %v3088_v58 = vld [vmem:[#allocation2 + $0x19a] sm:$0xff] }
 0x14c   : > { %4544 = vmatprep.mubr.f32.mxu1 %v6741_v39  ;;  %4861 = vmatprep.mubr.f32.mxu0 %v3082_v52  ;;  %v3089_v39 = vld [vmem:[#allocation2 + $0x1a2] sm:$0xff] }
 0x14f   : > { %4545 = vmatmul.mubr.f32.gmra.mrb[26].mxu1 %v6748_v17  ;;  %4862 = vmatmul.mubr.f32.gmra.mrb[24].mxu0 %v3083_v2 }
 0x150   : > { %4547 = vmatprep.mubr.f32.mxu1 %v6750_v59  ;;  %4864 = vmatprep.mubr.f32.mxu0 %v3084_v32 }
 0x153   : > { %4548 = vmatmul.mubr.f32.gmra.mrb[28].mxu1 %v6756_v51  ;;  %4865 = vmatmul.mubr.f32.gmra.mrb[26].mxu0 %v3085_v5 }
 0x154   : > { %4550 = vmatprep.mubr.f32.mxu1 %v6758_v29  ;;  %4867 = vmatprep.mubr.f32.mxu0 %v3086_v1 }
 0x157   : > { %4551 = vmatmul.mubr.f32.gmra.mrb[30].mxu1 %v6764_v43  ;;  %4868 = vmatmul.mubr.f32.gmra.mrb[28].mxu0 %v3087_v3 }
 0x158   : > { %4870 = vmatprep.mubr.f32.mxu0 %v3088_v58 }
 0x15b   : > { %4871 = vmatmul.mubr.f32.gmra.mrb[30].mxu0 %v3089_v39 }
 0x1ce   : > { %v4427_v53 = vpop.f32.mrb[0].mxu1 }
 0x1cf   : > { %v1642_v34 = vpop.f32.mrb[1].mxu1 }
 0x1d2   : > { %v4430_v17 = vpop.f32.mrb[2].mxu1 }
 0x1d3   : > { %v1652_v26 = vpop.f32.mrb[3].mxu1 }
 0x1d6   : > { %v4433_v59 = vpop.f32.mrb[4].mxu1 }
 0x1d7   : > { %v1662_v57 = vpop.f32.mrb[5].mxu1 }
 0x1da   : > { %v4436_v13 = vpop.f32.mrb[6].mxu1 }
 0x1db   : > { %v1672_v51 = vpop.f32.mrb[7].mxu1 }
 0x1de   : > { %v4439_v36 = vpop.f32.mrb[8].mxu1 }
 0x1df   : > { %v1682_v29 = vpop.f32.mrb[9].mxu1 }
 0x1e2   : > { %v4442_v33 = vpop.f32.mrb[10].mxu1 }
 0x1e3   : > { %v1692_v12 = vpop.f32.mrb[11].mxu1 }
 0x1e6   : > { %v4445_v4 = vpop.f32.mrb[12].mxu1 }
 0x1e7   : > { %v1702_v54 = vpop.f32.mrb[13].mxu1 }
 0x1ea   : > { %v4448_v43 = vpop.f32.mrb[14].mxu1 }
 0x1eb   : > { %v1712_v38 = vpop.f32.mrb[15].mxu1 }
 0x1f2   : > { %v4827_v50 = vpop.f32.mrb[0].mxu0 }
 0x1f3   : > { %v6792_v31 = vadd.f32 %v4827_v50, %v4427_v53  ;;  %v3173_v0 = vpop.f32.mrb[1].mxu0 }
 0x1f4   : > { %v6794_v10 = vadd.f32 %v3173_v0, %v1642_v34 }
 0x1f5   : > { %3365 = vst [vmem:[%s6790_s25 + $0x8] sm:$0xff] %v6792_v31 }
 0x1f6   : > { %3364 = vst [vmem:[%s6790_s25] sm:$0xff] %v6794_v10  ;;  %v4830_v42 = vpop.f32.mrb[2].mxu0 }
 0x1f7   : > { %v6800_v30 = vadd.f32 %v4830_v42, %v4430_v17  ;;  %v3183_v44 = vpop.f32.mrb[3].mxu0 }
 0x1f8   : > { %v6802_v18 = vadd.f32 %v3183_v44, %v1652_v26 }
 0x1f9   : > { %3367 = vst [vmem:[%s6790_s25 + $0x18] sm:$0xff] %v6800_v30 }
 0x1fa   : > { %3366 = vst [vmem:[%s6790_s25 + $0x10] sm:$0xff] %v6802_v18  ;;  %v4833_v25 = vpop.f32.mrb[4].mxu0 }
 0x1fb   : > { %v6808_v63 = vadd.f32 %v4833_v25, %v4433_v59  ;;  %v3193_v62 = vpop.f32.mrb[5].mxu0 }
 0x1fc   : > { %v6810_v20 = vadd.f32 %v3193_v62, %v1662_v57 }
 0x1fd   : > { %3369 = vst [vmem:[%s6790_s25 + $0x28] sm:$0xff] %v6808_v63 }
 0x1fe   : > { %3368 = vst [vmem:[%s6790_s25 + $0x20] sm:$0xff] %v6810_v20  ;;  %v4836_v47 = vpop.f32.mrb[6].mxu0 }
 0x1ff   : > { %v6816_v9 = vadd.f32 %v4836_v47, %v4436_v13  ;;  %v3203_v40 = vpop.f32.mrb[7].mxu0 }
 0x200   : > { %v6818_v23 = vadd.f32 %v3203_v40, %v1672_v51 }
 0x201   : > { %3371 = vst [vmem:[%s6790_s25 + $0x38] sm:$0xff] %v6816_v9 }
 0x202   : > { %3370 = vst [vmem:[%s6790_s25 + $0x30] sm:$0xff] %v6818_v23  ;;  %v4839_v24 = vpop.f32.mrb[8].mxu0 }
 0x203   : > { %v6824_v22 = vadd.f32 %v4839_v24, %v4439_v36  ;;  %v3213_v41 = vpop.f32.mrb[9].mxu0 }
 0x204   : > { %v6826_v19 = vadd.f32 %v3213_v41, %v1682_v29 }
 0x205   : > { %3373 = vst [vmem:[%s6790_s25 + $0x48] sm:$0xff] %v6824_v22 }
 0x206   : > { %3372 = vst [vmem:[%s6790_s25 + $0x40] sm:$0xff] %v6826_v19  ;;  %v4842_v7 = vpop.f32.mrb[10].mxu0 }
 0x207   : > { %v6832_v27 = vadd.f32 %v4842_v7, %v4442_v33  ;;  %v3223_v55 = vpop.f32.mrb[11].mxu0 }
 0x208   : > { %v6834_v56 = vadd.f32 %v3223_v55, %v1692_v12 }
 0x209   : > { %3375 = vst [vmem:[%s6790_s25 + $0x58] sm:$0xff] %v6832_v27 }
 0x20a   : > { %3374 = vst [vmem:[%s6790_s25 + $0x50] sm:$0xff] %v6834_v56  ;;  %v4845_v35 = vpop.f32.mrb[12].mxu0 }
 0x20b   : > { %v6840_v14 = vadd.f32 %v4845_v35, %v4445_v4  ;;  %v3233_v11 = vpop.f32.mrb[13].mxu0 }
 0x20c   : > { %v6842_v61 = vadd.f32 %v3233_v11, %v1702_v54 }
 0x20d   : > { %3377 = vst [vmem:[%s6790_s25 + $0x68] sm:$0xff] %v6840_v14 }
 0x20e   : > { %3376 = vst [vmem:[%s6790_s25 + $0x60] sm:$0xff] %v6842_v61  ;;  %v4531_v15 = vpop.f32.mrb[16].mxu1  ;;  %v4848_v6 = vpop.f32.mrb[14].mxu0 }
 0x20f   : > { %v6848_v48 = vadd.f32 %v4848_v6, %v4448_v43  ;;  %v2028_v8 = vpop.f32.mrb[17].mxu1  ;;  %v3243_v21 = vpop.f32.mrb[15].mxu0 }
 0x210   : > { %v6850_v45 = vadd.f32 %v3243_v21, %v1712_v38 }
 0x211   : > { %3379 = vst [vmem:[%s6790_s25 + $0x78] sm:$0xff] %v6848_v48 }
 0x212   : > { %3378 = vst [vmem:[%s6790_s25 + $0x70] sm:$0xff] %v6850_v45  ;;  %v4534_v46 = vpop.f32.mrb[18].mxu1  ;;  %v4851_v37 = vpop.f32.mrb[16].mxu0 }
 0x213   : > { %v6856_v49 = vadd.f32 %v4851_v37, %v4531_v15  ;;  %v2038_v28 = vpop.f32.mrb[19].mxu1  ;;  %v3253_v60 = vpop.f32.mrb[17].mxu0 }
 0x214   : > { %v6858_v16 = vadd.f32 %v3253_v60, %v2028_v8  ;;  %v5485_v8 = vmov (!%p3717_p4), 0.0  }
 0x215   : > { %3381 = vst [vmem:[%s6790_s25 + $0x88] sm:$0xff] %v6856_v49  ;;  %3400 = vst [vmem:[%s7045_s7] sm:$0x1] (!%p3717_p4), %v5485_v8 }
 0x216   : > { %3380 = vst [vmem:[%s6790_s25 + $0x80] sm:$0xff] %v6858_v16  ;;  %v4537_v52 = vpop.f32.mrb[20].mxu1  ;;  %v4854_v2 = vpop.f32.mrb[18].mxu0  ;;  %3401 = vst [vmem:[%s7046_s8] sm:$0x1] (!%p3717_p4), %v5485_v8 }
 0x217   : > { %v6864_v32 = vadd.f32 %v4854_v2, %v4534_v46  ;;  %v2048_v5 = vpop.f32.mrb[21].mxu1  ;;  %v3263_v1 = vpop.f32.mrb[19].mxu0 }
 0x218   : > { %v6866_v3 = vadd.f32 %v3263_v1, %v2038_v28 }
 0x219   : > { %3383 = vst [vmem:[%s6790_s25 + $0x98] sm:$0xff] %v6864_v32 }
 0x21a   : > { %3382 = vst [vmem:[%s6790_s25 + $0x90] sm:$0xff] %v6866_v3  ;;  %v4540_v58 = vpop.f32.mrb[22].mxu1  ;;  %v4857_v39 = vpop.f32.mrb[20].mxu0 }
 0x21b   : > { %v6872_v53 = vadd.f32 %v4857_v39, %v4537_v52  ;;  %v2058_v34 = vpop.f32.mrb[23].mxu1  ;;  %v3273_v17 = vpop.f32.mrb[21].mxu0 }
 0x21c   : > { %v6874_v26 = vadd.f32 %v3273_v17, %v2048_v5 }
 0x21d   : > { %3385 = vst [vmem:[%s6790_s25 + $0xa8] sm:$0xff] %v6872_v53 }
 0x21e   : > { %3384 = vst [vmem:[%s6790_s25 + $0xa0] sm:$0xff] %v6874_v26  ;;  %v4543_v59 = vpop.f32.mrb[24].mxu1  ;;  %v4860_v57 = vpop.f32.mrb[22].mxu0 }
 0x21f   : > { %v6880_v13 = vadd.f32 %v4860_v57, %v4540_v58  ;;  %v2068_v51 = vpop.f32.mrb[25].mxu1  ;;  %v3283_v36 = vpop.f32.mrb[23].mxu0 }
 0x220   : > { %v6882_v29 = vadd.f32 %v3283_v36, %v2058_v34 }
 0x221   : > { %3387 = vst [vmem:[%s6790_s25 + $0xb8] sm:$0xff] %v6880_v13 }
 0x222   : > { %3386 = vst [vmem:[%s6790_s25 + $0xb0] sm:$0xff] %v6882_v29  ;;  %v4546_v33 = vpop.f32.mrb[26].mxu1  ;;  %v4863_v12 = vpop.f32.mrb[24].mxu0 }
 0x223   : > { %v6888_v4 = vadd.f32 %v4863_v12, %v4543_v59  ;;  %v2078_v54 = vpop.f32.mrb[27].mxu1  ;;  %v3293_v43 = vpop.f32.mrb[25].mxu0 }
 0x224   : > { %v6890_v38 = vadd.f32 %v3293_v43, %v2068_v51 }
 0x225   : > { %3389 = vst [vmem:[%s6790_s25 + $0xc8] sm:$0xff] %v6888_v4 }
 0x226   : > { %3388 = vst [vmem:[%s6790_s25 + $0xc0] sm:$0xff] %v6890_v38  ;;  %v4549_v50 = vpop.f32.mrb[28].mxu1  ;;  %v4866_v0 = vpop.f32.mrb[26].mxu0 }
 0x227   : > { %v6896_v42 = vadd.f32 %v4866_v0, %v4546_v33  ;;  %v2088_v44 = vpop.f32.mrb[29].mxu1  ;;  %v3303_v25 = vpop.f32.mrb[27].mxu0 }
 0x228   : > { %v6898_v62 = vadd.f32 %v3303_v25, %v2078_v54 }
 0x229   : > { %3391 = vst [vmem:[%s6790_s25 + $0xd8] sm:$0xff] %v6896_v42 }
 0x22a   : > { %3390 = vst [vmem:[%s6790_s25 + $0xd0] sm:$0xff] %v6898_v62  ;;  %v4552_v47 = vpop.f32.mrb[30].mxu1  ;;  %v4869_v40 = vpop.f32.mrb[28].mxu0 }
 0x22b   : > { %v6904_v24 = vadd.f32 %v4869_v40, %v4549_v50  ;;  %v2098_v41 = vpop.f32.mrb[31].mxu1  ;;  %v3313_v7 = vpop.f32.mrb[29].mxu0 }
 0x22c   : > { %v6906_v55 = vadd.f32 %v3313_v7, %v2088_v44  ;;  %3399 = sbr.rel (%p3717_p4) target bundleno = 563 (0x233), region = 48 }
 0x22d   : > { %3393 = vst [vmem:[%s6790_s25 + $0xe8] sm:$0xff] %v6904_v24 }
 0x22e   : > { %3392 = vst [vmem:[%s6790_s25 + $0xe0] sm:$0xff] %v6906_v55  ;;  %v4872_v35 = vpop.f32.mrb[30].mxu0 }
 0x22f   : > { %v6912_v11 = vadd.f32 %v4872_v35, %v4552_v47  ;;  %v3323_v15 = vpop.f32.mrb[31].mxu0 }
 0x230   : > { %v6914_v6 = vadd.f32 %v3323_v15, %v2098_v41 }
 0x231   : > { %3395 = vst [vmem:[%s6790_s25 + $0xf8] sm:$0xff] %v6912_v11 }
 0x232   : > { %3394 = vst [vmem:[%s6790_s25 + $0xf0] sm:$0xff] %v6914_v6 }
 0x233 PF: > { %v3403_v21 = vadd.f32 %v6794_v10, %v6792_v31  ;;  %v3443_v28 = vmul.f32 %v6794_v10, %v6794_v10  ;;  %v3444_v60 = vmul.f32 %v6792_v31, %v6792_v31  ;;  %v3445_v2 = vmul.f32 %v6802_v18, %v6802_v18 }
 0x234   : > { %v3446_v1 = vmul.f32 %v6800_v30, %v6800_v30  ;;  %v3447_v34 = vmul.f32 %v6810_v20, %v6810_v20  ;;  %v3448_v31 = vmul.f32 %v6808_v63, %v6808_v63  ;;  %v3449_v57 = vmul.f32 %v6818_v23, %v6818_v23 }
 0x235   : > { %v3404_v46 = vadd.f32 %v6802_v18, %v3403_v21  ;;  %v3475_v58 = vadd.f32 %v3444_v60, %v3443_v28  ;;  %v3450_v36 = vmul.f32 %v6816_v9, %v6816_v9  ;;  %v3451_v12 = vmul.f32 %v6826_v19, %v6826_v19 }
 0x236   : > { %v3452_v43 = vmul.f32 %v6824_v22, %v6824_v22  ;;  %v3453_v0 = vmul.f32 %v6834_v56, %v6834_v56  ;;  %v3454_v25 = vmul.f32 %v6832_v27, %v6832_v27  ;;  %v3455_v40 = vmul.f32 %v6842_v61, %v6842_v61 }
 0x237   : > { %v3405_v37 = vadd.f32 %v6800_v30, %v3404_v46  ;;  %v3476_v10 = vadd.f32 %v3475_v58, %v3445_v2  ;;  %v3456_v7 = vmul.f32 %v6840_v14, %v6840_v14  ;;  %v3457_v15 = vmul.f32 %v6850_v45, %v6850_v45 }
 0x238   : > { %v3458_v21 = vmul.f32 %v6848_v48, %v6848_v48  ;;  %v3460_v60 = vmul.f32 %v6856_v49, %v6856_v49  ;;  %v3461_v2 = vmul.f32 %v6866_v3, %v6866_v3 }
 0x239   : > { %v3406_v52 = vadd.f32 %v6810_v20, %v3405_v37  ;;  %v3477_v59 = vadd.f32 %v3476_v10, %v3446_v1  ;;  %v3459_v37 = vmul.f32 %v6858_v16, %v6858_v16  ;;  %v3462_v1 = vmul.f32 %v6864_v32, %v6864_v32 }
 0x23a   : > { %v3464_v10 = vmul.f32 %v6872_v53, %v6872_v53 }
 0x23b   : > { %v3407_v5 = vadd.f32 %v6808_v63, %v3406_v52  ;;  %v3478_v51 = vadd.f32 %v3477_v59, %v3447_v34 }
 0x23d   : > { %v3408_v39 = vadd.f32 %v6818_v23, %v3407_v5  ;;  %v3479_v33 = vadd.f32 %v3478_v51, %v3448_v31  ;;  %v3465_v31 = vmul.f32 %v6882_v29, %v6882_v29  ;;  %v3467_v51 = vmul.f32 %v6890_v38, %v6890_v38 }
 0x23f   : > { %v3409_v17 = vadd.f32 %v6816_v9, %v3408_v39  ;;  %v3480_v54 = vadd.f32 %v3479_v33, %v3449_v57  ;;  %v3463_v39 = vmul.f32 %v6874_v26, %v6874_v26 }
 0x241   : > { %v3410_v18 = vadd.f32 %v6826_v19, %v3409_v17  ;;  %v3481_v50 = vadd.f32 %v3480_v54, %v3450_v36  ;;  %v3468_v36 = vmul.f32 %v6888_v4, %v6888_v4  ;;  %v3470_v54 = vmul.f32 %v6896_v42, %v6896_v42 }
 0x243   : > { %v3411_v30 = vadd.f32 %v6824_v22, %v3410_v18  ;;  %v3482_v44 = vadd.f32 %v3481_v50, %v3451_v12  ;;  %v3466_v18 = vmul.f32 %v6880_v13, %v6880_v13 }
 0x245   : > { %v3412_v20 = vadd.f32 %v6834_v56, %v3411_v30  ;;  %v3483_v47 = vadd.f32 %v3482_v44, %v3452_v43  ;;  %v3471_v43 = vmul.f32 %v6906_v55, %v6906_v55  ;;  %v3473_v44 = vmul.f32 %v6914_v6, %v6914_v6 }
 0x247   : > { %v3413_v63 = vadd.f32 %v6832_v27, %v3412_v20  ;;  %v3484_v41 = vadd.f32 %v3483_v47, %v3453_v0  ;;  %v3469_v20 = vmul.f32 %v6898_v62, %v6898_v62 }
 0x249   : > { %v3414_v23 = vadd.f32 %v6842_v61, %v3413_v63  ;;  %v3485_v35 = vadd.f32 %v3484_v41, %v3454_v25 }
 0x24b   : > { %v3415_v9 = vadd.f32 %v6840_v14, %v3414_v23  ;;  %v3486_v8 = vadd.f32 %v3485_v35, %v3455_v40  ;;  %v3472_v23 = vmul.f32 %v6904_v24, %v6904_v24 }
 0x24d   : > { %v3416_v19 = vadd.f32 %v6850_v45, %v3415_v9  ;;  %v3487_v46 = vadd.f32 %v3486_v8, %v3456_v7 }
 0x24f   : > { %v3417_v22 = vadd.f32 %v6848_v48, %v3416_v19  ;;  %v3488_v28 = vadd.f32 %v3487_v46, %v3457_v15 }
 0x251   : > { %v3418_v56 = vadd.f32 %v6858_v16, %v3417_v22  ;;  %v3489_v52 = vadd.f32 %v3488_v28, %v3458_v21 }
 0x253   : > { %v3419_v27 = vadd.f32 %v6856_v49, %v3418_v56  ;;  %v3490_v5 = vadd.f32 %v3489_v52, %v3459_v37 }
 0x255   : > { %v3420_v61 = vadd.f32 %v6866_v3, %v3419_v27  ;;  %v3491_v58 = vadd.f32 %v3490_v5, %v3460_v60  ;;  %v3442_v27 = vld [vmem:[%s7046_s8] sm:$0x1] }
 0x257   : > { %v3421_v14 = vadd.f32 %v6864_v32, %v3420_v61  ;;  %v3492_v34 = vadd.f32 %v3491_v58, %v3461_v2 }
 0x259   : > { %v3422_v45 = vadd.f32 %v6874_v26, %v3421_v14  ;;  %v3493_v17 = vadd.f32 %v3492_v34, %v3462_v1 }
 0x25b   : > { %v3423_v48 = vadd.f32 %v6872_v53, %v3422_v45  ;;  %v3494_v59 = vadd.f32 %v3493_v17, %v3463_v39 }
 0x25d   : > { %v3424_v16 = vadd.f32 %v6882_v29, %v3423_v48  ;;  %v3495_v57 = vadd.f32 %v3494_v59, %v3464_v10 }
 0x25f   : > { %v3425_v49 = vadd.f32 %v6880_v13, %v3424_v16  ;;  %v3496_v30 = vadd.f32 %v3495_v57, %v3465_v31 }
 0x261   : > { %v3426_v3 = vadd.f32 %v6890_v38, %v3425_v49  ;;  %v3497_v33 = vadd.f32 %v3496_v30, %v3466_v18 }
 0x263   : > { %v3427_v32 = vadd.f32 %v6888_v4, %v3426_v3  ;;  %v3498_v12 = vadd.f32 %v3497_v33, %v3467_v51 }
 0x265   : > { %v3428_v26 = vadd.f32 %v6898_v62, %v3427_v32  ;;  %v3499_v63 = vadd.f32 %v3498_v12, %v3468_v36 }
 0x267   : > { %v3429_v53 = vadd.f32 %v6896_v42, %v3428_v26  ;;  %v3500_v50 = vadd.f32 %v3499_v63, %v3469_v20  ;;  %v3474_v42 = vmul.f32 %v6912_v11, %v6912_v11 }
 0x269   : > { %v3430_v29 = vadd.f32 %v6906_v55, %v3429_v53  ;;  %v3501_v0 = vadd.f32 %v3500_v50, %v3470_v54 }
 0x26b   : > { %v3431_v13 = vadd.f32 %v6904_v24, %v3430_v29  ;;  %v3502_v9 = vadd.f32 %v3501_v0, %v3471_v43  ;;  %v3402_v24 = vld [vmem:[%s7045_s7] sm:$0x1] }
 0x26d   : > { %v3432_v38 = vadd.f32 %v6914_v6, %v3431_v13  ;;  %v3503_v47 = vadd.f32 %v3502_v9, %v3472_v23 }
 0x26f   : > { %v3433_v4 = vadd.f32 %v6912_v11, %v3432_v38  ;;  %v3504_v40 = vadd.f32 %v3503_v47, %v3473_v44 }
 0x271   : > { %v3434_v62 = vrot.slane %v3433_v4, 4  ;;  %v3505_v41 = vadd.f32 %v3504_v40, %v3474_v42 }
 0x273   : > { %v3435_v25 = vadd.f32 %v3434_v62, %v3433_v4  ;;  %v3506_v7 = vrot.slane %v3505_v41, 4 }
 0x275   : > { %v3436_v19 = vrot.slane %v3435_v25, 2  ;;  %v3507_v56 = vadd.f32 %v3506_v7, %v3505_v41 }
 0x277   : > { %v3437_v55 = vadd.f32 %v3436_v19, %v3435_v25  ;;  %v3508_v6 = vrot.slane %v3507_v56, 2 }
 0x279   : > { %v3438_v22 = vrot.slane %v3437_v55, 1  ;;  %v3509_v11 = vadd.f32 %v3508_v6, %v3507_v56 }
 0x27b   : > { %v3439_v35 = vadd.f32 %v3438_v22, %v3437_v55  ;;  %v3510_v8 = vrot.slane %v3509_v11, 1 }
 0x27d   : > { %v3440_v15 = vadd.f32 %v3439_v35, %v3402_v24  ;;  %v3511_v21 = vadd.f32 %v3510_v8, %v3509_v11 }
 0x27f   : > { %3441 = vst [vmem:[%s7045_s7] sm:$0x1] %v3440_v15  ;;  %v3512_v46 = vadd.f32 %v3511_v21, %v3442_v27 }
 0x281   : > { %3513 = vst [vmem:[%s7046_s8] sm:$0x1] %v3512_v46 }
 0x282 PF: > { %s19_s27 = sadd.s32 1, %s5482_s27  }
 0x283   : > { %p16_p5 = scmp.ge.s32.totalorder %s19_s27, 4  }
 0x285   :  { %18 = sbr.rel (!%p16_p5) target bundleno = 1 (0x1), region = 104 }

</bundles_post_ra>
